<compile_context>
chip_gen: v5e
topology: v5e:2x2
jax: 0.10.0
libtpu: 0.0.40
codegen_flags: <defaults>
</compile_context>

<pallas_src>
import jax
import jax.numpy as jnp
from jax import lax
from jax.experimental import pallas as pl
from jax.experimental.pallas import tpu as pltpu

# ----------------------------- config (tiny, lane-dense) --------------------
B = 2                         # batch of (image, text) pairs
C, H, W = 3, 16, 16
PATCH = 4
N_PATCH = (H // PATCH) * (W // PATCH)      # 16 vision tokens
PATCH_DIM = C * PATCH * PATCH              # 48
PD_PAD = 128                               # patch dim zero-padded to one full lane
D = 128                                    # hidden size (lane-dense)
FFN = 4 * D                                # 512
VOCAB = 128                                # lane-dense vocab
T_TEXT = 8                                 # prompt length (left-padded)
MAX_NEW = 4    # TODO(synk): reference uses max_new_tokens=20 with num_beams=3 beam search; greedy short-horizon decode here.
T_MAX = 16                                 # KV-cache length (>= T_TEXT + MAX_NEW, multiple of 8)
PAD_ID = 0
SCALE = 1.0 / float(D) ** 0.5
NEG_INF = -1e30

_CP = pltpu.CompilerParams(
    dimension_semantics=("parallel",),         # batch axis -> both TCs on v7x
    vmem_limit_bytes=32 * 1024 * 1024,         # safe on v5e/v6e/v7x (footprint ~2 MB)
)


# ----------------------------- in-kernel helpers -----------------------------
def _ln(x, g, b):
    # f32 layernorm (v5e VPU has no bf16)
    mu = jnp.mean(x, axis=-1, keepdims=True)
    var = jnp.mean(jnp.square(x - mu), axis=-1, keepdims=True)
    return (x - mu) * lax.rsqrt(var + 1e-5) * g + b


def _mm(a, w):
    # bf16 MXU operands, f32 accumulation
    return jnp.dot(a.astype(jnp.bfloat16), w.astype(jnp.bfloat16),
                   preferred_element_type=jnp.float32)


def _qk(a, b):
    # contract the shared last dim ("qd,kd->qk"): no transposed copy of K
    return lax.dot_general(a.astype(jnp.bfloat16), b.astype(jnp.bfloat16),
                           (((1,), (1,)), ((), ())),
                           preferred_element_type=jnp.float32)


def _softmax(s):
    m = jnp.max(s, axis=-1, keepdims=True)
    e = jnp.exp(s - m)
    return e * pl.reciprocal(jnp.sum(e, axis=-1, keepdims=True), approx=True)


def _attend(q, k, v, bias=None):
    s = _qk(q, k) * SCALE
    if bias is not None:
        s = s + bias
    p = _softmax(s)
    return jnp.dot(p.astype(jnp.bfloat16), v.astype(jnp.bfloat16),
                   preferred_element_type=jnp.float32)


def _argmax_lane(logits, lane_iota):
    # greedy argmax over the lane (vocab) dim -> [1, 1] int32 (first max wins)
    m = jnp.max(logits, axis=-1, keepdims=True)
    return jnp.min(jnp.where(logits == m, lane_iota, VOCAB), axis=-1, keepdims=True)


def _lm_common(x, q, kc, vc, bias, xk, xv, ln,
               wo, xq_w, xwo_g, w1, b1, w2, b2, hw, hb):
    """Self-attn output proj + gated cross-attn + MLP + LM head (last row only)."""
    x = x + _mm(_attend(q, kc, vc, bias), wo)
    # gated cross-attention to vision tokens (tanh(gate) folded into xwo_g)
    h = _ln(x, ln[2:3], ln[3:4])
    x = x + _mm(_attend(_mm(h, xq_w), xk, xv), xwo_g)
    # MLP
    h = _ln(x, ln[4:5], ln[5:6])
    h = jax.nn.gelu(_mm(h, w1) + b1)
    x = x + _mm(h, w2) + b2
    # LM head on the last position only
    h = _ln(x[-1:, :], ln[6:7], ln[7:8])
    return _mm(h, hw) + hb


# ----------------------------- single fused kernel ---------------------------
def _flamingo_kernel(
        plen_ref,                                      # scalar prefetch (SMEM) [B]
        patches_ref, x_emb_ref,                        # per-batch inputs
        v_patch_w_ref, v_pos_bias_ref, v_ln_ref, v_qkv_w_ref, v_wo_ref,
        v_w1_ref, v_b1_ref, v_w2_ref, v_b2_ref, x_kv_w_ref,
        l_ln_ref, l_qkv_w_ref, l_wo_ref, x_q_w_ref, x_wo_ref,
        l_w1_ref, l_b1_ref, l_w2_ref, l_b2_ref, head_w_ref, head_b_ref,
        tok_emb_ref, pos_emb_ref,
        gen_ref):                                      # output [1, 1, 128] int32
    prompt_len = plen_ref[pl.program_id(0)]
    pad_start = T_TEXT - prompt_len                    # first non-pad prompt slot

    # ---------------- stage 1: vision encoder -> cross-attn K/V --------------
    vln = v_ln_ref[...]
    x = _mm(patches_ref[0], v_patch_w_ref[...]) + v_pos_bias_ref[...]      # [NP, D]
    h = _ln(x, vln[0:1], vln[1:2])
    qkv = _mm(h, v_qkv_w_ref[...])                                          # [NP, 3D]
    q, k, v = qkv[:, :D], qkv[:, D:2 * D], qkv[:, 2 * D:]
    x = x + _mm(_attend(q, k, v), v_wo_ref[...])
    h = _ln(x, vln[2:3], vln[3:4])
    h = jax.nn.gelu(_mm(h, v_w1_ref[...]) + v_b1_ref[...])
    x = x + _mm(h, v_w2_ref[...]) + v_b2_ref[...]
    vis = _ln(x, vln[4:5], vln[5:6])
    xkv = _mm(vis, x_kv_w_ref[...])                                         # [NP, 2D]
    xk = xkv[:, :D].astype(jnp.bfloat16)     # cross-attn K/V: VMEM-resident, reused
    xv = xkv[:, D:].astype(jnp.bfloat16)     # by prefill + every decode step

    # hoist decoder weights out of the decode loop (loop-invariant values)
    ln = l_ln_ref[...]
    lqkv_w = l_qkv_w_ref[...]
    wo = l_wo_ref[...]
    xq_w = x_q_w_ref[...]
    xwo = x_wo_ref[...]
    w1, b1 = l_w1_ref[...], l_b1_ref[...]
    w2, b2 = l_w2_ref[...], l_b2_ref[...]
    hw, hb = head_w_ref[...], head_b_ref[...]
    tok_emb = tok_emb_ref[...]
    pos_emb = pos_emb_ref[...]

    # ---------------- stage 2: language prefill over the whole prompt --------
    x = x_emb_ref[0]                                                        # [T, D]
    h = _ln(x, ln[0:1], ln[1:2])
    qkv = _mm(h, lqkv_w)                                                    # [T, 3D]
    q, k, v = qkv[:, :D], qkv[:, D:2 * D], qkv[:, 2 * D:]
    # causal + left-pad mask built in-kernel (no lane-sparse bias DMA)
    qpos = lax.broadcasted_iota(jnp.int32, (T_TEXT, T_TEXT), 0)
    kpos = lax.broadcasted_iota(jnp.int32, (T_TEXT, T_TEXT), 1)
    bias = jnp.where((kpos <= qpos) & (kpos >= pad_start), 0.0, NEG_INF)
    logits = _lm_common(x, q, k, v, bias, xk, xv, ln,
                        wo, xq_w, xwo, w1, b1, w2, b2, hw, hb)              # [1, V]

    # bf16 self-attn KV cache, VMEM-resident (loop-carried) for all decode steps
    zpad = jnp.zeros((T_MAX - T_TEXT, D), jnp.bfloat16)
    kc = jnp.concatenate([k.astype(jnp.bfloat16), zpad], axis=0)            # [T_MAX, D]
    vc = jnp.concatenate([v.astype(jnp.bfloat16), zpad], axis=0)

    # ---------------- stage 3: greedy decode loop, fully in-kernel ------------
    lane = lax.broadcasted_iota(jnp.int32, (1, 128), 1)
    vocab_iota = lax.broadcasted_iota(jnp.int32, (1, VOCAB), 1)
    pos_iota = lax.broadcasted_iota(jnp.int32, (1, T_MAX), 1)
    row_iota = lax.broadcasted_iota(jnp.int32, (T_MAX, 1), 0)
    kpos_d = lax.broadcasted_iota(jnp.int32, (1, T_MAX), 1)

    tok0 = _argmax_lane(logits, vocab_iota)                                 # [1,1] i32
    gen_row = jnp.where(lane == 0, tok0, jnp.zeros((1, 128), jnp.int32))

    def step(i, carry):
        gen_row, prev, kc, vc = carry
        # token + position embedding as one-hot MXU matmuls (exact table lookup)
        tok_oh = (vocab_iota == prev).astype(jnp.bfloat16)                  # [1, V]
        pos_oh = (pos_iota == (prompt_len + i)).astype(jnp.bfloat16)        # [1, T_MAX]
        x = (jnp.dot(tok_oh, tok_emb, preferred_element_type=jnp.float32)
             + jnp.dot(pos_oh, pos_emb, preferred_element_type=jnp.float32))  # [1, D]
        h = _ln(x, ln[0:1], ln[1:2])
        qkv = _mm(h, lqkv_w)                                                # [1, 3D]
        q, k, v = qkv[:, :D], qkv[:, D:2 * D], qkv[:, 2 * D:]
        cache_pos = T_TEXT + i                                              # new slot
        kc = jnp.where(row_iota == cache_pos, k.astype(jnp.bfloat16), kc)
        vc = jnp.where(row_iota == cache_pos, v.astype(jnp.bfloat16), vc)
        # left-pad prompt mask + generated-token window, built with iota
        valid = (((kpos_d >= pad_start) & (kpos_d < T_TEXT))
                 | ((kpos_d >= T_TEXT) & (kpos_d <= cache_pos)))
        dbias = jnp.where(valid, 0.0, NEG_INF)                              # [1, T_MAX]
        logits = _lm_common(x, q, kc, vc, dbias, xk, xv, ln,
                            wo, xq_w, xwo, w1, b1, w2, b2, hw, hb)          # [1, V]
        nxt = _argmax_lane(logits, vocab_iota)                              # greedy
        gen_row = jnp.where(lane == (i + 1), nxt, gen_row)
        return gen_row, nxt, kc, vc

    gen_row, _, _, _ = lax.fori_loop(0, MAX_NEW - 1, step,
                                     (gen_row, tok0, kc, vc), unroll=True)
    gen_ref[0] = gen_row                              # lane-dense [1, 128] int32 row


# ----------------------------- pallas_call wrapper ----------------------------
def _bspec(shape):
    # per-batch-element block of a [B, ...] operand
    return pl.BlockSpec((1,) + tuple(shape), lambda b, *_: (b,) + (0,) * len(shape))


def _wspec(shape):
    # grid-invariant block: DMA'd once, stays resident in VMEM across the batch grid
    return pl.BlockSpec(tuple(shape), lambda b, *_: (0,) * len(shape))


def flamingo_generate(p, prompt_len, patches, x_emb):
    bq = patches.shape[0]
    grid_spec = pltpu.PrefetchScalarGridSpec(
        num_scalar_prefetch=1,                       # prompt_len (SMEM)
        grid=(bq,),
        in_specs=[
            _bspec((N_PATCH, PD_PAD)), _bspec((T_TEXT, D)),
            # vision weights
            _wspec((PD_PAD, D)), _wspec((N_PATCH, D)), _wspec((6, D)),
            _wspec((D, 3 * D)), _wspec((D, D)),
            _wspec((D, FFN)), _wspec((1, FFN)), _wspec((FFN, D)), _wspec((1, D)),
            _wspec((D, 2 * D)),
            # language weights
            _wspec((8, D)), _wspec((D, 3 * D)), _wspec((D, D)),
            _wspec((D, D)), _wspec((D, D)),
            _wspec((D, FFN)), _wspec((1, FFN)), _wspec((FFN, D)), _wspec((1, D)),
            _wspec((D, VOCAB)), _wspec((1, VOCAB)),
            _wspec((VOCAB, D)), _wspec((T_MAX, D)),
        ],
        out_specs=_bspec((1, 128)),
    )
    return pl.pallas_call(
        _flamingo_kernel,
        grid_spec=grid_spec,
        out_shape=jax.ShapeDtypeStruct((bq, 1, 128), jnp.int32),
        compiler_params=_CP,
    )(prompt_len, patches, x_emb,
      p["v_patch_w"], p["v_pos_bias"], p["v_ln"], p["v_qkv_w"], p["v_wo"],
      p["v_mlp_w1"], p["v_mlp_b1"], p["v_mlp_w2"], p["v_mlp_b2"], p["x_kv_w"],
      p["l_ln"], p["l_qkv_w"], p["l_wo"], p["x_q_w"], p["x_wo_g"],
      p["l_mlp_w1"], p["l_mlp_b1"], p["l_mlp_w2"], p["l_mlp_b2"],
      p["head_w"], p["head_b"], p["tok_emb"], p["pos_emb"])


# ----------------------------- parameters ------------------------------------
def init_params(key):
    keys = iter(jax.random.split(key, 32))

    def w(shape, scale=0.05):                         # MXU weights / tables in bf16
        return (scale * jax.random.normal(next(keys), shape, jnp.float32)).astype(jnp.bfloat16)

    def wf(shape, scale=0.05):                        # f32 tables / biases
        return scale * jax.random.normal(next(keys), shape, jnp.float32)

    ones = jnp.ones((D,), jnp.float32)
    zeros = jnp.zeros((D,), jnp.float32)
    # LN packs (gamma/beta rows): vision = ln1,ln2,lnf ; language = ln1,x_ln,ln2,lnf
    v_ln = jnp.stack([ones, zeros, ones, zeros, ones, zeros])
    l_ln = jnp.stack([ones, zeros, ones, zeros, ones, zeros, ones, zeros])
    # Flamingo inits the cross-attn gate to 0; nonzero so the vision path is exercised.
    gate = jnp.tanh(jnp.float32(0.5))
    x_wo = wf((D, D))

    return {
        # vision encoder (ViT-style patch-embed == matmul over zero-padded patches)
        "v_patch_w": w((PD_PAD, D)),                  # rows >= PATCH_DIM see zero inputs
        "v_pos_bias": wf((N_PATCH, D)),               # pos-emb + patch bias folded
        "v_ln": v_ln,
        "v_qkv_w": w((D, 3 * D)),
        "v_wo": w((D, D)),
        "v_mlp_w1": w((D, FFN)), "v_mlp_b1": jnp.zeros((1, FFN), jnp.float32),
        "v_mlp_w2": w((FFN, D)), "v_mlp_b2": jnp.zeros((1, D), jnp.float32),
        "x_kv_w": w((D, 2 * D)),                      # cross-attn K/V projection
        # language decoder
        "tok_emb": w((VOCAB, D)), "pos_emb": w((T_MAX, D)),
        "l_ln": l_ln,
        "l_qkv_w": w((D, 3 * D)), "l_wo": w((D, D)),
        "x_q_w": w((D, D)),
        "x_wo_g": (x_wo * gate).astype(jnp.bfloat16),  # tanh(gate) folded into out-proj
        "l_mlp_w1": w((D, FFN)), "l_mlp_b1": jnp.zeros((1, FFN), jnp.float32),
        "l_mlp_w2": w((FFN, D)), "l_mlp_b2": jnp.zeros((1, D), jnp.float32),
        "head_w": w((D, VOCAB)), "head_b": jnp.zeros((1, VOCAB), jnp.float32),
    }


# ----------------------------- model glue ------------------------------------
def extract_patches(imgs):
    # NCHW -> [B, num_patches, 128] zero-padded (layout plumbing only, lane-dense K)
    b, c, h, ww = imgs.shape
    x = imgs.reshape(b, c, h // PATCH, PATCH, ww // PATCH, PATCH)
    x = x.transpose(0, 2, 4, 1, 3, 5)
    x = x.reshape(b, (h // PATCH) * (ww // PATCH), c * PATCH * PATCH)
    return jnp.pad(x, ((0, 0), (0, 0), (0, PD_PAD - PATCH_DIM)))


@jax.jit
def generate(params, imgs, input_ids):
    patches = extract_patches(imgs)
    # HF-style left-pad handling: prompt length -> in-kernel masks + position ids
    mask = (input_ids != PAD_ID).astype(jnp.int32)                # [B, T]
    prompt_len = jnp.sum(mask, axis=1).astype(jnp.int32)          # [B]
    pos_ids = jnp.maximum(jnp.cumsum(mask, axis=1) - 1, 0)
    x_emb = (jnp.take(params["tok_emb"], input_ids, axis=0).astype(jnp.float32)
             + jnp.take(params["pos_emb"], pos_ids, axis=0).astype(jnp.float32))
    gen = flamingo_generate(params, prompt_len, patches, x_emb)   # [B, 1, 128]
    return gen[:, 0, :MAX_NEW]


# ----------------------------- wrapper ----------------------------------------
_ID2CHR = ["_"] + [chr(ord("a") + (i % 26)) for i in range(VOCAB - 1)]


class OpenFlamingoWrapperPallas:
    """Mirrors OpenFlamingoWrapper.forward: (imgs, texts) -> list[str] (decoded)."""

    def __init__(self):
        self.params = init_params(jax.random.PRNGKey(0))
        self.max_new_tokens = MAX_NEW

    # toy char-level tokenizer, left padding (padding_side='left')
    def _tokenize(self, texts):
        rows = []
        for s in texts:
            ids = [1 + (ord(ch) % (VOCAB - 1)) for ch in s][-T_TEXT:]
            rows.append([PAD_ID] * (T_TEXT - len(ids)) + ids)
        return jnp.array(rows, jnp.int32)

    def _decode(self, ids):
        return "".join(_ID2CHR[int(i)] for i in ids)

    def forward(self, imgs, texts):
        input_ids = self._tokenize(texts)
        gen = generate(self.params, imgs, input_ids)
        gen = jax.block_until_ready(gen)
        return [self._decode(row) for row in list(gen)]

    @property
    def name(self):
        return "flamingo"


# ----------------------------- main --------------------------------------------
if __name__ == "__main__":
    key = jax.random.PRNGKey(0)
    imgs = jax.random.normal(key, (B, C, H, W), jnp.float32)       # NCHW, like torch
    texts = ["a photo of", "two cats on"]

    wrapper = OpenFlamingoWrapperPallas()
    decoded = wrapper.forward(imgs, texts)
    assert len(decoded) == B and all(isinstance(s, str) for s in decoded)
    assert all(len(s) == MAX_NEW for s in decoded)
    print("KERNEL_OK")
</pallas_src>

<mosaic_0001>
module attributes {stable_mosaic.version = 11 : i64} {
  func.func @_flamingo_kernel(%arg0: i32, %arg1: memref<2xi32, #tpu.memory_space<smem>>, %arg2: memref<1x16x128xf32, #tpu.memory_space<vmem>>, %arg3: memref<1x8x128xf32, #tpu.memory_space<vmem>>, %arg4: memref<128x128xbf16, #tpu.memory_space<vmem>>, %arg5: memref<16x128xf32, #tpu.memory_space<vmem>>, %arg6: memref<6x128xf32, #tpu.memory_space<vmem>>, %arg7: memref<128x384xbf16, #tpu.memory_space<vmem>>, %arg8: memref<128x128xbf16, #tpu.memory_space<vmem>>, %arg9: memref<128x512xbf16, #tpu.memory_space<vmem>>, %arg10: memref<1x512xf32, #tpu.memory_space<vmem>>, %arg11: memref<512x128xbf16, #tpu.memory_space<vmem>>, %arg12: memref<1x128xf32, #tpu.memory_space<vmem>>, %arg13: memref<128x256xbf16, #tpu.memory_space<vmem>>, %arg14: memref<8x128xf32, #tpu.memory_space<vmem>>, %arg15: memref<128x384xbf16, #tpu.memory_space<vmem>>, %arg16: memref<128x128xbf16, #tpu.memory_space<vmem>>, %arg17: memref<128x128xbf16, #tpu.memory_space<vmem>>, %arg18: memref<128x128xbf16, #tpu.memory_space<vmem>>, %arg19: memref<128x512xbf16, #tpu.memory_space<vmem>>, %arg20: memref<1x512xf32, #tpu.memory_space<vmem>>, %arg21: memref<512x128xbf16, #tpu.memory_space<vmem>>, %arg22: memref<1x128xf32, #tpu.memory_space<vmem>>, %arg23: memref<128x128xbf16, #tpu.memory_space<vmem>>, %arg24: memref<1x128xf32, #tpu.memory_space<vmem>>, %arg25: memref<128x128xbf16, #tpu.memory_space<vmem>>, %arg26: memref<16x128xbf16, #tpu.memory_space<vmem>>, %arg27: memref<1x1x128xi32, #tpu.memory_space<vmem>>) attributes {dimension_semantics = [#tpu.dimension_semantics<parallel>], iteration_bounds = array<i64: 2>, scalar_prefetch = 1 : i64, scratch_operands = 0 : i64, tpu.core_type = #tpu.core_type<tc>, window_params = [{transform_indices = @transform_0, window_bounds = array<i64: 1, 16, 128>}, {transform_indices = @transform_1, window_bounds = array<i64: 1, 8, 128>}, {pipeline_mode = #tpu.pipeline_mode<synchronous>, transform_indices = @transform_2, window_bounds = array<i64: 128, 128>}, {pipeline_mode = #tpu.pipeline_mode<synchronous>, transform_indices = @transform_3, window_bounds = array<i64: 16, 128>}, {pipeline_mode = #tpu.pipeline_mode<synchronous>, transform_indices = @transform_4, window_bounds = array<i64: 6, 128>}, {pipeline_mode = #tpu.pipeline_mode<synchronous>, transform_indices = @transform_5, window_bounds = array<i64: 128, 384>}, {pipeline_mode = #tpu.pipeline_mode<synchronous>, transform_indices = @transform_6, window_bounds = array<i64: 128, 128>}, {pipeline_mode = #tpu.pipeline_mode<synchronous>, transform_indices = @transform_7, window_bounds = array<i64: 128, 512>}, {pipeline_mode = #tpu.pipeline_mode<synchronous>, transform_indices = @transform_8, window_bounds = array<i64: 1, 512>}, {pipeline_mode = #tpu.pipeline_mode<synchronous>, transform_indices = @transform_9, window_bounds = array<i64: 512, 128>}, {pipeline_mode = #tpu.pipeline_mode<synchronous>, transform_indices = @transform_10, window_bounds = array<i64: 1, 128>}, {pipeline_mode = #tpu.pipeline_mode<synchronous>, transform_indices = @transform_11, window_bounds = array<i64: 128, 256>}, {pipeline_mode = #tpu.pipeline_mode<synchronous>, transform_indices = @transform_12, window_bounds = array<i64: 8, 128>}, {pipeline_mode = #tpu.pipeline_mode<synchronous>, transform_indices = @transform_13, window_bounds = array<i64: 128, 384>}, {pipeline_mode = #tpu.pipeline_mode<synchronous>, transform_indices = @transform_14, window_bounds = array<i64: 128, 128>}, {pipeline_mode = #tpu.pipeline_mode<synchronous>, transform_indices = @transform_15, window_bounds = array<i64: 128, 128>}, {pipeline_mode = #tpu.pipeline_mode<synchronous>, transform_indices = @transform_16, window_bounds = array<i64: 128, 128>}, {pipeline_mode = #tpu.pipeline_mode<synchronous>, transform_indices = @transform_17, window_bounds = array<i64: 128, 512>}, {pipeline_mode = #tpu.pipeline_mode<synchronous>, transform_indices = @transform_18, window_bounds = array<i64: 1, 512>}, {pipeline_mode = #tpu.pipeline_mode<synchronous>, transform_indices = @transform_19, window_bounds = array<i64: 512, 128>}, {pipeline_mode = #tpu.pipeline_mode<synchronous>, transform_indices = @transform_20, window_bounds = array<i64: 1, 128>}, {pipeline_mode = #tpu.pipeline_mode<synchronous>, transform_indices = @transform_21, window_bounds = array<i64: 128, 128>}, {pipeline_mode = #tpu.pipeline_mode<synchronous>, transform_indices = @transform_22, window_bounds = array<i64: 1, 128>}, {pipeline_mode = #tpu.pipeline_mode<synchronous>, transform_indices = @transform_23, window_bounds = array<i64: 128, 128>}, {pipeline_mode = #tpu.pipeline_mode<synchronous>, transform_indices = @transform_24, window_bounds = array<i64: 16, 128>}, {transform_indices = @transform_25, window_bounds = array<i64: 1, 1, 128>}]} {
    %0 = arith.index_cast %arg0 : i32 to index
    %1 = memref.load %arg1[%0] : memref<2xi32, #tpu.memory_space<smem>>
    %c8_i32 = arith.constant 8 : i32
    %2 = arith.subi %c8_i32, %1 : i32
    %c0 = arith.constant 0 : index
    %c0_0 = arith.constant 0 : index
    %3 = vector.load %arg6[%c0, %c0_0] : memref<6x128xf32, #tpu.memory_space<vmem>>, vector<6x128xf32>
    %c0_1 = arith.constant 0 : index
    %c0_2 = arith.constant 0 : index
    %c0_3 = arith.constant 0 : index
    %4 = vector.load %arg2[%c0_1, %c0_2, %c0_3] : memref<1x16x128xf32, #tpu.memory_space<vmem>>, vector<1x16x128xf32>
    %5 = vector.shape_cast %4 : vector<1x16x128xf32> to vector<16x128xf32>
    %c0_4 = arith.constant 0 : index
    %c0_5 = arith.constant 0 : index
    %6 = vector.load %arg4[%c0_4, %c0_5] : memref<128x128xbf16, #tpu.memory_space<vmem>>, vector<128x128xbf16>
    %7 = arith.truncf %5 : vector<16x128xf32> to vector<16x128xbf16>
    %cst = arith.constant dense<0.000000e+00> : vector<16x128xf32>
    %8 = tpu.matmul %7, %6, %cst {dimension_numbers = #tpu.dot_dimension_numbers<[1], [0], [0], [1], [0, 0, 1, 1], [], []>} : vector<16x128xbf16>, vector<128x128xbf16>, vector<16x128xf32> -> vector<16x128xf32>
    %c0_6 = arith.constant 0 : index
    %c0_7 = arith.constant 0 : index
    %9 = vector.load %arg5[%c0_6, %c0_7] : memref<16x128xf32, #tpu.memory_space<vmem>>, vector<16x128xf32>
    %10 = arith.addf %8, %9 : vector<16x128xf32>
    %11 = vector.extract_strided_slice %3 {offsets = [0, 0], sizes = [1, 128], strides = [1, 1]} : vector<6x128xf32> to vector<1x128xf32>
    %12 = vector.extract_strided_slice %3 {offsets = [1, 0], sizes = [1, 128], strides = [1, 1]} : vector<6x128xf32> to vector<1x128xf32>
    %cst_8 = arith.constant dense<0.000000e+00> : vector<16xf32>
    %13 = vector.multi_reduction <add>, %10, %cst_8 [1] : vector<16x128xf32> to vector<16xf32>
    %14 = vector.shape_cast %13 : vector<16xf32> to vector<16x1xf32>
    %cst_9 = arith.constant 1.280000e+02 : f32
    %15 = vector.broadcast %cst_9 : f32 to vector<16x1xf32>
    %16 = arith.divf %14, %15 : vector<16x1xf32>
    %17 = vector.broadcast %16 : vector<16x1xf32> to vector<16x128xf32>
    %18 = arith.subf %10, %17 : vector<16x128xf32>
    %19 = arith.mulf %18, %18 : vector<16x128xf32>
    %cst_10 = arith.constant dense<0.000000e+00> : vector<16xf32>
    %20 = vector.multi_reduction <add>, %19, %cst_10 [1] : vector<16x128xf32> to vector<16xf32>
    %21 = vector.shape_cast %20 : vector<16xf32> to vector<16x1xf32>
    %cst_11 = arith.constant 1.280000e+02 : f32
    %22 = vector.broadcast %cst_11 : f32 to vector<16x1xf32>
    %23 = arith.divf %21, %22 : vector<16x1xf32>
    %24 = vector.broadcast %16 : vector<16x1xf32> to vector<16x128xf32>
    %25 = arith.subf %10, %24 : vector<16x128xf32>
    %cst_12 = arith.constant 9.99999974E-6 : f32
    %26 = vector.broadcast %cst_12 : f32 to vector<16x1xf32>
    %27 = arith.addf %23, %26 : vector<16x1xf32>
    %28 = math.rsqrt %27 : vector<16x1xf32>
    %29 = vector.broadcast %28 : vector<16x1xf32> to vector<16x128xf32>
    %30 = arith.mulf %25, %29 : vector<16x128xf32>
    %31 = vector.broadcast %11 : vector<1x128xf32> to vector<16x128xf32>
    %32 = arith.mulf %30, %31 : vector<16x128xf32>
    %33 = vector.broadcast %12 : vector<1x128xf32> to vector<16x128xf32>
    %34 = arith.addf %32, %33 : vector<16x128xf32>
    %c0_13 = arith.constant 0 : index
    %c0_14 = arith.constant 0 : index
    %35 = vector.load %arg7[%c0_13, %c0_14] : memref<128x384xbf16, #tpu.memory_space<vmem>>, vector<128x384xbf16>
    %36 = arith.truncf %34 : vector<16x128xf32> to vector<16x128xbf16>
    %cst_15 = arith.constant dense<0.000000e+00> : vector<16x384xf32>
    %37 = tpu.matmul %36, %35, %cst_15 {dimension_numbers = #tpu.dot_dimension_numbers<[1], [0], [0], [1], [0, 0, 1, 1], [], []>} : vector<16x128xbf16>, vector<128x384xbf16>, vector<16x384xf32> -> vector<16x384xf32>
    %38 = vector.extract_strided_slice %37 {offsets = [0, 0], sizes = [16, 128], strides = [1, 1]} : vector<16x384xf32> to vector<16x128xf32>
    %39 = vector.extract_strided_slice %37 {offsets = [0, 128], sizes = [16, 128], strides = [1, 1]} : vector<16x384xf32> to vector<16x128xf32>
    %40 = vector.extract_strided_slice %37 {offsets = [0, 256], sizes = [16, 128], strides = [1, 1]} : vector<16x384xf32> to vector<16x128xf32>
    %41 = arith.truncf %38 : vector<16x128xf32> to vector<16x128xbf16>
    %42 = arith.truncf %39 : vector<16x128xf32> to vector<16x128xbf16>
    %cst_16 = arith.constant dense<0.000000e+00> : vector<16x16xf32>
    %43 = tpu.matmul %41, %42, %cst_16 {dimension_numbers = #tpu.dot_dimension_numbers<[1], [1], [0], [0], [0, 0, 1, 0], [], []>} : vector<16x128xbf16>, vector<16x128xbf16>, vector<16x16xf32> -> vector<16x16xf32>
    %cst_17 = arith.constant 0.0883883461 : f32
    %44 = vector.broadcast %cst_17 : f32 to vector<16x16xf32>
    %45 = arith.mulf %43, %44 : vector<16x16xf32>
    %cst_18 = arith.constant dense<0xFF800000> : vector<16xf32>
    %46 = vector.multi_reduction <maximumf>, %45, %cst_18 [1] : vector<16x16xf32> to vector<16xf32>
    %47 = vector.shape_cast %46 : vector<16xf32> to vector<16x1xf32>
    %48 = vector.broadcast %47 : vector<16x1xf32> to vector<16x16xf32>
    %49 = arith.subf %45, %48 : vector<16x16xf32>
    %50 = math.exp %49 : vector<16x16xf32>
    %cst_19 = arith.constant dense<0.000000e+00> : vector<16xf32>
    %51 = vector.multi_reduction <add>, %50, %cst_19 [1] : vector<16x16xf32> to vector<16xf32>
    %52 = vector.shape_cast %51 : vector<16xf32> to vector<16x1xf32>
    %53 = tpu.reciprocal %52 {approx = true} : vector<16x1xf32> -> vector<16x1xf32>
    %54 = vector.broadcast %53 : vector<16x1xf32> to vector<16x16xf32>
    %55 = arith.mulf %50, %54 : vector<16x16xf32>
    %56 = arith.truncf %55 : vector<16x16xf32> to vector<16x16xbf16>
    %57 = arith.truncf %40 : vector<16x128xf32> to vector<16x128xbf16>
    %cst_20 = arith.constant dense<0.000000e+00> : vector<16x128xf32>
    %58 = tpu.matmul %56, %57, %cst_20 {dimension_numbers = #tpu.dot_dimension_numbers<[1], [0], [0], [1], [0, 0, 1, 1], [], []>} : vector<16x16xbf16>, vector<16x128xbf16>, vector<16x128xf32> -> vector<16x128xf32>
    %c0_21 = arith.constant 0 : index
    %c0_22 = arith.constant 0 : index
    %59 = vector.load %arg8[%c0_21, %c0_22] : memref<128x128xbf16, #tpu.memory_space<vmem>>, vector<128x128xbf16>
    %60 = arith.truncf %58 : vector<16x128xf32> to vector<16x128xbf16>
    %cst_23 = arith.constant dense<0.000000e+00> : vector<16x128xf32>
    %61 = tpu.matmul %60, %59, %cst_23 {dimension_numbers = #tpu.dot_dimension_numbers<[1], [0], [0], [1], [0, 0, 1, 1], [], []>} : vector<16x128xbf16>, vector<128x128xbf16>, vector<16x128xf32> -> vector<16x128xf32>
    %62 = arith.addf %10, %61 : vector<16x128xf32>
    %63 = vector.extract_strided_slice %3 {offsets = [2, 0], sizes = [1, 128], strides = [1, 1]} : vector<6x128xf32> to vector<1x128xf32>
    %64 = vector.extract_strided_slice %3 {offsets = [3, 0], sizes = [1, 128], strides = [1, 1]} : vector<6x128xf32> to vector<1x128xf32>
    %cst_24 = arith.constant dense<0.000000e+00> : vector<16xf32>
    %65 = vector.multi_reduction <add>, %62, %cst_24 [1] : vector<16x128xf32> to vector<16xf32>
    %66 = vector.shape_cast %65 : vector<16xf32> to vector<16x1xf32>
    %cst_25 = arith.constant 1.280000e+02 : f32
    %67 = vector.broadcast %cst_25 : f32 to vector<16x1xf32>
    %68 = arith.divf %66, %67 : vector<16x1xf32>
    %69 = vector.broadcast %68 : vector<16x1xf32> to vector<16x128xf32>
    %70 = arith.subf %62, %69 : vector<16x128xf32>
    %71 = arith.mulf %70, %70 : vector<16x128xf32>
    %cst_26 = arith.constant dense<0.000000e+00> : vector<16xf32>
    %72 = vector.multi_reduction <add>, %71, %cst_26 [1] : vector<16x128xf32> to vector<16xf32>
    %73 = vector.shape_cast %72 : vector<16xf32> to vector<16x1xf32>
    %cst_27 = arith.constant 1.280000e+02 : f32
    %74 = vector.broadcast %cst_27 : f32 to vector<16x1xf32>
    %75 = arith.divf %73, %74 : vector<16x1xf32>
    %76 = vector.broadcast %68 : vector<16x1xf32> to vector<16x128xf32>
    %77 = arith.subf %62, %76 : vector<16x128xf32>
    %cst_28 = arith.constant 9.99999974E-6 : f32
    %78 = vector.broadcast %cst_28 : f32 to vector<16x1xf32>
    %79 = arith.addf %75, %78 : vector<16x1xf32>
    %80 = math.rsqrt %79 : vector<16x1xf32>
    %81 = vector.broadcast %80 : vector<16x1xf32> to vector<16x128xf32>
    %82 = arith.mulf %77, %81 : vector<16x128xf32>
    %83 = vector.broadcast %63 : vector<1x128xf32> to vector<16x128xf32>
    %84 = arith.mulf %82, %83 : vector<16x128xf32>
    %85 = vector.broadcast %64 : vector<1x128xf32> to vector<16x128xf32>
    %86 = arith.addf %84, %85 : vector<16x128xf32>
    %c0_29 = arith.constant 0 : index
    %c0_30 = arith.constant 0 : index
    %87 = vector.load %arg9[%c0_29, %c0_30] : memref<128x512xbf16, #tpu.memory_space<vmem>>, vector<128x512xbf16>
    %88 = arith.truncf %86 : vector<16x128xf32> to vector<16x128xbf16>
    %cst_31 = arith.constant dense<0.000000e+00> : vector<16x512xf32>
    %89 = tpu.matmul %88, %87, %cst_31 {dimension_numbers = #tpu.dot_dimension_numbers<[1], [0], [0], [1], [0, 0, 1, 1], [], []>} : vector<16x128xbf16>, vector<128x512xbf16>, vector<16x512xf32> -> vector<16x512xf32>
    %c0_32 = arith.constant 0 : index
    %c0_33 = arith.constant 0 : index
    %90 = vector.load %arg10[%c0_32, %c0_33] : memref<1x512xf32, #tpu.memory_space<vmem>>, vector<1x512xf32>
    %91 = vector.broadcast %90 : vector<1x512xf32> to vector<16x512xf32>
    %92 = arith.addf %89, %91 : vector<16x512xf32>
    %93 = arith.mulf %92, %92 : vector<16x512xf32>
    %94 = arith.mulf %92, %93 : vector<16x512xf32>
    %cst_34 = arith.constant 4.471500e-02 : f32
    %95 = vector.broadcast %cst_34 : f32 to vector<16x512xf32>
    %96 = arith.mulf %95, %94 : vector<16x512xf32>
    %97 = arith.addf %92, %96 : vector<16x512xf32>
    %cst_35 = arith.constant 0.797884583 : f32
    %98 = vector.broadcast %cst_35 : f32 to vector<16x512xf32>
    %99 = arith.mulf %98, %97 : vector<16x512xf32>
    %100 = math.tanh %99 : vector<16x512xf32>
    %cst_36 = arith.constant 1.000000e+00 : f32
    %101 = vector.broadcast %cst_36 : f32 to vector<16x512xf32>
    %102 = arith.addf %101, %100 : vector<16x512xf32>
    %cst_37 = arith.constant 5.000000e-01 : f32
    %103 = vector.broadcast %cst_37 : f32 to vector<16x512xf32>
    %104 = arith.mulf %103, %102 : vector<16x512xf32>
    %105 = arith.mulf %92, %104 : vector<16x512xf32>
    %c0_38 = arith.constant 0 : index
    %c0_39 = arith.constant 0 : index
    %106 = vector.load %arg11[%c0_38, %c0_39] : memref<512x128xbf16, #tpu.memory_space<vmem>>, vector<512x128xbf16>
    %107 = arith.truncf %105 : vector<16x512xf32> to vector<16x512xbf16>
    %cst_40 = arith.constant dense<0.000000e+00> : vector<16x128xf32>
    %108 = tpu.matmul %107, %106, %cst_40 {dimension_numbers = #tpu.dot_dimension_numbers<[1], [0], [0], [1], [0, 0, 1, 1], [], []>} : vector<16x512xbf16>, vector<512x128xbf16>, vector<16x128xf32> -> vector<16x128xf32>
    %109 = arith.addf %62, %108 : vector<16x128xf32>
    %c0_41 = arith.constant 0 : index
    %c0_42 = arith.constant 0 : index
    %110 = vector.load %arg12[%c0_41, %c0_42] : memref<1x128xf32, #tpu.memory_space<vmem>>, vector<1x128xf32>
    %111 = vector.broadcast %110 : vector<1x128xf32> to vector<16x128xf32>
    %112 = arith.addf %109, %111 : vector<16x128xf32>
    %113 = vector.extract_strided_slice %3 {offsets = [4, 0], sizes = [1, 128], strides = [1, 1]} : vector<6x128xf32> to vector<1x128xf32>
    %114 = vector.extract_strided_slice %3 {offsets = [5, 0], sizes = [1, 128], strides = [1, 1]} : vector<6x128xf32> to vector<1x128xf32>
    %cst_43 = arith.constant dense<0.000000e+00> : vector<16xf32>
    %115 = vector.multi_reduction <add>, %112, %cst_43 [1] : vector<16x128xf32> to vector<16xf32>
    %116 = vector.shape_cast %115 : vector<16xf32> to vector<16x1xf32>
    %cst_44 = arith.constant 1.280000e+02 : f32
    %117 = vector.broadcast %cst_44 : f32 to vector<16x1xf32>
    %118 = arith.divf %116, %117 : vector<16x1xf32>
    %119 = vector.broadcast %118 : vector<16x1xf32> to vector<16x128xf32>
    %120 = arith.subf %112, %119 : vector<16x128xf32>
    %121 = arith.mulf %120, %120 : vector<16x128xf32>
    %cst_45 = arith.constant dense<0.000000e+00> : vector<16xf32>
    %122 = vector.multi_reduction <add>, %121, %cst_45 [1] : vector<16x128xf32> to vector<16xf32>
    %123 = vector.shape_cast %122 : vector<16xf32> to vector<16x1xf32>
    %cst_46 = arith.constant 1.280000e+02 : f32
    %124 = vector.broadcast %cst_46 : f32 to vector<16x1xf32>
    %125 = arith.divf %123, %124 : vector<16x1xf32>
    %126 = vector.broadcast %118 : vector<16x1xf32> to vector<16x128xf32>
    %127 = arith.subf %112, %126 : vector<16x128xf32>
    %cst_47 = arith.constant 9.99999974E-6 : f32
    %128 = vector.broadcast %cst_47 : f32 to vector<16x1xf32>
    %129 = arith.addf %125, %128 : vector<16x1xf32>
    %130 = math.rsqrt %129 : vector<16x1xf32>
    %131 = vector.broadcast %130 : vector<16x1xf32> to vector<16x128xf32>
    %132 = arith.mulf %127, %131 : vector<16x128xf32>
    %133 = vector.broadcast %113 : vector<1x128xf32> to vector<16x128xf32>
    %134 = arith.mulf %132, %133 : vector<16x128xf32>
    %135 = vector.broadcast %114 : vector<1x128xf32> to vector<16x128xf32>
    %136 = arith.addf %134, %135 : vector<16x128xf32>
    %c0_48 = arith.constant 0 : index
    %c0_49 = arith.constant 0 : index
    %137 = vector.load %arg13[%c0_48, %c0_49] : memref<128x256xbf16, #tpu.memory_space<vmem>>, vector<128x256xbf16>
    %138 = arith.truncf %136 : vector<16x128xf32> to vector<16x128xbf16>
    %cst_50 = arith.constant dense<0.000000e+00> : vector<16x256xf32>
    %139 = tpu.matmul %138, %137, %cst_50 {dimension_numbers = #tpu.dot_dimension_numbers<[1], [0], [0], [1], [0, 0, 1, 1], [], []>} : vector<16x128xbf16>, vector<128x256xbf16>, vector<16x256xf32> -> vector<16x256xf32>
    %140 = vector.extract_strided_slice %139 {offsets = [0, 0], sizes = [16, 128], strides = [1, 1]} : vector<16x256xf32> to vector<16x128xf32>
    %141 = arith.truncf %140 : vector<16x128xf32> to vector<16x128xbf16>
    %142 = vector.extract_strided_slice %139 {offsets = [0, 128], sizes = [16, 128], strides = [1, 1]} : vector<16x256xf32> to vector<16x128xf32>
    %143 = arith.truncf %142 : vector<16x128xf32> to vector<16x128xbf16>
    %c0_51 = arith.constant 0 : index
    %c0_52 = arith.constant 0 : index
    %144 = vector.load %arg14[%c0_51, %c0_52] : memref<8x128xf32, #tpu.memory_space<vmem>>, vector<8x128xf32>
    %c0_53 = arith.constant 0 : index
    %c0_54 = arith.constant 0 : index
    %145 = vector.load %arg15[%c0_53, %c0_54] : memref<128x384xbf16, #tpu.memory_space<vmem>>, vector<128x384xbf16>
    %c0_55 = arith.constant 0 : index
    %c0_56 = arith.constant 0 : index
    %146 = vector.load %arg16[%c0_55, %c0_56] : memref<128x128xbf16, #tpu.memory_space<vmem>>, vector<128x128xbf16>
    %c0_57 = arith.constant 0 : index
    %c0_58 = arith.constant 0 : index
    %147 = vector.load %arg17[%c0_57, %c0_58] : memref<128x128xbf16, #tpu.memory_space<vmem>>, vector<128x128xbf16>
    %c0_59 = arith.constant 0 : index
    %c0_60 = arith.constant 0 : index
    %148 = vector.load %arg18[%c0_59, %c0_60] : memref<128x128xbf16, #tpu.memory_space<vmem>>, vector<128x128xbf16>
    %c0_61 = arith.constant 0 : index
    %c0_62 = arith.constant 0 : index
    %149 = vector.load %arg19[%c0_61, %c0_62] : memref<128x512xbf16, #tpu.memory_space<vmem>>, vector<128x512xbf16>
    %c0_63 = arith.constant 0 : index
    %c0_64 = arith.constant 0 : index
    %150 = vector.load %arg20[%c0_63, %c0_64] : memref<1x512xf32, #tpu.memory_space<vmem>>, vector<1x512xf32>
    %c0_65 = arith.constant 0 : index
    %c0_66 = arith.constant 0 : index
    %151 = vector.load %arg21[%c0_65, %c0_66] : memref<512x128xbf16, #tpu.memory_space<vmem>>, vector<512x128xbf16>
    %c0_67 = arith.constant 0 : index
    %c0_68 = arith.constant 0 : index
    %152 = vector.load %arg22[%c0_67, %c0_68] : memref<1x128xf32, #tpu.memory_space<vmem>>, vector<1x128xf32>
    %c0_69 = arith.constant 0 : index
    %c0_70 = arith.constant 0 : index
    %153 = vector.load %arg23[%c0_69, %c0_70] : memref<128x128xbf16, #tpu.memory_space<vmem>>, vector<128x128xbf16>
    %c0_71 = arith.constant 0 : index
    %c0_72 = arith.constant 0 : index
    %154 = vector.load %arg24[%c0_71, %c0_72] : memref<1x128xf32, #tpu.memory_space<vmem>>, vector<1x128xf32>
    %c0_73 = arith.constant 0 : index
    %c0_74 = arith.constant 0 : index
    %155 = vector.load %arg25[%c0_73, %c0_74] : memref<128x128xbf16, #tpu.memory_space<vmem>>, vector<128x128xbf16>
    %c0_75 = arith.constant 0 : index
    %c0_76 = arith.constant 0 : index
    %156 = vector.load %arg26[%c0_75, %c0_76] : memref<16x128xbf16, #tpu.memory_space<vmem>>, vector<16x128xbf16>
    %c0_77 = arith.constant 0 : index
    %c0_78 = arith.constant 0 : index
    %c0_79 = arith.constant 0 : index
    %157 = vector.load %arg3[%c0_77, %c0_78, %c0_79] : memref<1x8x128xf32, #tpu.memory_space<vmem>>, vector<1x8x128xf32>
    %158 = vector.shape_cast %157 : vector<1x8x128xf32> to vector<8x128xf32>
    %159 = vector.extract_strided_slice %144 {offsets = [0, 0], sizes = [1, 128], strides = [1, 1]} : vector<8x128xf32> to vector<1x128xf32>
    %160 = vector.extract_strided_slice %144 {offsets = [1, 0], sizes = [1, 128], strides = [1, 1]} : vector<8x128xf32> to vector<1x128xf32>
    %cst_80 = arith.constant dense<0.000000e+00> : vector<8xf32>
    %161 = vector.multi_reduction <add>, %158, %cst_80 [1] : vector<8x128xf32> to vector<8xf32>
    %162 = vector.shape_cast %161 : vector<8xf32> to vector<8x1xf32>
    %cst_81 = arith.constant 1.280000e+02 : f32
    %163 = vector.broadcast %cst_81 : f32 to vector<8x1xf32>
    %164 = arith.divf %162, %163 : vector<8x1xf32>
    %165 = vector.broadcast %164 : vector<8x1xf32> to vector<8x128xf32>
    %166 = arith.subf %158, %165 : vector<8x128xf32>
    %167 = arith.mulf %166, %166 : vector<8x128xf32>
    %cst_82 = arith.constant dense<0.000000e+00> : vector<8xf32>
    %168 = vector.multi_reduction <add>, %167, %cst_82 [1] : vector<8x128xf32> to vector<8xf32>
    %169 = vector.shape_cast %168 : vector<8xf32> to vector<8x1xf32>
    %cst_83 = arith.constant 1.280000e+02 : f32
    %170 = vector.broadcast %cst_83 : f32 to vector<8x1xf32>
    %171 = arith.divf %169, %170 : vector<8x1xf32>
    %172 = vector.broadcast %164 : vector<8x1xf32> to vector<8x128xf32>
    %173 = arith.subf %158, %172 : vector<8x128xf32>
    %cst_84 = arith.constant 9.99999974E-6 : f32
    %174 = vector.broadcast %cst_84 : f32 to vector<8x1xf32>
    %175 = arith.addf %171, %174 : vector<8x1xf32>
    %176 = math.rsqrt %175 : vector<8x1xf32>
    %177 = vector.broadcast %176 : vector<8x1xf32> to vector<8x128xf32>
    %178 = arith.mulf %173, %177 : vector<8x128xf32>
    %179 = vector.broadcast %159 : vector<1x128xf32> to vector<8x128xf32>
    %180 = arith.mulf %178, %179 : vector<8x128xf32>
    %181 = vector.broadcast %160 : vector<1x128xf32> to vector<8x128xf32>
    %182 = arith.addf %180, %181 : vector<8x128xf32>
    %183 = arith.truncf %182 : vector<8x128xf32> to vector<8x128xbf16>
    %cst_85 = arith.constant dense<0.000000e+00> : vector<8x384xf32>
    %184 = tpu.matmul %183, %145, %cst_85 {dimension_numbers = #tpu.dot_dimension_numbers<[1], [0], [0], [1], [0, 0, 1, 1], [], []>} : vector<8x128xbf16>, vector<128x384xbf16>, vector<8x384xf32> -> vector<8x384xf32>
    %185 = vector.extract_strided_slice %184 {offsets = [0, 0], sizes = [8, 128], strides = [1, 1]} : vector<8x384xf32> to vector<8x128xf32>
    %186 = vector.extract_strided_slice %184 {offsets = [0, 128], sizes = [8, 128], strides = [1, 1]} : vector<8x384xf32> to vector<8x128xf32>
    %187 = vector.extract_strided_slice %184 {offsets = [0, 256], sizes = [8, 128], strides = [1, 1]} : vector<8x384xf32> to vector<8x128xf32>
    %188 = tpu.iota {dimensions = array<i32: 0>} : vector<8x8xi32>
    %189 = tpu.iota {dimensions = array<i32: 1>} : vector<8x8xi32>
    %190 = arith.cmpi sle, %189, %188 : vector<8x8xi32>
    %191 = vector.broadcast %2 : i32 to vector<8x8xi32>
    %192 = arith.cmpi sge, %189, %191 : vector<8x8xi32>
    %193 = arith.andi %190, %192 : vector<8x8xi1>
    %cst_86 = arith.constant 0.000000e+00 : f32
    %cst_87 = arith.constant -1.000000e+30 : f32
    %194 = vector.broadcast %cst_86 : f32 to vector<8x8xf32>
    %195 = vector.broadcast %cst_87 : f32 to vector<8x8xf32>
    %196 = arith.select %193, %194, %195 : vector<8x8xi1>, vector<8x8xf32>
    %197 = arith.truncf %185 : vector<8x128xf32> to vector<8x128xbf16>
    %198 = arith.truncf %186 : vector<8x128xf32> to vector<8x128xbf16>
    %cst_88 = arith.constant dense<0.000000e+00> : vector<8x8xf32>
    %199 = tpu.matmul %197, %198, %cst_88 {dimension_numbers = #tpu.dot_dimension_numbers<[1], [1], [0], [0], [0, 0, 1, 0], [], []>} : vector<8x128xbf16>, vector<8x128xbf16>, vector<8x8xf32> -> vector<8x8xf32>
    %cst_89 = arith.constant 0.0883883461 : f32
    %200 = vector.broadcast %cst_89 : f32 to vector<8x8xf32>
    %201 = arith.mulf %199, %200 : vector<8x8xf32>
    %202 = arith.addf %201, %196 : vector<8x8xf32>
    %cst_90 = arith.constant dense<0xFF800000> : vector<8xf32>
    %203 = vector.multi_reduction <maximumf>, %202, %cst_90 [1] : vector<8x8xf32> to vector<8xf32>
    %204 = vector.shape_cast %203 : vector<8xf32> to vector<8x1xf32>
    %205 = vector.broadcast %204 : vector<8x1xf32> to vector<8x8xf32>
    %206 = arith.subf %202, %205 : vector<8x8xf32>
    %207 = math.exp %206 : vector<8x8xf32>
    %cst_91 = arith.constant dense<0.000000e+00> : vector<8xf32>
    %208 = vector.multi_reduction <add>, %207, %cst_91 [1] : vector<8x8xf32> to vector<8xf32>
    %209 = vector.shape_cast %208 : vector<8xf32> to vector<8x1xf32>
    %210 = tpu.reciprocal %209 {approx = true} : vector<8x1xf32> -> vector<8x1xf32>
    %211 = vector.broadcast %210 : vector<8x1xf32> to vector<8x8xf32>
    %212 = arith.mulf %207, %211 : vector<8x8xf32>
    %213 = arith.truncf %212 : vector<8x8xf32> to vector<8x8xbf16>
    %214 = arith.truncf %187 : vector<8x128xf32> to vector<8x128xbf16>
    %cst_92 = arith.constant dense<0.000000e+00> : vector<8x128xf32>
    %215 = tpu.matmul %213, %214, %cst_92 {dimension_numbers = #tpu.dot_dimension_numbers<[1], [0], [0], [1], [0, 0, 1, 1], [], []>} : vector<8x8xbf16>, vector<8x128xbf16>, vector<8x128xf32> -> vector<8x128xf32>
    %216 = arith.truncf %215 : vector<8x128xf32> to vector<8x128xbf16>
    %cst_93 = arith.constant dense<0.000000e+00> : vector<8x128xf32>
    %217 = tpu.matmul %216, %146, %cst_93 {dimension_numbers = #tpu.dot_dimension_numbers<[1], [0], [0], [1], [0, 0, 1, 1], [], []>} : vector<8x128xbf16>, vector<128x128xbf16>, vector<8x128xf32> -> vector<8x128xf32>
    %218 = arith.addf %158, %217 : vector<8x128xf32>
    %219 = vector.extract_strided_slice %144 {offsets = [2, 0], sizes = [1, 128], strides = [1, 1]} : vector<8x128xf32> to vector<1x128xf32>
    %220 = vector.extract_strided_slice %144 {offsets = [3, 0], sizes = [1, 128], strides = [1, 1]} : vector<8x128xf32> to vector<1x128xf32>
    %cst_94 = arith.constant dense<0.000000e+00> : vector<8xf32>
    %221 = vector.multi_reduction <add>, %218, %cst_94 [1] : vector<8x128xf32> to vector<8xf32>
    %222 = vector.shape_cast %221 : vector<8xf32> to vector<8x1xf32>
    %cst_95 = arith.constant 1.280000e+02 : f32
    %223 = vector.broadcast %cst_95 : f32 to vector<8x1xf32>
    %224 = arith.divf %222, %223 : vector<8x1xf32>
    %225 = vector.broadcast %224 : vector<8x1xf32> to vector<8x128xf32>
    %226 = arith.subf %218, %225 : vector<8x128xf32>
    %227 = arith.mulf %226, %226 : vector<8x128xf32>
    %cst_96 = arith.constant dense<0.000000e+00> : vector<8xf32>
    %228 = vector.multi_reduction <add>, %227, %cst_96 [1] : vector<8x128xf32> to vector<8xf32>
    %229 = vector.shape_cast %228 : vector<8xf32> to vector<8x1xf32>
    %cst_97 = arith.constant 1.280000e+02 : f32
    %230 = vector.broadcast %cst_97 : f32 to vector<8x1xf32>
    %231 = arith.divf %229, %230 : vector<8x1xf32>
    %232 = vector.broadcast %224 : vector<8x1xf32> to vector<8x128xf32>
    %233 = arith.subf %218, %232 : vector<8x128xf32>
    %cst_98 = arith.constant 9.99999974E-6 : f32
    %234 = vector.broadcast %cst_98 : f32 to vector<8x1xf32>
    %235 = arith.addf %231, %234 : vector<8x1xf32>
    %236 = math.rsqrt %235 : vector<8x1xf32>
    %237 = vector.broadcast %236 : vector<8x1xf32> to vector<8x128xf32>
    %238 = arith.mulf %233, %237 : vector<8x128xf32>
    %239 = vector.broadcast %219 : vector<1x128xf32> to vector<8x128xf32>
    %240 = arith.mulf %238, %239 : vector<8x128xf32>
    %241 = vector.broadcast %220 : vector<1x128xf32> to vector<8x128xf32>
    %242 = arith.addf %240, %241 : vector<8x128xf32>
    %243 = arith.truncf %242 : vector<8x128xf32> to vector<8x128xbf16>
    %cst_99 = arith.constant dense<0.000000e+00> : vector<8x128xf32>
    %244 = tpu.matmul %243, %147, %cst_99 {dimension_numbers = #tpu.dot_dimension_numbers<[1], [0], [0], [1], [0, 0, 1, 1], [], []>} : vector<8x128xbf16>, vector<128x128xbf16>, vector<8x128xf32> -> vector<8x128xf32>
    %245 = arith.truncf %244 : vector<8x128xf32> to vector<8x128xbf16>
    %cst_100 = arith.constant dense<0.000000e+00> : vector<8x16xf32>
    %246 = tpu.matmul %245, %141, %cst_100 {dimension_numbers = #tpu.dot_dimension_numbers<[1], [1], [0], [0], [0, 0, 1, 0], [], []>} : vector<8x128xbf16>, vector<16x128xbf16>, vector<8x16xf32> -> vector<8x16xf32>
    %cst_101 = arith.constant 0.0883883461 : f32
    %247 = vector.broadcast %cst_101 : f32 to vector<8x16xf32>
    %248 = arith.mulf %246, %247 : vector<8x16xf32>
    %cst_102 = arith.constant dense<0xFF800000> : vector<8xf32>
    %249 = vector.multi_reduction <maximumf>, %248, %cst_102 [1] : vector<8x16xf32> to vector<8xf32>
    %250 = vector.shape_cast %249 : vector<8xf32> to vector<8x1xf32>
    %251 = vector.broadcast %250 : vector<8x1xf32> to vector<8x16xf32>
    %252 = arith.subf %248, %251 : vector<8x16xf32>
    %253 = math.exp %252 : vector<8x16xf32>
    %cst_103 = arith.constant dense<0.000000e+00> : vector<8xf32>
    %254 = vector.multi_reduction <add>, %253, %cst_103 [1] : vector<8x16xf32> to vector<8xf32>
    %255 = vector.shape_cast %254 : vector<8xf32> to vector<8x1xf32>
    %256 = tpu.reciprocal %255 {approx = true} : vector<8x1xf32> -> vector<8x1xf32>
    %257 = vector.broadcast %256 : vector<8x1xf32> to vector<8x16xf32>
    %258 = arith.mulf %253, %257 : vector<8x16xf32>
    %259 = arith.truncf %258 : vector<8x16xf32> to vector<8x16xbf16>
    %cst_104 = arith.constant dense<0.000000e+00> : vector<8x128xf32>
    %260 = tpu.matmul %259, %143, %cst_104 {dimension_numbers = #tpu.dot_dimension_numbers<[1], [0], [0], [1], [0, 0, 1, 1], [], []>} : vector<8x16xbf16>, vector<16x128xbf16>, vector<8x128xf32> -> vector<8x128xf32>
    %261 = arith.truncf %260 : vector<8x128xf32> to vector<8x128xbf16>
    %cst_105 = arith.constant dense<0.000000e+00> : vector<8x128xf32>
    %262 = tpu.matmul %261, %148, %cst_105 {dimension_numbers = #tpu.dot_dimension_numbers<[1], [0], [0], [1], [0, 0, 1, 1], [], []>} : vector<8x128xbf16>, vector<128x128xbf16>, vector<8x128xf32> -> vector<8x128xf32>
    %263 = arith.addf %218, %262 : vector<8x128xf32>
    %264 = vector.extract_strided_slice %144 {offsets = [4, 0], sizes = [1, 128], strides = [1, 1]} : vector<8x128xf32> to vector<1x128xf32>
    %265 = vector.extract_strided_slice %144 {offsets = [5, 0], sizes = [1, 128], strides = [1, 1]} : vector<8x128xf32> to vector<1x128xf32>
    %cst_106 = arith.constant dense<0.000000e+00> : vector<8xf32>
    %266 = vector.multi_reduction <add>, %263, %cst_106 [1] : vector<8x128xf32> to vector<8xf32>
    %267 = vector.shape_cast %266 : vector<8xf32> to vector<8x1xf32>
    %cst_107 = arith.constant 1.280000e+02 : f32
    %268 = vector.broadcast %cst_107 : f32 to vector<8x1xf32>
    %269 = arith.divf %267, %268 : vector<8x1xf32>
    %270 = vector.broadcast %269 : vector<8x1xf32> to vector<8x128xf32>
    %271 = arith.subf %263, %270 : vector<8x128xf32>
    %272 = arith.mulf %271, %271 : vector<8x128xf32>
    %cst_108 = arith.constant dense<0.000000e+00> : vector<8xf32>
    %273 = vector.multi_reduction <add>, %272, %cst_108 [1] : vector<8x128xf32> to vector<8xf32>
    %274 = vector.shape_cast %273 : vector<8xf32> to vector<8x1xf32>
    %cst_109 = arith.constant 1.280000e+02 : f32
    %275 = vector.broadcast %cst_109 : f32 to vector<8x1xf32>
    %276 = arith.divf %274, %275 : vector<8x1xf32>
    %277 = vector.broadcast %269 : vector<8x1xf32> to vector<8x128xf32>
    %278 = arith.subf %263, %277 : vector<8x128xf32>
    %cst_110 = arith.constant 9.99999974E-6 : f32
    %279 = vector.broadcast %cst_110 : f32 to vector<8x1xf32>
    %280 = arith.addf %276, %279 : vector<8x1xf32>
    %281 = math.rsqrt %280 : vector<8x1xf32>
    %282 = vector.broadcast %281 : vector<8x1xf32> to vector<8x128xf32>
    %283 = arith.mulf %278, %282 : vector<8x128xf32>
    %284 = vector.broadcast %264 : vector<1x128xf32> to vector<8x128xf32>
    %285 = arith.mulf %283, %284 : vector<8x128xf32>
    %286 = vector.broadcast %265 : vector<1x128xf32> to vector<8x128xf32>
    %287 = arith.addf %285, %286 : vector<8x128xf32>
    %288 = arith.truncf %287 : vector<8x128xf32> to vector<8x128xbf16>
    %cst_111 = arith.constant dense<0.000000e+00> : vector<8x512xf32>
    %289 = tpu.matmul %288, %149, %cst_111 {dimension_numbers = #tpu.dot_dimension_numbers<[1], [0], [0], [1], [0, 0, 1, 1], [], []>} : vector<8x128xbf16>, vector<128x512xbf16>, vector<8x512xf32> -> vector<8x512xf32>
    %290 = vector.broadcast %150 : vector<1x512xf32> to vector<8x512xf32>
    %291 = arith.addf %289, %290 : vector<8x512xf32>
    %292 = arith.mulf %291, %291 : vector<8x512xf32>
    %293 = arith.mulf %291, %292 : vector<8x512xf32>
    %cst_112 = arith.constant 4.471500e-02 : f32
    %294 = vector.broadcast %cst_112 : f32 to vector<8x512xf32>
    %295 = arith.mulf %294, %293 : vector<8x512xf32>
    %296 = arith.addf %291, %295 : vector<8x512xf32>
    %cst_113 = arith.constant 0.797884583 : f32
    %297 = vector.broadcast %cst_113 : f32 to vector<8x512xf32>
    %298 = arith.mulf %297, %296 : vector<8x512xf32>
    %299 = math.tanh %298 : vector<8x512xf32>
    %cst_114 = arith.constant 1.000000e+00 : f32
    %300 = vector.broadcast %cst_114 : f32 to vector<8x512xf32>
    %301 = arith.addf %300, %299 : vector<8x512xf32>
    %cst_115 = arith.constant 5.000000e-01 : f32
    %302 = vector.broadcast %cst_115 : f32 to vector<8x512xf32>
    %303 = arith.mulf %302, %301 : vector<8x512xf32>
    %304 = arith.mulf %291, %303 : vector<8x512xf32>
    %305 = arith.truncf %304 : vector<8x512xf32> to vector<8x512xbf16>
    %cst_116 = arith.constant dense<0.000000e+00> : vector<8x128xf32>
    %306 = tpu.matmul %305, %151, %cst_116 {dimension_numbers = #tpu.dot_dimension_numbers<[1], [0], [0], [1], [0, 0, 1, 1], [], []>} : vector<8x512xbf16>, vector<512x128xbf16>, vector<8x128xf32> -> vector<8x128xf32>
    %307 = arith.addf %263, %306 : vector<8x128xf32>
    %308 = vector.broadcast %152 : vector<1x128xf32> to vector<8x128xf32>
    %309 = arith.addf %307, %308 : vector<8x128xf32>
    %310 = vector.extract_strided_slice %309 {offsets = [7, 0], sizes = [1, 128], strides = [1, 1]} : vector<8x128xf32> to vector<1x128xf32>
    %311 = vector.extract_strided_slice %144 {offsets = [6, 0], sizes = [1, 128], strides = [1, 1]} : vector<8x128xf32> to vector<1x128xf32>
    %312 = vector.extract_strided_slice %144 {offsets = [7, 0], sizes = [1, 128], strides = [1, 1]} : vector<8x128xf32> to vector<1x128xf32>
    %cst_117 = arith.constant dense<0.000000e+00> : vector<1xf32>
    %313 = vector.multi_reduction <add>, %310, %cst_117 [1] : vector<1x128xf32> to vector<1xf32>
    %314 = vector.shape_cast %313 : vector<1xf32> to vector<1x1xf32>
    %cst_118 = arith.constant 1.280000e+02 : f32
    %315 = vector.broadcast %cst_118 : f32 to vector<1x1xf32>
    %316 = arith.divf %314, %315 : vector<1x1xf32>
    %317 = vector.broadcast %316 : vector<1x1xf32> to vector<1x128xf32>
    %318 = arith.subf %310, %317 : vector<1x128xf32>
    %319 = arith.mulf %318, %318 : vector<1x128xf32>
    %cst_119 = arith.constant dense<0.000000e+00> : vector<1xf32>
    %320 = vector.multi_reduction <add>, %319, %cst_119 [1] : vector<1x128xf32> to vector<1xf32>
    %321 = vector.shape_cast %320 : vector<1xf32> to vector<1x1xf32>
    %cst_120 = arith.constant 1.280000e+02 : f32
    %322 = vector.broadcast %cst_120 : f32 to vector<1x1xf32>
    %323 = arith.divf %321, %322 : vector<1x1xf32>
    %324 = vector.broadcast %316 : vector<1x1xf32> to vector<1x128xf32>
    %325 = arith.subf %310, %324 : vector<1x128xf32>
    %cst_121 = arith.constant 9.99999974E-6 : f32
    %326 = vector.broadcast %cst_121 : f32 to vector<1x1xf32>
    %327 = arith.addf %323, %326 : vector<1x1xf32>
    %328 = math.rsqrt %327 : vector<1x1xf32>
    %329 = vector.broadcast %328 : vector<1x1xf32> to vector<1x128xf32>
    %330 = arith.mulf %325, %329 : vector<1x128xf32>
    %331 = arith.mulf %330, %311 : vector<1x128xf32>
    %332 = arith.addf %331, %312 : vector<1x128xf32>
    %333 = arith.truncf %332 : vector<1x128xf32> to vector<1x128xbf16>
    %cst_122 = arith.constant dense<0.000000e+00> : vector<1x128xf32>
    %334 = tpu.matmul %333, %153, %cst_122 {dimension_numbers = #tpu.dot_dimension_numbers<[1], [0], [0], [1], [0, 0, 1, 1], [], []>} : vector<1x128xbf16>, vector<128x128xbf16>, vector<1x128xf32> -> vector<1x128xf32>
    %335 = arith.addf %334, %154 : vector<1x128xf32>
    %cst_123 = arith.constant 0.000000e+00 : bf16
    %336 = vector.broadcast %cst_123 : bf16 to vector<8x128xbf16>
    %337 = arith.truncf %186 : vector<8x128xf32> to vector<8x128xbf16>
    %338 = tpu.concatenate %337, %336 in 0 : vector<8x128xbf16>, vector<8x128xbf16> -> vector<16x128xbf16>
    %339 = arith.truncf %187 : vector<8x128xf32> to vector<8x128xbf16>
    %340 = tpu.concatenate %339, %336 in 0 : vector<8x128xbf16>, vector<8x128xbf16> -> vector<16x128xbf16>
    %341 = tpu.iota {dimensions = array<i32: 1>} : vector<1x128xi32>
    %342 = tpu.iota {dimensions = array<i32: 1>} : vector<1x128xi32>
    %343 = tpu.iota {dimensions = array<i32: 1>} : vector<1x16xi32>
    %344 = tpu.iota {dimensions = array<i32: 0>} : vector<16x1xi32>
    %345 = tpu.iota {dimensions = array<i32: 1>} : vector<1x16xi32>
    %cst_124 = arith.constant dense<0xFF800000> : vector<1xf32>
    %346 = vector.multi_reduction <maximumf>, %335, %cst_124 [1] : vector<1x128xf32> to vector<1xf32>
    %347 = vector.shape_cast %346 : vector<1xf32> to vector<1x1xf32>
    %348 = vector.broadcast %347 : vector<1x1xf32> to vector<1x128xf32>
    %349 = arith.cmpf oeq, %335, %348 : vector<1x128xf32>
    %c128_i32 = arith.constant 128 : i32
    %350 = vector.broadcast %c128_i32 : i32 to vector<1x128xi32>
    %351 = arith.select %349, %342, %350 : vector<1x128xi1>, vector<1x128xi32>
    %cst_125 = arith.constant dense<2147483647> : vector<1xi32>
    %352 = vector.multi_reduction <minsi>, %351, %cst_125 [1] : vector<1x128xi32> to vector<1xi32>
    %353 = vector.shape_cast %352 : vector<1xi32> to vector<1x1xi32>
    %c0_i32 = arith.constant 0 : i32
    %354 = vector.broadcast %c0_i32 : i32 to vector<1x128xi32>
    %355 = arith.cmpi eq, %341, %354 : vector<1x128xi32>
    %c0_i32_126 = arith.constant 0 : i32
    %356 = vector.broadcast %c0_i32_126 : i32 to vector<1x128xi32>
    %357 = vector.shape_cast %353 : vector<1x1xi32> to vector<1x1xi32>
    %358 = vector.broadcast %357 : vector<1x1xi32> to vector<1x128xi32>
    %359 = arith.select %355, %358, %356 : vector<1x128xi1>, vector<1x128xi32>
    %c0_i32_127 = arith.constant 0 : i32
    %360 = vector.broadcast %353 : vector<1x1xi32> to vector<1x128xi32>
    %361 = arith.cmpi eq, %342, %360 : vector<1x128xi32>
    %362 = arith.extui %361 : vector<1x128xi1> to vector<1x128xi32>
    %363 = arith.sitofp %362 : vector<1x128xi32> to vector<1x128xf32>
    %364 = arith.truncf %363 : vector<1x128xf32> to vector<1x128xbf16>
    %365 = arith.addi %1, %c0_i32_127 : i32
    %366 = vector.broadcast %365 : i32 to vector<1x16xi32>
    %367 = arith.cmpi eq, %343, %366 : vector<1x16xi32>
    %368 = arith.extui %367 : vector<1x16xi1> to vector<1x16xi32>
    %369 = arith.sitofp %368 : vector<1x16xi32> to vector<1x16xf32>
    %370 = arith.truncf %369 : vector<1x16xf32> to vector<1x16xbf16>
    %cst_128 = arith.constant dense<0.000000e+00> : vector<1x128xf32>
    %371 = tpu.matmul %364, %155, %cst_128 {dimension_numbers = #tpu.dot_dimension_numbers<[1], [0], [0], [1], [0, 0, 1, 1], [], []>} : vector<1x128xbf16>, vector<128x128xbf16>, vector<1x128xf32> -> vector<1x128xf32>
    %cst_129 = arith.constant dense<0.000000e+00> : vector<1x128xf32>
    %372 = tpu.matmul %370, %156, %cst_129 {dimension_numbers = #tpu.dot_dimension_numbers<[1], [0], [0], [1], [0, 0, 1, 1], [], []>} : vector<1x16xbf16>, vector<16x128xbf16>, vector<1x128xf32> -> vector<1x128xf32>
    %373 = arith.addf %371, %372 : vector<1x128xf32>
    %374 = vector.extract_strided_slice %144 {offsets = [0, 0], sizes = [1, 128], strides = [1, 1]} : vector<8x128xf32> to vector<1x128xf32>
    %375 = vector.extract_strided_slice %144 {offsets = [1, 0], sizes = [1, 128], strides = [1, 1]} : vector<8x128xf32> to vector<1x128xf32>
    %cst_130 = arith.constant dense<0.000000e+00> : vector<1xf32>
    %376 = vector.multi_reduction <add>, %373, %cst_130 [1] : vector<1x128xf32> to vector<1xf32>
    %377 = vector.shape_cast %376 : vector<1xf32> to vector<1x1xf32>
    %cst_131 = arith.constant 1.280000e+02 : f32
    %378 = vector.broadcast %cst_131 : f32 to vector<1x1xf32>
    %379 = arith.divf %377, %378 : vector<1x1xf32>
    %380 = vector.broadcast %379 : vector<1x1xf32> to vector<1x128xf32>
    %381 = arith.subf %373, %380 : vector<1x128xf32>
    %382 = arith.mulf %381, %381 : vector<1x128xf32>
    %cst_132 = arith.constant dense<0.000000e+00> : vector<1xf32>
    %383 = vector.multi_reduction <add>, %382, %cst_132 [1] : vector<1x128xf32> to vector<1xf32>
    %384 = vector.shape_cast %383 : vector<1xf32> to vector<1x1xf32>
    %cst_133 = arith.constant 1.280000e+02 : f32
    %385 = vector.broadcast %cst_133 : f32 to vector<1x1xf32>
    %386 = arith.divf %384, %385 : vector<1x1xf32>
    %387 = vector.broadcast %379 : vector<1x1xf32> to vector<1x128xf32>
    %388 = arith.subf %373, %387 : vector<1x128xf32>
    %cst_134 = arith.constant 9.99999974E-6 : f32
    %389 = vector.broadcast %cst_134 : f32 to vector<1x1xf32>
    %390 = arith.addf %386, %389 : vector<1x1xf32>
    %391 = math.rsqrt %390 : vector<1x1xf32>
    %392 = vector.broadcast %391 : vector<1x1xf32> to vector<1x128xf32>
    %393 = arith.mulf %388, %392 : vector<1x128xf32>
    %394 = arith.mulf %393, %374 : vector<1x128xf32>
    %395 = arith.addf %394, %375 : vector<1x128xf32>
    %396 = arith.truncf %395 : vector<1x128xf32> to vector<1x128xbf16>
    %cst_135 = arith.constant dense<0.000000e+00> : vector<1x384xf32>
    %397 = tpu.matmul %396, %145, %cst_135 {dimension_numbers = #tpu.dot_dimension_numbers<[1], [0], [0], [1], [0, 0, 1, 1], [], []>} : vector<1x128xbf16>, vector<128x384xbf16>, vector<1x384xf32> -> vector<1x384xf32>
    %398 = vector.extract_strided_slice %397 {offsets = [0, 0], sizes = [1, 128], strides = [1, 1]} : vector<1x384xf32> to vector<1x128xf32>
    %399 = vector.extract_strided_slice %397 {offsets = [0, 128], sizes = [1, 128], strides = [1, 1]} : vector<1x384xf32> to vector<1x128xf32>
    %400 = vector.extract_strided_slice %397 {offsets = [0, 256], sizes = [1, 128], strides = [1, 1]} : vector<1x384xf32> to vector<1x128xf32>
    %c8_i32_136 = arith.constant 8 : i32
    %401 = arith.addi %c8_i32_136, %c0_i32_127 : i32
    %402 = vector.broadcast %401 : i32 to vector<16x1xi32>
    %403 = arith.cmpi eq, %344, %402 : vector<16x1xi32>
    %404 = arith.truncf %399 : vector<1x128xf32> to vector<1x128xbf16>
    %405 = vector.shape_cast %403 : vector<16x1xi1> to vector<16x1xi1>
    %406 = vector.broadcast %405 : vector<16x1xi1> to vector<16x128xi1>
    %407 = vector.shape_cast %404 : vector<1x128xbf16> to vector<1x128xbf16>
    %408 = vector.broadcast %407 : vector<1x128xbf16> to vector<16x128xbf16>
    %409 = arith.select %406, %408, %338 : vector<16x128xi1>, vector<16x128xbf16>
    %410 = vector.broadcast %401 : i32 to vector<16x1xi32>
    %411 = arith.cmpi eq, %344, %410 : vector<16x1xi32>
    %412 = arith.truncf %400 : vector<1x128xf32> to vector<1x128xbf16>
    %413 = vector.shape_cast %411 : vector<16x1xi1> to vector<16x1xi1>
    %414 = vector.broadcast %413 : vector<16x1xi1> to vector<16x128xi1>
    %415 = vector.shape_cast %412 : vector<1x128xbf16> to vector<1x128xbf16>
    %416 = vector.broadcast %415 : vector<1x128xbf16> to vector<16x128xbf16>
    %417 = arith.select %414, %416, %340 : vector<16x128xi1>, vector<16x128xbf16>
    %418 = vector.broadcast %2 : i32 to vector<1x16xi32>
    %419 = arith.cmpi sge, %345, %418 : vector<1x16xi32>
    %c8_i32_137 = arith.constant 8 : i32
    %420 = vector.broadcast %c8_i32_137 : i32 to vector<1x16xi32>
    %421 = arith.cmpi slt, %345, %420 : vector<1x16xi32>
    %422 = arith.andi %419, %421 : vector<1x16xi1>
    %c8_i32_138 = arith.constant 8 : i32
    %423 = vector.broadcast %c8_i32_138 : i32 to vector<1x16xi32>
    %424 = arith.cmpi sge, %345, %423 : vector<1x16xi32>
    %425 = vector.broadcast %401 : i32 to vector<1x16xi32>
    %426 = arith.cmpi sle, %345, %425 : vector<1x16xi32>
    %427 = arith.andi %424, %426 : vector<1x16xi1>
    %428 = arith.ori %422, %427 : vector<1x16xi1>
    %cst_139 = arith.constant 0.000000e+00 : f32
    %cst_140 = arith.constant -1.000000e+30 : f32
    %429 = vector.broadcast %cst_139 : f32 to vector<1x16xf32>
    %430 = vector.broadcast %cst_140 : f32 to vector<1x16xf32>
    %431 = arith.select %428, %429, %430 : vector<1x16xi1>, vector<1x16xf32>
    %432 = arith.truncf %398 : vector<1x128xf32> to vector<1x128xbf16>
    %cst_141 = arith.constant dense<0.000000e+00> : vector<1x16xf32>
    %433 = tpu.matmul %432, %409, %cst_141 {dimension_numbers = #tpu.dot_dimension_numbers<[1], [1], [0], [0], [0, 0, 1, 0], [], []>} : vector<1x128xbf16>, vector<16x128xbf16>, vector<1x16xf32> -> vector<1x16xf32>
    %cst_142 = arith.constant 0.0883883461 : f32
    %434 = vector.broadcast %cst_142 : f32 to vector<1x16xf32>
    %435 = arith.mulf %433, %434 : vector<1x16xf32>
    %436 = arith.addf %435, %431 : vector<1x16xf32>
    %cst_143 = arith.constant dense<0xFF800000> : vector<1xf32>
    %437 = vector.multi_reduction <maximumf>, %436, %cst_143 [1] : vector<1x16xf32> to vector<1xf32>
    %438 = vector.shape_cast %437 : vector<1xf32> to vector<1x1xf32>
    %439 = vector.broadcast %438 : vector<1x1xf32> to vector<1x16xf32>
    %440 = arith.subf %436, %439 : vector<1x16xf32>
    %441 = math.exp %440 : vector<1x16xf32>
    %cst_144 = arith.constant dense<0.000000e+00> : vector<1xf32>
    %442 = vector.multi_reduction <add>, %441, %cst_144 [1] : vector<1x16xf32> to vector<1xf32>
    %443 = vector.shape_cast %442 : vector<1xf32> to vector<1x1xf32>
    %444 = tpu.reciprocal %443 {approx = true} : vector<1x1xf32> -> vector<1x1xf32>
    %445 = vector.broadcast %444 : vector<1x1xf32> to vector<1x16xf32>
    %446 = arith.mulf %441, %445 : vector<1x16xf32>
    %447 = arith.truncf %446 : vector<1x16xf32> to vector<1x16xbf16>
    %cst_145 = arith.constant dense<0.000000e+00> : vector<1x128xf32>
    %448 = tpu.matmul %447, %417, %cst_145 {dimension_numbers = #tpu.dot_dimension_numbers<[1], [0], [0], [1], [0, 0, 1, 1], [], []>} : vector<1x16xbf16>, vector<16x128xbf16>, vector<1x128xf32> -> vector<1x128xf32>
    %449 = arith.truncf %448 : vector<1x128xf32> to vector<1x128xbf16>
    %cst_146 = arith.constant dense<0.000000e+00> : vector<1x128xf32>
    %450 = tpu.matmul %449, %146, %cst_146 {dimension_numbers = #tpu.dot_dimension_numbers<[1], [0], [0], [1], [0, 0, 1, 1], [], []>} : vector<1x128xbf16>, vector<128x128xbf16>, vector<1x128xf32> -> vector<1x128xf32>
    %451 = arith.addf %373, %450 : vector<1x128xf32>
    %452 = vector.extract_strided_slice %144 {offsets = [2, 0], sizes = [1, 128], strides = [1, 1]} : vector<8x128xf32> to vector<1x128xf32>
    %453 = vector.extract_strided_slice %144 {offsets = [3, 0], sizes = [1, 128], strides = [1, 1]} : vector<8x128xf32> to vector<1x128xf32>
    %cst_147 = arith.constant dense<0.000000e+00> : vector<1xf32>
    %454 = vector.multi_reduction <add>, %451, %cst_147 [1] : vector<1x128xf32> to vector<1xf32>
    %455 = vector.shape_cast %454 : vector<1xf32> to vector<1x1xf32>
    %cst_148 = arith.constant 1.280000e+02 : f32
    %456 = vector.broadcast %cst_148 : f32 to vector<1x1xf32>
    %457 = arith.divf %455, %456 : vector<1x1xf32>
    %458 = vector.broadcast %457 : vector<1x1xf32> to vector<1x128xf32>
    %459 = arith.subf %451, %458 : vector<1x128xf32>
    %460 = arith.mulf %459, %459 : vector<1x128xf32>
    %cst_149 = arith.constant dense<0.000000e+00> : vector<1xf32>
    %461 = vector.multi_reduction <add>, %460, %cst_149 [1] : vector<1x128xf32> to vector<1xf32>
    %462 = vector.shape_cast %461 : vector<1xf32> to vector<1x1xf32>
    %cst_150 = arith.constant 1.280000e+02 : f32
    %463 = vector.broadcast %cst_150 : f32 to vector<1x1xf32>
    %464 = arith.divf %462, %463 : vector<1x1xf32>
    %465 = vector.broadcast %457 : vector<1x1xf32> to vector<1x128xf32>
    %466 = arith.subf %451, %465 : vector<1x128xf32>
    %cst_151 = arith.constant 9.99999974E-6 : f32
    %467 = vector.broadcast %cst_151 : f32 to vector<1x1xf32>
    %468 = arith.addf %464, %467 : vector<1x1xf32>
    %469 = math.rsqrt %468 : vector<1x1xf32>
    %470 = vector.broadcast %469 : vector<1x1xf32> to vector<1x128xf32>
    %471 = arith.mulf %466, %470 : vector<1x128xf32>
    %472 = arith.mulf %471, %452 : vector<1x128xf32>
    %473 = arith.addf %472, %453 : vector<1x128xf32>
    %474 = arith.truncf %473 : vector<1x128xf32> to vector<1x128xbf16>
    %cst_152 = arith.constant dense<0.000000e+00> : vector<1x128xf32>
    %475 = tpu.matmul %474, %147, %cst_152 {dimension_numbers = #tpu.dot_dimension_numbers<[1], [0], [0], [1], [0, 0, 1, 1], [], []>} : vector<1x128xbf16>, vector<128x128xbf16>, vector<1x128xf32> -> vector<1x128xf32>
    %476 = arith.truncf %475 : vector<1x128xf32> to vector<1x128xbf16>
    %cst_153 = arith.constant dense<0.000000e+00> : vector<1x16xf32>
    %477 = tpu.matmul %476, %141, %cst_153 {dimension_numbers = #tpu.dot_dimension_numbers<[1], [1], [0], [0], [0, 0, 1, 0], [], []>} : vector<1x128xbf16>, vector<16x128xbf16>, vector<1x16xf32> -> vector<1x16xf32>
    %cst_154 = arith.constant 0.0883883461 : f32
    %478 = vector.broadcast %cst_154 : f32 to vector<1x16xf32>
    %479 = arith.mulf %477, %478 : vector<1x16xf32>
    %cst_155 = arith.constant dense<0xFF800000> : vector<1xf32>
    %480 = vector.multi_reduction <maximumf>, %479, %cst_155 [1] : vector<1x16xf32> to vector<1xf32>
    %481 = vector.shape_cast %480 : vector<1xf32> to vector<1x1xf32>
    %482 = vector.broadcast %481 : vector<1x1xf32> to vector<1x16xf32>
    %483 = arith.subf %479, %482 : vector<1x16xf32>
    %484 = math.exp %483 : vector<1x16xf32>
    %cst_156 = arith.constant dense<0.000000e+00> : vector<1xf32>
    %485 = vector.multi_reduction <add>, %484, %cst_156 [1] : vector<1x16xf32> to vector<1xf32>
    %486 = vector.shape_cast %485 : vector<1xf32> to vector<1x1xf32>
    %487 = tpu.reciprocal %486 {approx = true} : vector<1x1xf32> -> vector<1x1xf32>
    %488 = vector.broadcast %487 : vector<1x1xf32> to vector<1x16xf32>
    %489 = arith.mulf %484, %488 : vector<1x16xf32>
    %490 = arith.truncf %489 : vector<1x16xf32> to vector<1x16xbf16>
    %cst_157 = arith.constant dense<0.000000e+00> : vector<1x128xf32>
    %491 = tpu.matmul %490, %143, %cst_157 {dimension_numbers = #tpu.dot_dimension_numbers<[1], [0], [0], [1], [0, 0, 1, 1], [], []>} : vector<1x16xbf16>, vector<16x128xbf16>, vector<1x128xf32> -> vector<1x128xf32>
    %492 = arith.truncf %491 : vector<1x128xf32> to vector<1x128xbf16>
    %cst_158 = arith.constant dense<0.000000e+00> : vector<1x128xf32>
    %493 = tpu.matmul %492, %148, %cst_158 {dimension_numbers = #tpu.dot_dimension_numbers<[1], [0], [0], [1], [0, 0, 1, 1], [], []>} : vector<1x128xbf16>, vector<128x128xbf16>, vector<1x128xf32> -> vector<1x128xf32>
    %494 = arith.addf %451, %493 : vector<1x128xf32>
    %495 = vector.extract_strided_slice %144 {offsets = [4, 0], sizes = [1, 128], strides = [1, 1]} : vector<8x128xf32> to vector<1x128xf32>
    %496 = vector.extract_strided_slice %144 {offsets = [5, 0], sizes = [1, 128], strides = [1, 1]} : vector<8x128xf32> to vector<1x128xf32>
    %cst_159 = arith.constant dense<0.000000e+00> : vector<1xf32>
    %497 = vector.multi_reduction <add>, %494, %cst_159 [1] : vector<1x128xf32> to vector<1xf32>
    %498 = vector.shape_cast %497 : vector<1xf32> to vector<1x1xf32>
    %cst_160 = arith.constant 1.280000e+02 : f32
    %499 = vector.broadcast %cst_160 : f32 to vector<1x1xf32>
    %500 = arith.divf %498, %499 : vector<1x1xf32>
    %501 = vector.broadcast %500 : vector<1x1xf32> to vector<1x128xf32>
    %502 = arith.subf %494, %501 : vector<1x128xf32>
    %503 = arith.mulf %502, %502 : vector<1x128xf32>
    %cst_161 = arith.constant dense<0.000000e+00> : vector<1xf32>
    %504 = vector.multi_reduction <add>, %503, %cst_161 [1] : vector<1x128xf32> to vector<1xf32>
    %505 = vector.shape_cast %504 : vector<1xf32> to vector<1x1xf32>
    %cst_162 = arith.constant 1.280000e+02 : f32
    %506 = vector.broadcast %cst_162 : f32 to vector<1x1xf32>
    %507 = arith.divf %505, %506 : vector<1x1xf32>
    %508 = vector.broadcast %500 : vector<1x1xf32> to vector<1x128xf32>
    %509 = arith.subf %494, %508 : vector<1x128xf32>
    %cst_163 = arith.constant 9.99999974E-6 : f32
    %510 = vector.broadcast %cst_163 : f32 to vector<1x1xf32>
    %511 = arith.addf %507, %510 : vector<1x1xf32>
    %512 = math.rsqrt %511 : vector<1x1xf32>
    %513 = vector.broadcast %512 : vector<1x1xf32> to vector<1x128xf32>
    %514 = arith.mulf %509, %513 : vector<1x128xf32>
    %515 = arith.mulf %514, %495 : vector<1x128xf32>
    %516 = arith.addf %515, %496 : vector<1x128xf32>
    %517 = arith.truncf %516 : vector<1x128xf32> to vector<1x128xbf16>
    %cst_164 = arith.constant dense<0.000000e+00> : vector<1x512xf32>
    %518 = tpu.matmul %517, %149, %cst_164 {dimension_numbers = #tpu.dot_dimension_numbers<[1], [0], [0], [1], [0, 0, 1, 1], [], []>} : vector<1x128xbf16>, vector<128x512xbf16>, vector<1x512xf32> -> vector<1x512xf32>
    %519 = arith.addf %518, %150 : vector<1x512xf32>
    %520 = arith.mulf %519, %519 : vector<1x512xf32>
    %521 = arith.mulf %519, %520 : vector<1x512xf32>
    %cst_165 = arith.constant 4.471500e-02 : f32
    %522 = vector.broadcast %cst_165 : f32 to vector<1x512xf32>
    %523 = arith.mulf %522, %521 : vector<1x512xf32>
    %524 = arith.addf %519, %523 : vector<1x512xf32>
    %cst_166 = arith.constant 0.797884583 : f32
    %525 = vector.broadcast %cst_166 : f32 to vector<1x512xf32>
    %526 = arith.mulf %525, %524 : vector<1x512xf32>
    %527 = math.tanh %526 : vector<1x512xf32>
    %cst_167 = arith.constant 1.000000e+00 : f32
    %528 = vector.broadcast %cst_167 : f32 to vector<1x512xf32>
    %529 = arith.addf %528, %527 : vector<1x512xf32>
    %cst_168 = arith.constant 5.000000e-01 : f32
    %530 = vector.broadcast %cst_168 : f32 to vector<1x512xf32>
    %531 = arith.mulf %530, %529 : vector<1x512xf32>
    %532 = arith.mulf %519, %531 : vector<1x512xf32>
    %533 = arith.truncf %532 : vector<1x512xf32> to vector<1x512xbf16>
    %cst_169 = arith.constant dense<0.000000e+00> : vector<1x128xf32>
    %534 = tpu.matmul %533, %151, %cst_169 {dimension_numbers = #tpu.dot_dimension_numbers<[1], [0], [0], [1], [0, 0, 1, 1], [], []>} : vector<1x512xbf16>, vector<512x128xbf16>, vector<1x128xf32> -> vector<1x128xf32>
    %535 = arith.addf %494, %534 : vector<1x128xf32>
    %536 = arith.addf %535, %152 : vector<1x128xf32>
    %537 = vector.extract_strided_slice %144 {offsets = [6, 0], sizes = [1, 128], strides = [1, 1]} : vector<8x128xf32> to vector<1x128xf32>
    %538 = vector.extract_strided_slice %144 {offsets = [7, 0], sizes = [1, 128], strides = [1, 1]} : vector<8x128xf32> to vector<1x128xf32>
    %cst_170 = arith.constant dense<0.000000e+00> : vector<1xf32>
    %539 = vector.multi_reduction <add>, %536, %cst_170 [1] : vector<1x128xf32> to vector<1xf32>
    %540 = vector.shape_cast %539 : vector<1xf32> to vector<1x1xf32>
    %cst_171 = arith.constant 1.280000e+02 : f32
    %541 = vector.broadcast %cst_171 : f32 to vector<1x1xf32>
    %542 = arith.divf %540, %541 : vector<1x1xf32>
    %543 = vector.broadcast %542 : vector<1x1xf32> to vector<1x128xf32>
    %544 = arith.subf %536, %543 : vector<1x128xf32>
    %545 = arith.mulf %544, %544 : vector<1x128xf32>
    %cst_172 = arith.constant dense<0.000000e+00> : vector<1xf32>
    %546 = vector.multi_reduction <add>, %545, %cst_172 [1] : vector<1x128xf32> to vector<1xf32>
    %547 = vector.shape_cast %546 : vector<1xf32> to vector<1x1xf32>
    %cst_173 = arith.constant 1.280000e+02 : f32
    %548 = vector.broadcast %cst_173 : f32 to vector<1x1xf32>
    %549 = arith.divf %547, %548 : vector<1x1xf32>
    %550 = vector.broadcast %542 : vector<1x1xf32> to vector<1x128xf32>
    %551 = arith.subf %536, %550 : vector<1x128xf32>
    %cst_174 = arith.constant 9.99999974E-6 : f32
    %552 = vector.broadcast %cst_174 : f32 to vector<1x1xf32>
    %553 = arith.addf %549, %552 : vector<1x1xf32>
    %554 = math.rsqrt %553 : vector<1x1xf32>
    %555 = vector.broadcast %554 : vector<1x1xf32> to vector<1x128xf32>
    %556 = arith.mulf %551, %555 : vector<1x128xf32>
    %557 = arith.mulf %556, %537 : vector<1x128xf32>
    %558 = arith.addf %557, %538 : vector<1x128xf32>
    %559 = arith.truncf %558 : vector<1x128xf32> to vector<1x128xbf16>
    %cst_175 = arith.constant dense<0.000000e+00> : vector<1x128xf32>
    %560 = tpu.matmul %559, %153, %cst_175 {dimension_numbers = #tpu.dot_dimension_numbers<[1], [0], [0], [1], [0, 0, 1, 1], [], []>} : vector<1x128xbf16>, vector<128x128xbf16>, vector<1x128xf32> -> vector<1x128xf32>
    %561 = arith.addf %560, %154 : vector<1x128xf32>
    %cst_176 = arith.constant dense<0xFF800000> : vector<1xf32>
    %562 = vector.multi_reduction <maximumf>, %561, %cst_176 [1] : vector<1x128xf32> to vector<1xf32>
    %563 = vector.shape_cast %562 : vector<1xf32> to vector<1x1xf32>
    %564 = vector.broadcast %563 : vector<1x1xf32> to vector<1x128xf32>
    %565 = arith.cmpf oeq, %561, %564 : vector<1x128xf32>
    %c128_i32_177 = arith.constant 128 : i32
    %566 = vector.broadcast %c128_i32_177 : i32 to vector<1x128xi32>
    %567 = arith.select %565, %342, %566 : vector<1x128xi1>, vector<1x128xi32>
    %cst_178 = arith.constant dense<2147483647> : vector<1xi32>
    %568 = vector.multi_reduction <minsi>, %567, %cst_178 [1] : vector<1x128xi32> to vector<1xi32>
    %569 = vector.shape_cast %568 : vector<1xi32> to vector<1x1xi32>
    %c1_i32 = arith.constant 1 : i32
    %570 = arith.addi %c0_i32_127, %c1_i32 : i32
    %571 = vector.broadcast %570 : i32 to vector<1x128xi32>
    %572 = arith.cmpi eq, %341, %571 : vector<1x128xi32>
    %573 = vector.shape_cast %569 : vector<1x1xi32> to vector<1x1xi32>
    %574 = vector.broadcast %573 : vector<1x1xi32> to vector<1x128xi32>
    %575 = arith.select %572, %574, %359 : vector<1x128xi1>, vector<1x128xi32>
    %c1_i32_179 = arith.constant 1 : i32
    %576 = vector.broadcast %569 : vector<1x1xi32> to vector<1x128xi32>
    %577 = arith.cmpi eq, %342, %576 : vector<1x128xi32>
    %578 = arith.extui %577 : vector<1x128xi1> to vector<1x128xi32>
    %579 = arith.sitofp %578 : vector<1x128xi32> to vector<1x128xf32>
    %580 = arith.truncf %579 : vector<1x128xf32> to vector<1x128xbf16>
    %581 = arith.addi %1, %c1_i32_179 : i32
    %582 = vector.broadcast %581 : i32 to vector<1x16xi32>
    %583 = arith.cmpi eq, %343, %582 : vector<1x16xi32>
    %584 = arith.extui %583 : vector<1x16xi1> to vector<1x16xi32>
    %585 = arith.sitofp %584 : vector<1x16xi32> to vector<1x16xf32>
    %586 = arith.truncf %585 : vector<1x16xf32> to vector<1x16xbf16>
    %cst_180 = arith.constant dense<0.000000e+00> : vector<1x128xf32>
    %587 = tpu.matmul %580, %155, %cst_180 {dimension_numbers = #tpu.dot_dimension_numbers<[1], [0], [0], [1], [0, 0, 1, 1], [], []>} : vector<1x128xbf16>, vector<128x128xbf16>, vector<1x128xf32> -> vector<1x128xf32>
    %cst_181 = arith.constant dense<0.000000e+00> : vector<1x128xf32>
    %588 = tpu.matmul %586, %156, %cst_181 {dimension_numbers = #tpu.dot_dimension_numbers<[1], [0], [0], [1], [0, 0, 1, 1], [], []>} : vector<1x16xbf16>, vector<16x128xbf16>, vector<1x128xf32> -> vector<1x128xf32>
    %589 = arith.addf %587, %588 : vector<1x128xf32>
    %590 = vector.extract_strided_slice %144 {offsets = [0, 0], sizes = [1, 128], strides = [1, 1]} : vector<8x128xf32> to vector<1x128xf32>
    %591 = vector.extract_strided_slice %144 {offsets = [1, 0], sizes = [1, 128], strides = [1, 1]} : vector<8x128xf32> to vector<1x128xf32>
    %cst_182 = arith.constant dense<0.000000e+00> : vector<1xf32>
    %592 = vector.multi_reduction <add>, %589, %cst_182 [1] : vector<1x128xf32> to vector<1xf32>
    %593 = vector.shape_cast %592 : vector<1xf32> to vector<1x1xf32>
    %cst_183 = arith.constant 1.280000e+02 : f32
    %594 = vector.broadcast %cst_183 : f32 to vector<1x1xf32>
    %595 = arith.divf %593, %594 : vector<1x1xf32>
    %596 = vector.broadcast %595 : vector<1x1xf32> to vector<1x128xf32>
    %597 = arith.subf %589, %596 : vector<1x128xf32>
    %598 = arith.mulf %597, %597 : vector<1x128xf32>
    %cst_184 = arith.constant dense<0.000000e+00> : vector<1xf32>
    %599 = vector.multi_reduction <add>, %598, %cst_184 [1] : vector<1x128xf32> to vector<1xf32>
    %600 = vector.shape_cast %599 : vector<1xf32> to vector<1x1xf32>
    %cst_185 = arith.constant 1.280000e+02 : f32
    %601 = vector.broadcast %cst_185 : f32 to vector<1x1xf32>
    %602 = arith.divf %600, %601 : vector<1x1xf32>
    %603 = vector.broadcast %595 : vector<1x1xf32> to vector<1x128xf32>
    %604 = arith.subf %589, %603 : vector<1x128xf32>
    %cst_186 = arith.constant 9.99999974E-6 : f32
    %605 = vector.broadcast %cst_186 : f32 to vector<1x1xf32>
    %606 = arith.addf %602, %605 : vector<1x1xf32>
    %607 = math.rsqrt %606 : vector<1x1xf32>
    %608 = vector.broadcast %607 : vector<1x1xf32> to vector<1x128xf32>
    %609 = arith.mulf %604, %608 : vector<1x128xf32>
    %610 = arith.mulf %609, %590 : vector<1x128xf32>
    %611 = arith.addf %610, %591 : vector<1x128xf32>
    %612 = arith.truncf %611 : vector<1x128xf32> to vector<1x128xbf16>
    %cst_187 = arith.constant dense<0.000000e+00> : vector<1x384xf32>
    %613 = tpu.matmul %612, %145, %cst_187 {dimension_numbers = #tpu.dot_dimension_numbers<[1], [0], [0], [1], [0, 0, 1, 1], [], []>} : vector<1x128xbf16>, vector<128x384xbf16>, vector<1x384xf32> -> vector<1x384xf32>
    %614 = vector.extract_strided_slice %613 {offsets = [0, 0], sizes = [1, 128], strides = [1, 1]} : vector<1x384xf32> to vector<1x128xf32>
    %615 = vector.extract_strided_slice %613 {offsets = [0, 128], sizes = [1, 128], strides = [1, 1]} : vector<1x384xf32> to vector<1x128xf32>
    %616 = vector.extract_strided_slice %613 {offsets = [0, 256], sizes = [1, 128], strides = [1, 1]} : vector<1x384xf32> to vector<1x128xf32>
    %c8_i32_188 = arith.constant 8 : i32
    %617 = arith.addi %c8_i32_188, %c1_i32_179 : i32
    %618 = vector.broadcast %617 : i32 to vector<16x1xi32>
    %619 = arith.cmpi eq, %344, %618 : vector<16x1xi32>
    %620 = arith.truncf %615 : vector<1x128xf32> to vector<1x128xbf16>
    %621 = vector.shape_cast %619 : vector<16x1xi1> to vector<16x1xi1>
    %622 = vector.broadcast %621 : vector<16x1xi1> to vector<16x128xi1>
    %623 = vector.shape_cast %620 : vector<1x128xbf16> to vector<1x128xbf16>
    %624 = vector.broadcast %623 : vector<1x128xbf16> to vector<16x128xbf16>
    %625 = arith.select %622, %624, %409 : vector<16x128xi1>, vector<16x128xbf16>
    %626 = vector.broadcast %617 : i32 to vector<16x1xi32>
    %627 = arith.cmpi eq, %344, %626 : vector<16x1xi32>
    %628 = arith.truncf %616 : vector<1x128xf32> to vector<1x128xbf16>
    %629 = vector.shape_cast %627 : vector<16x1xi1> to vector<16x1xi1>
    %630 = vector.broadcast %629 : vector<16x1xi1> to vector<16x128xi1>
    %631 = vector.shape_cast %628 : vector<1x128xbf16> to vector<1x128xbf16>
    %632 = vector.broadcast %631 : vector<1x128xbf16> to vector<16x128xbf16>
    %633 = arith.select %630, %632, %417 : vector<16x128xi1>, vector<16x128xbf16>
    %634 = vector.broadcast %2 : i32 to vector<1x16xi32>
    %635 = arith.cmpi sge, %345, %634 : vector<1x16xi32>
    %c8_i32_189 = arith.constant 8 : i32
    %636 = vector.broadcast %c8_i32_189 : i32 to vector<1x16xi32>
    %637 = arith.cmpi slt, %345, %636 : vector<1x16xi32>
    %638 = arith.andi %635, %637 : vector<1x16xi1>
    %c8_i32_190 = arith.constant 8 : i32
    %639 = vector.broadcast %c8_i32_190 : i32 to vector<1x16xi32>
    %640 = arith.cmpi sge, %345, %639 : vector<1x16xi32>
    %641 = vector.broadcast %617 : i32 to vector<1x16xi32>
    %642 = arith.cmpi sle, %345, %641 : vector<1x16xi32>
    %643 = arith.andi %640, %642 : vector<1x16xi1>
    %644 = arith.ori %638, %643 : vector<1x16xi1>
    %cst_191 = arith.constant 0.000000e+00 : f32
    %cst_192 = arith.constant -1.000000e+30 : f32
    %645 = vector.broadcast %cst_191 : f32 to vector<1x16xf32>
    %646 = vector.broadcast %cst_192 : f32 to vector<1x16xf32>
    %647 = arith.select %644, %645, %646 : vector<1x16xi1>, vector<1x16xf32>
    %648 = arith.truncf %614 : vector<1x128xf32> to vector<1x128xbf16>
    %cst_193 = arith.constant dense<0.000000e+00> : vector<1x16xf32>
    %649 = tpu.matmul %648, %625, %cst_193 {dimension_numbers = #tpu.dot_dimension_numbers<[1], [1], [0], [0], [0, 0, 1, 0], [], []>} : vector<1x128xbf16>, vector<16x128xbf16>, vector<1x16xf32> -> vector<1x16xf32>
    %cst_194 = arith.constant 0.0883883461 : f32
    %650 = vector.broadcast %cst_194 : f32 to vector<1x16xf32>
    %651 = arith.mulf %649, %650 : vector<1x16xf32>
    %652 = arith.addf %651, %647 : vector<1x16xf32>
    %cst_195 = arith.constant dense<0xFF800000> : vector<1xf32>
    %653 = vector.multi_reduction <maximumf>, %652, %cst_195 [1] : vector<1x16xf32> to vector<1xf32>
    %654 = vector.shape_cast %653 : vector<1xf32> to vector<1x1xf32>
    %655 = vector.broadcast %654 : vector<1x1xf32> to vector<1x16xf32>
    %656 = arith.subf %652, %655 : vector<1x16xf32>
    %657 = math.exp %656 : vector<1x16xf32>
    %cst_196 = arith.constant dense<0.000000e+00> : vector<1xf32>
    %658 = vector.multi_reduction <add>, %657, %cst_196 [1] : vector<1x16xf32> to vector<1xf32>
    %659 = vector.shape_cast %658 : vector<1xf32> to vector<1x1xf32>
    %660 = tpu.reciprocal %659 {approx = true} : vector<1x1xf32> -> vector<1x1xf32>
    %661 = vector.broadcast %660 : vector<1x1xf32> to vector<1x16xf32>
    %662 = arith.mulf %657, %661 : vector<1x16xf32>
    %663 = arith.truncf %662 : vector<1x16xf32> to vector<1x16xbf16>
    %cst_197 = arith.constant dense<0.000000e+00> : vector<1x128xf32>
    %664 = tpu.matmul %663, %633, %cst_197 {dimension_numbers = #tpu.dot_dimension_numbers<[1], [0], [0], [1], [0, 0, 1, 1], [], []>} : vector<1x16xbf16>, vector<16x128xbf16>, vector<1x128xf32> -> vector<1x128xf32>
    %665 = arith.truncf %664 : vector<1x128xf32> to vector<1x128xbf16>
    %cst_198 = arith.constant dense<0.000000e+00> : vector<1x128xf32>
    %666 = tpu.matmul %665, %146, %cst_198 {dimension_numbers = #tpu.dot_dimension_numbers<[1], [0], [0], [1], [0, 0, 1, 1], [], []>} : vector<1x128xbf16>, vector<128x128xbf16>, vector<1x128xf32> -> vector<1x128xf32>
    %667 = arith.addf %589, %666 : vector<1x128xf32>
    %668 = vector.extract_strided_slice %144 {offsets = [2, 0], sizes = [1, 128], strides = [1, 1]} : vector<8x128xf32> to vector<1x128xf32>
    %669 = vector.extract_strided_slice %144 {offsets = [3, 0], sizes = [1, 128], strides = [1, 1]} : vector<8x128xf32> to vector<1x128xf32>
    %cst_199 = arith.constant dense<0.000000e+00> : vector<1xf32>
    %670 = vector.multi_reduction <add>, %667, %cst_199 [1] : vector<1x128xf32> to vector<1xf32>
    %671 = vector.shape_cast %670 : vector<1xf32> to vector<1x1xf32>
    %cst_200 = arith.constant 1.280000e+02 : f32
    %672 = vector.broadcast %cst_200 : f32 to vector<1x1xf32>
    %673 = arith.divf %671, %672 : vector<1x1xf32>
    %674 = vector.broadcast %673 : vector<1x1xf32> to vector<1x128xf32>
    %675 = arith.subf %667, %674 : vector<1x128xf32>
    %676 = arith.mulf %675, %675 : vector<1x128xf32>
    %cst_201 = arith.constant dense<0.000000e+00> : vector<1xf32>
    %677 = vector.multi_reduction <add>, %676, %cst_201 [1] : vector<1x128xf32> to vector<1xf32>
    %678 = vector.shape_cast %677 : vector<1xf32> to vector<1x1xf32>
    %cst_202 = arith.constant 1.280000e+02 : f32
    %679 = vector.broadcast %cst_202 : f32 to vector<1x1xf32>
    %680 = arith.divf %678, %679 : vector<1x1xf32>
    %681 = vector.broadcast %673 : vector<1x1xf32> to vector<1x128xf32>
    %682 = arith.subf %667, %681 : vector<1x128xf32>
    %cst_203 = arith.constant 9.99999974E-6 : f32
    %683 = vector.broadcast %cst_203 : f32 to vector<1x1xf32>
    %684 = arith.addf %680, %683 : vector<1x1xf32>
    %685 = math.rsqrt %684 : vector<1x1xf32>
    %686 = vector.broadcast %685 : vector<1x1xf32> to vector<1x128xf32>
    %687 = arith.mulf %682, %686 : vector<1x128xf32>
    %688 = arith.mulf %687, %668 : vector<1x128xf32>
    %689 = arith.addf %688, %669 : vector<1x128xf32>
    %690 = arith.truncf %689 : vector<1x128xf32> to vector<1x128xbf16>
    %cst_204 = arith.constant dense<0.000000e+00> : vector<1x128xf32>
    %691 = tpu.matmul %690, %147, %cst_204 {dimension_numbers = #tpu.dot_dimension_numbers<[1], [0], [0], [1], [0, 0, 1, 1], [], []>} : vector<1x128xbf16>, vector<128x128xbf16>, vector<1x128xf32> -> vector<1x128xf32>
    %692 = arith.truncf %691 : vector<1x128xf32> to vector<1x128xbf16>
    %cst_205 = arith.constant dense<0.000000e+00> : vector<1x16xf32>
    %693 = tpu.matmul %692, %141, %cst_205 {dimension_numbers = #tpu.dot_dimension_numbers<[1], [1], [0], [0], [0, 0, 1, 0], [], []>} : vector<1x128xbf16>, vector<16x128xbf16>, vector<1x16xf32> -> vector<1x16xf32>
    %cst_206 = arith.constant 0.0883883461 : f32
    %694 = vector.broadcast %cst_206 : f32 to vector<1x16xf32>
    %695 = arith.mulf %693, %694 : vector<1x16xf32>
    %cst_207 = arith.constant dense<0xFF800000> : vector<1xf32>
    %696 = vector.multi_reduction <maximumf>, %695, %cst_207 [1] : vector<1x16xf32> to vector<1xf32>
    %697 = vector.shape_cast %696 : vector<1xf32> to vector<1x1xf32>
    %698 = vector.broadcast %697 : vector<1x1xf32> to vector<1x16xf32>
    %699 = arith.subf %695, %698 : vector<1x16xf32>
    %700 = math.exp %699 : vector<1x16xf32>
    %cst_208 = arith.constant dense<0.000000e+00> : vector<1xf32>
    %701 = vector.multi_reduction <add>, %700, %cst_208 [1] : vector<1x16xf32> to vector<1xf32>
    %702 = vector.shape_cast %701 : vector<1xf32> to vector<1x1xf32>
    %703 = tpu.reciprocal %702 {approx = true} : vector<1x1xf32> -> vector<1x1xf32>
    %704 = vector.broadcast %703 : vector<1x1xf32> to vector<1x16xf32>
    %705 = arith.mulf %700, %704 : vector<1x16xf32>
    %706 = arith.truncf %705 : vector<1x16xf32> to vector<1x16xbf16>
    %cst_209 = arith.constant dense<0.000000e+00> : vector<1x128xf32>
    %707 = tpu.matmul %706, %143, %cst_209 {dimension_numbers = #tpu.dot_dimension_numbers<[1], [0], [0], [1], [0, 0, 1, 1], [], []>} : vector<1x16xbf16>, vector<16x128xbf16>, vector<1x128xf32> -> vector<1x128xf32>
    %708 = arith.truncf %707 : vector<1x128xf32> to vector<1x128xbf16>
    %cst_210 = arith.constant dense<0.000000e+00> : vector<1x128xf32>
    %709 = tpu.matmul %708, %148, %cst_210 {dimension_numbers = #tpu.dot_dimension_numbers<[1], [0], [0], [1], [0, 0, 1, 1], [], []>} : vector<1x128xbf16>, vector<128x128xbf16>, vector<1x128xf32> -> vector<1x128xf32>
    %710 = arith.addf %667, %709 : vector<1x128xf32>
    %711 = vector.extract_strided_slice %144 {offsets = [4, 0], sizes = [1, 128], strides = [1, 1]} : vector<8x128xf32> to vector<1x128xf32>
    %712 = vector.extract_strided_slice %144 {offsets = [5, 0], sizes = [1, 128], strides = [1, 1]} : vector<8x128xf32> to vector<1x128xf32>
    %cst_211 = arith.constant dense<0.000000e+00> : vector<1xf32>
    %713 = vector.multi_reduction <add>, %710, %cst_211 [1] : vector<1x128xf32> to vector<1xf32>
    %714 = vector.shape_cast %713 : vector<1xf32> to vector<1x1xf32>
    %cst_212 = arith.constant 1.280000e+02 : f32
    %715 = vector.broadcast %cst_212 : f32 to vector<1x1xf32>
    %716 = arith.divf %714, %715 : vector<1x1xf32>
    %717 = vector.broadcast %716 : vector<1x1xf32> to vector<1x128xf32>
    %718 = arith.subf %710, %717 : vector<1x128xf32>
    %719 = arith.mulf %718, %718 : vector<1x128xf32>
    %cst_213 = arith.constant dense<0.000000e+00> : vector<1xf32>
    %720 = vector.multi_reduction <add>, %719, %cst_213 [1] : vector<1x128xf32> to vector<1xf32>
    %721 = vector.shape_cast %720 : vector<1xf32> to vector<1x1xf32>
    %cst_214 = arith.constant 1.280000e+02 : f32
    %722 = vector.broadcast %cst_214 : f32 to vector<1x1xf32>
    %723 = arith.divf %721, %722 : vector<1x1xf32>
    %724 = vector.broadcast %716 : vector<1x1xf32> to vector<1x128xf32>
    %725 = arith.subf %710, %724 : vector<1x128xf32>
    %cst_215 = arith.constant 9.99999974E-6 : f32
    %726 = vector.broadcast %cst_215 : f32 to vector<1x1xf32>
    %727 = arith.addf %723, %726 : vector<1x1xf32>
    %728 = math.rsqrt %727 : vector<1x1xf32>
    %729 = vector.broadcast %728 : vector<1x1xf32> to vector<1x128xf32>
    %730 = arith.mulf %725, %729 : vector<1x128xf32>
    %731 = arith.mulf %730, %711 : vector<1x128xf32>
    %732 = arith.addf %731, %712 : vector<1x128xf32>
    %733 = arith.truncf %732 : vector<1x128xf32> to vector<1x128xbf16>
    %cst_216 = arith.constant dense<0.000000e+00> : vector<1x512xf32>
    %734 = tpu.matmul %733, %149, %cst_216 {dimension_numbers = #tpu.dot_dimension_numbers<[1], [0], [0], [1], [0, 0, 1, 1], [], []>} : vector<1x128xbf16>, vector<128x512xbf16>, vector<1x512xf32> -> vector<1x512xf32>
    %735 = arith.addf %734, %150 : vector<1x512xf32>
    %736 = arith.mulf %735, %735 : vector<1x512xf32>
    %737 = arith.mulf %735, %736 : vector<1x512xf32>
    %cst_217 = arith.constant 4.471500e-02 : f32
    %738 = vector.broadcast %cst_217 : f32 to vector<1x512xf32>
    %739 = arith.mulf %738, %737 : vector<1x512xf32>
    %740 = arith.addf %735, %739 : vector<1x512xf32>
    %cst_218 = arith.constant 0.797884583 : f32
    %741 = vector.broadcast %cst_218 : f32 to vector<1x512xf32>
    %742 = arith.mulf %741, %740 : vector<1x512xf32>
    %743 = math.tanh %742 : vector<1x512xf32>
    %cst_219 = arith.constant 1.000000e+00 : f32
    %744 = vector.broadcast %cst_219 : f32 to vector<1x512xf32>
    %745 = arith.addf %744, %743 : vector<1x512xf32>
    %cst_220 = arith.constant 5.000000e-01 : f32
    %746 = vector.broadcast %cst_220 : f32 to vector<1x512xf32>
    %747 = arith.mulf %746, %745 : vector<1x512xf32>
    %748 = arith.mulf %735, %747 : vector<1x512xf32>
    %749 = arith.truncf %748 : vector<1x512xf32> to vector<1x512xbf16>
    %cst_221 = arith.constant dense<0.000000e+00> : vector<1x128xf32>
    %750 = tpu.matmul %749, %151, %cst_221 {dimension_numbers = #tpu.dot_dimension_numbers<[1], [0], [0], [1], [0, 0, 1, 1], [], []>} : vector<1x512xbf16>, vector<512x128xbf16>, vector<1x128xf32> -> vector<1x128xf32>
    %751 = arith.addf %710, %750 : vector<1x128xf32>
    %752 = arith.addf %751, %152 : vector<1x128xf32>
    %753 = vector.extract_strided_slice %144 {offsets = [6, 0], sizes = [1, 128], strides = [1, 1]} : vector<8x128xf32> to vector<1x128xf32>
    %754 = vector.extract_strided_slice %144 {offsets = [7, 0], sizes = [1, 128], strides = [1, 1]} : vector<8x128xf32> to vector<1x128xf32>
    %cst_222 = arith.constant dense<0.000000e+00> : vector<1xf32>
    %755 = vector.multi_reduction <add>, %752, %cst_222 [1] : vector<1x128xf32> to vector<1xf32>
    %756 = vector.shape_cast %755 : vector<1xf32> to vector<1x1xf32>
    %cst_223 = arith.constant 1.280000e+02 : f32
    %757 = vector.broadcast %cst_223 : f32 to vector<1x1xf32>
    %758 = arith.divf %756, %757 : vector<1x1xf32>
    %759 = vector.broadcast %758 : vector<1x1xf32> to vector<1x128xf32>
    %760 = arith.subf %752, %759 : vector<1x128xf32>
    %761 = arith.mulf %760, %760 : vector<1x128xf32>
    %cst_224 = arith.constant dense<0.000000e+00> : vector<1xf32>
    %762 = vector.multi_reduction <add>, %761, %cst_224 [1] : vector<1x128xf32> to vector<1xf32>
    %763 = vector.shape_cast %762 : vector<1xf32> to vector<1x1xf32>
    %cst_225 = arith.constant 1.280000e+02 : f32
    %764 = vector.broadcast %cst_225 : f32 to vector<1x1xf32>
    %765 = arith.divf %763, %764 : vector<1x1xf32>
    %766 = vector.broadcast %758 : vector<1x1xf32> to vector<1x128xf32>
    %767 = arith.subf %752, %766 : vector<1x128xf32>
    %cst_226 = arith.constant 9.99999974E-6 : f32
    %768 = vector.broadcast %cst_226 : f32 to vector<1x1xf32>
    %769 = arith.addf %765, %768 : vector<1x1xf32>
    %770 = math.rsqrt %769 : vector<1x1xf32>
    %771 = vector.broadcast %770 : vector<1x1xf32> to vector<1x128xf32>
    %772 = arith.mulf %767, %771 : vector<1x128xf32>
    %773 = arith.mulf %772, %753 : vector<1x128xf32>
    %774 = arith.addf %773, %754 : vector<1x128xf32>
    %775 = arith.truncf %774 : vector<1x128xf32> to vector<1x128xbf16>
    %cst_227 = arith.constant dense<0.000000e+00> : vector<1x128xf32>
    %776 = tpu.matmul %775, %153, %cst_227 {dimension_numbers = #tpu.dot_dimension_numbers<[1], [0], [0], [1], [0, 0, 1, 1], [], []>} : vector<1x128xbf16>, vector<128x128xbf16>, vector<1x128xf32> -> vector<1x128xf32>
    %777 = arith.addf %776, %154 : vector<1x128xf32>
    %cst_228 = arith.constant dense<0xFF800000> : vector<1xf32>
    %778 = vector.multi_reduction <maximumf>, %777, %cst_228 [1] : vector<1x128xf32> to vector<1xf32>
    %779 = vector.shape_cast %778 : vector<1xf32> to vector<1x1xf32>
    %780 = vector.broadcast %779 : vector<1x1xf32> to vector<1x128xf32>
    %781 = arith.cmpf oeq, %777, %780 : vector<1x128xf32>
    %c128_i32_229 = arith.constant 128 : i32
    %782 = vector.broadcast %c128_i32_229 : i32 to vector<1x128xi32>
    %783 = arith.select %781, %342, %782 : vector<1x128xi1>, vector<1x128xi32>
    %cst_230 = arith.constant dense<2147483647> : vector<1xi32>
    %784 = vector.multi_reduction <minsi>, %783, %cst_230 [1] : vector<1x128xi32> to vector<1xi32>
    %785 = vector.shape_cast %784 : vector<1xi32> to vector<1x1xi32>
    %c1_i32_231 = arith.constant 1 : i32
    %786 = arith.addi %c1_i32_179, %c1_i32_231 : i32
    %787 = vector.broadcast %786 : i32 to vector<1x128xi32>
    %788 = arith.cmpi eq, %341, %787 : vector<1x128xi32>
    %789 = vector.shape_cast %785 : vector<1x1xi32> to vector<1x1xi32>
    %790 = vector.broadcast %789 : vector<1x1xi32> to vector<1x128xi32>
    %791 = arith.select %788, %790, %575 : vector<1x128xi1>, vector<1x128xi32>
    %c2_i32 = arith.constant 2 : i32
    %792 = vector.broadcast %785 : vector<1x1xi32> to vector<1x128xi32>
    %793 = arith.cmpi eq, %342, %792 : vector<1x128xi32>
    %794 = arith.extui %793 : vector<1x128xi1> to vector<1x128xi32>
    %795 = arith.sitofp %794 : vector<1x128xi32> to vector<1x128xf32>
    %796 = arith.truncf %795 : vector<1x128xf32> to vector<1x128xbf16>
    %797 = arith.addi %1, %c2_i32 : i32
    %798 = vector.broadcast %797 : i32 to vector<1x16xi32>
    %799 = arith.cmpi eq, %343, %798 : vector<1x16xi32>
    %800 = arith.extui %799 : vector<1x16xi1> to vector<1x16xi32>
    %801 = arith.sitofp %800 : vector<1x16xi32> to vector<1x16xf32>
    %802 = arith.truncf %801 : vector<1x16xf32> to vector<1x16xbf16>
    %cst_232 = arith.constant dense<0.000000e+00> : vector<1x128xf32>
    %803 = tpu.matmul %796, %155, %cst_232 {dimension_numbers = #tpu.dot_dimension_numbers<[1], [0], [0], [1], [0, 0, 1, 1], [], []>} : vector<1x128xbf16>, vector<128x128xbf16>, vector<1x128xf32> -> vector<1x128xf32>
    %cst_233 = arith.constant dense<0.000000e+00> : vector<1x128xf32>
    %804 = tpu.matmul %802, %156, %cst_233 {dimension_numbers = #tpu.dot_dimension_numbers<[1], [0], [0], [1], [0, 0, 1, 1], [], []>} : vector<1x16xbf16>, vector<16x128xbf16>, vector<1x128xf32> -> vector<1x128xf32>
    %805 = arith.addf %803, %804 : vector<1x128xf32>
    %806 = vector.extract_strided_slice %144 {offsets = [0, 0], sizes = [1, 128], strides = [1, 1]} : vector<8x128xf32> to vector<1x128xf32>
    %807 = vector.extract_strided_slice %144 {offsets = [1, 0], sizes = [1, 128], strides = [1, 1]} : vector<8x128xf32> to vector<1x128xf32>
    %cst_234 = arith.constant dense<0.000000e+00> : vector<1xf32>
    %808 = vector.multi_reduction <add>, %805, %cst_234 [1] : vector<1x128xf32> to vector<1xf32>
    %809 = vector.shape_cast %808 : vector<1xf32> to vector<1x1xf32>
    %cst_235 = arith.constant 1.280000e+02 : f32
    %810 = vector.broadcast %cst_235 : f32 to vector<1x1xf32>
    %811 = arith.divf %809, %810 : vector<1x1xf32>
    %812 = vector.broadcast %811 : vector<1x1xf32> to vector<1x128xf32>
    %813 = arith.subf %805, %812 : vector<1x128xf32>
    %814 = arith.mulf %813, %813 : vector<1x128xf32>
    %cst_236 = arith.constant dense<0.000000e+00> : vector<1xf32>
    %815 = vector.multi_reduction <add>, %814, %cst_236 [1] : vector<1x128xf32> to vector<1xf32>
    %816 = vector.shape_cast %815 : vector<1xf32> to vector<1x1xf32>
    %cst_237 = arith.constant 1.280000e+02 : f32
    %817 = vector.broadcast %cst_237 : f32 to vector<1x1xf32>
    %818 = arith.divf %816, %817 : vector<1x1xf32>
    %819 = vector.broadcast %811 : vector<1x1xf32> to vector<1x128xf32>
    %820 = arith.subf %805, %819 : vector<1x128xf32>
    %cst_238 = arith.constant 9.99999974E-6 : f32
    %821 = vector.broadcast %cst_238 : f32 to vector<1x1xf32>
    %822 = arith.addf %818, %821 : vector<1x1xf32>
    %823 = math.rsqrt %822 : vector<1x1xf32>
    %824 = vector.broadcast %823 : vector<1x1xf32> to vector<1x128xf32>
    %825 = arith.mulf %820, %824 : vector<1x128xf32>
    %826 = arith.mulf %825, %806 : vector<1x128xf32>
    %827 = arith.addf %826, %807 : vector<1x128xf32>
    %828 = arith.truncf %827 : vector<1x128xf32> to vector<1x128xbf16>
    %cst_239 = arith.constant dense<0.000000e+00> : vector<1x384xf32>
    %829 = tpu.matmul %828, %145, %cst_239 {dimension_numbers = #tpu.dot_dimension_numbers<[1], [0], [0], [1], [0, 0, 1, 1], [], []>} : vector<1x128xbf16>, vector<128x384xbf16>, vector<1x384xf32> -> vector<1x384xf32>
    %830 = vector.extract_strided_slice %829 {offsets = [0, 0], sizes = [1, 128], strides = [1, 1]} : vector<1x384xf32> to vector<1x128xf32>
    %831 = vector.extract_strided_slice %829 {offsets = [0, 128], sizes = [1, 128], strides = [1, 1]} : vector<1x384xf32> to vector<1x128xf32>
    %832 = vector.extract_strided_slice %829 {offsets = [0, 256], sizes = [1, 128], strides = [1, 1]} : vector<1x384xf32> to vector<1x128xf32>
    %c8_i32_240 = arith.constant 8 : i32
    %833 = arith.addi %c8_i32_240, %c2_i32 : i32
    %834 = vector.broadcast %833 : i32 to vector<16x1xi32>
    %835 = arith.cmpi eq, %344, %834 : vector<16x1xi32>
    %836 = arith.truncf %831 : vector<1x128xf32> to vector<1x128xbf16>
    %837 = vector.shape_cast %835 : vector<16x1xi1> to vector<16x1xi1>
    %838 = vector.broadcast %837 : vector<16x1xi1> to vector<16x128xi1>
    %839 = vector.shape_cast %836 : vector<1x128xbf16> to vector<1x128xbf16>
    %840 = vector.broadcast %839 : vector<1x128xbf16> to vector<16x128xbf16>
    %841 = arith.select %838, %840, %625 : vector<16x128xi1>, vector<16x128xbf16>
    %842 = vector.broadcast %833 : i32 to vector<16x1xi32>
    %843 = arith.cmpi eq, %344, %842 : vector<16x1xi32>
    %844 = arith.truncf %832 : vector<1x128xf32> to vector<1x128xbf16>
    %845 = vector.shape_cast %843 : vector<16x1xi1> to vector<16x1xi1>
    %846 = vector.broadcast %845 : vector<16x1xi1> to vector<16x128xi1>
    %847 = vector.shape_cast %844 : vector<1x128xbf16> to vector<1x128xbf16>
    %848 = vector.broadcast %847 : vector<1x128xbf16> to vector<16x128xbf16>
    %849 = arith.select %846, %848, %633 : vector<16x128xi1>, vector<16x128xbf16>
    %850 = vector.broadcast %2 : i32 to vector<1x16xi32>
    %851 = arith.cmpi sge, %345, %850 : vector<1x16xi32>
    %c8_i32_241 = arith.constant 8 : i32
    %852 = vector.broadcast %c8_i32_241 : i32 to vector<1x16xi32>
    %853 = arith.cmpi slt, %345, %852 : vector<1x16xi32>
    %854 = arith.andi %851, %853 : vector<1x16xi1>
    %c8_i32_242 = arith.constant 8 : i32
    %855 = vector.broadcast %c8_i32_242 : i32 to vector<1x16xi32>
    %856 = arith.cmpi sge, %345, %855 : vector<1x16xi32>
    %857 = vector.broadcast %833 : i32 to vector<1x16xi32>
    %858 = arith.cmpi sle, %345, %857 : vector<1x16xi32>
    %859 = arith.andi %856, %858 : vector<1x16xi1>
    %860 = arith.ori %854, %859 : vector<1x16xi1>
    %cst_243 = arith.constant 0.000000e+00 : f32
    %cst_244 = arith.constant -1.000000e+30 : f32
    %861 = vector.broadcast %cst_243 : f32 to vector<1x16xf32>
    %862 = vector.broadcast %cst_244 : f32 to vector<1x16xf32>
    %863 = arith.select %860, %861, %862 : vector<1x16xi1>, vector<1x16xf32>
    %864 = arith.truncf %830 : vector<1x128xf32> to vector<1x128xbf16>
    %cst_245 = arith.constant dense<0.000000e+00> : vector<1x16xf32>
    %865 = tpu.matmul %864, %841, %cst_245 {dimension_numbers = #tpu.dot_dimension_numbers<[1], [1], [0], [0], [0, 0, 1, 0], [], []>} : vector<1x128xbf16>, vector<16x128xbf16>, vector<1x16xf32> -> vector<1x16xf32>
    %cst_246 = arith.constant 0.0883883461 : f32
    %866 = vector.broadcast %cst_246 : f32 to vector<1x16xf32>
    %867 = arith.mulf %865, %866 : vector<1x16xf32>
    %868 = arith.addf %867, %863 : vector<1x16xf32>
    %cst_247 = arith.constant dense<0xFF800000> : vector<1xf32>
    %869 = vector.multi_reduction <maximumf>, %868, %cst_247 [1] : vector<1x16xf32> to vector<1xf32>
    %870 = vector.shape_cast %869 : vector<1xf32> to vector<1x1xf32>
    %871 = vector.broadcast %870 : vector<1x1xf32> to vector<1x16xf32>
    %872 = arith.subf %868, %871 : vector<1x16xf32>
    %873 = math.exp %872 : vector<1x16xf32>
    %cst_248 = arith.constant dense<0.000000e+00> : vector<1xf32>
    %874 = vector.multi_reduction <add>, %873, %cst_248 [1] : vector<1x16xf32> to vector<1xf32>
    %875 = vector.shape_cast %874 : vector<1xf32> to vector<1x1xf32>
    %876 = tpu.reciprocal %875 {approx = true} : vector<1x1xf32> -> vector<1x1xf32>
    %877 = vector.broadcast %876 : vector<1x1xf32> to vector<1x16xf32>
    %878 = arith.mulf %873, %877 : vector<1x16xf32>
    %879 = arith.truncf %878 : vector<1x16xf32> to vector<1x16xbf16>
    %cst_249 = arith.constant dense<0.000000e+00> : vector<1x128xf32>
    %880 = tpu.matmul %879, %849, %cst_249 {dimension_numbers = #tpu.dot_dimension_numbers<[1], [0], [0], [1], [0, 0, 1, 1], [], []>} : vector<1x16xbf16>, vector<16x128xbf16>, vector<1x128xf32> -> vector<1x128xf32>
    %881 = arith.truncf %880 : vector<1x128xf32> to vector<1x128xbf16>
    %cst_250 = arith.constant dense<0.000000e+00> : vector<1x128xf32>
    %882 = tpu.matmul %881, %146, %cst_250 {dimension_numbers = #tpu.dot_dimension_numbers<[1], [0], [0], [1], [0, 0, 1, 1], [], []>} : vector<1x128xbf16>, vector<128x128xbf16>, vector<1x128xf32> -> vector<1x128xf32>
    %883 = arith.addf %805, %882 : vector<1x128xf32>
    %884 = vector.extract_strided_slice %144 {offsets = [2, 0], sizes = [1, 128], strides = [1, 1]} : vector<8x128xf32> to vector<1x128xf32>
    %885 = vector.extract_strided_slice %144 {offsets = [3, 0], sizes = [1, 128], strides = [1, 1]} : vector<8x128xf32> to vector<1x128xf32>
    %cst_251 = arith.constant dense<0.000000e+00> : vector<1xf32>
    %886 = vector.multi_reduction <add>, %883, %cst_251 [1] : vector<1x128xf32> to vector<1xf32>
    %887 = vector.shape_cast %886 : vector<1xf32> to vector<1x1xf32>
    %cst_252 = arith.constant 1.280000e+02 : f32
    %888 = vector.broadcast %cst_252 : f32 to vector<1x1xf32>
    %889 = arith.divf %887, %888 : vector<1x1xf32>
    %890 = vector.broadcast %889 : vector<1x1xf32> to vector<1x128xf32>
    %891 = arith.subf %883, %890 : vector<1x128xf32>
    %892 = arith.mulf %891, %891 : vector<1x128xf32>
    %cst_253 = arith.constant dense<0.000000e+00> : vector<1xf32>
    %893 = vector.multi_reduction <add>, %892, %cst_253 [1] : vector<1x128xf32> to vector<1xf32>
    %894 = vector.shape_cast %893 : vector<1xf32> to vector<1x1xf32>
    %cst_254 = arith.constant 1.280000e+02 : f32
    %895 = vector.broadcast %cst_254 : f32 to vector<1x1xf32>
    %896 = arith.divf %894, %895 : vector<1x1xf32>
    %897 = vector.broadcast %889 : vector<1x1xf32> to vector<1x128xf32>
    %898 = arith.subf %883, %897 : vector<1x128xf32>
    %cst_255 = arith.constant 9.99999974E-6 : f32
    %899 = vector.broadcast %cst_255 : f32 to vector<1x1xf32>
    %900 = arith.addf %896, %899 : vector<1x1xf32>
    %901 = math.rsqrt %900 : vector<1x1xf32>
    %902 = vector.broadcast %901 : vector<1x1xf32> to vector<1x128xf32>
    %903 = arith.mulf %898, %902 : vector<1x128xf32>
    %904 = arith.mulf %903, %884 : vector<1x128xf32>
    %905 = arith.addf %904, %885 : vector<1x128xf32>
    %906 = arith.truncf %905 : vector<1x128xf32> to vector<1x128xbf16>
    %cst_256 = arith.constant dense<0.000000e+00> : vector<1x128xf32>
    %907 = tpu.matmul %906, %147, %cst_256 {dimension_numbers = #tpu.dot_dimension_numbers<[1], [0], [0], [1], [0, 0, 1, 1], [], []>} : vector<1x128xbf16>, vector<128x128xbf16>, vector<1x128xf32> -> vector<1x128xf32>
    %908 = arith.truncf %907 : vector<1x128xf32> to vector<1x128xbf16>
    %cst_257 = arith.constant dense<0.000000e+00> : vector<1x16xf32>
    %909 = tpu.matmul %908, %141, %cst_257 {dimension_numbers = #tpu.dot_dimension_numbers<[1], [1], [0], [0], [0, 0, 1, 0], [], []>} : vector<1x128xbf16>, vector<16x128xbf16>, vector<1x16xf32> -> vector<1x16xf32>
    %cst_258 = arith.constant 0.0883883461 : f32
    %910 = vector.broadcast %cst_258 : f32 to vector<1x16xf32>
    %911 = arith.mulf %909, %910 : vector<1x16xf32>
    %cst_259 = arith.constant dense<0xFF800000> : vector<1xf32>
    %912 = vector.multi_reduction <maximumf>, %911, %cst_259 [1] : vector<1x16xf32> to vector<1xf32>
    %913 = vector.shape_cast %912 : vector<1xf32> to vector<1x1xf32>
    %914 = vector.broadcast %913 : vector<1x1xf32> to vector<1x16xf32>
    %915 = arith.subf %911, %914 : vector<1x16xf32>
    %916 = math.exp %915 : vector<1x16xf32>
    %cst_260 = arith.constant dense<0.000000e+00> : vector<1xf32>
    %917 = vector.multi_reduction <add>, %916, %cst_260 [1] : vector<1x16xf32> to vector<1xf32>
    %918 = vector.shape_cast %917 : vector<1xf32> to vector<1x1xf32>
    %919 = tpu.reciprocal %918 {approx = true} : vector<1x1xf32> -> vector<1x1xf32>
    %920 = vector.broadcast %919 : vector<1x1xf32> to vector<1x16xf32>
    %921 = arith.mulf %916, %920 : vector<1x16xf32>
    %922 = arith.truncf %921 : vector<1x16xf32> to vector<1x16xbf16>
    %cst_261 = arith.constant dense<0.000000e+00> : vector<1x128xf32>
    %923 = tpu.matmul %922, %143, %cst_261 {dimension_numbers = #tpu.dot_dimension_numbers<[1], [0], [0], [1], [0, 0, 1, 1], [], []>} : vector<1x16xbf16>, vector<16x128xbf16>, vector<1x128xf32> -> vector<1x128xf32>
    %924 = arith.truncf %923 : vector<1x128xf32> to vector<1x128xbf16>
    %cst_262 = arith.constant dense<0.000000e+00> : vector<1x128xf32>
    %925 = tpu.matmul %924, %148, %cst_262 {dimension_numbers = #tpu.dot_dimension_numbers<[1], [0], [0], [1], [0, 0, 1, 1], [], []>} : vector<1x128xbf16>, vector<128x128xbf16>, vector<1x128xf32> -> vector<1x128xf32>
    %926 = arith.addf %883, %925 : vector<1x128xf32>
    %927 = vector.extract_strided_slice %144 {offsets = [4, 0], sizes = [1, 128], strides = [1, 1]} : vector<8x128xf32> to vector<1x128xf32>
    %928 = vector.extract_strided_slice %144 {offsets = [5, 0], sizes = [1, 128], strides = [1, 1]} : vector<8x128xf32> to vector<1x128xf32>
    %cst_263 = arith.constant dense<0.000000e+00> : vector<1xf32>
    %929 = vector.multi_reduction <add>, %926, %cst_263 [1] : vector<1x128xf32> to vector<1xf32>
    %930 = vector.shape_cast %929 : vector<1xf32> to vector<1x1xf32>
    %cst_264 = arith.constant 1.280000e+02 : f32
    %931 = vector.broadcast %cst_264 : f32 to vector<1x1xf32>
    %932 = arith.divf %930, %931 : vector<1x1xf32>
    %933 = vector.broadcast %932 : vector<1x1xf32> to vector<1x128xf32>
    %934 = arith.subf %926, %933 : vector<1x128xf32>
    %935 = arith.mulf %934, %934 : vector<1x128xf32>
    %cst_265 = arith.constant dense<0.000000e+00> : vector<1xf32>
    %936 = vector.multi_reduction <add>, %935, %cst_265 [1] : vector<1x128xf32> to vector<1xf32>
    %937 = vector.shape_cast %936 : vector<1xf32> to vector<1x1xf32>
    %cst_266 = arith.constant 1.280000e+02 : f32
    %938 = vector.broadcast %cst_266 : f32 to vector<1x1xf32>
    %939 = arith.divf %937, %938 : vector<1x1xf32>
    %940 = vector.broadcast %932 : vector<1x1xf32> to vector<1x128xf32>
    %941 = arith.subf %926, %940 : vector<1x128xf32>
    %cst_267 = arith.constant 9.99999974E-6 : f32
    %942 = vector.broadcast %cst_267 : f32 to vector<1x1xf32>
    %943 = arith.addf %939, %942 : vector<1x1xf32>
    %944 = math.rsqrt %943 : vector<1x1xf32>
    %945 = vector.broadcast %944 : vector<1x1xf32> to vector<1x128xf32>
    %946 = arith.mulf %941, %945 : vector<1x128xf32>
    %947 = arith.mulf %946, %927 : vector<1x128xf32>
    %948 = arith.addf %947, %928 : vector<1x128xf32>
    %949 = arith.truncf %948 : vector<1x128xf32> to vector<1x128xbf16>
    %cst_268 = arith.constant dense<0.000000e+00> : vector<1x512xf32>
    %950 = tpu.matmul %949, %149, %cst_268 {dimension_numbers = #tpu.dot_dimension_numbers<[1], [0], [0], [1], [0, 0, 1, 1], [], []>} : vector<1x128xbf16>, vector<128x512xbf16>, vector<1x512xf32> -> vector<1x512xf32>
    %951 = arith.addf %950, %150 : vector<1x512xf32>
    %952 = arith.mulf %951, %951 : vector<1x512xf32>
    %953 = arith.mulf %951, %952 : vector<1x512xf32>
    %cst_269 = arith.constant 4.471500e-02 : f32
    %954 = vector.broadcast %cst_269 : f32 to vector<1x512xf32>
    %955 = arith.mulf %954, %953 : vector<1x512xf32>
    %956 = arith.addf %951, %955 : vector<1x512xf32>
    %cst_270 = arith.constant 0.797884583 : f32
    %957 = vector.broadcast %cst_270 : f32 to vector<1x512xf32>
    %958 = arith.mulf %957, %956 : vector<1x512xf32>
    %959 = math.tanh %958 : vector<1x512xf32>
    %cst_271 = arith.constant 1.000000e+00 : f32
    %960 = vector.broadcast %cst_271 : f32 to vector<1x512xf32>
    %961 = arith.addf %960, %959 : vector<1x512xf32>
    %cst_272 = arith.constant 5.000000e-01 : f32
    %962 = vector.broadcast %cst_272 : f32 to vector<1x512xf32>
    %963 = arith.mulf %962, %961 : vector<1x512xf32>
    %964 = arith.mulf %951, %963 : vector<1x512xf32>
    %965 = arith.truncf %964 : vector<1x512xf32> to vector<1x512xbf16>
    %cst_273 = arith.constant dense<0.000000e+00> : vector<1x128xf32>
    %966 = tpu.matmul %965, %151, %cst_273 {dimension_numbers = #tpu.dot_dimension_numbers<[1], [0], [0], [1], [0, 0, 1, 1], [], []>} : vector<1x512xbf16>, vector<512x128xbf16>, vector<1x128xf32> -> vector<1x128xf32>
    %967 = arith.addf %926, %966 : vector<1x128xf32>
    %968 = arith.addf %967, %152 : vector<1x128xf32>
    %969 = vector.extract_strided_slice %144 {offsets = [6, 0], sizes = [1, 128], strides = [1, 1]} : vector<8x128xf32> to vector<1x128xf32>
    %970 = vector.extract_strided_slice %144 {offsets = [7, 0], sizes = [1, 128], strides = [1, 1]} : vector<8x128xf32> to vector<1x128xf32>
    %cst_274 = arith.constant dense<0.000000e+00> : vector<1xf32>
    %971 = vector.multi_reduction <add>, %968, %cst_274 [1] : vector<1x128xf32> to vector<1xf32>
    %972 = vector.shape_cast %971 : vector<1xf32> to vector<1x1xf32>
    %cst_275 = arith.constant 1.280000e+02 : f32
    %973 = vector.broadcast %cst_275 : f32 to vector<1x1xf32>
    %974 = arith.divf %972, %973 : vector<1x1xf32>
    %975 = vector.broadcast %974 : vector<1x1xf32> to vector<1x128xf32>
    %976 = arith.subf %968, %975 : vector<1x128xf32>
    %977 = arith.mulf %976, %976 : vector<1x128xf32>
    %cst_276 = arith.constant dense<0.000000e+00> : vector<1xf32>
    %978 = vector.multi_reduction <add>, %977, %cst_276 [1] : vector<1x128xf32> to vector<1xf32>
    %979 = vector.shape_cast %978 : vector<1xf32> to vector<1x1xf32>
    %cst_277 = arith.constant 1.280000e+02 : f32
    %980 = vector.broadcast %cst_277 : f32 to vector<1x1xf32>
    %981 = arith.divf %979, %980 : vector<1x1xf32>
    %982 = vector.broadcast %974 : vector<1x1xf32> to vector<1x128xf32>
    %983 = arith.subf %968, %982 : vector<1x128xf32>
    %cst_278 = arith.constant 9.99999974E-6 : f32
    %984 = vector.broadcast %cst_278 : f32 to vector<1x1xf32>
    %985 = arith.addf %981, %984 : vector<1x1xf32>
    %986 = math.rsqrt %985 : vector<1x1xf32>
    %987 = vector.broadcast %986 : vector<1x1xf32> to vector<1x128xf32>
    %988 = arith.mulf %983, %987 : vector<1x128xf32>
    %989 = arith.mulf %988, %969 : vector<1x128xf32>
    %990 = arith.addf %989, %970 : vector<1x128xf32>
    %991 = arith.truncf %990 : vector<1x128xf32> to vector<1x128xbf16>
    %cst_279 = arith.constant dense<0.000000e+00> : vector<1x128xf32>
    %992 = tpu.matmul %991, %153, %cst_279 {dimension_numbers = #tpu.dot_dimension_numbers<[1], [0], [0], [1], [0, 0, 1, 1], [], []>} : vector<1x128xbf16>, vector<128x128xbf16>, vector<1x128xf32> -> vector<1x128xf32>
    %993 = arith.addf %992, %154 : vector<1x128xf32>
    %cst_280 = arith.constant dense<0xFF800000> : vector<1xf32>
    %994 = vector.multi_reduction <maximumf>, %993, %cst_280 [1] : vector<1x128xf32> to vector<1xf32>
    %995 = vector.shape_cast %994 : vector<1xf32> to vector<1x1xf32>
    %996 = vector.broadcast %995 : vector<1x1xf32> to vector<1x128xf32>
    %997 = arith.cmpf oeq, %993, %996 : vector<1x128xf32>
    %c128_i32_281 = arith.constant 128 : i32
    %998 = vector.broadcast %c128_i32_281 : i32 to vector<1x128xi32>
    %999 = arith.select %997, %342, %998 : vector<1x128xi1>, vector<1x128xi32>
    %cst_282 = arith.constant dense<2147483647> : vector<1xi32>
    %1000 = vector.multi_reduction <minsi>, %999, %cst_282 [1] : vector<1x128xi32> to vector<1xi32>
    %1001 = vector.shape_cast %1000 : vector<1xi32> to vector<1x1xi32>
    %c1_i32_283 = arith.constant 1 : i32
    %1002 = arith.addi %c2_i32, %c1_i32_283 : i32
    %1003 = vector.broadcast %1002 : i32 to vector<1x128xi32>
    %1004 = arith.cmpi eq, %341, %1003 : vector<1x128xi32>
    %1005 = vector.shape_cast %1001 : vector<1x1xi32> to vector<1x1xi32>
    %1006 = vector.broadcast %1005 : vector<1x1xi32> to vector<1x128xi32>
    %1007 = arith.select %1004, %1006, %791 : vector<1x128xi1>, vector<1x128xi32>
    %c3_i32 = arith.constant 3 : i32
    %c0_284 = arith.constant 0 : index
    %c0_285 = arith.constant 0 : index
    %c0_286 = arith.constant 0 : index
    %1008 = vector.load %arg27[%c0_284, %c0_285, %c0_286] : memref<1x1x128xi32, #tpu.memory_space<vmem>>, vector<1x1x128xi32>
    %1009 = vector.shape_cast %1008 : vector<1x1x128xi32> to vector<1x128xi32>
    %1010 = vector.shape_cast %1007 : vector<1x128xi32> to vector<1x1x128xi32>
    tpu.vector_store %arg27[%c0_284, %c0_285, %c0_286], %1010 {strides = array<i32>} : memref<1x1x128xi32, #tpu.memory_space<vmem>>, vector<1x1x128xi32>,
    return
  }
  func.func @transform_0(%arg0: i32, %arg1: memref<2xi32, #tpu.memory_space<smem>>) -> (i32, i32, i32) {
    %c0_i32 = arith.constant 0 : i32
    %c0_i32_0 = arith.constant 0 : i32
    %c0_i32_1 = arith.constant 0 : i32
    return %arg0, %c0_i32, %c0_i32_0 : i32, i32, i32
  }
  func.func @transform_1(%arg0: i32, %arg1: memref<2xi32, #tpu.memory_space<smem>>) -> (i32, i32, i32) {
    %c0_i32 = arith.constant 0 : i32
    %c0_i32_0 = arith.constant 0 : i32
    %c0_i32_1 = arith.constant 0 : i32
    return %arg0, %c0_i32, %c0_i32_0 : i32, i32, i32
  }
  func.func @transform_2(%arg0: i32, %arg1: memref<2xi32, #tpu.memory_space<smem>>) -> (i32, i32) {
    %c0_i32 = arith.constant 0 : i32
    %c0_i32_0 = arith.constant 0 : i32
    %c0_i32_1 = arith.constant 0 : i32
    return %c0_i32, %c0_i32_0 : i32, i32
  }
  func.func @transform_3(%arg0: i32, %arg1: memref<2xi32, #tpu.memory_space<smem>>) -> (i32, i32) {
    %c0_i32 = arith.constant 0 : i32
    %c0_i32_0 = arith.constant 0 : i32
    %c0_i32_1 = arith.constant 0 : i32
    return %c0_i32, %c0_i32_0 : i32, i32
  }
  func.func @transform_4(%arg0: i32, %arg1: memref<2xi32, #tpu.memory_space<smem>>) -> (i32, i32) {
    %c0_i32 = arith.constant 0 : i32
    %c0_i32_0 = arith.constant 0 : i32
    %c0_i32_1 = arith.constant 0 : i32
    return %c0_i32, %c0_i32_0 : i32, i32
  }
  func.func @transform_5(%arg0: i32, %arg1: memref<2xi32, #tpu.memory_space<smem>>) -> (i32, i32) {
    %c0_i32 = arith.constant 0 : i32
    %c0_i32_0 = arith.constant 0 : i32
    %c0_i32_1 = arith.constant 0 : i32
    return %c0_i32, %c0_i32_0 : i32, i32
  }
  func.func @transform_6(%arg0: i32, %arg1: memref<2xi32, #tpu.memory_space<smem>>) -> (i32, i32) {
    %c0_i32 = arith.constant 0 : i32
    %c0_i32_0 = arith.constant 0 : i32
    %c0_i32_1 = arith.constant 0 : i32
    return %c0_i32, %c0_i32_0 : i32, i32
  }
  func.func @transform_7(%arg0: i32, %arg1: memref<2xi32, #tpu.memory_space<smem>>) -> (i32, i32) {
    %c0_i32 = arith.constant 0 : i32
    %c0_i32_0 = arith.constant 0 : i32
    %c0_i32_1 = arith.constant 0 : i32
    return %c0_i32, %c0_i32_0 : i32, i32
  }
  func.func @transform_8(%arg0: i32, %arg1: memref<2xi32, #tpu.memory_space<smem>>) -> (i32, i32) {
    %c0_i32 = arith.constant 0 : i32
    %c0_i32_0 = arith.constant 0 : i32
    %c0_i32_1 = arith.constant 0 : i32
    return %c0_i32, %c0_i32_0 : i32, i32
  }
  func.func @transform_9(%arg0: i32, %arg1: memref<2xi32, #tpu.memory_space<smem>>) -> (i32, i32) {
    %c0_i32 = arith.constant 0 : i32
    %c0_i32_0 = arith.constant 0 : i32
    %c0_i32_1 = arith.constant 0 : i32
    return %c0_i32, %c0_i32_0 : i32, i32
  }
  func.func @transform_10(%arg0: i32, %arg1: memref<2xi32, #tpu.memory_space<smem>>) -> (i32, i32) {
    %c0_i32 = arith.constant 0 : i32
    %c0_i32_0 = arith.constant 0 : i32
    %c0_i32_1 = arith.constant 0 : i32
    return %c0_i32, %c0_i32_0 : i32, i32
  }
  func.func @transform_11(%arg0: i32, %arg1: memref<2xi32, #tpu.memory_space<smem>>) -> (i32, i32) {
    %c0_i32 = arith.constant 0 : i32
    %c0_i32_0 = arith.constant 0 : i32
    %c0_i32_1 = arith.constant 0 : i32
    return %c0_i32, %c0_i32_0 : i32, i32
  }
  func.func @transform_12(%arg0: i32, %arg1: memref<2xi32, #tpu.memory_space<smem>>) -> (i32, i32) {
    %c0_i32 = arith.constant 0 : i32
    %c0_i32_0 = arith.constant 0 : i32
    %c0_i32_1 = arith.constant 0 : i32
    return %c0_i32, %c0_i32_0 : i32, i32
  }
  func.func @transform_13(%arg0: i32, %arg1: memref<2xi32, #tpu.memory_space<smem>>) -> (i32, i32) {
    %c0_i32 = arith.constant 0 : i32
    %c0_i32_0 = arith.constant 0 : i32
    %c0_i32_1 = arith.constant 0 : i32
    return %c0_i32, %c0_i32_0 : i32, i32
  }
  func.func @transform_14(%arg0: i32, %arg1: memref<2xi32, #tpu.memory_space<smem>>) -> (i32, i32) {
    %c0_i32 = arith.constant 0 : i32
    %c0_i32_0 = arith.constant 0 : i32
    %c0_i32_1 = arith.constant 0 : i32
    return %c0_i32, %c0_i32_0 : i32, i32
  }
  func.func @transform_15(%arg0: i32, %arg1: memref<2xi32, #tpu.memory_space<smem>>) -> (i32, i32) {
    %c0_i32 = arith.constant 0 : i32
    %c0_i32_0 = arith.constant 0 : i32
    %c0_i32_1 = arith.constant 0 : i32
    return %c0_i32, %c0_i32_0 : i32, i32
  }
  func.func @transform_16(%arg0: i32, %arg1: memref<2xi32, #tpu.memory_space<smem>>) -> (i32, i32) {
    %c0_i32 = arith.constant 0 : i32
    %c0_i32_0 = arith.constant 0 : i32
    %c0_i32_1 = arith.constant 0 : i32
    return %c0_i32, %c0_i32_0 : i32, i32
  }
  func.func @transform_17(%arg0: i32, %arg1: memref<2xi32, #tpu.memory_space<smem>>) -> (i32, i32) {
    %c0_i32 = arith.constant 0 : i32
    %c0_i32_0 = arith.constant 0 : i32
    %c0_i32_1 = arith.constant 0 : i32
    return %c0_i32, %c0_i32_0 : i32, i32
  }
  func.func @transform_18(%arg0: i32, %arg1: memref<2xi32, #tpu.memory_space<smem>>) -> (i32, i32) {
    %c0_i32 = arith.constant 0 : i32
    %c0_i32_0 = arith.constant 0 : i32
    %c0_i32_1 = arith.constant 0 : i32
    return %c0_i32, %c0_i32_0 : i32, i32
  }
  func.func @transform_19(%arg0: i32, %arg1: memref<2xi32, #tpu.memory_space<smem>>) -> (i32, i32) {
    %c0_i32 = arith.constant 0 : i32
    %c0_i32_0 = arith.constant 0 : i32
    %c0_i32_1 = arith.constant 0 : i32
    return %c0_i32, %c0_i32_0 : i32, i32
  }
  func.func @transform_20(%arg0: i32, %arg1: memref<2xi32, #tpu.memory_space<smem>>) -> (i32, i32) {
    %c0_i32 = arith.constant 0 : i32
    %c0_i32_0 = arith.constant 0 : i32
    %c0_i32_1 = arith.constant 0 : i32
    return %c0_i32, %c0_i32_0 : i32, i32
  }
  func.func @transform_21(%arg0: i32, %arg1: memref<2xi32, #tpu.memory_space<smem>>) -> (i32, i32) {
    %c0_i32 = arith.constant 0 : i32
    %c0_i32_0 = arith.constant 0 : i32
    %c0_i32_1 = arith.constant 0 : i32
    return %c0_i32, %c0_i32_0 : i32, i32
  }
  func.func @transform_22(%arg0: i32, %arg1: memref<2xi32, #tpu.memory_space<smem>>) -> (i32, i32) {
    %c0_i32 = arith.constant 0 : i32
    %c0_i32_0 = arith.constant 0 : i32
    %c0_i32_1 = arith.constant 0 : i32
    return %c0_i32, %c0_i32_0 : i32, i32
  }
  func.func @transform_23(%arg0: i32, %arg1: memref<2xi32, #tpu.memory_space<smem>>) -> (i32, i32) {
    %c0_i32 = arith.constant 0 : i32
    %c0_i32_0 = arith.constant 0 : i32
    %c0_i32_1 = arith.constant 0 : i32
    return %c0_i32, %c0_i32_0 : i32, i32
  }
  func.func @transform_24(%arg0: i32, %arg1: memref<2xi32, #tpu.memory_space<smem>>) -> (i32, i32) {
    %c0_i32 = arith.constant 0 : i32
    %c0_i32_0 = arith.constant 0 : i32
    %c0_i32_1 = arith.constant 0 : i32
    return %c0_i32, %c0_i32_0 : i32, i32
  }
  func.func @transform_25(%arg0: i32, %arg1: memref<2xi32, #tpu.memory_space<smem>>) -> (i32, i32, i32) {
    %c0_i32 = arith.constant 0 : i32
    %c0_i32_0 = arith.constant 0 : i32
    %c0_i32_1 = arith.constant 0 : i32
    return %arg0, %c0_i32, %c0_i32_0 : i32, i32, i32
  }
}

</mosaic_0001>

<bundles_post_ra>
// kernel: generate.1
= control target key start
LH: loop header
LB: loop body
LE: loop exit
PB: predicated region body
PF: predicated region fallthrough
CT: control target
= control target key end

     0   :  { %s7101_s28 = smov [#allocation3]   ;;  %s10135_s0 = inlined_call_operand.vmem [shape: s32[2], index: 0, kind: input, shape index: {}]   ;;  %s10136_s1 = inlined_call_operand.vmem [shape: f32[2,16,128], index: 1, kind: input, shape index: {}]   ;;  %s10137_s2 = inlined_call_operand.vmem [shape: f32[2,8,128], index: 2, kind: input, shape index: {}]   ;;  %s10138_s3 = inlined_call_operand.vmem [shape: bf16[128,128], index: 3, kind: input, shape index: {}]   ;;  %s10139_s4 = inlined_call_operand.vmem [shape: f32[16,128], index: 4, kind: input, shape index: {}]   ;;  %s10140_s5 = inlined_call_operand.vmem [shape: f32[6,128], index: 5, kind: input, shape index: {}]   ;;  %s10141_s6 = inlined_call_operand.vmem [shape: bf16[128,384], index: 6, kind: input, shape index: {}]   ;;  %s10142_s7 = inlined_call_operand.vmem [shape: bf16[128,128], index: 7, kind: input, shape index: {}]   ;;  %s10143_s8 = inlined_call_operand.vmem [shape: bf16[128,512], index: 8, kind: input, shape index: {}]   ;;  %s10144_s9 = inlined_call_operand.vmem [shape: f32[1,512], index: 9, kind: input, shape index: {}]   ;;  %s10145_s10 = inlined_call_operand.vmem [shape: bf16[512,128], index: 10, kind: input, shape index: {}]   ;;  %s10146_s11 = inlined_call_operand.vmem [shape: f32[1,128], index: 11, kind: input, shape index: {}]   ;;  %s10147_s12 = inlined_call_operand.vmem [shape: bf16[128,256], index: 12, kind: input, shape index: {}]   ;;  %s10148_s13 = inlined_call_operand.hbm [shape: f32[8,128], index: 13, kind: input, shape index: {}]   ;;  %s10149_s14 = inlined_call_operand.vmem [shape: bf16[128,384], index: 14, kind: input, shape index: {}]   ;;  %s10150_s15 = inlined_call_operand.vmem [shape: bf16[128,128], index: 15, kind: input, shape index: {}]   ;;  %s10151_s16 = inlined_call_operand.vmem [shape: bf16[128,128], index: 16, kind: input, shape index: {}]   ;;  %s10152_s17 = inlined_call_operand.vmem [shape: bf16[128,128], index: 17, kind: input, shape index: {}]   ;;  %s10153_s18 = inlined_call_operand.vmem [shape: bf16[128,512], index: 18, kind: input, shape index: {}]   ;;  %s10154_s19 = inlined_call_operand.hbm [shape: f32[1,512], index: 19, kind: input, shape index: {}]   ;;  %s10155_s20 = inlined_call_operand.vmem [shape: bf16[512,128], index: 20, kind: input, shape index: {}]   ;;  %s10156_s21 = inlined_call_operand.vmem [shape: f32[1,128], index: 21, kind: input, shape index: {}]   ;;  %s10157_s22 = inlined_call_operand.hbm [shape: bf16[128,128], index: 22, kind: input, shape index: {}]   ;;  %s10158_s23 = inlined_call_operand.vmem [shape: f32[1,128], index: 23, kind: input, shape index: {}]   ;;  %s10159_s24 = inlined_call_operand.vmem [shape: bf16[128,128], index: 24, kind: input, shape index: {}]   ;;  %s10160_s25 = inlined_call_operand.vmem [shape: bf16[16,128], index: 25, kind: input, shape index: {}]   ;;  %s10161_s26 = inlined_call_operand.hbm [shape: s32[2,1,128], index: 26, kind: output, shape index: {}]  }
   0x1   :  { %10381 = sst [smem:[#allocation111_spill]] %s10135_s0 }
   0x2   :  { %10382 = sst [smem:[#allocation112_spill]] %s10136_s1 }
   0x3   :  { %10383 = sst [smem:[#allocation113_spill]] %s10137_s2 }
   0x4   :  { %10384 = sst [smem:[#allocation114_spill]] %s10138_s3 }
   0x5   :  { %10385 = sst [smem:[#allocation115_spill]] %s10139_s4 }
   0x6   :  { %10386 = sst [smem:[#allocation116_spill]] %s10140_s5 }
   0x7   :  { %10387 = sst [smem:[#allocation117_spill]] %s10141_s6 }
   0x8   :  { %10388 = sst [smem:[#allocation118_spill]] %s10142_s7 }
   0x9   :  { %10389 = sst [smem:[#allocation119_spill]] %s10143_s8 }
   0xa   :  { %10390 = sst [smem:[#allocation120_spill]] %s10144_s9 }
   0xb   :  { %10391 = sst [smem:[#allocation121_spill]] %s10145_s10 }
   0xc   :  { %10392 = sst [smem:[#allocation122_spill]] %s10148_s13 }
   0xd   :  { %10393 = sst [smem:[#allocation123_spill]] %s10154_s19 }
   0xe   :  { %10394 = sst [smem:[#allocation124_spill]] %s10155_s20 }
   0xf   :  { %10395 = sst [smem:[#allocation125_spill]] %s10157_s22 }
  0x10   :  { %s10396_s7 = sld [smem:[#allocation111_spill]] }
  0x16   :  { %s32_s20 = sshll.u32 %s10396_s7, 4  ;;  %s33_s20 = int_to_ptr.vmem [resolvable:$true] %s32_s20 }
  0x17   :  { %35 = dma.vmem_to_smem %s33_s20, 16, %s7101_s28, [#allocation2] }
  0x18   :  { %7071 = dma.done.wait [#allocation2], 16 }
  0x19   :  { %7072 = vsyncadd [#allocation2], 4294967280 }
  0x1a   :  { %38 = sfence }
  0x1b   :  { %39 = vsyncpa [#allocation5], 0 }
  0x1c   :  { %40 = vsyncpa [#allocation8], 0 }
  0x1d   :  { %41 = vsyncpa [#allocation6], 0 }
  0x1e   :  { %43 = vsyncpa [#allocation6 + $0x1], 0  ;;  %s7251_s8 = smov 0   ;;  %s7253_s4 = smov 0  }
  0x1f   :  { %s7255_s29 = smov 0   ;;  %s7257_s0 = smov 0  }
  0x20 LB: > { %10397 = sst [smem:[#allocation15_spill]] %s7087_s8  ;;  %s7272_s20 = sadd.s32 4294967295, %s7099_s0   ;;  %s7099_s0 = sphi %s7257_s0, %s10797_s0   ;;  %s7095_s29 = sphi %s7255_s29, %s10799_s29   ;;  %s7091_s4 = sphi %s7253_s4, %s10801_s4   ;;  %s7087_s8 = sphi %s7251_s8, %s10800_s8  }
  0x21   : > { %10398 = sst [smem:[#allocation16_spill]] %s7095_s29  ;;  %s5332_s9 = sadd.s32 4294967294, %s7099_s0  }
  0x22   : > { %s7276_s30 = sadd.s32 1, %s7099_s0   ;;  %s591_s2 = sadd.s32 1, %s7095_s29 }
  0x23   : > { %10399 = sst [smem:[#allocation17_spill]] %s7276_s30  ;;  %s588_s5 = ssub.s32 %s7099_s0, %s7276_s30 }
  0x24   : > { %p601_p0 = scmp.ne.s32.totalorder %s7095_s29, %s7091_s4  ;;  %p589_p1 = scmp.eq.s32.totalorder %s588_s5, 0 }
  0x25   : > { %p602_p2 = scmp.eq.s32.totalorder %s7272_s20, 1  ;;  %p607_p3 = scmp.ne.s32.totalorder %s7091_s4, %s7087_s8 }
  0x26   : > { %p608_p4 = scmp.eq.s32.totalorder %s5332_s9, 1  ;;  %p5333_p7 = scmp.ge.s32.totalorder %s7099_s0, 1 }
  0x27   : > { %s7287_s10 = scalar_select %p589_p1, %s7095_s29, %s591_s2  }
  0x28   : > { %p7289_p5 = por %p602_p2, %p601_p0  ;;  %p7293_p6 = por %p608_p4, %p607_p3 }
  0x29   : > { %10400 = sst [smem:[#allocation18_spill]] %s7287_s10  ;;  %p615_p8 = scmp.lt.s32.totalorder %s7099_s0, 3 }
  0x2a   : > { %s10402_s1 = scalar_select %p7293_p6, 1, 0 }
  0x2b   : > { %p6651_p9 = scmp.eq.s32.totalorder %s7272_s20, 0  ;;  %p7300_p10 = pnand %p5333_p7, %p615_p8 }
  0x2c   : > { %10403 = sst [smem:[#allocation19_spill]] %s10402_s1  ;;  %s7102_s9 = smov [#allocation7]  }
  0x2d   : > { %s10405_s19 = sld [smem:[#allocation123_spill]]  ;;  %p6637_p11 = pneg %p7300_p10 }
  0x2e   : > { %s686_s2 = sshll.u32 %s7102_s9, 4  ;;  %s10406_s13 = sld [smem:[#allocation122_spill]]  ;;  %s687_s2 = int_to_ptr.vmem [resolvable:$true] %s686_s2 }
  0x2f   : > { %p7314_p12 = pnand %p6651_p9, %p6637_p11  ;;  %s10408_s22 = sld [smem:[#allocation125_spill]] }
  0x30   : > { %s7103_s1 = smov [#allocation4]   ;;  %s7104_s10 = smov [#allocation9]  }
  0x31   : > { %s659_s9 = sshll.u32 %s7103_s1, 4  ;;  %s703_s5 = sshll.u32 %s7104_s10, 4  ;;  %s660_s9 = int_to_ptr.vmem [resolvable:$true] %s659_s9  ;;  %s704_s5 = int_to_ptr.vmem [resolvable:$true] %s703_s5 }
  0x32   : > { %s7106_s8 = smov 4  }
  0x33   : > { %s684_s28 = sshll.u32 %s10405_s19, 4  ;;  %s685_s28 = int_to_ptr.hbm [resolvable:$true] %s684_s28 }
  0x34   : > { %s657_s29 = sshll.u32 %s10406_s13, 4  ;;  %s7105_s13 = smov 64   ;;  %s658_s29 = int_to_ptr.hbm [resolvable:$true] %s657_s29 }
  0x35   : > { %s701_s19 = sshll.u32 %s10408_s22, 4  ;;  %743 = sbr.rel (%p7300_p10) target bundleno = 15979 (0x3e6b), region = 120  ;;  %s702_s19 = int_to_ptr.hbm [resolvable:$true] %s701_s19 }
  0x36   : > { %6643 = dma.hbm_to_vmem [thread:$0]  (!%p7314_p12), %s685_s28, 64, %s687_s2, [#allocation8]  }
  0x37   : > { %6640 = dma.hbm_to_vmem [thread:$0]  (!%p7314_p12), %s658_s29, 128, %s660_s9, [#allocation5]  }
  0x38   : > { %6646 = dma.hbm_to_vmem [thread:$0]  (!%p7314_p12), %s702_s19, 1024, %s704_s5, [#allocation8], %s7105_s13, %s7105_s13, %s7106_s8  }
  0x3a   : > { %7074 = dma.done.wait (%p6651_p9), [#allocation5], 128  }
  0x3b   : > { %7076 = vsyncadd (%p6651_p9), [#allocation5], 4294967168 }
  0x3c   : > { %7078 = dma.done.wait (%p6651_p9), [#allocation8], 1088  }
  0x3d   : > { %7080 = vsyncadd (%p6651_p9), [#allocation8], 4294966208  ;;  %s10409_s28 = sld [smem:[#allocation114_spill]]  ;;  %p825_p13 = scmp.lt.s32.totalorder %s7272_s20, 1  ;;  %v7107_v17 = vmov 128.0   ;;  %vm1197_vm7 = vcmask 130048  }
  0x3e   : > { %s10410_s30 = sld [smem:[#allocation112_spill]]  ;;  %6704 = vrcp.f32 %v7107_v17 }
  0x3f   : > { %s7354_s9 = scalar_select %p825_p13, %s7272_s20, 1 }
  0x40   : > { %s10411_s5 = sld [smem:[#allocation115_spill]] }
  0x41   : > { %s6373_s29 = sshll.u32 %s7354_s9, 4  ;;  %s10412_s8 = sld [smem:[#allocation117_spill]] }
  0x42   : > { %s10416_s19 = sld [smem:[#allocation119_spill]]  ;;  %s5344_s7 = sshll.u32 %s7354_s9, 3 }
  0x43   : > { %v6381_v0 = vld [vmem:[%s10409_s28 + $0x38] sm:$0xff]  ;;  %v6380_v1 = vld [vmem:[%s10409_s28 + $0x30] sm:$0xff]  ;;  %v6379_v2 = vld [vmem:[%s10409_s28 + $0x28] sm:$0xff]  ;;  %s10418_s3 = sld [smem:[#allocation121_spill]] }
  0x44   : > { %909 = vmatpush.bf16.msra.mxu0 %v6381_v0  ;;  %v6378_v3 = vld [vmem:[%s10409_s28 + $0x20] sm:$0xff]  ;;  %v6377_v4 = vld [vmem:[%s10409_s28 + $0x18] sm:$0xff]  ;;  %v6376_v5 = vld [vmem:[%s10409_s28 + $0x10] sm:$0xff]  ;;  %s829_s27 = scalar_lea.vmem %s10410_s30, %s6373_s29  ;;  %v6705_v18 = vpop.eup %6704  ;;  %s8315_s22 = sld [smem:[#allocation3 + %s7272_s20]] }
  0x45   : > { %v6375_v6 = vld [vmem:[%s10409_s28 + $0x8] sm:$0xff]  ;;  %v6374_v7 = vld [vmem:[%s10409_s28] sm:$0xff]  ;;  %v928_v19 = vmul.f32 128.0, %v6705_v18  ;;  %vm932_vm0 = vweird.f32 %v6705_v18  ;;  %s10465_s13 = sld [smem:[#allocation124_spill]]  ;;  %s5230_s29 = scalar_lea.hbm %s10161_s26, %s7272_s20 }
  0x46   : > { %v840_v8 = vld [vmem:[%s829_s27] sm:$0xff]  ;;  %v841_v9 = vld [vmem:[%s829_s27 + $0x8] sm:$0xff]  ;;  %s10414_s27 = sld [smem:[#allocation116_spill]] }
  0x47   : > { %v858_v10 = vpack.c.bf16 %v841_v9, %v840_v8  ;;  %v859_v11 = vld [vmem:[%s10411_s5] sm:$0xff]  ;;  %v860_v14 = vld [vmem:[%s10411_s5 + $0x8] sm:$0xff]  ;;  %v929_v20 = vsub.f32 1.0, %v928_v19  ;;  %s10413_s30 = smov %s10412_s8  ;;  %s10415_s5 = sld [smem:[#allocation118_spill]] }
  0x48   : > { %910 = vmatpush.bf16.msra.mxu0 %v6380_v1  ;;  %v5463_v32 = vld [vmem:[%s10412_s8 + $0xa8] sm:$0xf]  ;;  %v6404_v33 = vld [vmem:[%s10413_s30 + $0xb0] sm:$0xf0]  ;;  %v6403_v34 = vld [vmem:[%s10413_s30 + $0xac] sm:$0xf] }
  0x49   : > { %v930_v21 = vmul.f32 %v6705_v18, %v929_v20  ;;  %v5464_v35 = vor.u32 %v6404_v33, %v5463_v32  ;;  %v5465_v36 = vld [vmem:[%s10413_s30 + $0xb4] sm:$0xf0]  ;;  %v5471_v37 = vld [vmem:[%s10413_s30 + $0xb0] sm:$0xf]  ;;  %v6405_v38 = vld [vmem:[%s10413_s30 + $0xb8] sm:$0xf0] }
  0x4a   : > { %v5468_v39 = vor.u32 %v6403_v34, %v5465_v36  ;;  %v5472_v40 = vor.u32 %v6405_v38, %v5471_v37  ;;  %v5451_v41 = vld [vmem:[%s10413_s30 + $0x90] sm:$0xf]  ;;  %v6401_v42 = vld [vmem:[%s10413_s30 + $0x98] sm:$0xf0]  ;;  %v6400_v43 = vld [vmem:[%s10413_s30 + $0x94] sm:$0xf] }
  0x4b   : > { %v931_v22 = vadd.f32 %v6705_v18, %v930_v21  ;;  %1137 = vmatpush.bf16.msra.mxu1 %v5464_v35  ;;  %v5452_v44 = vor.u32 %v6401_v42, %v5451_v41  ;;  %v5453_v45 = vld [vmem:[%s10413_s30 + $0x9c] sm:$0xf0]  ;;  %v5459_v46 = vld [vmem:[%s10413_s30 + $0x98] sm:$0xf]  ;;  %v6402_v47 = vld [vmem:[%s10413_s30 + $0xa0] sm:$0xf0] }
  0x4c   : > { %911 = vmatpush.bf16.msra.mxu0 %v6379_v2  ;;  %1151 = vmatpush.bf16.msra.mxu2 %v5468_v39  ;;  %v5456_v48 = vor.u32 %v6400_v43, %v5453_v45  ;;  %v5460_v49 = vor.u32 %v6402_v47, %v5459_v46  ;;  %v5439_v50 = vld [vmem:[%s10413_s30 + $0x78] sm:$0xf]  ;;  %v6398_v51 = vld [vmem:[%s10413_s30 + $0x80] sm:$0xf0]  ;;  %v6397_v52 = vld [vmem:[%s10413_s30 + $0x7c] sm:$0xf] }
  0x4d   : > { %v7381_v23 = vsel %vm932_vm0, %v6705_v18, %v931_v22  ;;  %1165 = vmatpush.bf16.msra.mxu3 %v5472_v40  ;;  %v5440_v53 = vor.u32 %v6398_v51, %v5439_v50  ;;  %v5441_v54 = vld [vmem:[%s10413_s30 + $0x84] sm:$0xf0]  ;;  %v5447_v55 = vld [vmem:[%s10413_s30 + $0x80] sm:$0xf]  ;;  %v6399_v56 = vld [vmem:[%s10413_s30 + $0x88] sm:$0xf0] }
  0x4e   : > { %v5444_v57 = vor.u32 %v6397_v52, %v5441_v54  ;;  %v5448_v58 = vor.u32 %v6399_v56, %v5447_v55  ;;  %v5427_v59 = vld [vmem:[%s10413_s30 + $0x60] sm:$0xf]  ;;  %v6395_v60 = vld [vmem:[%s10413_s30 + $0x68] sm:$0xf0]  ;;  %v6394_v61 = vld [vmem:[%s10413_s30 + $0x64] sm:$0xf] }
  0x4f   : > { %1138 = vmatpush.bf16.msra.mxu1 %v5452_v44  ;;  %v5428_v62 = vor.u32 %v6395_v60, %v5427_v59  ;;  %v5429_v63 = vld [vmem:[%s10413_s30 + $0x6c] sm:$0xf0]  ;;  %v5435_v0 = vld [vmem:[%s10413_s30 + $0x68] sm:$0xf]  ;;  %v6396_v1 = vld [vmem:[%s10413_s30 + $0x70] sm:$0xf0] }
  0x50   : > { %912 = vmatpush.bf16.msra.mxu0 %v6378_v3  ;;  %1152 = vmatpush.bf16.msra.mxu2 %v5456_v48  ;;  %v5432_v2 = vor.u32 %v6394_v61, %v5429_v63  ;;  %v5436_v3 = vor.u32 %v6396_v1, %v5435_v0  ;;  %v5417_v8 = vld [vmem:[%s10413_s30 + $0x54] sm:$0xf0]  ;;  %v5423_v9 = vld [vmem:[%s10413_s30 + $0x50] sm:$0xf]  ;;  %v6388_v17 = vld [vmem:[%s10413_s30 + $0x34] sm:$0xf] }
  0x51   : > { %1166 = vmatpush.bf16.msra.mxu3 %v5460_v49  ;;  %v5405_v19 = vld [vmem:[%s10413_s30 + $0x3c] sm:$0xf0]  ;;  %v5411_v20 = vld [vmem:[%s10413_s30 + $0x38] sm:$0xf]  ;;  %v6390_v21 = vld [vmem:[%s10413_s30 + $0x40] sm:$0xf0] }
  0x52   : > { %v5408_v22 = vor.u32 %v6388_v17, %v5405_v19  ;;  %v5399_v32 = vld [vmem:[%s10413_s30 + $0x20] sm:$0xf]  ;;  %v6387_v33 = vld [vmem:[%s10413_s30 + $0x28] sm:$0xf0]  ;;  %v6382_v38 = vld [vmem:[%s10413_s30 + $0x4] sm:$0xf] }
  0x53   : > { %1139 = vmatpush.bf16.msra.mxu1 %v5440_v53  ;;  %v5400_v35 = vor.u32 %v6387_v33, %v5399_v32  ;;  %v5379_v36 = vld [vmem:[%s10413_s30] sm:$0xf]  ;;  %v6383_v37 = vld [vmem:[%s10413_s30 + $0x8] sm:$0xf0]  ;;  %v5381_v41 = vld [vmem:[%s10413_s30 + $0xc] sm:$0xf0] }
  0x54   : > { %913 = vmatpush.bf16.msra.mxu0 %v6377_v4  ;;  %1153 = vmatpush.bf16.msra.mxu2 %v5444_v57  ;;  %v5415_v4 = vld [vmem:[%s10413_s30 + $0x48] sm:$0xf]  ;;  %v5380_v40 = vor.u32 %v6383_v37, %v5379_v36  ;;  %v6384_v43 = vld [vmem:[%s10413_s30 + $0x10] sm:$0xf0]  ;;  %v5384_v45 = vor.u32 %v6382_v38, %v5381_v41  ;;  %s10417_s8 = sld [smem:[#allocation113_spill]]  ;;  %s838_s28 = ssub.s32 8, %s8315_s22 }
  0x55   : > { %1167 = vmatpush.bf16.msra.mxu3 %v5448_v58  ;;  %v5387_v42 = vld [vmem:[%s10413_s30 + $0x8] sm:$0xf]  ;;  %s4699_s10 = sadd.s32 2, %s8315_s22 }
  0x56   : > { %v5388_v46 = vor.u32 %v6384_v43, %v5387_v42  ;;  %v6411_v41 = vld [vmem:[%s10415_s5 + $0x28] sm:$0xff]  ;;  %v6410_v42 = vld [vmem:[%s10415_s5 + $0x20] sm:$0xff]  ;;  %v6409_v43 = vld [vmem:[%s10415_s5 + $0x18] sm:$0xff] }
  0x57   : > { %1140 = vmatpush.bf16.msra.mxu1 %v5428_v62  ;;  %v7544_v62 = vld [vmem:[%s10414_s27] sm:$0x3f] }
  0x58   : > { %914 = vmatpush.bf16.msra.mxu0 %v6376_v5  ;;  %1154 = vmatpush.bf16.msra.mxu2 %v5432_v2  ;;  %v6392_v5 = vld [vmem:[%s10413_s30 + $0x50] sm:$0xf0]  ;;  %v970_v1 = vperm.slane %v7544_v62, 0 }
  0x59   : > { %1168 = vmatpush.bf16.msra.mxu3 %v5436_v3 }
  0x5a   : > { %s7798_s2 = scalar_lea.vmem %s10417_s8, %s5344_s7  ;;  %s4174_s8 = sadd.s32 1, %s8315_s22 }
  0x5c   : > { %915 = vmatpush.bf16.msra.mxu0 %v6375_v6  ;;  %v6391_v6 = vld [vmem:[%s10413_s30 + $0x4c] sm:$0xf] }
  0x60   : > { %916 = vmatpush.bf16.msra.mxu0 %v6374_v7  ;;  %v5416_v7 = vor.u32 %v6392_v5, %v5415_v4 }
  0x62   : > { %1141 = vmatpush.bf16.msra.mxu1 %v5416_v7 }
  0x63   : > { %917 = vmatmul.bf16.vlgmr.msra.gmra.mxu0 %v858_v10  ;;  %v6393_v10 = vld [vmem:[%s10413_s30 + $0x58] sm:$0xf0] }
  0xe0   : > { %v918_v12 = vpop.f32.mrf.mxu0 }
  0xe1   : > { %v7372_v13 = vadd.f32 %v918_v12, %v859_v11  ;;  %v5420_v11 = vor.u32 %v6391_v6, %v5417_v8  ;;  %v5424_v12 = vor.u32 %v6393_v10, %v5423_v9  ;;  %v973_v6 = vperm.slane %v7544_v62, 1 }
  0xe3   : > { %923 = vadd.xlane.f32.xlu0 %v7372_v13  ;;  %1155 = vmatpush.bf16.msra.mxu2 %v5420_v11 }
  0xe4   : > { %1169 = vmatpush.bf16.msra.mxu3 %v5424_v12 }
  0xe7   : > { %1156 = vmatpush.bf16.msra.mxu2 %v5408_v22 }
  0xe8   : > { %v920_v15 = vpop.f32.mrf.mxu0 }
  0xe9   : > { %v7378_v16 = vadd.f32 %v920_v15, %v860_v14  ;;  %v5403_v14 = vld [vmem:[%s10413_s30 + $0x30] sm:$0xf]  ;;  %v6389_v15 = vld [vmem:[%s10413_s30 + $0x38] sm:$0xf0] }
  0xea   : > { %v5404_v18 = vor.u32 %v6389_v15, %v5403_v14 }
  0xeb   : > { %925 = vadd.xlane.f32.xlu0 %v7378_v16 }
  0xec   : > { %1142 = vmatpush.bf16.msra.mxu1 %v5404_v18 }
 0x156   : > { %v924_v24 = vpop.xlane.xlu0 %923 }
 0x157   : > { %v934_v25 = vmul.f32 %v7381_v23, %v924_v24  ;;  %v5412_v24 = vor.u32 %v6390_v21, %v5411_v20 }
 0x159   : > { %v7385_v26 = vsub.f32 %v7372_v13, %v934_v25  ;;  %1170 = vmatpush.bf16.msra.mxu3 %v5412_v24  ;;  %v5391_v25 = vld [vmem:[%s10413_s30 + $0x18] sm:$0xf] }
 0x15b   : > { %v938_v27 = vmul.f32 %v7385_v26, %v7385_v26 }
 0x15d   : > { %940 = vadd.xlane.f32.xlu1 %v938_v27  ;;  %v6386_v27 = vld [vmem:[%s10413_s30 + $0x20] sm:$0xf0]  ;;  %1171 = vmatpush.bf16.msra.mxu3 %v5400_v35 }
 0x15e   : > { %v926_v28 = vpop.xlane.xlu0 %925 }
 0x15f   : > { %v935_v29 = vmul.f32 %v7381_v23, %v926_v28  ;;  %v6385_v28 = vld [vmem:[%s10413_s30 + $0x1c] sm:$0xf] }
 0x161   : > { %v7391_v30 = vsub.f32 %v7378_v16, %v935_v29  ;;  %v5392_v29 = vor.u32 %v6386_v27, %v5391_v25  ;;  %1172 = vmatpush.bf16.msra.mxu3 %v5388_v46 }
 0x163   : > { %v939_v31 = vmul.f32 %v7391_v30, %v7391_v30  ;;  %1143 = vmatpush.bf16.msra.mxu1 %v5392_v29 }
 0x165   : > { %942 = vadd.xlane.f32.xlu1 %v939_v31  ;;  %v5393_v31 = vld [vmem:[%s10413_s30 + $0x24] sm:$0xf0] }
 0x166   : > { %v5396_v34 = vor.u32 %v6385_v28, %v5393_v31 }
 0x167   : > { %1144 = vmatpush.bf16.msra.mxu1 %v5380_v40  ;;  %v6412_v40 = vld [vmem:[%s10415_s5 + $0x30] sm:$0xff] }
 0x168   : > { %1157 = vmatpush.bf16.msra.mxu2 %v5396_v34 }
 0x16c   : > { %1158 = vmatpush.bf16.msra.mxu2 %v5384_v45 }
 0x1d0   : > { %v941_v39 = vpop.xlane.xlu1 %940 }
 0x1d1   : > { %v944_v44 = vmul.f32 %v941_v39, %v7381_v23  ;;  %v6413_v39 = vld [vmem:[%s10415_s5 + $0x38] sm:$0xff] }
 0x1d2   : > { %1304 = vmatpush.bf16.msrb.mxu2 %v6413_v39 }
 0x1d3   : > { %v946_v47 = vadd.f32 1e-05, %v944_v44 }
 0x1d5   : > { %6706 = vrsqrt.f32 %v946_v47  ;;  %vm954_vm2 = vweird.f32 %v946_v47 }
 0x1d6   : > { %1305 = vmatpush.bf16.msrb.mxu2 %v6412_v40  ;;  %v6435_v40 = vld [vmem:[%s10416_s19 + $0xac] sm:$0xf] }
 0x1d8   : > { %v943_v48 = vpop.xlane.xlu1 %942 }
 0x1d9   : > { %v945_v49 = vmul.f32 %v943_v48, %v7381_v23 }
 0x1da   : > { %1306 = vmatpush.bf16.msrb.mxu2 %v6411_v41  ;;  %v5598_v41 = vld [vmem:[%s10416_s19 + $0xb8] sm:$0xf0] }
 0x1db   : > { %v6707_v50 = vpop.eup %6706  ;;  %v947_v51 = vadd.f32 1e-05, %v945_v49 }
 0x1dc   : > { %v949_v52 = vmul.f32 %v6707_v50, %v946_v47  ;;  %vm955_vm1 = vweird.f32 %v6707_v50 }
 0x1dd   : > { %6708 = vrsqrt.f32 %v947_v51  ;;  %vm956_vm3 = vmor %vm954_vm2, %vm955_vm1  ;;  %vm964_vm5 = vweird.f32 %v947_v51 }
 0x1de   : > { %v950_v53 = vmul.f32 %v6707_v50, %v949_v52  ;;  %1307 = vmatpush.bf16.msrb.mxu2 %v6410_v42  ;;  %v6407_v52 = vld [vmem:[%s10415_s5 + $0x8] sm:$0xff]  ;;  %v5601_v42 = vor.u32 %v6435_v40, %v5598_v41 }
 0x1df   : > { %v5516_v41 = vld [vmem:[%s10416_s19 + $0x8] sm:$0xf] }
 0x1e0   : > { %v951_v54 = vmul.f32 0.5, %v950_v53  ;;  %v6406_v53 = vld [vmem:[%s10415_s5] sm:$0xff] }
 0x1e2   : > { %v952_v55 = vsub.f32 1.5, %v951_v54  ;;  %1308 = vmatpush.bf16.msrb.mxu2 %v6409_v43  ;;  %v5572_v43 = vld [vmem:[%s10416_s19 + $0x80] sm:$0xf] }
 0x1e3   : > { %v6709_v56 = vpop.eup %6708 }
 0x1e4   : > { %v953_v57 = vmul.f32 %v6707_v50, %v952_v55  ;;  %v959_v58 = vmul.f32 %v6709_v56, %v947_v51  ;;  %vm965_vm4 = vweird.f32 %v6709_v56  ;;  %v6408_v51 = vld [vmem:[%s10415_s5 + $0x10] sm:$0xff] }
 0x1e5   : > { %vm966_vm6 = vmor %vm964_vm5, %vm965_vm4 }
 0x1e6   : > { %v960_v59 = vmul.f32 %v6709_v56, %v959_v58  ;;  %v957_v60 = vsel %vm956_vm3, %v6707_v50, %v953_v57  ;;  %1309 = vmatpush.bf16.msrb.mxu2 %v6408_v51 }
 0x1e7   : > { %v968_v0 = vmul.f32 %v957_v60, %v7385_v26 }
 0x1e8   : > { %v961_v61 = vmul.f32 0.5, %v960_v59 }
 0x1e9   : > { %v971_v5 = vmul.f32 %v970_v1, %v968_v0 }
 0x1ea   : > { %v962_v63 = vsub.f32 1.5, %v961_v61  ;;  %1310 = vmatpush.bf16.msrb.mxu2 %v6407_v52  ;;  %v6431_v52 = vld [vmem:[%s10416_s19 + $0x8c] sm:$0xf] }
 0x1eb   : > { %v974_v8 = vadd.f32 %v973_v6, %v971_v5  ;;  %v6444_v5 = vld [vmem:[%s10416_s19 + $0xec] sm:$0xf0] }
 0x1ec   : > { %v963_v2 = vmul.f32 %v6709_v56, %v962_v63 }
 0x1ee   : > { %v967_v3 = vsel %vm966_vm6, %v6709_v56, %v963_v2  ;;  %1311 = vmatpush.bf16.msrb.mxu2 %v6406_v53  ;;  %v5582_v53 = vld [vmem:[%s10416_s19 + $0x98] sm:$0xf0] }
 0x1ef   : > { %v969_v4 = vmul.f32 %v967_v3, %v7391_v30 }
 0x1f1   : > { %v972_v7 = vmul.f32 %v970_v1, %v969_v4  ;;  %v5620_v4 = vld [vmem:[%s10416_s19 + $0xe0] sm:$0xf] }
 0x1f3   : > { %v975_v9 = vadd.f32 %v973_v6, %v972_v7  ;;  %v6442_v6 = vld [vmem:[%s10416_s19 + $0xe4] sm:$0xf]  ;;  %v5621_v7 = vor.u32 %v6444_v5, %v5620_v4  ;;  %v5566_v4 = vld [vmem:[%s10416_s19 + $0x78] sm:$0xf0] }
 0x1f5   : > { %v1008_v10 = vpack.c.bf16 %v975_v9, %v974_v8  ;;  %v5622_v8 = vld [vmem:[%s10416_s19 + $0xf0] sm:$0xf0]  ;;  %v5628_v9 = vld [vmem:[%s10416_s19 + $0xe8] sm:$0xf] }
 0x1f7   : > { %1145 = vmatmul.bf16.vlgmr.msra.gmra.mxu1 %v1008_v10  ;;  %1159 = vmatmul.bf16.vlgmr.msra.gmra.mxu2 %v1008_v10 }
 0x1f8   : > { %1173 = vmatmul.bf16.vlgmr.msra.gmra.mxu3 %v1008_v10  ;;  %v6445_v10 = vld [vmem:[%s10416_s19 + $0xf4] sm:$0xf0] }
 0x274   : > { %v1146_v12 = vpop.f32.mrf.mxu1 }
 0x27a   : > { %v1160_v11 = vpop.f32.mrf.mxu2 }
 0x27b   : > { %v1174_v26 = vpop.f32.mrf.mxu3 }
 0x27c   : > { %v1148_v30 = vpop.f32.mrf.mxu1 }
 0x27d   : > { %v1179_v19 = vpack.c.bf16 %v1148_v30, %v1146_v12  ;;  %v6443_v12 = vld [vmem:[%s10416_s19 + $0xec] sm:$0xf]  ;;  %v6438_v30 = vld [vmem:[%s10416_s19 + $0xc4] sm:$0xf] }
 0x282   : > { %v1162_v14 = vpop.f32.mrf.mxu2 }
 0x283   : > { %v1176_v15 = vpop.f32.mrf.mxu3  ;;  %v1180_v17 = vpack.c.bf16 %v1162_v14, %v1160_v11  ;;  %v5625_v11 = vor.u32 %v6442_v6, %v5622_v8  ;;  %v5630_v14 = vld [vmem:[%s10416_s19 + $0xf8] sm:$0xf0]  ;;  %v5540_v6 = vld [vmem:[%s10416_s19 + $0x40] sm:$0xf]  ;;  %v6422_v8 = vld [vmem:[%s10416_s19 + $0x44] sm:$0xf] }
 0x284   : > { %v1221_v18 = vpack.c.bf16 %v1176_v15, %v1174_v26  ;;  %v5629_v26 = vor.u32 %v6445_v10, %v5628_v9  ;;  %v5633_v15 = vor.u32 %v6443_v12, %v5630_v14  ;;  %v5542_v10 = vld [vmem:[%s10416_s19 + $0x50] sm:$0xf0] }
 0x285   : > { %1188 = vmatpush.bf16.xpose.msrb.mxu0 %v1180_v17  ;;  %v5604_v17 = vld [vmem:[%s10416_s19 + $0xc0] sm:$0xf]  ;;  %v5545_v12 = vor.u32 %v6422_v8, %v5542_v10 }
 0x286   : > { %1232 = vmatpush.bf16.msrb.mxu3 %v1221_v18  ;;  %1597 = vmatpush.bf16.msrb.mxu1 %v5629_v26  ;;  %v6440_v18 = vld [vmem:[%s10416_s19 + $0xcc] sm:$0xf0]  ;;  %v6425_v26 = vld [vmem:[%s10416_s19 + $0x54] sm:$0xf0] }
 0x287   : > { %1611 = vmatpush.bf16.msra.mxu2 %v5633_v15  ;;  %v6423_v15 = vld [vmem:[%s10416_s19 + $0x4c] sm:$0xf] }
 0x28a   : > { %1569 = vmatpush.bf16.msra.mxu3 %v5621_v7  ;;  %v6424_v7 = vld [vmem:[%s10416_s19 + $0x4c] sm:$0xf0] }
 0x28b   : > { %v5541_v9 = vor.u32 %v6424_v7, %v5540_v6 }
 0x28c   : > { %1189 = vmatmul.bf16.vlgmr.msrb.gmra.mxu0 %v1179_v19  ;;  %v5605_v19 = vor.u32 %v6440_v18, %v5604_v17  ;;  %v5550_v17 = vld [vmem:[%s10416_s19 + $0x58] sm:$0xf0] }
 0x28d   : > { %1583 = vmatpush.bf16.msra.mxu0 %v5625_v11  ;;  %v5548_v11 = vld [vmem:[%s10416_s19 + $0x48] sm:$0xf]  ;;  %v5553_v18 = vor.u32 %v6423_v15, %v5550_v17  ;;  %v6453_v15 = vld [vmem:[%s10418_s3 + $0x38] sm:$0xff] }
 0x28e   : > { %1570 = vmatpush.bf16.msra.mxu3 %v5605_v19  ;;  %v5549_v14 = vor.u32 %v6425_v26, %v5548_v11  ;;  %v6420_v19 = vld [vmem:[%s10416_s19 + $0x2c] sm:$0xf0]  ;;  %v6477_v17 = vld [vmem:[%s10418_s3 + $0xf8] sm:$0xff] }
 0x309   : > { %v1190_v20 = vpop.f32.mrf.mxu0 }
 0x30a   : > { %v1195_v21 = vmul.f32 0.088388346, %v1190_v20  ;;  %v5606_v20 = vld [vmem:[%s10416_s19 + $0xd0] sm:$0xf0] }
 0x30c   : > { %v1198_v22 = vsel %vm1197_vm7, %v1195_v21, -inf }
 0x30d   : > { %1199 = vmax.xlane.f32.xlu2 %v1198_v22  ;;  %v6441_v22 = vld [vmem:[%s10416_s19 + $0xd4] sm:$0xf0] }
 0x311   : > { %v1192_v24 = vpop.f32.mrf.mxu0 }
 0x312   : > { %v1196_v25 = vmul.f32 0.088388346, %v1192_v24  ;;  %v5609_v24 = vor.u32 %v6438_v30, %v5606_v20  ;;  %v5524_v30 = vld [vmem:[%s10416_s19 + $0x20] sm:$0xf]  ;;  %v6418_v20 = vld [vmem:[%s10416_s19 + $0x24] sm:$0xf] }
 0x314   : > { %v1201_v27 = vsel %vm1197_vm7, %v1196_v25, -inf  ;;  %1584 = vmatpush.bf16.msra.mxu0 %v5609_v24  ;;  %v5532_v24 = vld [vmem:[%s10416_s19 + $0x28] sm:$0xf] }
 0x315   : > { %1202 = vmax.xlane.f32.xlu2 %v1201_v27  ;;  %v6439_v27 = vld [vmem:[%s10416_s19 + $0xcc] sm:$0xf] }
 0x380   : > { %v1200_v28 = vpop.xlane.xlu2 %1199 }
 0x381   : > { %v1204_v29 = vsub.f32 %v1195_v21, %v1200_v28  ;;  %v5612_v21 = vld [vmem:[%s10416_s19 + $0xc8] sm:$0xf]  ;;  %v5614_v28 = vld [vmem:[%s10416_s19 + $0xd8] sm:$0xf0] }
 0x383   : > { %v1206_v31 = vmul.f32 1.442695, %v1204_v29  ;;  %v5617_v29 = vor.u32 %v6439_v27, %v5614_v28 }
 0x385   : > { %6710 = vpow2.f32 %v1206_v31  ;;  %v5588_v31 = vld [vmem:[%s10416_s19 + $0xa0] sm:$0xf]  ;;  %1612 = vmatpush.bf16.msra.mxu2 %v5617_v29 }
 0x388   : > { %v1203_v32 = vpop.xlane.xlu2 %1202 }
 0x389   : > { %v1205_v33 = vsub.f32 %v1196_v25, %v1203_v32  ;;  %v5613_v25 = vor.u32 %v6441_v22, %v5612_v21  ;;  %v6436_v32 = vld [vmem:[%s10416_s19 + $0xac] sm:$0xf0]  ;;  %1613 = vmatpush.bf16.msra.mxu2 %v5601_v42  ;;  %v5525_v21 = vor.u32 %v6420_v19, %v5524_v30  ;;  %v5526_v22 = vld [vmem:[%s10416_s19 + $0x30] sm:$0xf0]  ;;  %v6417_v42 = vld [vmem:[%s10416_s19 + $0x14] sm:$0xf0] }
 0x38a   : > { %v5529_v28 = vor.u32 %v6418_v20, %v5526_v22  ;;  %v6467_v30 = vld [vmem:[%s10418_s3 + $0xa8] sm:$0xff]  ;;  %v6452_v19 = vld [vmem:[%s10418_s3 + $0x30] sm:$0xff]  ;;  %v6466_v22 = vld [vmem:[%s10418_s3 + $0xa0] sm:$0xff] }
 0x38b   : > { %v6711_v34 = vpop.eup %6710  ;;  %v1208_v35 = vmul.f32 1.442695, %v1205_v33  ;;  %1598 = vmatpush.bf16.msrb.mxu1 %v5613_v25  ;;  %v6434_v33 = vld [vmem:[%s10416_s19 + $0xa4] sm:$0xf]  ;;  %v6421_v25 = vld [vmem:[%s10416_s19 + $0x34] sm:$0xf0] }
 0x38c   : > { %v1210_v36 = vsel %vm1197_vm7, %v6711_v34, 0.0  ;;  %v5533_v29 = vor.u32 %v6421_v25, %v5532_v24  ;;  %v6476_v20 = vld [vmem:[%s10418_s3 + $0xf0] sm:$0xff]  ;;  %v6451_v24 = vld [vmem:[%s10418_s3 + $0x28] sm:$0xff] }
 0x38d   : > { %6712 = vpow2.f32 %v1208_v35  ;;  %1211 = vadd.xlane.f32.xlu0 %v1210_v36  ;;  %v5590_v35 = vld [vmem:[%s10416_s19 + $0xb0] sm:$0xf0]  ;;  %v5596_v36 = vld [vmem:[%s10416_s19 + $0xa8] sm:$0xf] }
 0x38e   : > { %v6475_v25 = vld [vmem:[%s10418_s3 + $0xe8] sm:$0xff] }
 0x393   : > { %v6713_v37 = vpop.eup %6712 }
 0x394   : > { %v1213_v38 = vsel %vm1197_vm7, %v6713_v37, 0.0 }
 0x395   : > { %1214 = vadd.xlane.f32.xlu1 %v1213_v38  ;;  %v5593_v38 = vor.u32 %v6434_v33, %v5590_v35  ;;  %v5508_v33 = vld [vmem:[%s10416_s19] sm:$0xf] }
 0x397   : > { %1585 = vmatpush.bf16.msra.mxu0 %v5593_v38  ;;  %v5510_v38 = vld [vmem:[%s10416_s19 + $0x10] sm:$0xf0] }
 0x400   : > { %v1212_v44 = vpop.xlane.xlu0 %1211 }
 0x401   : > { %6714 = vrcp.f32 %v1212_v44  ;;  %v6432_v44 = vld [vmem:[%s10416_s19 + $0x8c] sm:$0xf0] }
 0x407   : > { %v6715_v46 = vpop.eup %6714 }
 0x408   : > { %v1215_v45 = vpop.xlane.xlu1 %1214  ;;  %v1218_v48 = vmul.f32 %v6715_v46, %v6711_v34  ;;  %v5589_v34 = vor.u32 %v6436_v32, %v5588_v31  ;;  %v5573_v46 = vor.u32 %v6432_v44, %v5572_v43  ;;  %v6419_v31 = vld [vmem:[%s10416_s19 + $0x2c] sm:$0xf]  ;;  %v5534_v32 = vld [vmem:[%s10416_s19 + $0x38] sm:$0xf0] }
 0x409   : > { %6716 = vrcp.f32 %v1215_v45  ;;  %v6430_v45 = vld [vmem:[%s10416_s19 + $0x84] sm:$0xf]  ;;  %v5537_v35 = vor.u32 %v6419_v31, %v5534_v32  ;;  %v6415_v43 = vld [vmem:[%s10416_s19 + $0xc] sm:$0xf]  ;;  %v6456_v32 = vld [vmem:[%s10418_s3 + $0x50] sm:$0xff] }
 0x40a   : > { %1571 = vmatpush.bf16.msra.mxu3 %v5589_v34  ;;  %v6474_v31 = vld [vmem:[%s10418_s3 + $0xe0] sm:$0xff] }
 0x40e   : > { %1572 = vmatpush.bf16.msra.mxu3 %v5573_v46  ;;  %v5518_v46 = vld [vmem:[%s10416_s19 + $0x18] sm:$0xf0] }
 0x40f   : > { %v6717_v47 = vpop.eup %6716 }
 0x410   : > { %v1219_v49 = vmul.f32 %v6717_v47, %v6713_v37  ;;  %v6437_v37 = vld [vmem:[%s10416_s19 + $0xb4] sm:$0xf0]  ;;  %v5574_v47 = vld [vmem:[%s10416_s19 + $0x90] sm:$0xf0] }
 0x411   : > { %v5597_v39 = vor.u32 %v6437_v37, %v5596_v36  ;;  %v6416_v36 = vld [vmem:[%s10416_s19 + $0xc] sm:$0xf0]  ;;  %v6414_v37 = vld [vmem:[%s10416_s19 + $0x4] sm:$0xf] }
 0x412   : > { %v1220_v50 = vpack.c.bf16 %v1219_v49, %v1218_v48  ;;  %v5580_v48 = vld [vmem:[%s10416_s19 + $0x88] sm:$0xf]  ;;  %v6433_v49 = vld [vmem:[%s10416_s19 + $0x94] sm:$0xf0]  ;;  %v5513_v40 = vor.u32 %v6414_v37, %v5510_v38 }
 0x413   : > { %1599 = vmatpush.bf16.msrb.mxu1 %v5597_v39  ;;  %v5581_v51 = vor.u32 %v6433_v49, %v5580_v48  ;;  %v5509_v39 = vor.u32 %v6416_v36, %v5508_v33  ;;  %v7801_v49 = vld [vmem:[%s7798_s2] sm:$0xff]  ;;  %v6464_v33 = vld [vmem:[%s10418_s3 + $0x90] sm:$0xff]  ;;  %v6473_v36 = vld [vmem:[%s10418_s3 + $0xd8] sm:$0xff] }
 0x414   : > { %5473 = vmatmul.msk.bf16.vlgmr.msrb.gmra.mxu3 %vm1197_vm7, %v1220_v50  ;;  %v5577_v50 = vor.u32 %v6430_v45, %v5574_v47  ;;  %v5517_v45 = vor.u32 %v6417_v42, %v5516_v41  ;;  %v5521_v47 = vor.u32 %v6415_v43, %v5518_v46  ;;  %v6455_v37 = vld [vmem:[%s10418_s3 + $0x48] sm:$0xff]  ;;  %v6448_v41 = vld [vmem:[%s10418_s3 + $0x10] sm:$0xff]  ;;  %v6454_v43 = vld [vmem:[%s10418_s3 + $0x40] sm:$0xff] }
 0x415   : > { %v6463_v38 = vld [vmem:[%s10418_s3 + $0x88] sm:$0xff]  ;;  %v6472_v42 = vld [vmem:[%s10418_s3 + $0xd0] sm:$0xff] }
 0x416   : > { %1586 = vmatpush.bf16.msra.mxu0 %v5577_v50 }
 0x417   : > { %1600 = vmatpush.bf16.msrb.mxu1 %v5581_v51 }
 0x497   : > { %v1234_v54 = vpop.f32.mrf.mxu3 }
 0x49f   : > { %v1236_v55 = vpop.f32.mrf.mxu3 }
 0x4a0   : > { %v1255_v56 = vpack.c.bf16 %v1236_v55, %v1234_v54  ;;  %v5585_v54 = vor.u32 %v6431_v52, %v5582_v53  ;;  %v5556_v55 = vld [vmem:[%s10416_s19 + $0x60] sm:$0xf] }
 0x4a2   : > { %1312 = vmatmul.bf16.vlgmr.msrb.gmra.mxu2 %v1255_v56  ;;  %v6428_v56 = vld [vmem:[%s10416_s19 + $0x6c] sm:$0xf0] }
 0x4a3   : > { %1614 = vmatpush.bf16.msra.mxu2 %v5585_v54 }
 0x525   : > { %v1313_v57 = vpop.f32.mrf.mxu2 }
 0x526   : > { %v7580_v58 = vadd.f32 %v1313_v57, %v7372_v13  ;;  %v6426_v57 = vld [vmem:[%s10416_s19 + $0x64] sm:$0xf] }
 0x528   : > { %1320 = vadd.xlane.f32.xlu2 %v7580_v58 }
 0x52d   : > { %v1315_v59 = vpop.f32.mrf.mxu2 }
 0x52e   : > { %v7584_v60 = vadd.f32 %v1315_v59, %v7378_v16  ;;  %v5557_v59 = vor.u32 %v6428_v56, %v5556_v55 }
 0x530   : > { %1322 = vadd.xlane.f32.xlu0 %v7584_v60  ;;  %1573 = vmatpush.bf16.msra.mxu3 %v5557_v59 }
 0x534   : > { %1574 = vmatpush.bf16.msra.mxu3 %v5541_v9  ;;  %v1363_v9 = vperm.slane %v7544_v62, 3 }
 0x538   : > { %1575 = vmatpush.bf16.msra.mxu3 %v5525_v21  ;;  %2409 = vadd.xlane.f32.xlu0 %v7801_v49  ;;  %v6458_v21 = vld [vmem:[%s10418_s3 + $0x60] sm:$0xff] }
 0x53c   : > { %1576 = vmatpush.bf16.msra.mxu3 %v5509_v39 }
 0x540   : > { %1957 = vmatpush.bf16.msrb.mxu3 %v6453_v15 }
 0x544   : > { %1958 = vmatpush.bf16.msrb.mxu3 %v6452_v19 }
 0x548   : > { %1959 = vmatpush.bf16.msrb.mxu3 %v6451_v24  ;;  %v5914_v24 = vld [vmem:[%s10149_s14 + $0xb4] sm:$0xf0] }
 0x59b   : > { %v1321_v61 = vpop.xlane.xlu2 %1320 }
 0x59c   : > { %v1324_v63 = vmul.f32 %v1321_v61, %v7381_v23  ;;  %v5558_v61 = vld [vmem:[%s10416_s19 + $0x70] sm:$0xf0] }
 0x59e   : > { %v7589_v0 = vsub.f32 %v7580_v58, %v1324_v63  ;;  %v5564_v63 = vld [vmem:[%s10416_s19 + $0x68] sm:$0xf] }
 0x5a0   : > { %v1328_v1 = vmul.f32 %v7589_v0, %v7589_v0 }
 0x5a2   : > { %1330 = vadd.xlane.f32.xlu1 %v1328_v1  ;;  %v6429_v1 = vld [vmem:[%s10416_s19 + $0x74] sm:$0xf0] }
 0x5a3   : > { %v1323_v13 = vpop.xlane.xlu0 %1322 }
 0x5a4   : > { %v1325_v2 = vmul.f32 %v1323_v13, %v7381_v23  ;;  %v5561_v13 = vor.u32 %v6426_v57, %v5558_v61 }
 0x5a6   : > { %v7595_v3 = vsub.f32 %v7584_v60, %v1325_v2  ;;  %v5565_v2 = vor.u32 %v6429_v1, %v5564_v63  ;;  %1587 = vmatpush.bf16.msra.mxu0 %v5561_v13 }
 0x5a8   : > { %v1329_v16 = vmul.f32 %v7595_v3, %v7595_v3  ;;  %1601 = vmatpush.bf16.msrb.mxu1 %v5565_v2 }
 0x5aa   : > { %1332 = vadd.xlane.f32.xlu2 %v1329_v16  ;;  %v6427_v16 = vld [vmem:[%s10416_s19 + $0x6c] sm:$0xf]  ;;  %1588 = vmatpush.bf16.msra.mxu0 %v5545_v12  ;;  %s10419_s19 = sld [smem:[#allocation120_spill]] }
 0x5ab   : > { %v5569_v5 = vor.u32 %v6427_v16, %v5566_v4  ;;  %v1360_v4 = vperm.slane %v7544_v62, 2  ;;  %v6460_v62 = vld [vmem:[%s10418_s3 + $0x70] sm:$0xff] }
 0x5ac   : > { %1602 = vmatpush.bf16.msrb.mxu1 %v5549_v14  ;;  %v6469_v14 = vld [vmem:[%s10418_s3 + $0xb8] sm:$0xff] }
 0x5ad   : > { %1615 = vmatpush.bf16.msra.mxu2 %v5569_v5 }
 0x5ae   : > { %1589 = vmatpush.bf16.msra.mxu0 %v5529_v28  ;;  %v6465_v28 = vld [vmem:[%s10418_s3 + $0x98] sm:$0xff] }
 0x5b0   : > { %1603 = vmatpush.bf16.msrb.mxu1 %v5533_v29  ;;  %v6450_v29 = vld [vmem:[%s10418_s3 + $0x20] sm:$0xff] }
 0x5b1   : > { %1616 = vmatpush.bf16.msra.mxu2 %v5553_v18  ;;  %v6459_v18 = vld [vmem:[%s10418_s3 + $0x68] sm:$0xff]  ;;  %1960 = vmatpush.bf16.msrb.mxu3 %v6450_v29 }
 0x5b2   : > { %1590 = vmatpush.bf16.msra.mxu0 %v5513_v40 }
 0x5b4   : > { %1604 = vmatpush.bf16.msrb.mxu1 %v5517_v45  ;;  %v2410_v45 = vpop.xlane.xlu0 %2409 }
 0x5b5   : > { %1617 = vmatpush.bf16.msra.mxu2 %v5537_v35  ;;  %v6449_v35 = vld [vmem:[%s10418_s3 + $0x18] sm:$0xff] }
 0x5b6   : > { %1961 = vmatpush.bf16.msrb.mxu3 %v6449_v35 }
 0x5b8   : > { %1985 = vmatpush.bf16.msra.mxu1 %v6469_v14 }
 0x5b9   : > { %1618 = vmatpush.bf16.msra.mxu2 %v5521_v47  ;;  %v2411_v47 = vmul.f32 %v2410_v45, %v7381_v23 }
 0x5ba   : > { %1962 = vmatpush.bf16.msrb.mxu3 %v6448_v41 }
 0x5bd   : > { %1999 = vmatpush.bf16.msrb.mxu2 %v6477_v17  ;;  %v5912_v17 = vld [vmem:[%s10149_s14 + $0xa8] sm:$0xf] }
 0x5c1   : > { %2000 = vmatpush.bf16.msrb.mxu2 %v6476_v20 }
 0x5c5   : > { %2001 = vmatpush.bf16.msrb.mxu2 %v6475_v25 }
 0x5c9   : > { %2002 = vmatpush.bf16.msrb.mxu2 %v6474_v31 }
 0x5cd   : > { %2003 = vmatpush.bf16.msrb.mxu2 %v6473_v36 }
 0x5d1   : > { %2004 = vmatpush.bf16.msrb.mxu2 %v6472_v42 }
 0x615   : > { %v1331_v27 = vpop.xlane.xlu1 %1330 }
 0x616   : > { %v1334_v34 = vmul.f32 %v1331_v27, %v7381_v23  ;;  %v6457_v27 = vld [vmem:[%s10418_s3 + $0x58] sm:$0xff] }
 0x618   : > { %v1336_v44 = vadd.f32 1e-05, %v1334_v34  ;;  %v7872_v34 = vld [vmem:[%s10419_s19] sm:$0xf]  ;;  %s5234_s19 = sshll.u32 %s5230_s29, 4  ;;  %s5235_s19 = int_to_ptr.hbm [resolvable:$true] %s5234_s19 }
 0x619   : > { %v1402_v39 = vperm.slane %v7872_v34, 1  ;;  %v1403_v40 = vperm.slane %v7872_v34, 2  ;;  %s7041_s7 = sshra.s32 %s5235_s19, 4  ;;  %s7042_s7 = int_to_ptr.hbm [resolvable:$true] %s7041_s7 }
 0x61a   : > { %6718 = vrsqrt.f32 %v1336_v44  ;;  %vm1344_vm9 = vweird.f32 %v1336_v44  ;;  %p7048_p3 = scmp.lt.s32.totalorder %s7042_s7, %s10161_s26 }
 0x61d   : > { %v1333_v48 = vpop.xlane.xlu2 %1332 }
 0x61e   : > { %v1335_v50 = vmul.f32 %v1333_v48, %v7381_v23  ;;  %v6447_v48 = vld [vmem:[%s10418_s3 + $0x8] sm:$0xff] }
 0x61f   : > { %1963 = vmatpush.bf16.msrb.mxu3 %v6447_v48 }
 0x620   : > { %v6719_v51 = vpop.eup %6718  ;;  %v1337_v52 = vadd.f32 1e-05, %v1335_v50  ;;  %v6471_v50 = vld [vmem:[%s10418_s3 + $0xc8] sm:$0xff] }
 0x621   : > { %v1339_v53 = vmul.f32 %v6719_v51, %v1336_v44  ;;  %vm1345_vm8 = vweird.f32 %v6719_v51  ;;  %v6462_v44 = vld [vmem:[%s10418_s3 + $0x80] sm:$0xff]  ;;  %2005 = vmatpush.bf16.msrb.mxu2 %v6471_v50 }
 0x622   : > { %6720 = vrsqrt.f32 %v1337_v52  ;;  %vm1346_vm10 = vmor %vm1344_vm9, %vm1345_vm8  ;;  %vm1354_vm12 = vweird.f32 %v1337_v52 }
 0x623   : > { %v1340_v54 = vmul.f32 %v6719_v51, %v1339_v53 }
 0x625   : > { %v1341_v55 = vmul.f32 0.5, %v1340_v54  ;;  %v7912_v54 = vsub.f32 %v7801_v49, %v2411_v47  ;;  %v6470_v49 = vld [vmem:[%s10418_s3 + $0xc0] sm:$0xff] }
 0x626   : > { %2006 = vmatpush.bf16.msrb.mxu2 %v6470_v49 }
 0x627   : > { %v1342_v56 = vsub.f32 1.5, %v1341_v55 }
 0x628   : > { %v6721_v57 = vpop.eup %6720 }
 0x629   : > { %v1343_v59 = vmul.f32 %v6719_v51, %v1342_v56  ;;  %v1349_v61 = vmul.f32 %v6721_v57, %v1337_v52  ;;  %vm1355_vm11 = vweird.f32 %v6721_v57  ;;  %v1401_v56 = vperm.slane %v7872_v34, 0 }
 0x62a   : > { %vm1356_vm13 = vmor %vm1354_vm12, %vm1355_vm11  ;;  %vm2627_vm11 = vcmask 64512   ;;  %vm2644_vm12 = vcmask 1043456  }
 0x62b   : > { %v1350_v63 = vmul.f32 %v6721_v57, %v1349_v61  ;;  %v1347_v1 = vsel %vm1346_vm10, %v6719_v51, %v1343_v59  ;;  %v1404_v59 = vperm.slane %v7872_v34, 3 }
 0x62c   : > { %v1358_v16 = vmul.f32 %v1347_v1, %v7589_v0  ;;  %v6461_v0 = vld [vmem:[%s10418_s3 + $0x78] sm:$0xff]  ;;  %v2413_v1 = vmul.f32 %v7912_v54, %v7912_v54 }
 0x62d   : > { %v1351_v13 = vmul.f32 0.5, %v1350_v63  ;;  %1971 = vmatpush.bf16.msrb.mxu0 %v6461_v0  ;;  %v6446_v63 = vld [vmem:[%s10418_s3] sm:$0xff] }
 0x62e   : > { %v1361_v8 = vmul.f32 %v1360_v4, %v1358_v16  ;;  %2414 = vadd.xlane.f32.xlu1 %v2413_v1  ;;  %1964 = vmatpush.bf16.msrb.mxu3 %v6446_v63 }
 0x62f   : > { %v1352_v2 = vsub.f32 1.5, %v1351_v13 }
 0x630   : > { %v1364_v11 = vadd.f32 %v1363_v9, %v1361_v8 }
 0x631   : > { %v1353_v5 = vmul.f32 %v6721_v57, %v1352_v2  ;;  %1972 = vmatpush.bf16.msrb.mxu0 %v6460_v62 }
 0x633   : > { %v1357_v6 = vsel %vm1356_vm13, %v6721_v57, %v1353_v5 }
 0x634   : > { %v1359_v7 = vmul.f32 %v1357_v6, %v7595_v3  ;;  %v6468_v3 = vld [vmem:[%s10418_s3 + $0xb0] sm:$0xff] }
 0x635   : > { %1986 = vmatpush.bf16.msra.mxu1 %v6468_v3  ;;  %1973 = vmatpush.bf16.msrb.mxu0 %v6459_v18  ;;  %v6516_v18 = vld [vmem:[%s10149_s14 + $0xb0] sm:$0xf0] }
 0x636   : > { %v1362_v10 = vmul.f32 %v1360_v4, %v1359_v7 }
 0x638   : > { %v1365_v26 = vadd.f32 %v1363_v9, %v1362_v10 }
 0x639   : > { %1987 = vmatpush.bf16.msra.mxu1 %v6467_v30  ;;  %1974 = vmatpush.bf16.msrb.mxu0 %v6458_v21  ;;  %v7956_v21 = vor.u32 %v6516_v18, %v5912_v17 }
 0x63a   : > { %v1398_v12 = vpack.c.bf16 %v1365_v26, %v1364_v11 }
 0x63c   : > { %1577 = vmatmul.bf16.vlgmr.msra.gmra.mxu3 %v1398_v12  ;;  %1591 = vmatmul.bf16.vlgmr.msra.gmra.mxu0 %v1398_v12 }
 0x63d   : > { %1605 = vmatmul.bf16.vlgmr.msrb.gmra.mxu1 %v1398_v12  ;;  %1619 = vmatmul.bf16.vlgmr.msra.gmra.mxu2 %v1398_v12 }
 0x63e   : > { %1988 = vmatpush.bf16.msra.mxu1 %v6466_v22  ;;  %1975 = vmatpush.bf16.msrb.mxu0 %v6457_v27  ;;  %v6515_v22 = vld [vmem:[%s10149_s14 + $0xac] sm:$0xf] }
 0x642   : > { %1989 = vmatpush.bf16.msra.mxu1 %v6465_v28  ;;  %1976 = vmatpush.bf16.msrb.mxu0 %v6456_v32  ;;  %v7965_v28 = vor.u32 %v6515_v22, %v5914_v24 }
 0x644   : > { %10420 = vst [vmem:[#allocation20_spill] sm:$0xff] %v7965_v28  ;;  %2575 = vmatpush.bf16.msra.mxu2 %v7965_v28 }
 0x646   : > { %1990 = vmatpush.bf16.msra.mxu1 %v6464_v33  ;;  %1977 = vmatpush.bf16.msrb.mxu0 %v6455_v37 }
 0x64a   : > { %1991 = vmatpush.bf16.msra.mxu1 %v6463_v38  ;;  %1978 = vmatpush.bf16.msrb.mxu0 %v6454_v43 }
 0x64e   : > { %1992 = vmatpush.bf16.msra.mxu1 %v6462_v44 }
 0x652   : > { %2562 = vmatpush.bf16.msrb.mxu1 %v7956_v21 }
 0x6b9   : > { %v1592_v46 = vpop.f32.mrf.mxu0 }
 0x6ba   : > { %v7907_v51 = vadd.f32 %v1592_v46, %v1402_v39  ;;  %v1606_v52 = vpop.f32.mrf.mxu1 }
 0x6bb   : > { %v7909_v53 = vadd.f32 %v1606_v52, %v1403_v40 }
 0x6bc   : > { %v1626_v55 = vmul.f32 %v7907_v51, %v7907_v51 }
 0x6bd   : > { %v1627_v57 = vmul.f32 %v7909_v53, %v7909_v53 }
 0x6be   : > { %v1634_v61 = vmul.f32 %v1626_v55, %v7907_v51 }
 0x6bf   : > { %v1635_v13 = vmul.f32 %v1627_v57, %v7909_v53  ;;  %v1578_v2 = vpop.f32.mrf.mxu3 }
 0x6c0   : > { %v1642_v16 = vmul.f32 0.044715, %v1634_v61  ;;  %v7930_v4 = vadd.f32 %v1578_v2, %v1401_v56  ;;  %v1620_v5 = vpop.f32.mrf.mxu2 }
 0x6c1   : > { %v1643_v6 = vmul.f32 0.044715, %v1635_v13  ;;  %v7932_v7 = vadd.f32 %v1620_v5, %v1404_v59  ;;  %v1594_v8 = vpop.f32.mrf.mxu0 }
 0x6c2   : > { %v1650_v9 = vadd.f32 %v1642_v16, %v7907_v51  ;;  %v1625_v10 = vmul.f32 %v7930_v4, %v7930_v4  ;;  %v7937_v11 = vadd.f32 %v1594_v8, %v1402_v39  ;;  %v1608_v26 = vpop.f32.mrf.mxu1 }
 0x6c3   : > { %v1651_v12 = vadd.f32 %v1643_v6, %v7909_v53  ;;  %v1628_v0 = vmul.f32 %v7932_v7, %v7932_v7  ;;  %v7942_v14 = vadd.f32 %v1608_v26, %v1403_v40 }
 0x6c4   : > { %v1658_v62 = vmul.f32 0.7978846, %v1650_v9  ;;  %v1633_v3 = vmul.f32 %v1625_v10, %v7930_v4  ;;  %v1630_v15 = vmul.f32 %v7937_v11, %v7937_v11 }
 0x6c5   : > { %v1659_v30 = vmul.f32 0.7978846, %v1651_v12  ;;  %v1636_v19 = vmul.f32 %v1628_v0, %v7932_v7  ;;  %v1631_v20 = vmul.f32 %v7942_v14, %v7942_v14 }
 0x6c6   : > { %v1641_v25 = vmul.f32 0.044715, %v1633_v3  ;;  %v1638_v27 = vmul.f32 %v1630_v15, %v7937_v11  ;;  %6722 = vtanh.f32 %v1658_v62 }
 0x6c7   : > { %v1644_v29 = vmul.f32 0.044715, %v1636_v19  ;;  %v1639_v31 = vmul.f32 %v1631_v20, %v7942_v14  ;;  %v1580_v32 = vpop.f32.mrf.mxu3  ;;  %6724 = vtanh.f32 %v1659_v30 }
 0x6c8   : > { %v1649_v33 = vadd.f32 %v1641_v25, %v7930_v4  ;;  %v1646_v34 = vmul.f32 0.044715, %v1638_v27  ;;  %v1581_v35 = vadd.f32 %v1580_v32, %v1401_v56  ;;  %v1622_v36 = vpop.f32.mrf.mxu2 }
 0x6c9   : > { %v1652_v37 = vadd.f32 %v1644_v29, %v7932_v7  ;;  %v1647_v38 = vmul.f32 0.044715, %v1639_v31  ;;  %v1623_v39 = vadd.f32 %v1622_v36, %v1404_v59 }
 0x6ca   : > { %v1657_v40 = vmul.f32 0.7978846, %v1649_v33  ;;  %v1654_v41 = vadd.f32 %v1646_v34, %v7937_v11  ;;  %v1629_v42 = vmul.f32 %v1581_v35, %v1581_v35 }
 0x6cb   : > { %v1660_v43 = vmul.f32 0.7978846, %v1652_v37  ;;  %v1655_v44 = vadd.f32 %v1647_v38, %v7942_v14  ;;  %v1632_v45 = vmul.f32 %v1623_v39, %v1623_v39  ;;  %v6513_v38 = vld [vmem:[%s10149_s14 + $0x98] sm:$0xf0] }
 0x6cc   : > { %6726 = vtanh.f32 %v1657_v40  ;;  %v1662_v46 = vmul.f32 0.7978846, %v1654_v41  ;;  %v1637_v47 = vmul.f32 %v1629_v42, %v1581_v35  ;;  %v6723_v52 = vpop.eup %6722  ;;  %v2415_v40 = vpop.xlane.xlu1 %2414 }
 0x6cd   : > { %6728 = vtanh.f32 %v1660_v43  ;;  %v1663_v48 = vmul.f32 0.7978846, %v1655_v44  ;;  %v1640_v50 = vmul.f32 %v1632_v45, %v1623_v39  ;;  %v6725_v56 = vpop.eup %6724  ;;  %v1674_v61 = vadd.f32 1.0, %v6723_v52  ;;  %v5888_v43 = vld [vmem:[%s10149_s14 + $0x78] sm:$0xf] }
 0x6ce   : > { %6730 = vtanh.f32 %v1662_v46  ;;  %v1645_v55 = vmul.f32 0.044715, %v1637_v47  ;;  %v1675_v1 = vadd.f32 1.0, %v6725_v56  ;;  %v2416_v41 = vmul.f32 %v2415_v40, %v7381_v23  ;;  %v6510_v44 = vld [vmem:[%s10149_s14 + $0x80] sm:$0xf0] }
 0x6cf   : > { %6732 = vtanh.f32 %v1663_v48  ;;  %v1648_v57 = vmul.f32 0.044715, %v1640_v50  ;;  %v1682_v8 = vmul.f32 0.5, %v1674_v61  ;;  %v6509_v45 = vld [vmem:[%s10149_s14 + $0x7c] sm:$0xf]  ;;  %v8008_v46 = vor.u32 %v6510_v44, %v5888_v43 }
 0x6d0   : > { %v1653_v59 = vadd.f32 %v1645_v55, %v1581_v35  ;;  %v1683_v10 = vmul.f32 0.5, %v1675_v1  ;;  %v2417_v42 = vadd.f32 1e-05, %v2416_v41  ;;  %v5890_v47 = vld [vmem:[%s10149_s14 + $0x84] sm:$0xf0] }
 0x6d1   : > { %v1656_v63 = vadd.f32 %v1648_v57, %v1623_v39  ;;  %v1690_v15 = vmul.f32 %v1682_v8, %v7907_v51  ;;  %v5876_v48 = vld [vmem:[%s10149_s14 + $0x60] sm:$0xf]  ;;  %v6507_v50 = vld [vmem:[%s10149_s14 + $0x68] sm:$0xf0]  ;;  %v8019_v52 = vor.u32 %v6509_v45, %v5890_v47  ;;  %v6506_v55 = vld [vmem:[%s10149_s14 + $0x64] sm:$0xf] }
 0x6d2   : > { %v6727_v49 = vpop.eup %6726  ;;  %v1661_v13 = vmul.f32 0.7978846, %v1653_v59  ;;  %v1691_v30 = vmul.f32 %v1683_v10, %v7909_v53  ;;  %v5878_v56 = vld [vmem:[%s10149_s14 + $0x6c] sm:$0xf0]  ;;  %v8028_v59 = vor.u32 %v6507_v50, %v5876_v48  ;;  %vm2424_vm14 = vweird.f32 %v2417_v42  ;;  %v6702_v43 = vld [vmem:[%s10146_s11] ss:$0 sm:$0xff] }
 0x6d3   : > { %v6729_v2 = vpop.eup %6728  ;;  %v1664_v16 = vmul.f32 0.7978846, %v1656_v63  ;;  %v1673_v12 = vadd.f32 1.0, %v6727_v49  ;;  %v8031_v63 = vor.u32 %v6506_v55, %v5878_v56 }
 0x6d4   : > { %v6731_v5 = vpop.eup %6730  ;;  %6734 = vtanh.f32 %v1661_v13  ;;  %v1676_v62 = vadd.f32 1.0, %v6729_v2  ;;  %v5864_v13 = vld [vmem:[%s10149_s14 + $0x48] sm:$0xf]  ;;  %v6504_v2 = vld [vmem:[%s10149_s14 + $0x50] sm:$0xf0] }
 0x6d5   : > { %v6733_v6 = vpop.eup %6732  ;;  %6736 = vtanh.f32 %v1664_v16  ;;  %v1678_v9 = vadd.f32 1.0, %v6731_v5  ;;  %v1681_v22 = vmul.f32 0.5, %v1673_v12  ;;  %v8041_v16 = vor.u32 %v6504_v2, %v5864_v13  ;;  %v6503_v5 = vld [vmem:[%s10149_s14 + $0x4c] sm:$0xf]  ;;  %v6501_v12 = vld [vmem:[%s10149_s14 + $0x38] sm:$0xf0] }
 0x6d6   : > { %v1679_v26 = vadd.f32 1.0, %v6733_v6  ;;  %v1684_v27 = vmul.f32 0.5, %v1676_v62  ;;  %6738 = vrsqrt.f32 %v2417_v42  ;;  %v5866_v6 = vld [vmem:[%s10149_s14 + $0x54] sm:$0xf0]  ;;  %v6492_v13 = vld [vmem:[%s10147_s12 + $0x74] sm:$0xf] }
 0x6d7   : > { %v1686_v0 = vmul.f32 0.5, %v1678_v9  ;;  %v1689_v51 = vmul.f32 %v1681_v22, %v7930_v4  ;;  %v6512_v4 = vld [vmem:[%s10149_s14 + $0x94] sm:$0xf]  ;;  %v8049_v9 = vor.u32 %v6503_v5, %v5866_v6  ;;  %v6490_v5 = vld [vmem:[%s10147_s12 + $0x64] sm:$0xf] }
 0x6d8   : > { %v1687_v3 = vmul.f32 0.5, %v1679_v26  ;;  %v5852_v26 = vld [vmem:[%s10149_s14 + $0x30] sm:$0xf] }
 0x6d9   : > { %v1694_v17 = vmul.f32 %v1686_v0, %v7937_v11  ;;  %v1692_v11 = vmul.f32 %v1684_v27, %v7932_v7  ;;  %v5902_v7 = vld [vmem:[%s10149_s14 + $0x9c] sm:$0xf0]  ;;  %v6500_v0 = vld [vmem:[%s10149_s14 + $0x34] sm:$0xf]  ;;  %v8062_v62 = vor.u32 %v6501_v12, %v5852_v26  ;;  %v6486_v12 = vld [vmem:[%s10147_s12 + $0x44] sm:$0xf] }
 0x6da   : > { %v6735_v18 = vpop.eup %6734  ;;  %v1695_v19 = vmul.f32 %v1687_v3, %v7942_v14  ;;  %v5900_v14 = vld [vmem:[%s10149_s14 + $0x90] sm:$0xf]  ;;  %v5854_v3 = vld [vmem:[%s10149_s14 + $0x3c] sm:$0xf0] }
 0x6db   : > { %v6737_v20 = vpop.eup %6736  ;;  %v1762_v24 = vpack.c.bf16 %v1694_v17, %v1690_v15  ;;  %v1677_v25 = vadd.f32 1.0, %v6735_v18  ;;  %v8067_v17 = vor.u32 %v6500_v0, %v5854_v3  ;;  %v5798_v0 = vld [vmem:[%s10147_s12 + $0x48] sm:$0xf0] }
 0x6dc   : > { %v1763_v29 = vpack.c.bf16 %v1695_v19, %v1691_v30  ;;  %v1680_v31 = vadd.f32 1.0, %v6737_v20  ;;  %v6739_v57 = vpop.eup %6738  ;;  %v5840_v30 = vld [vmem:[%s10149_s14 + $0x18] sm:$0xf]  ;;  %v6498_v19 = vld [vmem:[%s10149_s14 + $0x20] sm:$0xf0]  ;;  %v5801_v3 = vor.u32 %v6486_v12, %v5798_v0 }
 0x6dd   : > { %1979 = vmatmul.bf16.vlgmr.msrb.gmra.mxu0 %v1762_v24  ;;  %v1685_v32 = vmul.f32 0.5, %v1677_v25  ;;  %v2419_v61 = vmul.f32 %v6739_v57, %v2417_v42  ;;  %vm2425_vm15 = vweird.f32 %v6739_v57  ;;  %v6497_v20 = vld [vmem:[%s10149_s14 + $0x1c] sm:$0xf]  ;;  %v8081_v22 = vor.u32 %v6498_v19, %v5840_v30  ;;  %v8086_v24 = vld [vmem:[#allocation4] sm:$0xff]  ;;  %v5772_v0 = vld [vmem:[%s10147_s12 + $0x10] sm:$0xf] }
 0x6de   : > { %1993 = vmatmul.bf16.vlgmr.msra.gmra.mxu1 %v1763_v29  ;;  %v1688_v33 = vmul.f32 0.5, %v1680_v31  ;;  %vm2426_vm0 = vmor %vm2424_vm14, %vm2425_vm15  ;;  %v2429_v27 = vperm.slane %v8086_v24, 0  ;;  %v5828_v29 = vld [vmem:[%s10149_s14] sm:$0xf]  ;;  %v6495_v31 = vld [vmem:[%s10149_s14 + $0x8] sm:$0xf0] }
 0x6df   : > { %v1693_v34 = vmul.f32 %v1685_v32, %v1581_v35  ;;  %v7989_v35 = vor.u32 %v6513_v38, %v5900_v14  ;;  %v2420_v49 = vmul.f32 %v6739_v57, %v2419_v61  ;;  %10422 = vst [vmem:[#allocation22_spill] sm:$0xff] %v8081_v22  ;;  %v6494_v32 = vld [vmem:[%s10149_s14 + $0x4] sm:$0xf]  ;;  %v5790_v30 = vld [vmem:[%s10147_s12 + $0x38] sm:$0xf0] }
 0x6e0   : > { %v1696_v36 = vmul.f32 %v1688_v33, %v1623_v39  ;;  %v7994_v39 = vor.u32 %v6512_v4, %v5902_v7 }
 0x6e1   : > { %v1761_v53 = vpack.c.bf16 %v1693_v34, %v1689_v51  ;;  %2563 = vmatpush.bf16.msrb.mxu1 %v7989_v35  ;;  %v2421_v1 = vmul.f32 0.5, %v2420_v49  ;;  %v8102_v51 = vor.u32 %v6495_v31, %v5828_v29  ;;  %v5830_v34 = vld [vmem:[%s10149_s14 + $0xc] sm:$0xf0]  ;;  %v6493_v31 = vld [vmem:[%s10147_s12 + $0x74] sm:$0xf0] }
 0x6e2   : > { %v1764_v37 = vpack.c.bf16 %v1696_v36, %v1692_v11  ;;  %10421 = vst [vmem:[#allocation21_spill] sm:$0xff] %v7994_v39  ;;  %2576 = vmatpush.bf16.msra.mxu2 %v7994_v39  ;;  %v2431_v11 = vperm.slane %v8086_v24, 1  ;;  %v8108_v36 = vor.u32 %v6494_v32, %v5830_v34  ;;  %v5820_v29 = vld [vmem:[%s10147_s12 + $0x70] sm:$0xf]  ;;  %v5812_v32 = vld [vmem:[%s10147_s12 + $0x60] sm:$0xf] }
 0x6e3   : > { %1965 = vmatmul.bf16.vlgmr.msrb.gmra.mxu3 %v1761_v53  ;;  %v2422_v8 = vsub.f32 1.5, %v2421_v1  ;;  %10423 = vst [vmem:[#allocation23_spill] sm:$0xff] %v8102_v51  ;;  %v5774_v34 = vld [vmem:[%s10147_s12 + $0x18] sm:$0xf0] }
 0x6e4   : > { %2007 = vmatmul.bf16.vlgmr.msrb.gmra.mxu2 %v1764_v37 }
 0x6e5   : > { %2564 = vmatpush.bf16.msrb.mxu1 %v8008_v46  ;;  %v2423_v10 = vmul.f32 %v6739_v57, %v2422_v8  ;;  %v6488_v8 = vld [vmem:[%s10147_s12 + $0x54] sm:$0xf] }
 0x6e6   : > { %2577 = vmatpush.bf16.msra.mxu2 %v8019_v52 }
 0x6e7   : > { %v2427_v15 = vsel %vm2426_vm0, %v6739_v57, %v2423_v10  ;;  %v5806_v10 = vld [vmem:[%s10147_s12 + $0x58] sm:$0xf0] }
 0x6e8   : > { %v2428_v18 = vmul.f32 %v2427_v15, %v7912_v54  ;;  %v5842_v54 = vld [vmem:[%s10149_s14 + $0x24] sm:$0xf0]  ;;  %v5809_v26 = vor.u32 %v6488_v8, %v5806_v10  ;;  %v5780_v10 = vld [vmem:[%s10147_s12 + $0x20] sm:$0xf] }
 0x6e9   : > { %2565 = vmatpush.bf16.msrb.mxu1 %v8028_v59  ;;  %v8088_v25 = vor.u32 %v6497_v20, %v5842_v54  ;;  %v6482_v20 = vld [vmem:[%s10147_s12 + $0x24] sm:$0xf]  ;;  %v5782_v54 = vld [vmem:[%s10147_s12 + $0x28] sm:$0xf0] }
 0x6ea   : > { %2578 = vmatpush.bf16.msra.mxu2 %v8031_v63  ;;  %v2430_v33 = vmul.f32 %v2429_v27, %v2428_v18  ;;  %v6484_v18 = vld [vmem:[%s10147_s12 + $0x34] sm:$0xf]  ;;  %v5785_v27 = vor.u32 %v6482_v20, %v5782_v54  ;;  %v5920_v54 = vld [vmem:[%s10149_s14 + $0xb0] sm:$0xf] }
 0x6eb   : > { %v5793_v19 = vor.u32 %v6484_v18, %v5790_v30  ;;  %v5764_v30 = vld [vmem:[%s10147_s12] sm:$0xf] }
 0x6ec   : > { %v2432_v53 = vadd.f32 %v2431_v11, %v2430_v33  ;;  %v6480_v33 = vld [vmem:[%s10147_s12 + $0x14] sm:$0xf]  ;;  %v5821_v11 = vor.u32 %v6493_v31, %v5820_v29  ;;  %v5908_v31 = vld [vmem:[%s10149_s14 + $0x98] sm:$0xf] }
 0x6ed   : > { %2566 = vmatpush.bf16.msrb.mxu1 %v8041_v16 }
 0x6ee   : > { %2579 = vmatpush.bf16.msra.mxu2 %v8049_v9  ;;  %v8112_v37 = vpack.c.bf16 %v2432_v53, %v2432_v53  ;;  %v6491_v53 = vld [vmem:[%s10147_s12 + $0x64] sm:$0xf0]  ;;  %2164 = vmatpush.bf16.msra.mxu3 %v5821_v11  ;;  %v6511_v11 = vld [vmem:[%s10149_s14 + $0x88] sm:$0xf0] }
 0x6f1   : > { %2567 = vmatpush.bf16.msrb.mxu1 %v8062_v62 }
 0x6f2   : > { %2580 = vmatpush.bf16.msra.mxu2 %v8067_v17 }
 0x6f5   : > { %2568 = vmatpush.bf16.msrb.mxu1 %v8081_v22 }
 0x6f6   : > { %2581 = vmatpush.bf16.msra.mxu2 %v8088_v25 }
 0x6f9   : > { %2569 = vmatpush.bf16.msrb.mxu1 %v8102_v51 }
 0x6fa   : > { %2582 = vmatpush.bf16.msra.mxu2 %v8108_v36 }
 0x6fc   : > { %2570 = vmatmul.bf16.vlgmr.msrb.gmra.mxu1 %v8112_v37 }
 0x6fd   : > { %2583 = vmatmul.bf16.vlgmr.msra.gmra.mxu2 %v8112_v37 }
 0x75a   : > { %v1980_v14 = vpop.f32.mrf.mxu0 }
 0x75b   : > { %v1994_v38 = vpop.f32.mrf.mxu1 }
 0x762   : > { %v1982_v45 = vpop.f32.mrf.mxu0 }
 0x763   : > { %v1996_v55 = vpop.f32.mrf.mxu1 }
 0x766   : > { %v1966_v4 = vpop.f32.mrf.mxu3 }
 0x767   : > { %v1981_v7 = vadd.f32 %v1980_v14, %v1966_v4  ;;  %v2008_v40 = vpop.f32.mrf.mxu2  ;;  %v5777_v4 = vor.u32 %v6480_v33, %v5774_v34  ;;  %v5896_v34 = vld [vmem:[%s10149_s14 + $0x80] sm:$0xf] }
 0x769   : > { %v1995_v41 = vadd.f32 %v1994_v38, %v1981_v7  ;;  %v5813_v38 = vor.u32 %v6491_v53, %v5812_v32  ;;  %v6514_v32 = vld [vmem:[%s10149_s14 + $0xa0] sm:$0xf0]  ;;  %v8256_v53 = vor.u32 %v6511_v11, %v5896_v34 }
 0x76a   : > { %v8247_v33 = vor.u32 %v6514_v32, %v5908_v31  ;;  %v6838_v31 = vld [vmem:[%s10414_s27] sm:$0x3f] }
 0x76b   : > { %v2009_v42 = vadd.f32 %v2008_v40, %v1995_v41  ;;  %v6478_v40 = vld [vmem:[%s10147_s12 + $0x4] sm:$0xf]  ;;  %v5766_v41 = vld [vmem:[%s10147_s12 + $0x8] sm:$0xf0]  ;;  %2165 = vmatpush.bf16.msra.mxu3 %v5813_v38  ;;  %v6508_v38 = vld [vmem:[%s10149_s14 + $0x70] sm:$0xf0] }
 0x76c   : > { %v2061_v32 = vperm.slane %v6838_v31, 4 }
 0x76d   : > { %v2013_v44 = vadd.f32 %v2009_v42, %v7580_v58  ;;  %v5822_v58 = vld [vmem:[%s10147_s12 + $0x78] sm:$0xf0]  ;;  %v5769_v42 = vor.u32 %v6478_v40, %v5766_v41 }
 0x76e   : > { %v1968_v47 = vpop.f32.mrf.mxu3  ;;  %v5825_v2 = vor.u32 %v6492_v13, %v5822_v58  ;;  %v5804_v13 = vld [vmem:[%s10147_s12 + $0x50] sm:$0xf] }
 0x76f   : > { %v1983_v48 = vadd.f32 %v1982_v45, %v1968_v47  ;;  %v2019_v50 = vadd.f32 %v6702_v43, %v2013_v44  ;;  %v2010_v57 = vpop.f32.mrf.mxu2 }
 0x770   : > { %2178 = vmatpush.bf16.msra.mxu0 %v5825_v2  ;;  %v5796_v2 = vld [vmem:[%s10147_s12 + $0x40] sm:$0xf] }
 0x771   : > { %v1997_v56 = vadd.f32 %v1996_v55, %v1983_v48  ;;  %2021 = vadd.xlane.f32.xlu2 %v2019_v50 }
 0x773   : > { %v2011_v61 = vadd.f32 %v2010_v57, %v1997_v56 }
 0x775   : > { %v2014_v49 = vadd.f32 %v2011_v61, %v7584_v60  ;;  %v5814_v60 = vld [vmem:[%s10147_s12 + $0x68] sm:$0xf0] }
 0x776   : > { %v5817_v6 = vor.u32 %v6490_v5, %v5814_v60  ;;  %v5788_v60 = vld [vmem:[%s10147_s12 + $0x30] sm:$0xf] }
 0x777   : > { %v2020_v1 = vadd.f32 %v6702_v43, %v2014_v49 }
 0x778   : > { %2179 = vmatpush.bf16.msra.mxu0 %v5817_v6  ;;  %v6485_v6 = vld [vmem:[%s10147_s12 + $0x34] sm:$0xf0] }
 0x779   : > { %2023 = vadd.xlane.f32.xlu0 %v2020_v1  ;;  %v8145_v15 = vpop.f32.mrf.mxu1  ;;  %v5789_v8 = vor.u32 %v6485_v6, %v5788_v60  ;;  %v5836_v6 = vld [vmem:[%s10149_s14 + $0x8] sm:$0xf] }
 0x77c   : > { %2180 = vmatpush.bf16.msra.mxu0 %v5809_v26  ;;  %v6483_v26 = vld [vmem:[%s10147_s12 + $0x24] sm:$0xf0] }
 0x77d   : > { %v5781_v12 = vor.u32 %v6483_v26, %v5780_v10 }
 0x780   : > { %2181 = vmatpush.bf16.msra.mxu0 %v5801_v3  ;;  %v2584_v14 = vpop.f32.mrf.mxu2  ;;  %v6481_v3 = vld [vmem:[%s10147_s12 + $0x14] sm:$0xf0] }
 0x781   : > { %v2573_v7 = vpop.f32.mrf.mxu1  ;;  %v8183_v43 = vpack.c.bf16 %v2584_v14, %v2584_v14  ;;  %v5773_v18 = vor.u32 %v6481_v3, %v5772_v0  ;;  %v5884_v14 = vld [vmem:[%s10149_s14 + $0x68] sm:$0xf] }
 0x782   : > { %v8266_v40 = vor.u32 %v6508_v38, %v5884_v14 }
 0x783   : > { %10424 = vst [vmem:[#allocation24_spill] sm:$0xff] %v8183_v43 }
 0x784   : > { %2182 = vmatpush.bf16.msra.mxu0 %v5793_v19  ;;  %v6479_v19 = vld [vmem:[%s10147_s12 + $0x4] sm:$0xf0] }
 0x785   : > { %v5765_v20 = vor.u32 %v6479_v19, %v5764_v30 }
 0x788   : > { %2183 = vmatpush.bf16.msra.mxu0 %v5785_v27  ;;  %v2586_v44 = vpop.f32.mrf.mxu2  ;;  %v6517_v27 = vld [vmem:[%s10149_s14 + $0xb8] sm:$0xf0] }
 0x789   : > { %v8238_v29 = vor.u32 %v6517_v27, %v5920_v54  ;;  %v6505_v44 = vld [vmem:[%s10149_s14 + $0x58] sm:$0xf0] }
 0x78c   : > { %2184 = vmatpush.bf16.msra.mxu0 %v5777_v4 }
 0x790   : > { %2185 = vmatpush.bf16.msra.mxu0 %v5769_v42  ;;  %v5872_v42 = vld [vmem:[%s10149_s14 + $0x50] sm:$0xf] }
 0x794   : > { %2619 = vmatpush.bf16.xpose.msrb.mxu0 %v8183_v43 }
 0x7e4   : > { %v2022_v45 = vpop.xlane.xlu2 %2021 }
 0x7e5   : > { %v2025_v47 = vmul.f32 %v2022_v45, %v7381_v23  ;;  %v8275_v45 = vor.u32 %v6505_v44, %v5872_v42 }
 0x7e7   : > { %v8187_v48 = vsub.f32 %v2019_v50, %v2025_v47  ;;  %v6489_v50 = vld [vmem:[%s10147_s12 + $0x54] sm:$0xf0] }
 0x7e8   : > { %v5805_v58 = vor.u32 %v6489_v50, %v5804_v13  ;;  %v5860_v47 = vld [vmem:[%s10149_s14 + $0x38] sm:$0xf]  ;;  %v5848_v13 = vld [vmem:[%s10149_s14 + $0x20] sm:$0xf]  ;;  %v6499_v50 = vld [vmem:[%s10149_s14 + $0x28] sm:$0xf0] }
 0x7e9   : > { %v2029_v55 = vmul.f32 %v8187_v48, %v8187_v48 }
 0x7ea   : > { %2166 = vmatpush.bf16.msra.mxu3 %v5805_v58 }
 0x7eb   : > { %2031 = vadd.xlane.f32.xlu1 %v2029_v55  ;;  %v6502_v55 = vld [vmem:[%s10149_s14 + $0x40] sm:$0xf0] }
 0x7ec   : > { %v2024_v56 = vpop.xlane.xlu0 %2023 }
 0x7ed   : > { %v2026_v57 = vmul.f32 %v2024_v56, %v7381_v23 }
 0x7ef   : > { %v8192_v61 = vsub.f32 %v2020_v1, %v2026_v57  ;;  %v6487_v1 = vld [vmem:[%s10147_s12 + $0x44] sm:$0xf0] }
 0x7f0   : > { %v5797_v5 = vor.u32 %v6487_v1, %v5796_v2 }
 0x7f1   : > { %v2030_v49 = vmul.f32 %v8192_v61, %v8192_v61 }
 0x7f2   : > { %2167 = vmatpush.bf16.msra.mxu3 %v5797_v5  ;;  %v8294_v5 = vor.u32 %v6499_v50, %v5848_v13  ;;  %v8322_v13 = vstv %s838_s28  ;;  %s823_s28 = sand.u32 1, %s7091_s4  }
 0x7f3   : > { %2033 = vadd.xlane.f32.xlu2 %v2030_v49  ;;  %v8285_v49 = vor.u32 %v6502_v55, %v5860_v47  ;;  %v2601_v55 = vlaneseq  ;;  %10427 = vst [vmem:[#allocation27_spill] sm:$0xff] %v8322_v13  ;;  %s824_s1 = scalar_lea.vmem [#allocation10], %s823_s28  ;;  %s5222_s9 = scalar_lea.sflag [#allocation6], %s823_s28 }
 0x7f6   : > { %2168 = vmatpush.bf16.msra.mxu3 %v5789_v8  ;;  %v6496_v8 = vld [vmem:[%s10149_s14 + $0x10] sm:$0xf0] }
 0x7f7   : > { %v8303_v26 = vor.u32 %v6496_v8, %v5836_v6 }
 0x7f9   : > { %10425 = vst [vmem:[#allocation25_spill] sm:$0xff] %v8303_v26 }
 0x7fa   : > { %2169 = vmatpush.bf16.msra.mxu3 %v5781_v12 }
 0x7fe   : > { %2170 = vmatpush.bf16.msra.mxu3 %v5773_v18 }
 0x802   : > { %2171 = vmatpush.bf16.msra.mxu3 %v5765_v20 }
 0x806   : > { %2588 = vmatpush.bf16.msrb.mxu3 %v8238_v29 }
 0x80a   : > { %2589 = vmatpush.bf16.msrb.mxu3 %v8247_v33 }
 0x80e   : > { %2590 = vmatpush.bf16.msrb.mxu3 %v8256_v53 }
 0x812   : > { %2591 = vmatpush.bf16.msrb.mxu3 %v8266_v40 }
 0x816   : > { %2592 = vmatpush.bf16.msrb.mxu3 %v8275_v45 }
 0x81a   : > { %2593 = vmatpush.bf16.msrb.mxu3 %v8285_v49 }
 0x81e   : > { %2594 = vmatpush.bf16.msrb.mxu3 %v8294_v5 }
 0x822   : > { %2595 = vmatpush.bf16.msrb.mxu3 %v8303_v26 }
 0x85e   : > { %v2032_v4 = vpop.xlane.xlu1 %2031 }
 0x85f   : > { %v2035_v7 = vmul.f32 %v2032_v4, %v7381_v23  ;;  %v2064_v4 = vperm.slane %v6838_v31, 5 }
 0x861   : > { %v2037_v41 = vadd.f32 1e-05, %v2035_v7 }
 0x863   : > { %6740 = vrsqrt.f32 %v2037_v41  ;;  %vm2045_vm2 = vweird.f32 %v2037_v41 }
 0x866   : > { %v2034_v56 = vpop.xlane.xlu2 %2033 }
 0x867   : > { %v2036_v57 = vmul.f32 %v2034_v56, %v7381_v23  ;;  %v8318_v56 = vshrl.u32 %v2601_v55, 7 }
 0x869   : > { %v6741_v58 = vpop.eup %6740  ;;  %v2038_v2 = vadd.f32 1e-05, %v2036_v57  ;;  %10426 = vst [vmem:[#allocation26_spill] sm:$0xff] %v8318_v56  ;;  %v8320_v57 = vand.u32 127, %v2601_v55 }
 0x86a   : > { %v2040_v1 = vmul.f32 %v6741_v58, %v2037_v41  ;;  %vm2046_vm1 = vweird.f32 %v6741_v58 }
 0x86b   : > { %6742 = vrsqrt.f32 %v2038_v2  ;;  %vm2047_vm3 = vmor %vm2045_vm2, %vm2046_vm1  ;;  %vm2055_vm5 = vweird.f32 %v2038_v2  ;;  %vm2605_vm8 = vcmp.le.s32.totalorder %v8320_v57, %v8318_v56  ;;  %vm2607_vm9 = vcmp.ge.s32.totalorder %v8320_v57, %v8322_v13  ;;  %v6543_v56 = vld [vmem:[%s10153_s18 + $0xc] sm:$0xf] }
 0x86c   : > { %v2041_v60 = vmul.f32 %v6741_v58, %v2040_v1  ;;  %vm2608_vm10 = vmand %vm2605_vm8, %vm2607_vm9  ;;  %v10179_v1 = vmov -1e+30   ;;  %vm3553_vm8 = vcmask 1040384  }
 0x86e   : > { %v2042_v10 = vmul.f32 0.5, %v2041_v60  ;;  %v2609_v60 = vsel %vm2608_vm10, 0.0, %v10179_v1 }
 0x870   : > { %v2043_v12 = vsub.f32 1.5, %v2042_v10 }
 0x871   : > { %v6743_v0 = vpop.eup %6742 }
 0x872   : > { %v2044_v3 = vmul.f32 %v6741_v58, %v2043_v12  ;;  %v2050_v18 = vmul.f32 %v6743_v0, %v2038_v2  ;;  %vm2056_vm4 = vweird.f32 %v6743_v0 }
 0x873   : > { %vm2057_vm6 = vmor %vm2055_vm5, %vm2056_vm4 }
 0x874   : > { %v2051_v30 = vmul.f32 %v6743_v0, %v2050_v18  ;;  %v2048_v19 = vsel %vm2047_vm3, %v6741_v58, %v2044_v3  ;;  %vm3451_vm3 = vcmask 1047559  }
 0x875   : > { %v2059_v27 = vmul.f32 %v2048_v19, %v8187_v48  ;;  %v2610_v48 = vpack.c.bf16 %v8145_v15, %v8145_v15 }
 0x876   : > { %v2052_v20 = vmul.f32 0.5, %v2051_v30 }
 0x877   : > { %v2062_v38 = vmul.f32 %v2061_v32, %v2059_v27 }
 0x878   : > { %v2053_v54 = vsub.f32 1.5, %v2052_v20 }
 0x879   : > { %v2065_v41 = vadd.f32 %v2064_v4, %v2062_v38  ;;  %v6521_v38 = vld [vmem:[%s10150_s15 + $0x18] sm:$0xff] }
 0x87a   : > { %v2054_v34 = vmul.f32 %v6743_v0, %v2053_v54 }
 0x87c   : > { %v2058_v11 = vsel %vm2057_vm6, %v6743_v0, %v2054_v34  ;;  %v6524_v34 = vld [vmem:[%s10150_s15 + $0x30] sm:$0xff] }
 0x87d   : > { %v2060_v14 = vmul.f32 %v2058_v11, %v8192_v61  ;;  %v6523_v11 = vld [vmem:[%s10150_s15 + $0x28] sm:$0xff] }
 0x87f   : > { %v2063_v7 = vmul.f32 %v2061_v32, %v2060_v14  ;;  %v6525_v32 = vld [vmem:[%s10150_s15 + $0x38] sm:$0xff]  ;;  %v6522_v14 = vld [vmem:[%s10150_s15 + $0x20] sm:$0xff] }
 0x881   : > { %v2066_v42 = vadd.f32 %v2064_v4, %v2063_v7  ;;  %v6520_v4 = vld [vmem:[%s10150_s15 + $0x10] sm:$0xff] }
 0x883   : > { %v2083_v44 = vpack.c.bf16 %v2066_v42, %v2065_v41  ;;  %v6519_v41 = vld [vmem:[%s10150_s15 + $0x8] sm:$0xff] }
 0x885   : > { %2172 = vmatmul.bf16.vlgmr.msra.gmra.mxu3 %v2083_v44  ;;  %2186 = vmatmul.bf16.vlgmr.msra.gmra.mxu0 %v2083_v44 }
 0x886   : > { %2710 = vmatpush.bf16.msra.mxu0 %v6525_v32  ;;  %v8420_v32 = vld [vmem:[%s10151_s16] sm:$0xff] }
 0x88a   : > { %2711 = vmatpush.bf16.msra.mxu0 %v6524_v34 }
 0x88e   : > { %2712 = vmatpush.bf16.msra.mxu0 %v6523_v11 }
 0x892   : > { %2713 = vmatpush.bf16.msra.mxu0 %v6522_v14 }
 0x895   : > { %2596 = vmatmul.bf16.vlgmr.msrb.gmra.mxu3 %v8112_v37  ;;  %2620 = vmatmul.bf16.vlgmr.msrb.gmra.mxu0 %v2610_v48 }
 0x896   : > { %2714 = vmatpush.bf16.msra.mxu0 %v6521_v38 }
 0x89a   : > { %2715 = vmatpush.bf16.msra.mxu0 %v6520_v4 }
 0x89e   : > { %2716 = vmatpush.bf16.msra.mxu0 %v6519_v41 }
 0x902   : > { %v2187_v47 = vpop.f32.mrf.mxu0 }
 0x908   : > { %v2173_v61 = vpop.f32.mrf.mxu3 }
 0x90a   : > { %v2189_v50 = vpop.f32.mrf.mxu0 }
 0x90b   : > { %v8324_v58 = vpack.c.bf16 %v2189_v50, %v2187_v47  ;;  %v6518_v47 = vld [vmem:[%s10150_s15] sm:$0xff] }
 0x90c   : > { %2717 = vmatpush.bf16.msra.mxu0 %v6518_v47 }
 0x90d   : > { %10428 = vst [vmem:[#allocation28_spill] sm:$0xff] %v8324_v58  ;;  %2847 = vmatpush.bf16.msra.mxu3 %v8324_v58 }
 0x910   : > { %v2175_v37 = vpop.f32.mrf.mxu3 }
 0x911   : > { %v8334_v15 = vpack.c.bf16 %v2175_v37, %v2173_v61 }
 0x912   : > { %v2621_v2 = vpop.f32.mrf.mxu0 }
 0x913   : > { %10429 = vst [vmem:[#allocation29_spill] sm:$0xff] %v8334_v15  ;;  %v2625_v6 = vmul.f32 0.088388346, %v2621_v2  ;;  %2818 = vmatpush.bf16.xpose.msrb.mxu2 %v8334_v15  ;;  %v6839_v2 = vld [vmem:[%s7798_s2] sm:$0xff]  ;;  %s7043_s2 = scalar_lea.hbm %s7042_s7, 1 }
 0x914   : > { %p7044_p0 = scmp.ne.s32.totalorder %s7042_s7, %s7043_s2 }
 0x915   : > { %v2626_v8 = vadd.f32 %v2625_v6, %v2609_v60 }
 0x916   : > { %p7045_p1 = pnand %p7044_p0, %p7289_p5 }
 0x917   : > { %v2628_v10 = vsel %vm2627_vm11, %v2626_v8, -inf }
 0x918   : > { %v2597_v12 = vpop.f32.mrf.mxu3  ;;  %2629 = vmax.xlane.f32.xlu0 %v2628_v10  ;;  %p7046_p2 = pneg %p7045_p1 }
 0x919   : > { %v2640_v0 = vpack.c.bf16 %v2597_v12, %v2597_v12 }
 0x91a   : > { %v2623_v3 = vpop.f32.mrf.mxu0 }
 0x91b   : > { %v8340_v18 = vsel %vm2644_vm12, %v2640_v0, 0 }
 0x91c   : > { %10430 = vst [vmem:[#allocation30_spill] sm:$0xff] %v8340_v18  ;;  %2655 = vmatpush.bf16.msra.mxu1 %v8340_v18 }
 0x920   : > { %v2599_v30 = vpop.f32.mrf.mxu3 }
 0x921   : > { %v8384_v30 = vld [vmem:[%s10151_s16 + $0x30] sm:$0xff] }
 0x98b   : > { %v2630_v19 = vpop.xlane.xlu0 %2629 }
 0x98c   : > { %v2631_v20 = vsub.f32 %v2626_v8, %v2630_v19  ;;  %v8376_v8 = vld [vmem:[%s10151_s16 + $0x38] sm:$0xff]  ;;  %v8390_v19 = vld [vmem:[%s10151_s16 + $0x28] sm:$0xff] }
 0x98d   : > { %2797 = vmatpush.bf16.msrb.mxu1 %v8376_v8 }
 0x98e   : > { %v2632_v54 = vmul.f32 1.442695, %v2631_v20  ;;  %v8396_v20 = vld [vmem:[%s10151_s16 + $0x20] sm:$0xff] }
 0x990   : > { %6744 = vpow2.f32 %v2632_v54  ;;  %v8402_v54 = vld [vmem:[%s10151_s16 + $0x18] sm:$0xff] }
 0x991   : > { %2798 = vmatpush.bf16.msrb.mxu1 %v8384_v30 }
 0x995   : > { %2799 = vmatpush.bf16.msrb.mxu1 %v8390_v19 }
 0x996   : > { %v6745_v27 = vpop.eup %6744 }
 0x997   : > { %v2634_v31 = vsel %vm2627_vm11, %v6745_v27, 0.0 }
 0x998   : > { %2635 = vadd.xlane.f32.xlu1 %v2634_v31  ;;  %v8414_v31 = vld [vmem:[%s10151_s16 + $0x8] sm:$0xff] }
 0x999   : > { %2800 = vmatpush.bf16.msrb.mxu1 %v8396_v20 }
 0x99d   : > { %2801 = vmatpush.bf16.msrb.mxu1 %v8402_v54 }
 0xa0b   : > { %v2636_v7 = vpop.xlane.xlu1 %2635 }
 0xa0c   : > { %6746 = vrcp.f32 %v2636_v7 }
 0xa12   : > { %v6747_v42 = vpop.eup %6746 }
 0xa13   : > { %v2638_v44 = vmul.f32 %v6747_v42, %v6745_v27  ;;  %v8408_v27 = vld [vmem:[%s10151_s16 + $0x10] sm:$0xff] }
 0xa14   : > { %2802 = vmatpush.bf16.msrb.mxu1 %v8408_v27 }
 0xa15   : > { %v2639_v48 = vpack.c.bf16 %v2638_v44, %v2638_v44 }
 0xa17   : > { %5922 = vmatmul.msk.bf16.vlgmr.msra.gmra.mxu1 %vm2627_vm11, %v2639_v48  ;;  %v2744_v48 = vperm.slane %v8086_v24, 2 }
 0xa18   : > { %2803 = vmatpush.bf16.msrb.mxu1 %v8414_v31 }
 0xa1c   : > { %2804 = vmatpush.bf16.msrb.mxu1 %v8420_v32 }
 0xa94   : > { %v2657_v55 = vpop.f32.mrf.mxu1 }
 0xa95   : > { %v2661_v61 = vpack.c.bf16 %v2657_v55, %v2657_v55 }
 0xa97   : > { %2718 = vmatmul.bf16.vlgmr.msra.gmra.mxu0 %v2661_v61  ;;  %v2746_v61 = vperm.slane %v8086_v24, 3 }
 0xa9c   : > { %v2659_v50 = vpop.f32.mrf.mxu1 }
 0xb14   : > { %v2719_v37 = vpop.f32.mrf.mxu0 }
 0xb15   : > { %v8370_v60 = vadd.f32 %v6839_v2, %v2719_v37 }
 0xb17   : > { %2724 = vadd.xlane.f32.xlu2 %v8370_v60 }
 0xb1c   : > { %v2721_v6 = vpop.f32.mrf.mxu0 }
 0xb8a   : > { %v2725_v10 = vpop.xlane.xlu2 %2724 }
 0xb8b   : > { %v2726_v12 = vmul.f32 %v2725_v10, %v7381_v23 }
 0xb8d   : > { %v2727_v0 = vsub.f32 %v8370_v60, %v2726_v12 }
 0xb8f   : > { %v2728_v3 = vmul.f32 %v2727_v0, %v2727_v0 }
 0xb91   : > { %2729 = vadd.xlane.f32.xlu0 %v2728_v3 }
 0xc04   : > { %v2730_v34 = vpop.xlane.xlu0 %2729 }
 0xc05   : > { %v2731_v11 = vmul.f32 %v2730_v34, %v7381_v23 }
 0xc07   : > { %v2732_v14 = vadd.f32 1e-05, %v2731_v11 }
 0xc09   : > { %6748 = vrsqrt.f32 %v2732_v14  ;;  %vm2739_vm14 = vweird.f32 %v2732_v14 }
 0xc0f   : > { %v6749_v38 = vpop.eup %6748 }
 0xc10   : > { %v2734_v4 = vmul.f32 %v6749_v38, %v2732_v14  ;;  %vm2740_vm13 = vweird.f32 %v6749_v38 }
 0xc11   : > { %vm2741_vm15 = vmor %vm2739_vm14, %vm2740_vm13 }
 0xc12   : > { %v2735_v7 = vmul.f32 %v6749_v38, %v2734_v4 }
 0xc14   : > { %v2736_v41 = vmul.f32 0.5, %v2735_v7 }
 0xc16   : > { %v2737_v42 = vsub.f32 1.5, %v2736_v41 }
 0xc18   : > { %v2738_v44 = vmul.f32 %v6749_v38, %v2737_v42  ;;  %v8431_v42 = vld [vmem:[%s10152_s17 + $0x38] sm:$0xff] }
 0xc19   : > { %2902 = vmatpush.bf16.msra.mxu2 %v8431_v42 }
 0xc1a   : > { %v2742_v47 = vsel %vm2741_vm15, %v6749_v38, %v2738_v44  ;;  %v8437_v44 = vld [vmem:[%s10152_s17 + $0x30] sm:$0xff] }
 0xc1b   : > { %v2743_v55 = vmul.f32 %v2742_v47, %v2727_v0  ;;  %v8449_v47 = vld [vmem:[%s10152_s17 + $0x20] sm:$0xff] }
 0xc1d   : > { %v2745_v50 = vmul.f32 %v2744_v48, %v2743_v55  ;;  %2903 = vmatpush.bf16.msra.mxu2 %v8437_v44  ;;  %v8443_v48 = vld [vmem:[%s10152_s17 + $0x28] sm:$0xff]  ;;  %v8455_v55 = vld [vmem:[%s10152_s17 + $0x18] sm:$0xff] }
 0xc1e   : > { %10431 = vst [vmem:[#allocation31_spill] sm:$0xff] %v8455_v55 }
 0xc1f   : > { %v2747_v37 = vadd.f32 %v2746_v61, %v2745_v50  ;;  %v8461_v61 = vld [vmem:[%s10152_s17 + $0x10] sm:$0xff] }
 0xc20   : > { %10432 = vst [vmem:[#allocation32_spill] sm:$0xff] %v8461_v61 }
 0xc21   : > { %v2748_v2 = vpack.c.bf16 %v2747_v37, %v2747_v37  ;;  %2904 = vmatpush.bf16.msra.mxu2 %v8443_v48  ;;  %v8467_v37 = vld [vmem:[%s10152_s17 + $0x8] sm:$0xff] }
 0xc22   : > { %10433 = vst [vmem:[#allocation33_spill] sm:$0xff] %v8467_v37 }
 0xc23   : > { %2805 = vmatmul.bf16.vlgmr.msrb.gmra.mxu1 %v2748_v2 }
 0xc25   : > { %2905 = vmatpush.bf16.msra.mxu2 %v8449_v47 }
 0xc29   : > { %2906 = vmatpush.bf16.msra.mxu2 %v8455_v55 }
 0xc2d   : > { %2907 = vmatpush.bf16.msra.mxu2 %v8461_v61 }
 0xc31   : > { %2908 = vmatpush.bf16.msra.mxu2 %v8467_v37 }
 0xca0   : > { %v2806_v6 = vpop.f32.mrf.mxu1 }
 0xca1   : > { %v2810_v10 = vpack.c.bf16 %v2806_v6, %v2806_v6 }
 0xca3   : > { %2819 = vmatmul.bf16.vlgmr.msrb.gmra.mxu2 %v2810_v10 }
 0xca8   : > { %v2808_v12 = vpop.f32.mrf.mxu1 }
 0xca9   : > { %v8474_v12 = vld [vmem:[%s10152_s17] sm:$0xff] }
 0xcaa   : > { %10434 = vst [vmem:[#allocation34_spill] sm:$0xff] %v8474_v12  ;;  %2909 = vmatpush.bf16.msra.mxu2 %v8474_v12 }
 0xd26   : > { %v2820_v3 = vpop.f32.mrf.mxu2 }
 0xd27   : > { %v2824_v34 = vmul.f32 0.088388346, %v2820_v3 }
 0xd29   : > { %v2825_v11 = vsel %vm1197_vm7, %v2824_v34, -inf }
 0xd2a   : > { %2826 = vmax.xlane.f32.xlu1 %v2825_v11 }
 0xd2e   : > { %v2822_v14 = vpop.f32.mrf.mxu2 }
 0xd9d   : > { %v2827_v4 = vpop.xlane.xlu1 %2826 }
 0xd9e   : > { %v2828_v7 = vsub.f32 %v2824_v34, %v2827_v4 }
 0xda0   : > { %v2829_v38 = vmul.f32 1.442695, %v2828_v7 }
 0xda2   : > { %6750 = vpow2.f32 %v2829_v38  ;;  %v6134_v38 = vld [vmem:[%s10153_s18 + $0xe0] sm:$0xf] }
 0xda8   : > { %v6751_v0 = vpop.eup %6750 }
 0xda9   : > { %v2831_v41 = vsel %vm1197_vm7, %v6751_v0, 0.0 }
 0xdaa   : > { %2832 = vadd.xlane.f32.xlu2 %v2831_v41  ;;  %v6570_v41 = vld [vmem:[%s10153_s18 + $0xe4] sm:$0xf] }
 0xe1d   : > { %v2833_v50 = vpop.xlane.xlu2 %2832 }
 0xe1e   : > { %6752 = vrcp.f32 %v2833_v50 }
 0xe24   : > { %v6753_v2 = vpop.eup %6752 }
 0xe25   : > { %v2835_v6 = vmul.f32 %v6753_v2, %v6751_v0  ;;  %v6572_v0 = vld [vmem:[%s10153_s18 + $0xec] sm:$0xf0]  ;;  %v6142_v2 = vld [vmem:[%s10153_s18 + $0xe8] sm:$0xf] }
 0xe26   : > { %v8490_v50 = vor.u32 %v6572_v0, %v6134_v38 }
 0xe27   : > { %v2836_v10 = vpack.c.bf16 %v2835_v6, %v2835_v6  ;;  %v6573_v6 = vld [vmem:[%s10153_s18 + $0xf4] sm:$0xf0] }
 0xe28   : > { %10435 = vst [vmem:[#allocation35_spill] sm:$0xff] %v8490_v50  ;;  %3110 = vmatpush.bf16.msrb.mxu3 %v8490_v50 }
 0xe29   : > { %5987 = vmatmul.msk.bf16.vlgmr.msra.gmra.mxu3 %vm1197_vm7, %v2836_v10 }
 0xeac   : > { %v2849_v3 = vpop.f32.mrf.mxu3 }
 0xead   : > { %v2853_v34 = vpack.c.bf16 %v2849_v3, %v2849_v3  ;;  %v8503_v3 = vor.u32 %v6573_v6, %v6142_v2  ;;  %v6568_v2 = vld [vmem:[%s10153_s18 + $0xcc] sm:$0xf0]  ;;  %v6566_v6 = vld [vmem:[%s10153_s18 + $0xc4] sm:$0xf] }
 0xeaf   : > { %2910 = vmatmul.bf16.vlgmr.msra.gmra.mxu2 %v2853_v34  ;;  %v6571_v34 = vld [vmem:[%s10153_s18 + $0xec] sm:$0xf]  ;;  %3136 = vmatpush.bf16.msra.mxu1 %v8503_v3 }
 0xeb4   : > { %v2851_v11 = vpop.f32.mrf.mxu3 }
 0xeb5   : > { %v6144_v11 = vld [vmem:[%s10153_s18 + $0xf8] sm:$0xf0] }
 0xf32   : > { %v2911_v14 = vpop.f32.mrf.mxu2 }
 0xf33   : > { %v8478_v4 = vadd.f32 %v2911_v14, %v8370_v60  ;;  %v6136_v60 = vld [vmem:[%s10153_s18 + $0xf0] sm:$0xf0]  ;;  %v8512_v14 = vor.u32 %v6571_v34, %v6144_v11 }
 0xf34   : > { %v8501_v10 = vor.u32 %v6570_v41, %v6136_v60  ;;  %v6118_v60 = vld [vmem:[%s10153_s18 + $0xc0] sm:$0xf]  ;;  %v6120_v11 = vld [vmem:[%s10153_s18 + $0xd0] sm:$0xf0] }
 0xf35   : > { %2916 = vadd.xlane.f32.xlu0 %v8478_v4  ;;  %10437 = vst [vmem:[#allocation37_spill] sm:$0xff] %v8512_v14  ;;  %3149 = vmatpush.bf16.msrb.mxu2 %v8512_v14  ;;  %v8532_v34 = vor.u32 %v6568_v2, %v6118_v60  ;;  %v6567_v60 = vld [vmem:[%s10153_s18 + $0xcc] sm:$0xf]  ;;  %v6128_v2 = vld [vmem:[%s10153_s18 + $0xd8] sm:$0xf0] }
 0xf36   : > { %10436 = vst [vmem:[#allocation36_spill] sm:$0xff] %v8501_v10  ;;  %3123 = vmatpush.bf16.msrb.mxu0 %v8501_v10  ;;  %v8554_v14 = vor.u32 %v6567_v60, %v6128_v2  ;;  %v6104_v60 = vld [vmem:[%s10153_s18 + $0xb0] sm:$0xf0]  ;;  %v6110_v2 = vld [vmem:[%s10153_s18 + $0xa8] sm:$0xf] }
 0xf37   : > { %10438 = vst [vmem:[#allocation38_spill] sm:$0xff] %v8532_v34  ;;  %3111 = vmatpush.bf16.msrb.mxu3 %v8532_v34  ;;  %v6565_v34 = vld [vmem:[%s10153_s18 + $0xb4] sm:$0xf0] }
 0xf38   : > { %10440 = vst [vmem:[#allocation40_spill] sm:$0xff] %v8554_v14  ;;  %v8581_v13 = vor.u32 %v6565_v34, %v6110_v2  ;;  %v6086_v34 = vld [vmem:[%s10153_s18 + $0x80] sm:$0xf] }
 0xf39   : > { %3150 = vmatpush.bf16.msrb.mxu2 %v8554_v14 }
 0xf3a   : > { %v2913_v7 = vpop.f32.mrf.mxu2  ;;  %10443 = vst [vmem:[#allocation43_spill] sm:$0xff] %v8581_v13 }
 0xfa8   : > { %v2917_v7 = vpop.xlane.xlu0 %2916 }
 0xfa9   : > { %v2918_v38 = vmul.f32 %v2917_v7, %v7381_v23  ;;  %v6126_v7 = vld [vmem:[%s10153_s18 + $0xc8] sm:$0xf] }
 0xfab   : > { %v8519_v0 = vsub.f32 %v8478_v4, %v2918_v38  ;;  %v6569_v38 = vld [vmem:[%s10153_s18 + $0xd4] sm:$0xf0] }
 0xfac   : > { %v8545_v1 = vor.u32 %v6569_v38, %v6126_v7  ;;  %v6562_v7 = vld [vmem:[%s10153_s18 + $0xa4] sm:$0xf] }
 0xfad   : > { %v2920_v41 = vmul.f32 %v8519_v0, %v8519_v0  ;;  %v8579_v50 = vor.u32 %v6562_v7, %v6104_v60  ;;  %v6560_v7 = vld [vmem:[%s10153_s18 + $0x8c] sm:$0xf0]  ;;  %v6558_v60 = vld [vmem:[%s10153_s18 + $0x84] sm:$0xf] }
 0xfae   : > { %3137 = vmatpush.bf16.msra.mxu1 %v8545_v1  ;;  %v8604_v2 = vor.u32 %v6560_v7, %v6086_v34  ;;  %v6559_v34 = vld [vmem:[%s10153_s18 + $0x8c] sm:$0xf]  ;;  %v6096_v7 = vld [vmem:[%s10153_s18 + $0x98] sm:$0xf0] }
 0xfaf   : > { %2921 = vadd.xlane.f32.xlu1 %v2920_v41  ;;  %v8543_v41 = vor.u32 %v6566_v6, %v6120_v11  ;;  %v6102_v6 = vld [vmem:[%s10153_s18 + $0xa0] sm:$0xf]  ;;  %v6564_v11 = vld [vmem:[%s10153_s18 + $0xac] sm:$0xf0]  ;;  %10442 = vst [vmem:[#allocation42_spill] sm:$0xff] %v8579_v50 }
 0xfb0   : > { %v8568_v38 = vor.u32 %v6564_v11, %v6102_v6  ;;  %v6563_v6 = vld [vmem:[%s10153_s18 + $0xac] sm:$0xf]  ;;  %v6112_v11 = vld [vmem:[%s10153_s18 + $0xb8] sm:$0xf0]  ;;  %10445 = vst [vmem:[#allocation45_spill] sm:$0xff] %v8604_v2 }
 0xfb1   : > { %10439 = vst [vmem:[#allocation39_spill] sm:$0xff] %v8543_v41  ;;  %3124 = vmatpush.bf16.msrb.mxu0 %v8543_v41  ;;  %v8590_v14 = vor.u32 %v6563_v6, %v6112_v11  ;;  %v6088_v6 = vld [vmem:[%s10153_s18 + $0x90] sm:$0xf0]  ;;  %v6094_v11 = vld [vmem:[%s10153_s18 + $0x88] sm:$0xf] }
 0xfb2   : > { %10441 = vst [vmem:[#allocation41_spill] sm:$0xff] %v8568_v38  ;;  %3112 = vmatpush.bf16.msrb.mxu3 %v8568_v38  ;;  %3138 = vmatpush.bf16.msra.mxu1 %v8581_v13  ;;  %v6561_v38 = vld [vmem:[%s10153_s18 + $0x94] sm:$0xf0] }
 0xfb3   : > { %10444 = vst [vmem:[#allocation44_spill] sm:$0xff] %v8590_v14  ;;  %3151 = vmatpush.bf16.msrb.mxu2 %v8590_v14  ;;  %v8617_v41 = vor.u32 %v6561_v38, %v6094_v11  ;;  %v8626_v14 = vor.u32 %v6559_v34, %v6096_v7  ;;  %v6070_v38 = vld [vmem:[%s10153_s18 + $0x60] sm:$0xf]  ;;  %v6072_v34 = vld [vmem:[%s10153_s18 + $0x70] sm:$0xf0] }
 0xfb4   : > { %v6078_v7 = vld [vmem:[%s10153_s18 + $0x68] sm:$0xf] }
 0xfb5   : > { %3125 = vmatpush.bf16.msrb.mxu0 %v8579_v50  ;;  %v8615_v50 = vor.u32 %v6558_v60, %v6088_v6  ;;  %10447 = vst [vmem:[#allocation47_spill] sm:$0xff] %v8617_v41  ;;  %v6556_v60 = vld [vmem:[%s10153_s18 + $0x6c] sm:$0xf0]  ;;  %v6554_v6 = vld [vmem:[%s10153_s18 + $0x64] sm:$0xf] }
 0xfb6   : > { %3113 = vmatpush.bf16.msrb.mxu3 %v8604_v2  ;;  %10448 = vst [vmem:[#allocation48_spill] sm:$0xff] %v8626_v14  ;;  %3139 = vmatpush.bf16.msra.mxu1 %v8617_v41  ;;  %v8640_v11 = vor.u32 %v6556_v60, %v6070_v38  ;;  %v6557_v2 = vld [vmem:[%s10153_s18 + $0x74] sm:$0xf0]  ;;  %v6555_v38 = vld [vmem:[%s10153_s18 + $0x6c] sm:$0xf] }
 0xfb7   : > { %10446 = vst [vmem:[#allocation46_spill] sm:$0xff] %v8615_v50  ;;  %3152 = vmatpush.bf16.msrb.mxu2 %v8626_v14  ;;  %v8653_v10 = vor.u32 %v6557_v2, %v6078_v7  ;;  %v6080_v60 = vld [vmem:[%s10153_s18 + $0x78] sm:$0xf0]  ;;  %v6054_v2 = vld [vmem:[%s10153_s18 + $0x40] sm:$0xf] }
 0xfb8   : > { %10449 = vst [vmem:[#allocation49_spill] sm:$0xff] %v8640_v11  ;;  %v8662_v14 = vor.u32 %v6555_v38, %v6080_v60  ;;  %v6056_v38 = vld [vmem:[%s10153_s18 + $0x50] sm:$0xf0]  ;;  %v6062_v60 = vld [vmem:[%s10153_s18 + $0x48] sm:$0xf] }
 0xfb9   : > { %3126 = vmatpush.bf16.msrb.mxu0 %v8615_v50  ;;  %v8651_v50 = vor.u32 %v6554_v6, %v6072_v34  ;;  %10451 = vst [vmem:[#allocation51_spill] sm:$0xff] %v8653_v10  ;;  %v6552_v6 = vld [vmem:[%s10153_s18 + $0x4c] sm:$0xf0]  ;;  %v6550_v34 = vld [vmem:[%s10153_s18 + $0x44] sm:$0xf] }
 0xfba   : > { %3114 = vmatpush.bf16.msrb.mxu3 %v8640_v11  ;;  %10452 = vst [vmem:[#allocation52_spill] sm:$0xff] %v8662_v14  ;;  %3140 = vmatpush.bf16.msra.mxu1 %v8653_v10  ;;  %v8676_v7 = vor.u32 %v6552_v6, %v6054_v2  ;;  %v6553_v11 = vld [vmem:[%s10153_s18 + $0x54] sm:$0xf0]  ;;  %v6551_v2 = vld [vmem:[%s10153_s18 + $0x4c] sm:$0xf] }
 0xfbb   : > { %10450 = vst [vmem:[#allocation50_spill] sm:$0xff] %v8651_v50  ;;  %3153 = vmatpush.bf16.msrb.mxu2 %v8662_v14  ;;  %v8689_v58 = vor.u32 %v6553_v11, %v6062_v60  ;;  %v6064_v6 = vld [vmem:[%s10153_s18 + $0x58] sm:$0xf0]  ;;  %v6038_v11 = vld [vmem:[%s10153_s18 + $0x20] sm:$0xf] }
 0xfbc   : > { %10453 = vst [vmem:[#allocation53_spill] sm:$0xff] %v8676_v7  ;;  %v8698_v14 = vor.u32 %v6551_v2, %v6064_v6  ;;  %v6040_v2 = vld [vmem:[%s10153_s18 + $0x30] sm:$0xf0]  ;;  %v6046_v6 = vld [vmem:[%s10153_s18 + $0x28] sm:$0xf] }
 0xfbd   : > { %3127 = vmatpush.bf16.msrb.mxu0 %v8651_v50  ;;  %v8687_v50 = vor.u32 %v6550_v34, %v6056_v38  ;;  %10455 = vst [vmem:[#allocation55_spill] sm:$0xff] %v8689_v58  ;;  %v6548_v34 = vld [vmem:[%s10153_s18 + $0x2c] sm:$0xf0]  ;;  %v6546_v38 = vld [vmem:[%s10153_s18 + $0x24] sm:$0xf] }
 0xfbe   : > { %3115 = vmatpush.bf16.msrb.mxu3 %v8676_v7  ;;  %10456 = vst [vmem:[#allocation56_spill] sm:$0xff] %v8698_v14  ;;  %3141 = vmatpush.bf16.msra.mxu1 %v8689_v58  ;;  %v8712_v60 = vor.u32 %v6548_v34, %v6038_v11  ;;  %v6549_v7 = vld [vmem:[%s10153_s18 + $0x34] sm:$0xf0]  ;;  %v6547_v11 = vld [vmem:[%s10153_s18 + $0x2c] sm:$0xf] }
 0xfbf   : > { %10454 = vst [vmem:[#allocation54_spill] sm:$0xff] %v8687_v50  ;;  %3154 = vmatpush.bf16.msrb.mxu2 %v8698_v14  ;;  %v8725_v18 = vor.u32 %v6549_v7, %v6046_v6  ;;  %v6048_v34 = vld [vmem:[%s10153_s18 + $0x38] sm:$0xf0]  ;;  %v6022_v14 = vld [vmem:[%s10153_s18] sm:$0xf] }
 0xfc0   : > { %10457 = vst [vmem:[#allocation57_spill] sm:$0xff] %v8712_v60  ;;  %v8737_v43 = vor.u32 %v6547_v11, %v6048_v34  ;;  %v6544_v7 = vld [vmem:[%s10153_s18 + $0xc] sm:$0xf0]  ;;  %v6030_v34 = vld [vmem:[%s10153_s18 + $0x8] sm:$0xf] }
 0xfc1   : > { %3128 = vmatpush.bf16.msrb.mxu0 %v8687_v50  ;;  %v8723_v50 = vor.u32 %v6546_v38, %v6040_v2  ;;  %10459 = vst [vmem:[#allocation59_spill] sm:$0xff] %v8725_v18  ;;  %v6542_v38 = vld [vmem:[%s10153_s18 + $0x4] sm:$0xf]  ;;  %v6024_v2 = vld [vmem:[%s10153_s18 + $0x10] sm:$0xf0]  ;;  %v8750_v6 = vor.u32 %v6544_v7, %v6022_v14 }
 0xfc2   : > { %3116 = vmatpush.bf16.msrb.mxu3 %v8712_v60  ;;  %10460 = vst [vmem:[#allocation60_spill] sm:$0xff] %v8737_v43  ;;  %3142 = vmatpush.bf16.msra.mxu1 %v8725_v18  ;;  %v8752_v11 = vor.u32 %v6542_v38, %v6024_v2  ;;  %v6545_v60 = vld [vmem:[%s10153_s18 + $0x14] sm:$0xf0]  ;;  %v6032_v14 = vld [vmem:[%s10153_s18 + $0x18] sm:$0xf0] }
 0xfc3   : > { %10458 = vst [vmem:[#allocation58_spill] sm:$0xff] %v8723_v50  ;;  %3155 = vmatpush.bf16.msrb.mxu2 %v8737_v43  ;;  %v8769_v7 = vor.u32 %v6543_v56, %v6032_v14  ;;  %v8783_v2 = vld [vmem:[%s10465_s13 + $0xb8] sm:$0xff] }
 0xfc4   : > { %10461 = vst [vmem:[#allocation61_spill] sm:$0xff] %v8750_v6 }
 0xfc5   : > { %3129 = vmatpush.bf16.msrb.mxu0 %v8723_v50  ;;  %10462 = vst [vmem:[#allocation62_spill] sm:$0xff] %v8752_v11  ;;  %v8764_v50 = vor.u32 %v6545_v60, %v6030_v34  ;;  %v8778_v60 = vld [vmem:[%s10465_s13 + $0x78] sm:$0xff] }
 0xfc6   : > { %10464 = vst [vmem:[#allocation64_spill] sm:$0xff] %v8769_v7  ;;  %3117 = vmatpush.bf16.msrb.mxu3 %v8750_v6 }
 0xfc7   : > { %10463 = vst [vmem:[#allocation63_spill] sm:$0xff] %v8764_v50  ;;  %3143 = vmatpush.bf16.msra.mxu1 %v8764_v50  ;;  %3156 = vmatpush.bf16.msrb.mxu2 %v8769_v7  ;;  %v2936_v50 = vperm.slane %v8086_v24, 4 }
 0xfc8   : > { %10466 = vst [vmem:[#allocation65_spill] sm:$0xff] %v8778_v60 }
 0xfc9   : > { %3130 = vmatpush.bf16.msrb.mxu0 %v8752_v11  ;;  %10467 = vst [vmem:[#allocation66_spill] sm:$0xff] %v8783_v2 }
 0xfcb   : > { %3420 = vmatpush.bf16.msrb.mxu1 %v8783_v2 }
 0xfcd   : > { %3407 = vmatpush.bf16.msra.mxu0 %v8778_v60  ;;  %v2938_v60 = vperm.slane %v8086_v24, 5  ;;  %v8806_v24 = vld [vmem:[%s10465_s13 + $0x38] sm:$0xff] }
 0xfce   : > { %10470 = vst [vmem:[#allocation69_spill] sm:$0xff] %v8806_v24  ;;  %3394 = vmatpush.bf16.msra.mxu3 %v8806_v24  ;;  %v8941_v24 = vld [vmem:[%s10465_s13 + $0x80] sm:$0xff] }
 0xfcf   : > { %10493 = vst [vmem:[#allocation92_spill] sm:$0xff] %v8941_v24 }
0x1022   : > { %v2922_v38 = vpop.xlane.xlu1 %2921 }
0x1023   : > { %v2923_v56 = vmul.f32 %v2922_v38, %v7381_v23 }
0x1025   : > { %v2924_v34 = vadd.f32 1e-05, %v2923_v56 }
0x1027   : > { %6754 = vrsqrt.f32 %v2924_v34  ;;  %vm2931_vm1 = vweird.f32 %v2924_v34 }
0x102d   : > { %v6755_v14 = vpop.eup %6754 }
0x102e   : > { %v2926_v7 = vmul.f32 %v6755_v14, %v2924_v34  ;;  %vm2932_vm0 = vweird.f32 %v6755_v14  ;;  %v8866_v34 = vld [vmem:[%s10465_s13 + $0x58] sm:$0xff] }
0x102f   : > { %vm2933_vm2 = vmor %vm2931_vm1, %vm2932_vm0  ;;  %10480 = vst [vmem:[#allocation79_spill] sm:$0xff] %v8866_v34 }
0x1030   : > { %v2927_v43 = vmul.f32 %v6755_v14, %v2926_v7  ;;  %v8847_v7 = vld [vmem:[%s10465_s13 + $0xa0] sm:$0xff] }
0x1031   : > { %10477 = vst [vmem:[#allocation76_spill] sm:$0xff] %v8847_v7 }
0x1032   : > { %v2928_v6 = vmul.f32 0.5, %v2927_v43  ;;  %v8794_v43 = vld [vmem:[%s10465_s13 + $0x70] sm:$0xff] }
0x1033   : > { %10468 = vst [vmem:[#allocation67_spill] sm:$0xff] %v8794_v43  ;;  %3408 = vmatpush.bf16.msra.mxu0 %v8794_v43 }
0x1034   : > { %v2929_v11 = vsub.f32 1.5, %v2928_v6  ;;  %v8835_v6 = vld [vmem:[%s10465_s13 + $0xf0] sm:$0xff] }
0x1035   : > { %10475 = vst [vmem:[#allocation74_spill] sm:$0xff] %v8835_v6 }
0x1036   : > { %v2930_v12 = vmul.f32 %v6755_v14, %v2929_v11  ;;  %v8842_v11 = vld [vmem:[%s10465_s13 + $0x60] sm:$0xff] }
0x1037   : > { %10476 = vst [vmem:[#allocation75_spill] sm:$0xff] %v8842_v11 }
0x1038   : > { %v2934_v37 = vsel %vm2933_vm2, %v6755_v14, %v2930_v12  ;;  %v8799_v12 = vld [vmem:[%s10465_s13 + $0xb0] sm:$0xff]  ;;  %v8871_v14 = vld [vmem:[%s10465_s13 + $0x98] sm:$0xff] }
0x1039   : > { %v2935_v38 = vmul.f32 %v2934_v37, %v8519_v0  ;;  %10469 = vst [vmem:[#allocation68_spill] sm:$0xff] %v8799_v12  ;;  %3421 = vmatpush.bf16.msrb.mxu1 %v8799_v12  ;;  %v8818_v37 = vld [vmem:[%s10465_s13 + $0x68] sm:$0xff]  ;;  %v8830_v0 = vld [vmem:[%s10465_s13 + $0x30] sm:$0xff] }
0x103a   : > { %10472 = vst [vmem:[#allocation71_spill] sm:$0xff] %v8818_v37  ;;  %3409 = vmatpush.bf16.msra.mxu0 %v8818_v37  ;;  %3395 = vmatpush.bf16.msra.mxu3 %v8830_v0 }
0x103b   : > { %v2937_v18 = vmul.f32 %v2936_v50, %v2935_v38  ;;  %v8823_v50 = vld [vmem:[%s10465_s13 + $0xa8] sm:$0xff]  ;;  %10474 = vst [vmem:[#allocation73_spill] sm:$0xff] %v8830_v0  ;;  %v8878_v38 = vld [vmem:[%s10465_s13 + $0x20] sm:$0xff]  ;;  %v8924_v0 = vld [vmem:[%s10465_s13 + $0x10] sm:$0xff] }
0x103c   : > { %10473 = vst [vmem:[#allocation72_spill] sm:$0xff] %v8823_v50 }
0x103d   : > { %v2939_v2 = vadd.f32 %v2938_v60, %v2937_v18  ;;  %v8811_v18 = vld [vmem:[%s10465_s13 + $0xf8] sm:$0xff]  ;;  %3422 = vmatpush.bf16.msrb.mxu1 %v8823_v50  ;;  %v8854_v60 = vld [vmem:[%s10465_s13 + $0x28] sm:$0xff]  ;;  %10481 = vst [vmem:[#allocation80_spill] sm:$0xff] %v8871_v14 }
0x103e   : > { %10471 = vst [vmem:[#allocation70_spill] sm:$0xff] %v8811_v18  ;;  %3433 = vmatpush.bf16.msra.mxu2 %v8811_v18  ;;  %3410 = vmatpush.bf16.msra.mxu0 %v8842_v11  ;;  %v8902_v18 = vld [vmem:[%s10465_s13 + $0x18] sm:$0xff] }
0x103f   : > { %v2940_v56 = vpack.c.bf16 %v2939_v2, %v2939_v2  ;;  %10478 = vst [vmem:[#allocation77_spill] sm:$0xff] %v8854_v60  ;;  %v8859_v2 = vld [vmem:[%s10465_s13 + $0xe8] sm:$0xff]  ;;  %3396 = vmatpush.bf16.msra.mxu3 %v8854_v60 }
0x1040   : > { %10479 = vst [vmem:[#allocation78_spill] sm:$0xff] %v8859_v2  ;;  %v8919_v60 = vld [vmem:[%s10465_s13 + $0x88] sm:$0xff] }
0x1041   : > { %3118 = vmatmul.bf16.vlgmr.msrb.gmra.mxu3 %v2940_v56  ;;  %3131 = vmatmul.bf16.vlgmr.msrb.gmra.mxu0 %v2940_v56  ;;  %10482 = vst [vmem:[#allocation81_spill] sm:$0xff] %v8878_v38 }
0x1042   : > { %3144 = vmatmul.bf16.vlgmr.msra.gmra.mxu1 %v2940_v56  ;;  %3157 = vmatmul.bf16.vlgmr.msrb.gmra.mxu2 %v2940_v56  ;;  %v8883_v56 = vld [vmem:[%s10465_s13 + $0xe0] sm:$0xff]  ;;  %10486 = vst [vmem:[#allocation85_spill] sm:$0xff] %v8902_v18 }
0x1043   : > { %3434 = vmatpush.bf16.msra.mxu2 %v8835_v6  ;;  %3423 = vmatpush.bf16.msrb.mxu1 %v8847_v7  ;;  %10483 = vst [vmem:[#allocation82_spill] sm:$0xff] %v8883_v56  ;;  %v8895_v6 = vld [vmem:[%s10465_s13 + $0x90] sm:$0xff]  ;;  %v8969_v7 = vld [vmem:[%s10465_s13 + $0xc0] sm:$0xff] }
0x1044   : > { %3411 = vmatpush.bf16.msra.mxu0 %v8866_v34  ;;  %3397 = vmatpush.bf16.msra.mxu3 %v8878_v38  ;;  %10485 = vst [vmem:[#allocation84_spill] sm:$0xff] %v8895_v6  ;;  %v8914_v38 = vld [vmem:[%s10465_s13 + $0x48] sm:$0xff] }
0x1045   : > { %10488 = vst [vmem:[#allocation87_spill] sm:$0xff] %v8914_v38 }
0x1046   : > { %10489 = vst [vmem:[#allocation88_spill] sm:$0xff] %v8919_v60 }
0x1047   : > { %3435 = vmatpush.bf16.msra.mxu2 %v8859_v2  ;;  %3424 = vmatpush.bf16.msrb.mxu1 %v8871_v14  ;;  %v8890_v2 = vld [vmem:[%s10465_s13 + $0x50] sm:$0xff]  ;;  %10490 = vst [vmem:[#allocation89_spill] sm:$0xff] %v8924_v0  ;;  %v2307_v14 = vld [vmem:[#allocation7] sm:$0xf] }
0x1048   : > { %10484 = vst [vmem:[#allocation83_spill] sm:$0xff] %v8890_v2  ;;  %3412 = vmatpush.bf16.msra.mxu0 %v8890_v2  ;;  %3398 = vmatpush.bf16.msra.mxu3 %v8902_v18  ;;  %v8929_v18 = vld [vmem:[%s10465_s13 + $0xd0] sm:$0xff]  ;;  %v8971_v50 = vperm.slane %v2307_v14, 2  ;;  %v8980_v34 = vperm.slane %v2307_v14, 3 }
0x1049   : > { %10491 = vst [vmem:[#allocation90_spill] sm:$0xff] %v8929_v18 }
0x104a   : > { %10498 = vst [vmem:[#allocation97_spill] sm:$0xff] %v8969_v7 }
0x104b   : > { %3436 = vmatpush.bf16.msra.mxu2 %v8883_v56  ;;  %3425 = vmatpush.bf16.msrb.mxu1 %v8895_v6  ;;  %v8907_v56 = vld [vmem:[%s10465_s13 + $0xd8] sm:$0xff]  ;;  %v8948_v6 = vld [vmem:[%s10465_s13 + $0x8] sm:$0xff]  ;;  %10499 = vst [vmem:[#allocation98_spill] sm:$0xff] %v8971_v50 }
0x104c   : > { %10487 = vst [vmem:[#allocation86_spill] sm:$0xff] %v8907_v56  ;;  %3413 = vmatpush.bf16.msra.mxu0 %v8914_v38  ;;  %3399 = vmatpush.bf16.msra.mxu3 %v8924_v0  ;;  %v8964_v0 = vld [vmem:[%s10465_s13] sm:$0xff]  ;;  %v8978_v38 = vperm.slane %v2307_v14, 0 }
0x104d   : > { %10494 = vst [vmem:[#allocation93_spill] sm:$0xff] %v8948_v6 }
0x104e   : > { %10497 = vst [vmem:[#allocation96_spill] sm:$0xff] %v8964_v0 }
0x104f   : > { %3437 = vmatpush.bf16.msra.mxu2 %v8907_v56  ;;  %3426 = vmatpush.bf16.msrb.mxu1 %v8919_v60  ;;  %v8936_v56 = vld [vmem:[%s10465_s13 + $0x40] sm:$0xff]  ;;  %v8953_v60 = vld [vmem:[%s10465_s13 + $0xc8] sm:$0xff]  ;;  %10500 = vst [vmem:[#allocation99_spill] sm:$0xff] %v8978_v38 }
0x1050   : > { %10492 = vst [vmem:[#allocation91_spill] sm:$0xff] %v8936_v56  ;;  %3414 = vmatpush.bf16.msra.mxu0 %v8936_v56  ;;  %3400 = vmatpush.bf16.msra.mxu3 %v8948_v6 }
0x1051   : > { %10495 = vst [vmem:[#allocation94_spill] sm:$0xff] %v8953_v60 }
0x1052   : > { %10501 = vst [vmem:[#allocation100_spill] sm:$0xff] %v8980_v34 }
0x1053   : > { %3438 = vmatpush.bf16.msra.mxu2 %v8929_v18  ;;  %3427 = vmatpush.bf16.msrb.mxu1 %v8941_v24  ;;  %v8959_v18 = vperm.slane %v2307_v14, 1 }
0x1054   : > { %3401 = vmatpush.bf16.msra.mxu3 %v8964_v0 }
0x1055   : > { %10496 = vst [vmem:[#allocation95_spill] sm:$0xff] %v8959_v18 }
0x1057   : > { %3439 = vmatpush.bf16.msra.mxu2 %v8953_v60 }
0x105b   : > { %3440 = vmatpush.bf16.msra.mxu2 %v8969_v7 }
0x105f   : > { %3708 = vmatpush.bf16.msrb.mxu2 %v7965_v28 }
0x1063   : > { %3709 = vmatpush.bf16.msrb.mxu2 %v7994_v39 }
0x1067   : > { %3710 = vmatpush.bf16.msrb.mxu2 %v8019_v52 }
0x106b   : > { %3711 = vmatpush.bf16.msrb.mxu2 %v8031_v63 }
0x106f   : > { %3712 = vmatpush.bf16.msrb.mxu2 %v8049_v9 }
0x1073   : > { %3713 = vmatpush.bf16.msrb.mxu2 %v8067_v17 }
0x1077   : > { %3714 = vmatpush.bf16.msrb.mxu2 %v8088_v25 }
0x107b   : > { %3715 = vmatpush.bf16.msrb.mxu2 %v8108_v36 }
0x10be   : > { %v3132_v12 = vpop.f32.mrf.mxu0 }
0x10bf   : > { %v3133_v60 = vadd.f32 %v3132_v12, %v8959_v18  ;;  %v3145_v6 = vpop.f32.mrf.mxu1 }
0x10c0   : > { %v3146_v24 = vadd.f32 %v3145_v6, %v8971_v50 }
0x10c1   : > { %v3163_v56 = vmul.f32 %v3133_v60, %v3133_v60 }
0x10c2   : > { %v3164_v2 = vmul.f32 %v3146_v24, %v3146_v24 }
0x10c3   : > { %v3167_v11 = vmul.f32 %v3163_v56, %v3133_v60 }
0x10c4   : > { %v3168_v37 = vmul.f32 %v3164_v2, %v3146_v24  ;;  %v3119_v0 = vpop.f32.mrf.mxu3 }
0x10c5   : > { %v3171_v43 = vmul.f32 0.044715, %v3167_v11  ;;  %v3120_v7 = vadd.f32 %v3119_v0, %v8978_v38  ;;  %v3158_v12 = vpop.f32.mrf.mxu2 }
0x10c6   : > { %v3172_v18 = vmul.f32 0.044715, %v3168_v37  ;;  %v3159_v28 = vadd.f32 %v3158_v12, %v8980_v34  ;;  %v3134_v61 = vpop.f32.mrf.mxu0 }
0x10c7   : > { %v3175_v6 = vadd.f32 %v3171_v43, %v3133_v60  ;;  %v3162_v50 = vmul.f32 %v3120_v7, %v3120_v7  ;;  %v3147_v58 = vpop.f32.mrf.mxu1 }
0x10c8   : > { %v3176_v14 = vadd.f32 %v3172_v18, %v3146_v24  ;;  %v3165_v55 = vmul.f32 %v3159_v28, %v3159_v28 }
0x10c9   : > { %v3179_v56 = vmul.f32 0.7978846, %v3175_v6  ;;  %v3166_v10 = vmul.f32 %v3162_v50, %v3120_v7 }
0x10ca   : > { %v3180_v39 = vmul.f32 0.7978846, %v3176_v14  ;;  %v3169_v2 = vmul.f32 %v3165_v55, %v3159_v28 }
0x10cb   : > { %6756 = vtanh.f32 %v3179_v56  ;;  %v3170_v11 = vmul.f32 0.044715, %v3166_v10 }
0x10cc   : > { %6758 = vtanh.f32 %v3180_v39  ;;  %v3173_v37 = vmul.f32 0.044715, %v3169_v2  ;;  %v3121_v0 = vpop.f32.mrf.mxu3 }
0x10cd   : > { %v3174_v12 = vadd.f32 %v3170_v11, %v3120_v7  ;;  %v3160_v61 = vpop.f32.mrf.mxu2 }
0x10ce   : > { %v3177_v43 = vadd.f32 %v3173_v37, %v3159_v28 }
0x10cf   : > { %v3178_v34 = vmul.f32 0.7978846, %v3174_v12 }
0x10d0   : > { %v3181_v58 = vmul.f32 0.7978846, %v3177_v43 }
0x10d1   : > { %v6757_v18 = vpop.eup %6756  ;;  %6760 = vtanh.f32 %v3178_v34 }
0x10d2   : > { %v6759_v6 = vpop.eup %6758  ;;  %6762 = vtanh.f32 %v3181_v58  ;;  %v3187_v50 = vadd.f32 1.0, %v6757_v18 }
0x10d3   : > { %v3188_v55 = vadd.f32 1.0, %v6759_v6 }
0x10d4   : > { %v3191_v10 = vmul.f32 0.5, %v3187_v50 }
0x10d5   : > { %v3192_v14 = vmul.f32 0.5, %v3188_v55 }
0x10d6   : > { %v3195_v39 = vmul.f32 %v3191_v10, %v3133_v60 }
0x10d7   : > { %v6761_v56 = vpop.eup %6760  ;;  %v3196_v2 = vmul.f32 %v3192_v14, %v3146_v24 }
0x10d8   : > { %v6763_v11 = vpop.eup %6762  ;;  %v3199_v37 = vpack.c.bf16 %v3195_v39, %v3195_v39  ;;  %v3186_v0 = vadd.f32 1.0, %v6761_v56  ;;  %v9004_v39 = vld [vmem:[#allocation9 + $0x38] sm:$0xff]  ;;  %v9007_v56 = vld [vmem:[#allocation9 + $0x30] sm:$0xff] }
0x10d9   : > { %v3200_v12 = vpack.c.bf16 %v3196_v2, %v3196_v2  ;;  %v3189_v61 = vadd.f32 1.0, %v6763_v11  ;;  %3533 = vmatpush.bf16.msrb.mxu3 %v9004_v39  ;;  %v9010_v2 = vld [vmem:[#allocation9 + $0x28] sm:$0xff]  ;;  %v9016_v11 = vld [vmem:[#allocation9 + $0x18] sm:$0xff] }
0x10da   : > { %3415 = vmatmul.bf16.vlgmr.msra.gmra.mxu0 %v3199_v37  ;;  %v3190_v34 = vmul.f32 0.5, %v3186_v0  ;;  %v9019_v37 = vld [vmem:[#allocation9 + $0x10] sm:$0xff] }
0x10db   : > { %3428 = vmatmul.bf16.vlgmr.msrb.gmra.mxu1 %v3200_v12  ;;  %v3193_v43 = vmul.f32 0.5, %v3189_v61 }
0x10dc   : > { %v3194_v58 = vmul.f32 %v3190_v34, %v3120_v7 }
0x10dd   : > { %v3197_v18 = vmul.f32 %v3193_v43, %v3159_v28  ;;  %3534 = vmatpush.bf16.msrb.mxu3 %v9007_v56 }
0x10de   : > { %v3198_v6 = vpack.c.bf16 %v3194_v58, %v3194_v58  ;;  %v9024_v58 = vld [vmem:[#allocation9 + $0x8] sm:$0xff] }
0x10df   : > { %v3201_v50 = vpack.c.bf16 %v3197_v18, %v3197_v18  ;;  %v9027_v18 = vld [vmem:[#allocation9] sm:$0xff] }
0x10e0   : > { %3402 = vmatmul.bf16.vlgmr.msra.gmra.mxu3 %v3198_v6 }
0x10e1   : > { %3441 = vmatmul.bf16.vlgmr.msra.gmra.mxu2 %v3201_v50  ;;  %3535 = vmatpush.bf16.msrb.mxu3 %v9010_v2 }
0x10e2   : > { %3862 = vmatpush.bf16.msra.mxu2 %v8376_v8 }
0x10e6   : > { %3863 = vmatpush.bf16.msra.mxu2 %v8384_v30 }
0x10ea   : > { %3864 = vmatpush.bf16.msra.mxu2 %v8390_v19  ;;  %v6703_v19 = vld [vmem:[%s10156_s21] ss:$0 sm:$0xff] }
0x10ee   : > { %3865 = vmatpush.bf16.msra.mxu2 %v8396_v20 }
0x10f2   : > { %3866 = vmatpush.bf16.msra.mxu2 %v8402_v54 }
0x10f6   : > { %3867 = vmatpush.bf16.msra.mxu2 %v8408_v27 }
0x10fa   : > { %3868 = vmatpush.bf16.msra.mxu2 %v8414_v31 }
0x10fe   : > { %3869 = vmatpush.bf16.msra.mxu2 %v8420_v32 }
0x1157   : > { %v3416_v28 = vpop.f32.mrf.mxu0 }
0x1158   : > { %v3429_v24 = vpop.f32.mrf.mxu1 }
0x115f   : > { %v3418_v7 = vpop.f32.mrf.mxu0 }
0x1160   : > { %v3431_v60 = vpop.f32.mrf.mxu1 }
0x1163   : > { %v3403_v55 = vpop.f32.mrf.mxu3 }
0x1164   : > { %v3417_v8 = vadd.f32 %v3416_v28, %v3403_v55  ;;  %v3442_v10 = vpop.f32.mrf.mxu2 }
0x1166   : > { %v3430_v30 = vadd.f32 %v3429_v24, %v3417_v8 }
0x1168   : > { %v3443_v14 = vadd.f32 %v3442_v10, %v3430_v30  ;;  %v9039_v30 = vld [vmem:[#allocation4] sm:$0xff] }
0x116a   : > { %v3446_v20 = vadd.f32 %v3443_v14, %v8478_v4  ;;  %v9013_v4 = vld [vmem:[#allocation9 + $0x20] sm:$0xff]  ;;  %v9042_v14 = vrot.slane %v9039_v30, 7 }
0x116b   : > { %v3405_v54 = vpop.f32.mrf.mxu3  ;;  %3536 = vmatpush.bf16.msrb.mxu3 %v9013_v4 }
0x116c   : > { %v3444_v27 = vpop.f32.mrf.mxu2  ;;  %v3450_v31 = vadd.f32 %v6703_v19, %v3446_v20  ;;  %10502 = vst [vmem:[#allocation101_spill] sm:$0xff] %v9042_v14 }
0x116e   : > { %v3452_v32 = vsel %vm3451_vm3, %v3450_v31, 0.0 }
0x116f   : > { %3453 = vadd.xlane.f32.xlu2 %v3452_v32  ;;  %3537 = vmatpush.bf16.msrb.mxu3 %v9016_v11 }
0x1173   : > { %3538 = vmatpush.bf16.msrb.mxu3 %v9019_v37 }
0x1177   : > { %3539 = vmatpush.bf16.msrb.mxu3 %v9024_v58 }
0x117b   : > { %3540 = vmatpush.bf16.msrb.mxu3 %v9027_v18 }
0x117f   : > { %3721 = vmatpush.bf16.msra.mxu3 %v8238_v29 }
0x1183   : > { %3722 = vmatpush.bf16.msra.mxu3 %v8247_v33 }
0x1187   : > { %3723 = vmatpush.bf16.msra.mxu3 %v8256_v53 }
0x118b   : > { %3724 = vmatpush.bf16.msra.mxu3 %v8266_v40 }
0x118f   : > { %3725 = vmatpush.bf16.msra.mxu3 %v8275_v45 }
0x1193   : > { %3726 = vmatpush.bf16.msra.mxu3 %v8285_v49 }
0x1197   : > { %3727 = vmatpush.bf16.msra.mxu3 %v8294_v5 }
0x119b   : > { %3728 = vmatpush.bf16.msra.mxu3 %v8303_v26 }
0x11e2   : > { %v3454_v0 = vpop.xlane.xlu2 %3453 }
0x11e3   : > { %v3455_v12 = vmul.f32 %v3454_v0, %v7381_v23 }
0x11e5   : > { %v3456_v61 = vsub.f32 %v3450_v31, %v3455_v12  ;;  %v9050_v12 = vld [vmem:[%s10158_s23] sm:$0x1] }
0x11e6   : > { %10503 = vst [vmem:[#allocation102_spill] sm:$0xff] %v9050_v12 }
0x11e7   : > { %v3457_v34 = vmul.f32 %v3456_v61, %v3456_v61 }
0x11e9   : > { %v3458_v43 = vsel %vm3451_vm3, %v3457_v34, 0.0 }
0x11ea   : > { %3459 = vadd.xlane.f32.xlu0 %v3458_v43 }
0x125d   : > { %v3460_v6 = vpop.xlane.xlu0 %3459 }
0x125e   : > { %v3461_v50 = vmul.f32 %v3460_v6, %v7381_v23 }
0x1260   : > { %v3462_v28 = vadd.f32 1e-05, %v3461_v50 }
0x1262   : > { %6764 = vrsqrt.f32 %v3462_v28  ;;  %vm3469_vm5 = vweird.f32 %v3462_v28 }
0x1268   : > { %v6765_v24 = vpop.eup %6764 }
0x1269   : > { %v3464_v7 = vmul.f32 %v6765_v24, %v3462_v28  ;;  %vm3470_vm4 = vweird.f32 %v6765_v24 }
0x126a   : > { %vm3471_vm6 = vmor %vm3469_vm5, %vm3470_vm4  ;;  %vm7111_vm4 = vmmov 0  }
0x126b   : > { %v3465_v60 = vmul.f32 %v6765_v24, %v3464_v7  ;;  %vm3745_vm5 = vmpackc.low %vm7111_vm4, %vm7111_vm4 }
0x126d   : > { %v3466_v55 = vmul.f32 0.5, %v3465_v60 }
0x126f   : > { %v3467_v8 = vsub.f32 1.5, %v3466_v55  ;;  %v9059_v55 = vld [vmem:[%s10159_s24 + $0x38] sm:$0xff] }
0x1270   : > { %3655 = vmatpush.bf16.msra.mxu1 %v9059_v55 }
0x1271   : > { %v3468_v10 = vmul.f32 %v6765_v24, %v3467_v8  ;;  %v3580_v8 = vstv %s8315_s22 }
0x1272   : > { %vm3581_vm11 = vcmp.eq.s32.totalorder %v8320_v57, %v3580_v8 }
0x1273   : > { %v3472_v19 = vsel %vm3471_vm6, %v6765_v24, %v3468_v10  ;;  %v9065_v10 = vld [vmem:[%s10160_s25] sm:$0xff] }
0x1274   : > { %v3473_v20 = vmul.f32 %v3472_v19, %v3456_v61  ;;  %v9072_v19 = vld [vmem:[%s10159_s24 + $0x30] sm:$0xff]  ;;  %3601 = vmatpush.bf16.msrb.mxu0 %v9065_v10 }
0x1275   : > { %3656 = vmatpush.bf16.msra.mxu1 %v9072_v19 }
0x1276   : > { %v3477_v54 = vmul.f32 %v9042_v14, %v3473_v20  ;;  %v10289_v20 = vmov 0.0  }
0x1278   : > { %v3478_v27 = vadd.f32 %v9039_v30, %v3477_v54  ;;  %v6309_v54 = vsel %vm3581_vm11, 1.0, %v10289_v20  ;;  %3695 = vmatpush.bf16.msra.mxu0 %v7956_v21 }
0x127a   : > { %v3479_v31 = vpack.c.bf16 %v3478_v27, %v3478_v27  ;;  %v3584_v27 = vpack.c.bf16 %v6309_v54, %v6309_v54 }
0x127c   : > { %v3481_v32 = vshrl.u32 %v3479_v31, 16  ;;  %v9081_v31 = vld [vmem:[%s10159_s24 + $0x28] sm:$0xff]  ;;  %6314 = vmatmul.msk.bf16.vlgmr.msrb.gmra.mxu0 %vm1197_vm7, %v3584_v27 }
0x127d   : > { %3696 = vmatpush.bf16.msra.mxu0 %v7989_v35  ;;  %3657 = vmatpush.bf16.msra.mxu1 %v9081_v31 }
0x127e   : > { %v3483_v0 = vrot.slane %v3481_v32, 3  ;;  %v9089_v32 = vld [vmem:[%s10159_s24 + $0x20] sm:$0xff] }
0x1280   : > { %3541 = vmatmul.bf16.vlgmr.msrb.gmra.mxu3 %v3483_v0  ;;  %v9096_v0 = vld [vmem:[%s10159_s24 + $0x18] sm:$0xff] }
0x1281   : > { %3883 = vmatpush.bf16.xpose.msrb.mxu3 %v8334_v15  ;;  %3697 = vmatpush.bf16.msra.mxu0 %v8008_v46 }
0x1282   : > { %3658 = vmatpush.bf16.msra.mxu1 %v9089_v32 }
0x1285   : > { %3698 = vmatpush.bf16.msra.mxu0 %v8028_v59 }
0x1286   : > { %3659 = vmatpush.bf16.msra.mxu1 %v9096_v0 }
0x1289   : > { %3699 = vmatpush.bf16.msra.mxu0 %v8041_v16 }
0x128d   : > { %3700 = vmatpush.bf16.msra.mxu0 %v8062_v62 }
0x1291   : > { %3701 = vmatpush.bf16.msra.mxu0 %v8081_v22  ;;  %v9136_v22 = vrot.slane %v9039_v30, 1 }
0x1295   : > { %3702 = vmatpush.bf16.msra.mxu0 %v8102_v51 }
0x12f9   : > { %v3603_v8 = vpop.f32.mrf.mxu0 }
0x1303   : > { %v3542_v34 = vpop.f32.mrf.mxu3 }
0x1304   : > { %v3543_v61 = vadd.f32 %v3542_v34, %v9050_v12  ;;  %v9103_v34 = vld [vmem:[%s10159_s24 + $0x10] sm:$0xff] }
0x1305   : > { %3660 = vmatpush.bf16.msra.mxu1 %v9103_v34 }
0x1306   : > { %v3554_v43 = vsel %vm3553_vm8, %v3543_v61, -inf }
0x1307   : > { %3555 = vmax.xlane.f32.xlu1 %v3554_v43 }
0x130b   : > { %v3544_v6 = vpop.f32.mrf.mxu3 }
0x137a   : > { %v3556_v50 = vpop.xlane.xlu1 %3555 }
0x137b   : > { %vm3557_vm10 = vcmp.eq.f32.partialorder %v3543_v61, %v3556_v50  ;;  %v9110_v61 = vld [vmem:[%s10159_s24 + $0x8] sm:$0xff] }
0x137c   : > { %v3558_v28 = vsel %vm3557_vm10, %v8320_v57, 128  ;;  %3661 = vmatpush.bf16.msra.mxu1 %v9110_v61 }
0x137d   : > { %v3559_v24 = vsel %vm3553_vm8, %v3558_v28, 2147483647 }
0x137e   : > { %v3561_v7 = vshra.s32 %v3559_v24, 16  ;;  %v3560_v43 = vand.u32 65535, %v3559_v24  ;;  %v3605_v24 = vpop.f32.mrf.mxu0 }
0x1380   : > { %v3563_v60 = vcvt.s32.f32 %v3561_v7  ;;  %v3562_v50 = vcvt.s32.f32 %v3560_v43  ;;  %v9119_v7 = vld [vmem:[%s10159_s24] sm:$0xff] }
0x1381   : > { %3662 = vmatpush.bf16.msra.mxu1 %v9119_v7 }
0x1382   : > { %3564 = vmin.xlane.f32.xlu2 %v3563_v60 }
0x13f5   : > { %v3565_v6 = vpop.xlane.xlu2 %3564 }
0x13f6   : > { %vm3566_vm13 = vcmp.eq.f32.partialorder %v3563_v60, %v3565_v6  ;;  %v3571_v54 = vcvt.f32.s32 %v3565_v6  ;;  %v10295_v60 = vmov 1.0|1.0  }
0x13f7   : > { %v3567_v28 = vsel %vm3566_vm13, %v3562_v50, inf }
0x13f8   : > { %3568 = vmin.xlane.f32.xlu0 %v3567_v28  ;;  %v3572_v20 = vshll.u32 %v3571_v54, 16 }
0x146b   : > { %v3569_v27 = vpop.xlane.xlu0 %3568 }
0x146c   : > { %v3570_v12 = vcvt.f32.s32 %v3569_v27 }
0x146e   : > { %v9122_v15 = vadd.s32 %v3572_v20, %v3570_v12 }
0x1470   : > { %10504 = vst [vmem:[#allocation103_spill] sm:$0xff] %v9122_v15  ;;  %vm3576_vm14 = vcmp.eq.s32.totalorder %v8320_v57, %v9122_v15 }
0x1471   : > { %vm6347_vm15 = vmpackc.low %vm3576_vm14, %vm3576_vm14  ;;  %vm3768_vm14 = vcmp.ge.s32.totalorder %v8320_v57, 8 }
0x1472   : > { %6348 = vmatmul.msk.bf16.vlgmr.msra.gmra.mxu1 %vm6347_vm15, %v10295_v60  ;;  %vm3769_vm15 = vcmp.le.s32.totalorder %v8320_v57, 8 }
0x14ef   : > { %v3664_v43 = vpop.f32.mrf.mxu1 }
0x14f0   : > { %v9127_v50 = vadd.f32 %v3664_v43, %v3603_v8 }
0x14f2   : > { %v3668_v28 = vsel %vm3553_vm8, %v9127_v50, 0.0 }
0x14f3   : > { %3669 = vadd.xlane.f32.xlu1 %v3668_v28 }
0x14f7   : > { %v3666_v6 = vpop.f32.mrf.mxu1 }
0x1566   : > { %v3670_v24 = vpop.xlane.xlu1 %3669 }
0x1567   : > { %v3671_v54 = vmul.f32 %v3670_v24, %v7381_v23 }
0x1569   : > { %v3672_v12 = vsub.f32 %v9127_v50, %v3671_v54 }
0x156b   : > { %v3673_v20 = vmul.f32 %v3672_v12, %v3672_v12 }
0x156d   : > { %v3674_v27 = vsel %vm3553_vm8, %v3673_v20, 0.0 }
0x156e   : > { %3675 = vadd.xlane.f32.xlu2 %v3674_v27  ;;  %v10510_v27 = vld [vmem:[#allocation33_spill] sm:$0xff] }
0x15e1   : > { %v3676_v15 = vpop.xlane.xlu2 %3675 }
0x15e2   : > { %v3677_v60 = vmul.f32 %v3676_v15, %v7381_v23 }
0x15e4   : > { %v3678_v14 = vadd.f32 1e-05, %v3677_v60 }
0x15e6   : > { %6766 = vrsqrt.f32 %v3678_v14  ;;  %vm3685_vm1 = vweird.f32 %v3678_v14 }
0x15ec   : > { %v6767_v8 = vpop.eup %6766 }
0x15ed   : > { %v3680_v43 = vmul.f32 %v6767_v8, %v3678_v14  ;;  %vm3686_vm0 = vweird.f32 %v6767_v8  ;;  %v10507_v14 = vld [vmem:[#allocation55_spill] sm:$0xff] }
0x15ee   : > { %vm3687_vm2 = vmor %vm3685_vm1, %vm3686_vm0 }
0x15ef   : > { %v3681_v51 = vmul.f32 %v6767_v8, %v3680_v43  ;;  %vm3770_vm1 = vmand %vm3768_vm14, %vm3769_vm15 }
0x15f1   : > { %v3682_v26 = vmul.f32 0.5, %v3681_v51  ;;  %v10505_v51 = vld [vmem:[#allocation51_spill] sm:$0xff] }
0x15f3   : > { %v3683_v28 = vsub.f32 1.5, %v3682_v26  ;;  %v10506_v26 = vld [vmem:[#allocation31_spill] sm:$0xff] }
0x15f5   : > { %v3684_v6 = vmul.f32 %v6767_v8, %v3683_v28 }
0x15f7   : > { %v3688_v24 = vsel %vm3687_vm2, %v6767_v8, %v3684_v6  ;;  %v10512_v8 = vld [vmem:[#allocation34_spill] sm:$0xff] }
0x15f8   : > { %v3689_v54 = vmul.f32 %v3688_v24, %v3672_v12  ;;  %v10508_v12 = vld [vmem:[#allocation32_spill] sm:$0xff] }
0x15fa   : > { %v3690_v20 = vmul.f32 %v9039_v30, %v3689_v54 }
0x15fc   : > { %v3693_v15 = vadd.f32 %v9136_v22, %v3690_v20 }
0x15fe   : > { %v3694_v60 = vpack.c.bf16 %v3693_v15, %v3693_v15 }
0x1600   : > { %3703 = vmatmul.bf16.vlgmr.msra.gmra.mxu0 %v3694_v60  ;;  %3716 = vmatmul.bf16.vlgmr.msrb.gmra.mxu2 %v3694_v60 }
0x1601   : > { %3729 = vmatmul.bf16.vlgmr.msra.gmra.mxu3 %v3694_v60  ;;  %3988 = vmatpush.bf16.msrb.mxu2 %v8503_v3 }
0x1602   : > { %3919 = vmatpush.bf16.msra.mxu3 %v8431_v42  ;;  %v10509_v42 = vld [vmem:[#allocation59_spill] sm:$0xff] }
0x1605   : > { %3989 = vmatpush.bf16.msrb.mxu2 %v8545_v1 }
0x1606   : > { %3920 = vmatpush.bf16.msra.mxu3 %v8437_v44  ;;  %v10511_v44 = vld [vmem:[#allocation63_spill] sm:$0xff] }
0x1609   : > { %3990 = vmatpush.bf16.msrb.mxu2 %v8581_v13 }
0x160a   : > { %3921 = vmatpush.bf16.msra.mxu3 %v8443_v48  ;;  %v10513_v48 = vld [vmem:[#allocation26_spill] sm:$0xff] }
0x160b   : > { %v9157_v43 = vadd.s32 8, %v10513_v48 }
0x160d   : > { %3991 = vmatpush.bf16.msrb.mxu2 %v8617_v41  ;;  %10514 = vst [vmem:[#allocation31_spill] sm:$0xff] %v9157_v43  ;;  %vm3735_vm3 = vcmp.eq.s32.totalorder %v9157_v43, 8 }
0x160e   : > { %3922 = vmatpush.bf16.msra.mxu3 %v8449_v47  ;;  %vm3746_vm6 = vmpackc.low %vm3735_vm3, %vm3735_vm3  ;;  %v10307_v47 = vmov 0   ;;  %vm3789_vm3 = vcmask 122880  }
0x160f   : > { %v3747_v28 = vsel %vm3745_vm5, 65537, %v10307_v47  ;;  %v3748_v6 = vsel %vm3746_vm6, 65537, %v10307_v47 }
0x1610   : > { %v3749_v24 = vunpack.c.l.b16 %v3747_v28  ;;  %v3750_v54 = vunpack.c.l.b16 %v3748_v6 }
0x1611   : > { %3992 = vmatpush.bf16.msrb.mxu2 %v10505_v51  ;;  %v10520_v51 = vld [vmem:[#allocation30_spill] sm:$0xff] }
0x1612   : > { %3923 = vmatpush.bf16.msra.mxu3 %v10506_v26  ;;  %v9162_v15 = vunpack.i.l.s16 %v3749_v24  ;;  %v6350_v60 = vunpack.i.l.s16 %v3750_v54  ;;  %v9165_v26 = vunpack.c.l.b16 %v10307_v47 }
0x1614   : > { %10515 = vst [vmem:[#allocation32_spill] sm:$0xff] %v9162_v15  ;;  %vm3756_vm10 = vcmp.ne.s32.totalorder %v9162_v15, %v9165_v26 }
0x1615   : > { %3993 = vmatpush.bf16.msrb.mxu2 %v10507_v14  ;;  %10516 = vst [vmem:[#allocation33_spill] sm:$0xff] %v9165_v26 }
0x1616   : > { %3924 = vmatpush.bf16.msra.mxu3 %v10508_v12  ;;  %v9168_v12 = vunpack.c.h.b16 %v10307_v47 }
0x1618   : > { %10517 = vst [vmem:[#allocation34_spill] sm:$0xff] %v9168_v12  ;;  %vm3757_vm11 = vcmp.ne.s32.totalorder %v6350_v60, %v9168_v12 }
0x1619   : > { %3994 = vmatpush.bf16.msrb.mxu2 %v10509_v42  ;;  %vm3758_vm13 = vmpackc.low %vm3757_vm11, %vm3756_vm10 }
0x161a   : > { %3925 = vmatpush.bf16.msra.mxu3 %v10510_v27 }
0x161d   : > { %3995 = vmatpush.bf16.msrb.mxu2 %v10511_v44  ;;  %v10518_v44 = vld [vmem:[#allocation24_spill] sm:$0xff] }
0x161e   : > { %3926 = vmatpush.bf16.msra.mxu3 %v10512_v8  ;;  %v3548_v47 = vsel %vm2644_vm12, %v10518_v44, 0  ;;  %v10523_v44 = vld [vmem:[#allocation28_spill] sm:$0xff]  ;;  %vm3766_vm12 = vcmp.lt.s32.totalorder %v8320_v57, 8 }
0x161f   : > { %vm9248_vm0 = vmand %vm2607_vm9, %vm3766_vm12 }
0x1620   : > { %vm3771_vm2 = vmor %vm9248_vm0, %vm3770_vm1 }
0x167d   : > { %v3704_v20 = vpop.f32.mrf.mxu0 }
0x1683   : > { %v3717_v27 = vpop.f32.mrf.mxu2 }
0x1684   : > { %v3736_v8 = vpack.c.bf16 %v3717_v27, %v3717_v27  ;;  %v3730_v48 = vpop.f32.mrf.mxu3 }
0x1685   : > { %v3760_v28 = vpack.c.bf16 %v3730_v48, %v3730_v48  ;;  %v3706_v6 = vpop.f32.mrf.mxu0 }
0x1686   : > { %v3742_v43 = vpack.i.b16 %v3736_v8, %v3736_v8  ;;  %v9188_v8 = vld [vmem:[%s10150_s15 + $0x38] sm:$0xff]  ;;  %v9231_v6 = vld [vmem:[%s10150_s15] sm:$0xff] }
0x1687   : > { %v3762_v24 = vpack.i.b16 %v3760_v28, %v3760_v28  ;;  %10522 = vst [vmem:[#allocation30_spill] sm:$0xff] %v9188_v8  ;;  %v9225_v28 = vld [vmem:[%s10150_s15 + $0x8] sm:$0xff] }
0x1688   : > { %v3744_v54 = vperm.slane %v3742_v43, 0  ;;  %v3773_v43 = vpack.c.bf16 %v3704_v20, %v3704_v20  ;;  %v9219_v20 = vld [vmem:[%s10150_s15 + $0x10] sm:$0xff]  ;;  %10529 = vst [vmem:[#allocation109_spill] sm:$0xff] %v9225_v28 }
0x1689   : > { %v3764_v42 = vperm.slane %v3762_v24, 0  ;;  %10528 = vst [vmem:[#allocation108_spill] sm:$0xff] %v9219_v20  ;;  %v10531_v24 = vld [vmem:[#allocation36_spill] sm:$0xff] }
0x168a   : > { %v9178_v27 = vsel %vm3758_vm13, %v3744_v54, %v3548_v47  ;;  %v9213_v47 = vld [vmem:[%s10150_s15 + $0x18] sm:$0xff]  ;;  %10530 = vst [vmem:[#allocation110_spill] sm:$0xff] %v9231_v6  ;;  %v10532_v54 = vld [vmem:[#allocation39_spill] sm:$0xff] }
0x168b   : > { %10519 = vst [vmem:[#allocation26_spill] sm:$0xff] %v9178_v27  ;;  %v3719_v14 = vpop.f32.mrf.mxu2  ;;  %3781 = vmatpush.bf16.xpose.msrb.mxu1 %v9178_v27  ;;  %v9182_v60 = vsel %vm3758_vm13, %v3764_v42, %v10520_v51  ;;  %v9201_v51 = vld [vmem:[%s10150_s15 + $0x28] sm:$0xff]  ;;  %v9207_v42 = vld [vmem:[%s10150_s15 + $0x20] sm:$0xff] }
0x168c   : > { %10521 = vst [vmem:[#allocation24_spill] sm:$0xff] %v9182_v60  ;;  %v3732_v48 = vpop.f32.mrf.mxu3  ;;  %3812 = vmatpush.bf16.msrb.mxu0 %v9182_v60  ;;  %v9195_v14 = vld [vmem:[%s10150_s15 + $0x30] sm:$0xff] }
0x168d   : > { %10524 = vst [vmem:[#allocation104_spill] sm:$0xff] %v9195_v14  ;;  %v10533_v48 = vld [vmem:[#allocation42_spill] sm:$0xff] }
0x168e   : > { %10525 = vst [vmem:[#allocation105_spill] sm:$0xff] %v9201_v51 }
0x168f   : > { %10526 = vst [vmem:[#allocation106_spill] sm:$0xff] %v9207_v42 }
0x1690   : > { %3912 = vmatpush.bf16.msra.mxu0 %v10523_v44  ;;  %10527 = vst [vmem:[#allocation107_spill] sm:$0xff] %v9213_v47 }
0x1692   : > { %3782 = vmatmul.bf16.vlgmr.msrb.gmra.mxu1 %v3773_v43  ;;  %v10534_v43 = vld [vmem:[#allocation46_spill] sm:$0xff] }
0x1693   : > { %3819 = vmatpush.bf16.msra.mxu1 %v9188_v8 }
0x1697   : > { %3820 = vmatpush.bf16.msra.mxu1 %v9195_v14 }
0x169b   : > { %3821 = vmatpush.bf16.msra.mxu1 %v9201_v51 }
0x169f   : > { %3822 = vmatpush.bf16.msra.mxu1 %v9207_v42  ;;  %v10538_v42 = vld [vmem:[#allocation62_spill] sm:$0xff] }
0x16a3   : > { %3823 = vmatpush.bf16.msra.mxu1 %v9213_v47  ;;  %v10536_v47 = vld [vmem:[#allocation54_spill] sm:$0xff] }
0x16a7   : > { %3824 = vmatpush.bf16.msra.mxu1 %v9219_v20  ;;  %v10535_v20 = vld [vmem:[#allocation50_spill] sm:$0xff] }
0x16ab   : > { %3825 = vmatpush.bf16.msra.mxu1 %v9225_v28  ;;  %v10537_v28 = vld [vmem:[#allocation58_spill] sm:$0xff] }
0x16af   : > { %3826 = vmatpush.bf16.msra.mxu1 %v9231_v6 }
0x16b3   : > { %3975 = vmatpush.bf16.msrb.mxu1 %v10531_v24 }
0x16b7   : > { %3976 = vmatpush.bf16.msrb.mxu1 %v10532_v54 }
0x16bb   : > { %3977 = vmatpush.bf16.msrb.mxu1 %v10533_v48  ;;  %v10540_v48 = vmov 0 }
0x16bc   : > { %v10541_v48 = vsel %vm9248_vm0, 4294967295, %v10540_v48 }
0x16bd   : > { %10542 = vst [vmem:[#allocation27_spill] sm:$0xff] %v10541_v48 }
0x16bf   : > { %3978 = vmatpush.bf16.msrb.mxu1 %v10534_v43 }
0x16c3   : > { %3979 = vmatpush.bf16.msrb.mxu1 %v10535_v20 }
0x16c7   : > { %3980 = vmatpush.bf16.msrb.mxu1 %v10536_v47 }
0x16cb   : > { %3981 = vmatpush.bf16.msrb.mxu1 %v10537_v28  ;;  %v10543_v28 = vmov -1e+30  }
0x16cc   : > { %v3772_v47 = vsel %vm3771_vm2, 0.0, %v10543_v28 }
0x16cf   : > { %3982 = vmatpush.bf16.msrb.mxu1 %v10538_v42 }
0x170f   : > { %v3783_v42 = vpop.f32.mrf.mxu1 }
0x1710   : > { %v3787_v20 = vmul.f32 0.088388346, %v3783_v42  ;;  %v10544_v42 = vld [vmem:[#allocation35_spill] sm:$0xff] }
0x1712   : > { %v3788_v43 = vadd.f32 %v3787_v20, %v3772_v47  ;;  %v10545_v47 = vld [vmem:[#allocation38_spill] sm:$0xff]  ;;  %v10546_v20 = vld [vmem:[#allocation41_spill] sm:$0xff] }
0x1714   : > { %v3790_v24 = vsel %vm3789_vm3, %v3788_v43, -inf }
0x1715   : > { %3791 = vmax.xlane.f32.xlu0 %v3790_v24  ;;  %v10551_v24 = vld [vmem:[#allocation61_spill] sm:$0xff] }
0x1717   : > { %v3785_v54 = vpop.f32.mrf.mxu1 }
0x1718   : > { %v10555_v54 = vld [vmem:[#allocation75_spill] sm:$0xff] }
0x1788   : > { %v3792_v6 = vpop.xlane.xlu0 %3791 }
0x1789   : > { %v3793_v51 = vsub.f32 %v3788_v43, %v3792_v6  ;;  %v10547_v6 = vld [vmem:[#allocation45_spill] sm:$0xff]  ;;  %v10554_v43 = vld [vmem:[#allocation71_spill] sm:$0xff] }
0x178b   : > { %v3794_v14 = vmul.f32 1.442695, %v3793_v51  ;;  %v10549_v51 = vld [vmem:[#allocation53_spill] sm:$0xff] }
0x178d   : > { %6768 = vpow2.f32 %v3794_v14  ;;  %v10548_v14 = vld [vmem:[#allocation49_spill] sm:$0xff] }
0x1793   : > { %v6769_v8 = vpop.eup %6768 }
0x1794   : > { %v3796_v27 = vsel %vm3789_vm3, %v6769_v8, 0.0 }
0x1795   : > { %3797 = vadd.xlane.f32.xlu1 %v3796_v27  ;;  %v10550_v27 = vld [vmem:[#allocation57_spill] sm:$0xff] }
0x1808   : > { %v3798_v48 = vpop.xlane.xlu1 %3797 }
0x1809   : > { %6770 = vrcp.f32 %v3798_v48  ;;  %v10553_v48 = vld [vmem:[#allocation67_spill] sm:$0xff] }
0x180f   : > { %v6771_v44 = vpop.eup %6770 }
0x1810   : > { %v3800_v60 = vmul.f32 %v6771_v44, %v6769_v8  ;;  %v10552_v44 = vld [vmem:[#allocation65_spill] sm:$0xff] }
0x1812   : > { %v3801_v28 = vpack.c.bf16 %v3800_v60, %v3800_v60 }
0x1814   : > { %6351 = vmatmul.msk.bf16.vlgmr.msrb.gmra.mxu0 %vm1197_vm7, %v3801_v28 }
0x1815   : > { %3962 = vmatpush.bf16.msrb.mxu0 %v10544_v42 }
0x1819   : > { %3963 = vmatpush.bf16.msrb.mxu0 %v10545_v47 }
0x181d   : > { %3964 = vmatpush.bf16.msrb.mxu0 %v10546_v20 }
0x1821   : > { %3965 = vmatpush.bf16.msrb.mxu0 %v10547_v6  ;;  %v10556_v6 = vld [vmem:[#allocation79_spill] sm:$0xff] }
0x1825   : > { %3966 = vmatpush.bf16.msrb.mxu0 %v10548_v14  ;;  %v10557_v14 = vld [vmem:[#allocation83_spill] sm:$0xff] }
0x1829   : > { %3967 = vmatpush.bf16.msrb.mxu0 %v10549_v51  ;;  %v10558_v51 = vld [vmem:[#allocation87_spill] sm:$0xff] }
0x182d   : > { %3968 = vmatpush.bf16.msrb.mxu0 %v10550_v27  ;;  %v10559_v27 = vld [vmem:[#allocation91_spill] sm:$0xff] }
0x1831   : > { %3969 = vmatpush.bf16.msrb.mxu0 %v10551_v24 }
0x1891   : > { %v3814_v8 = vpop.f32.mrf.mxu0 }
0x1892   : > { %v3818_v60 = vpack.c.bf16 %v3814_v8, %v3814_v8 }
0x1894   : > { %3827 = vmatmul.bf16.vlgmr.msra.gmra.mxu1 %v3818_v60 }
0x1895   : > { %4067 = vmatpush.bf16.msra.mxu1 %v10552_v44 }
0x1899   : > { %v3816_v28 = vpop.f32.mrf.mxu0  ;;  %4068 = vmatpush.bf16.msra.mxu1 %v10553_v48 }
0x189d   : > { %4069 = vmatpush.bf16.msra.mxu1 %v10554_v43 }
0x18a1   : > { %4070 = vmatpush.bf16.msra.mxu1 %v10555_v54 }
0x18a5   : > { %4071 = vmatpush.bf16.msra.mxu1 %v10556_v6 }
0x18a9   : > { %4072 = vmatpush.bf16.msra.mxu1 %v10557_v14 }
0x18ad   : > { %4073 = vmatpush.bf16.msra.mxu1 %v10558_v51 }
0x18b1   : > { %4074 = vmatpush.bf16.msra.mxu1 %v10559_v27 }
0x1911   : > { %v3828_v24 = vpop.f32.mrf.mxu1 }
0x1912   : > { %v9277_v8 = vadd.f32 %v3828_v24, %v9127_v50 }
0x1914   : > { %v3833_v60 = vsel %vm3553_vm8, %v9277_v8, 0.0 }
0x1915   : > { %3834 = vadd.xlane.f32.xlu2 %v3833_v60 }
0x1919   : > { %v3830_v44 = vpop.f32.mrf.mxu1 }
0x1988   : > { %v3835_v28 = vpop.xlane.xlu2 %3834 }
0x1989   : > { %v3836_v48 = vmul.f32 %v3835_v28, %v7381_v23  ;;  %v9286_v28 = vrot.slane %v9039_v30, 2 }
0x198b   : > { %v3837_v6 = vsub.f32 %v9277_v8, %v3836_v48  ;;  %10560 = vst [vmem:[#allocation65_spill] sm:$0xff] %v9286_v28 }
0x198d   : > { %v3838_v43 = vmul.f32 %v3837_v6, %v3837_v6 }
0x198f   : > { %v3839_v14 = vsel %vm3553_vm8, %v3838_v43, 0.0 }
0x1990   : > { %3840 = vadd.xlane.f32.xlu0 %v3839_v14  ;;  %v9289_v14 = vrot.slane %v9039_v30, 3 }
0x1992   : > { %10561 = vst [vmem:[#allocation67_spill] sm:$0xff] %v9289_v14 }
0x1a03   : > { %v3841_v51 = vpop.xlane.xlu0 %3840 }
0x1a04   : > { %v3842_v27 = vmul.f32 %v3841_v51, %v7381_v23 }
0x1a06   : > { %v3843_v54 = vadd.f32 1e-05, %v3842_v27 }
0x1a08   : > { %6772 = vrsqrt.f32 %v3843_v54  ;;  %vm3850_vm4 = vweird.f32 %v3843_v54 }
0x1a0e   : > { %v6773_v50 = vpop.eup %6772 }
0x1a0f   : > { %v3845_v24 = vmul.f32 %v6773_v50, %v3843_v54  ;;  %vm3851_vm9 = vweird.f32 %v6773_v50  ;;  %v10564_v54 = vld [vmem:[#allocation72_spill] sm:$0xff] }
0x1a10   : > { %vm3852_vm5 = vmor %vm3850_vm4, %vm3851_vm9 }
0x1a11   : > { %v3846_v20 = vmul.f32 %v6773_v50, %v3845_v24  ;;  %v10565_v24 = vld [vmem:[#allocation76_spill] sm:$0xff] }
0x1a13   : > { %v3847_v47 = vmul.f32 0.5, %v3846_v20  ;;  %v10562_v20 = vld [vmem:[#allocation66_spill] sm:$0xff] }
0x1a15   : > { %v3848_v60 = vsub.f32 1.5, %v3847_v47  ;;  %v10563_v47 = vld [vmem:[#allocation68_spill] sm:$0xff] }
0x1a17   : > { %v3849_v44 = vmul.f32 %v6773_v50, %v3848_v60  ;;  %v10566_v60 = vld [vmem:[#allocation80_spill] sm:$0xff] }
0x1a19   : > { %v3853_v48 = vsel %vm3852_vm5, %v6773_v50, %v3849_v44  ;;  %v10568_v50 = vld [vmem:[#allocation88_spill] sm:$0xff]  ;;  %vm3574_vm5 = vcmp.eq.s32.totalorder %v8320_v57, 0 }
0x1a1a   : > { %v3854_v43 = vmul.f32 %v3853_v48, %v3837_v6  ;;  %v10567_v6 = vld [vmem:[#allocation84_spill] sm:$0xff] }
0x1a1b   : > { %v10569_v44 = vld [vmem:[#allocation92_spill] sm:$0xff] }
0x1a1c   : > { %v3857_v51 = vmul.f32 %v9286_v28, %v3854_v43 }
0x1a1e   : > { %v3860_v27 = vadd.f32 %v9289_v14, %v3857_v51 }
0x1a20   : > { %v3861_v42 = vpack.c.bf16 %v3860_v27, %v3860_v27  ;;  %v10571_v27 = vld [vmem:[#allocation40_spill] sm:$0xff] }
0x1a22   : > { %3870 = vmatmul.bf16.vlgmr.msra.gmra.mxu2 %v3861_v42  ;;  %v10570_v42 = vld [vmem:[#allocation37_spill] sm:$0xff] }
0x1a23   : > { %4080 = vmatpush.bf16.msra.mxu2 %v10562_v20  ;;  %v10572_v20 = vld [vmem:[#allocation44_spill] sm:$0xff] }
0x1a27   : > { %4081 = vmatpush.bf16.msra.mxu2 %v10563_v47  ;;  %v10573_v47 = vld [vmem:[#allocation48_spill] sm:$0xff] }
0x1a2b   : > { %4082 = vmatpush.bf16.msra.mxu2 %v10564_v54  ;;  %v10574_v54 = vld [vmem:[#allocation52_spill] sm:$0xff] }
0x1a2f   : > { %4083 = vmatpush.bf16.msra.mxu2 %v10565_v24  ;;  %v10575_v24 = vld [vmem:[#allocation56_spill] sm:$0xff] }
0x1a33   : > { %4084 = vmatpush.bf16.msra.mxu2 %v10566_v60  ;;  %v10576_v60 = vld [vmem:[#allocation60_spill] sm:$0xff] }
0x1a37   : > { %4085 = vmatpush.bf16.msra.mxu2 %v10567_v6  ;;  %v10577_v6 = vld [vmem:[#allocation64_spill] sm:$0xff] }
0x1a3b   : > { %4086 = vmatpush.bf16.msra.mxu2 %v10568_v50 }
0x1a3f   : > { %4087 = vmatpush.bf16.msra.mxu2 %v10569_v44 }
0x1aa5   : > { %v3871_v48 = vpop.f32.mrf.mxu2 }
0x1aa6   : > { %v3875_v43 = vpack.c.bf16 %v3871_v48, %v3871_v48 }
0x1aa8   : > { %3884 = vmatmul.bf16.vlgmr.msrb.gmra.mxu3 %v3875_v43 }
0x1aa9   : > { %4001 = vmatpush.bf16.msrb.mxu3 %v10570_v42 }
0x1aad   : > { %v3873_v51 = vpop.f32.mrf.mxu2  ;;  %4002 = vmatpush.bf16.msrb.mxu3 %v10571_v27 }
0x1ab1   : > { %4003 = vmatpush.bf16.msrb.mxu3 %v10572_v20 }
0x1ab5   : > { %4004 = vmatpush.bf16.msrb.mxu3 %v10573_v47 }
0x1ab9   : > { %4005 = vmatpush.bf16.msrb.mxu3 %v10574_v54 }
0x1abd   : > { %4006 = vmatpush.bf16.msrb.mxu3 %v10575_v24 }
0x1ac1   : > { %4007 = vmatpush.bf16.msrb.mxu3 %v10576_v60 }
0x1ac5   : > { %4008 = vmatpush.bf16.msrb.mxu3 %v10577_v6  ;;  %v10579_v6 = vld [vmem:[#allocation73_spill] sm:$0xff] }
0x1b2b   : > { %v3885_v50 = vpop.f32.mrf.mxu3 }
0x1b2c   : > { %v3889_v44 = vmul.f32 0.088388346, %v3885_v50  ;;  %v10578_v50 = vld [vmem:[#allocation69_spill] sm:$0xff] }
0x1b2e   : > { %v3890_v48 = vsel %vm3789_vm3, %v3889_v44, -inf }
0x1b2f   : > { %3891 = vmax.xlane.f32.xlu1 %v3890_v48  ;;  %v10580_v48 = vld [vmem:[#allocation77_spill] sm:$0xff] }
0x1b33   : > { %v3887_v43 = vpop.f32.mrf.mxu3 }
0x1b34   : > { %v10587_v43 = vld [vmem:[#allocation74_spill] sm:$0xff] }
0x1ba2   : > { %v3892_v51 = vpop.xlane.xlu1 %3891 }
0x1ba3   : > { %v3893_v27 = vsub.f32 %v3889_v44, %v3892_v51  ;;  %v10581_v44 = vld [vmem:[#allocation81_spill] sm:$0xff]  ;;  %v10589_v51 = vld [vmem:[#allocation82_spill] sm:$0xff] }
0x1ba5   : > { %v3894_v42 = vmul.f32 1.442695, %v3893_v27  ;;  %v10583_v27 = vld [vmem:[#allocation89_spill] sm:$0xff] }
0x1ba7   : > { %6774 = vpow2.f32 %v3894_v42  ;;  %v10582_v42 = vld [vmem:[#allocation85_spill] sm:$0xff] }
0x1bad   : > { %v6775_v20 = vpop.eup %6774 }
0x1bae   : > { %v3896_v47 = vsel %vm3789_vm3, %v6775_v20, 0.0 }
0x1baf   : > { %3897 = vadd.xlane.f32.xlu2 %v3896_v47  ;;  %v10584_v47 = vld [vmem:[#allocation93_spill] sm:$0xff] }
0x1c22   : > { %v3898_v54 = vpop.xlane.xlu2 %3897 }
0x1c23   : > { %6776 = vrcp.f32 %v3898_v54  ;;  %v10585_v54 = vld [vmem:[#allocation96_spill] sm:$0xff] }
0x1c29   : > { %v6777_v24 = vpop.eup %6776 }
0x1c2a   : > { %v3900_v60 = vmul.f32 %v6777_v24, %v6775_v20 }
0x1c2c   : > { %v3901_v14 = vpack.c.bf16 %v3900_v60, %v3900_v60 }
0x1c2e   : > { %6352 = vmatmul.msk.bf16.vlgmr.msra.gmra.mxu0 %vm1197_vm7, %v3901_v14  ;;  %v10586_v14 = vld [vmem:[#allocation70_spill] sm:$0xff] }
0x1c2f   : > { %4054 = vmatpush.bf16.msra.mxu0 %v10578_v50  ;;  %v10590_v50 = vld [vmem:[#allocation86_spill] sm:$0xff] }
0x1c33   : > { %4055 = vmatpush.bf16.msra.mxu0 %v10579_v6  ;;  %v10588_v6 = vld [vmem:[#allocation78_spill] sm:$0xff] }
0x1c37   : > { %4056 = vmatpush.bf16.msra.mxu0 %v10580_v48  ;;  %v10591_v48 = vld [vmem:[#allocation90_spill] sm:$0xff] }
0x1c3b   : > { %4057 = vmatpush.bf16.msra.mxu0 %v10581_v44  ;;  %v10592_v44 = vld [vmem:[#allocation94_spill] sm:$0xff] }
0x1c3f   : > { %4058 = vmatpush.bf16.msra.mxu0 %v10582_v42  ;;  %v10593_v42 = vld [vmem:[#allocation97_spill] sm:$0xff] }
0x1c43   : > { %4059 = vmatpush.bf16.msra.mxu0 %v10583_v27 }
0x1c47   : > { %4060 = vmatpush.bf16.msra.mxu0 %v10584_v47 }
0x1c4b   : > { %4061 = vmatpush.bf16.msra.mxu0 %v10585_v54 }
0x1cab   : > { %v3914_v20 = vpop.f32.mrf.mxu0 }
0x1cac   : > { %v3918_v24 = vpack.c.bf16 %v3914_v20, %v3914_v20 }
0x1cae   : > { %3927 = vmatmul.bf16.vlgmr.msra.gmra.mxu3 %v3918_v24 }
0x1caf   : > { %4093 = vmatpush.bf16.msra.mxu3 %v10586_v14 }
0x1cb3   : > { %v3916_v60 = vpop.f32.mrf.mxu0  ;;  %4094 = vmatpush.bf16.msra.mxu3 %v10587_v43 }
0x1cb7   : > { %4095 = vmatpush.bf16.msra.mxu3 %v10588_v6 }
0x1cbb   : > { %4096 = vmatpush.bf16.msra.mxu3 %v10589_v51 }
0x1cbf   : > { %4097 = vmatpush.bf16.msra.mxu3 %v10590_v50 }
0x1cc3   : > { %4098 = vmatpush.bf16.msra.mxu3 %v10591_v48 }
0x1cc7   : > { %4099 = vmatpush.bf16.msra.mxu3 %v10592_v44 }
0x1ccb   : > { %4100 = vmatpush.bf16.msra.mxu3 %v10593_v42 }
0x1d31   : > { %v3928_v27 = vpop.f32.mrf.mxu3 }
0x1d32   : > { %v9329_v47 = vadd.f32 %v3928_v27, %v9277_v8 }
0x1d34   : > { %v3933_v54 = vsel %vm3553_vm8, %v9329_v47, 0.0 }
0x1d35   : > { %3934 = vadd.xlane.f32.xlu0 %v3933_v54 }
0x1d39   : > { %v3930_v20 = vpop.f32.mrf.mxu3 }
0x1da8   : > { %v3935_v24 = vpop.xlane.xlu0 %3934 }
0x1da9   : > { %v3936_v14 = vmul.f32 %v3935_v24, %v7381_v23  ;;  %v9338_v24 = vrot.slane %v9039_v30, 4 }
0x1dab   : > { %v3937_v60 = vsub.f32 %v9329_v47, %v3936_v14 }
0x1dad   : > { %v3938_v43 = vmul.f32 %v3937_v60, %v3937_v60 }
0x1daf   : > { %v3939_v6 = vsel %vm3553_vm8, %v3938_v43, 0.0 }
0x1db0   : > { %3940 = vadd.xlane.f32.xlu1 %v3939_v6  ;;  %v9341_v6 = vrot.slane %v9039_v30, 5 }
0x1e23   : > { %v3941_v51 = vpop.xlane.xlu1 %3940 }
0x1e24   : > { %v3942_v50 = vmul.f32 %v3941_v51, %v7381_v23 }
0x1e26   : > { %v3943_v48 = vadd.f32 1e-05, %v3942_v50 }
0x1e28   : > { %6778 = vrsqrt.f32 %v3943_v48  ;;  %vm3950_vm11 = vweird.f32 %v3943_v48 }
0x1e2e   : > { %v6779_v8 = vpop.eup %6778 }
0x1e2f   : > { %v3945_v44 = vmul.f32 %v6779_v8, %v3943_v48  ;;  %vm3951_vm6 = vweird.f32 %v6779_v8  ;;  %v10594_v48 = vld [vmem:[#allocation20_spill] sm:$0xff] }
0x1e30   : > { %vm3952_vm13 = vmor %vm3950_vm11, %vm3951_vm6  ;;  %vm4168_vm6 = vcmp.eq.s32.totalorder %v8320_v57, 1 }
0x1e31   : > { %v3946_v42 = vmul.f32 %v6779_v8, %v3945_v44 }
0x1e33   : > { %v3947_v27 = vmul.f32 0.5, %v3946_v42 }
0x1e35   : > { %v3948_v54 = vsub.f32 1.5, %v3947_v27 }
0x1e37   : > { %v3949_v20 = vmul.f32 %v6779_v8, %v3948_v54 }
0x1e39   : > { %v3953_v14 = vsel %vm3952_vm13, %v6779_v8, %v3949_v20 }
0x1e3a   : > { %v3954_v43 = vmul.f32 %v3953_v14, %v3937_v60  ;;  %v10595_v60 = vld [vmem:[#allocation21_spill] sm:$0xff] }
0x1e3c   : > { %v3957_v51 = vmul.f32 %v9338_v24, %v3954_v43 }
0x1e3e   : > { %v3960_v50 = vadd.f32 %v9341_v6, %v3957_v51 }
0x1e40   : > { %v3961_v28 = vpack.c.bf16 %v3960_v50, %v3960_v50 }
0x1e42   : > { %3970 = vmatmul.bf16.vlgmr.msrb.gmra.mxu0 %v3961_v28  ;;  %3983 = vmatmul.bf16.vlgmr.msrb.gmra.mxu1 %v3961_v28 }
0x1e43   : > { %3996 = vmatmul.bf16.vlgmr.msrb.gmra.mxu2 %v3961_v28  ;;  %4009 = vmatmul.bf16.vlgmr.msrb.gmra.mxu3 %v3961_v28 }
0x1e44   : > { %4135 = vmatpush.bf16.msrb.mxu0 %v9004_v39  ;;  %4196 = vmatpush.bf16.msrb.mxu2 %v9059_v55 }
0x1e45   : > { %4190 = vmatpush.bf16.msrb.mxu1 %v9065_v10  ;;  %4247 = vmatpush.bf16.msrb.mxu3 %v10594_v48 }
0x1e48   : > { %4136 = vmatpush.bf16.msrb.mxu0 %v9007_v56  ;;  %4197 = vmatpush.bf16.msrb.mxu2 %v9072_v19 }
0x1e49   : > { %4248 = vmatpush.bf16.msrb.mxu3 %v10595_v60 }
0x1e4c   : > { %4137 = vmatpush.bf16.msrb.mxu0 %v9010_v2  ;;  %4198 = vmatpush.bf16.msrb.mxu2 %v9081_v31 }
0x1e4d   : > { %4249 = vmatpush.bf16.msrb.mxu3 %v8019_v52 }
0x1e50   : > { %4138 = vmatpush.bf16.msrb.mxu0 %v9013_v4  ;;  %4199 = vmatpush.bf16.msrb.mxu2 %v9089_v32  ;;  %v10596_v4 = vld [vmem:[#allocation95_spill] sm:$0xff] }
0x1e51   : > { %4250 = vmatpush.bf16.msrb.mxu3 %v8031_v63 }
0x1e54   : > { %4139 = vmatpush.bf16.msrb.mxu0 %v9016_v11  ;;  %4200 = vmatpush.bf16.msrb.mxu2 %v9096_v0 }
0x1e55   : > { %4251 = vmatpush.bf16.msrb.mxu3 %v8049_v9 }
0x1e58   : > { %4140 = vmatpush.bf16.msrb.mxu0 %v9019_v37  ;;  %4201 = vmatpush.bf16.msrb.mxu2 %v9103_v34  ;;  %v10597_v34 = vld [vmem:[#allocation98_spill] sm:$0xff] }
0x1e59   : > { %4252 = vmatpush.bf16.msrb.mxu3 %v8067_v17 }
0x1e5c   : > { %4141 = vmatpush.bf16.msrb.mxu0 %v9024_v58  ;;  %4202 = vmatpush.bf16.msrb.mxu2 %v9110_v61  ;;  %v10598_v61 = vld [vmem:[#allocation100_spill] sm:$0xff] }
0x1e5d   : > { %4253 = vmatpush.bf16.msrb.mxu3 %v8088_v25 }
0x1e60   : > { %4142 = vmatpush.bf16.msrb.mxu0 %v9027_v18  ;;  %4203 = vmatpush.bf16.msrb.mxu2 %v9119_v7 }
0x1e61   : > { %4254 = vmatpush.bf16.msrb.mxu3 %v8108_v36 }
0x1ebf   : > { %v3971_v39 = vpop.f32.mrf.mxu0  ;;  %v3984_v56 = vpop.f32.mrf.mxu1 }
0x1ec0   : > { %v3972_v2 = vadd.f32 %v3971_v39, %v8978_v38  ;;  %v3985_v11 = vadd.f32 %v3984_v56, %v10596_v4 }
0x1ec2   : > { %v4014_v37 = vmul.f32 %v3972_v2, %v3972_v2  ;;  %v4015_v55 = vmul.f32 %v3985_v11, %v3985_v11 }
0x1ec4   : > { %v4018_v10 = vmul.f32 %v4014_v37, %v3972_v2  ;;  %v4019_v58 = vmul.f32 %v4015_v55, %v3985_v11 }
0x1ec6   : > { %v4022_v19 = vmul.f32 0.044715, %v4018_v10  ;;  %v4023_v31 = vmul.f32 0.044715, %v4019_v58  ;;  %v3997_v32 = vpop.f32.mrf.mxu2  ;;  %v4010_v0 = vpop.f32.mrf.mxu3 }
0x1ec7   : > { %v3998_v18 = vadd.f32 %v3997_v32, %v10597_v34  ;;  %v4011_v7 = vadd.f32 %v4010_v0, %v10598_v61  ;;  %v3973_v28 = vpop.f32.mrf.mxu0  ;;  %v3986_v8 = vpop.f32.mrf.mxu1 }
0x1ec8   : > { %v4026_v44 = vadd.f32 %v4022_v19, %v3972_v2  ;;  %v4027_v42 = vadd.f32 %v4023_v31, %v3985_v11 }
0x1ec9   : > { %v4016_v27 = vmul.f32 %v3998_v18, %v3998_v18  ;;  %v4017_v54 = vmul.f32 %v4011_v7, %v4011_v7 }
0x1eca   : > { %v4030_v20 = vmul.f32 0.7978846, %v4026_v44  ;;  %v4031_v14 = vmul.f32 0.7978846, %v4027_v42 }
0x1ecb   : > { %v4020_v43 = vmul.f32 %v4016_v27, %v3998_v18  ;;  %v4021_v51 = vmul.f32 %v4017_v54, %v4011_v7 }
0x1ecc   : > { %6780 = vtanh.f32 %v4030_v20 }
0x1ecd   : > { %6782 = vtanh.f32 %v4031_v14  ;;  %v4024_v50 = vmul.f32 0.044715, %v4020_v43  ;;  %v4025_v39 = vmul.f32 0.044715, %v4021_v51 }
0x1ece   : > { %v3999_v56 = vpop.f32.mrf.mxu2  ;;  %v4012_v37 = vpop.f32.mrf.mxu3 }
0x1ecf   : > { %v4028_v55 = vadd.f32 %v4024_v50, %v3998_v18  ;;  %v4029_v10 = vadd.f32 %v4025_v39, %v4011_v7 }
0x1ed1   : > { %v4032_v58 = vmul.f32 0.7978846, %v4028_v55  ;;  %v4033_v32 = vmul.f32 0.7978846, %v4029_v10  ;;  %v4175_v55 = vstv %s4174_s8  ;;  %s5232_s8 = sshll.u32 %s824_s1, 4  ;;  %s5233_s8 = int_to_ptr.vmem [resolvable:$true] %s5232_s8 }
0x1ed2   : > { %v6781_v0 = vpop.eup %6780  ;;  %vm4176_vm12 = vcmp.eq.s32.totalorder %v8320_v57, %v4175_v55 }
0x1ed3   : > { %v6783_v28 = vpop.eup %6782  ;;  %v4038_v19 = vadd.f32 1.0, %v6781_v0  ;;  %6784 = vtanh.f32 %v4032_v58  ;;  %v9384_v58 = vld [vmem:[%s10151_s16 + $0x38] sm:$0xff]  ;;  %v9393_v0 = vld [vmem:[%s10151_s16 + $0x30] sm:$0xff] }
0x1ed4   : > { %v4039_v31 = vadd.f32 1.0, %v6783_v28  ;;  %6786 = vtanh.f32 %v4033_v32  ;;  %v9403_v28 = vld [vmem:[%s10151_s16 + $0x28] sm:$0xff] }
0x1ed5   : > { %v4042_v8 = vmul.f32 0.5, %v4038_v19  ;;  %v9411_v19 = vld [vmem:[%s10151_s16 + $0x20] sm:$0xff] }
0x1ed6   : > { %v4043_v44 = vmul.f32 0.5, %v4039_v31  ;;  %v10600_v31 = vld [vmem:[#allocation22_spill] sm:$0xff] }
0x1ed7   : > { %v4046_v42 = vmul.f32 %v4042_v8, %v3972_v2  ;;  %v9419_v8 = vld [vmem:[%s10151_s16 + $0x18] sm:$0xff] }
0x1ed8   : > { %v4047_v27 = vmul.f32 %v4043_v44, %v3985_v11  ;;  %v10601_v44 = vld [vmem:[#allocation25_spill] sm:$0xff] }
0x1ed9   : > { %v6785_v54 = vpop.eup %6784  ;;  %v4050_v20 = vpack.c.bf16 %v4046_v42, %v4046_v42  ;;  %v10602_v42 = vld [vmem:[#allocation23_spill] sm:$0xff] }
0x1eda   : > { %v6787_v14 = vpop.eup %6786  ;;  %v4051_v43 = vpack.c.bf16 %v4047_v27, %v4047_v27  ;;  %v4040_v51 = vadd.f32 1.0, %v6785_v54  ;;  %v9427_v27 = vld [vmem:[%s10151_s16 + $0x10] sm:$0xff]  ;;  %v9433_v54 = vld [vmem:[%s10151_s16 + $0x8] sm:$0xff] }
0x1edb   : > { %v4041_v50 = vadd.f32 1.0, %v6787_v14  ;;  %4062 = vmatmul.bf16.vlgmr.msra.gmra.mxu0 %v4050_v20  ;;  %v9439_v20 = vld [vmem:[%s10151_s16] sm:$0xff] }
0x1edc   : > { %v4044_v39 = vmul.f32 0.5, %v4040_v51  ;;  %4075 = vmatmul.bf16.vlgmr.msra.gmra.mxu1 %v4051_v43  ;;  %4260 = vmatpush.bf16.msra.mxu0 %v8238_v29 }
0x1edd   : > { %v4045_v56 = vmul.f32 0.5, %v4041_v50  ;;  %4234 = vmatpush.bf16.msra.mxu1 %v7956_v21 }
0x1ede   : > { %v4048_v37 = vmul.f32 %v4044_v39, %v3998_v18  ;;  %v10599_v18 = vmov 0.0  }
0x1edf   : > { %v4049_v10 = vmul.f32 %v4045_v56, %v4011_v7  ;;  %v6354_v7 = vsel %vm4176_vm12, 1.0, %v10599_v18 }
0x1ee0   : > { %v4052_v2 = vpack.c.bf16 %v4048_v37, %v4048_v37  ;;  %4261 = vmatpush.bf16.msra.mxu0 %v8247_v33  ;;  %v4179_v32 = vpack.c.bf16 %v6354_v7, %v6354_v7 }
0x1ee1   : > { %v4053_v11 = vpack.c.bf16 %v4049_v10, %v4049_v10  ;;  %4235 = vmatpush.bf16.msra.mxu1 %v7989_v35 }
0x1ee2   : > { %4088 = vmatmul.bf16.vlgmr.msra.gmra.mxu2 %v4052_v2  ;;  %v9445_v2 = vld [vmem:[%s10156_s21] sm:$0x1] }
0x1ee3   : > { %4101 = vmatmul.bf16.vlgmr.msra.gmra.mxu3 %v4053_v11  ;;  %10603 = vst [vmem:[#allocation71_spill] sm:$0xff] %v9445_v2 }
0x1ee4   : > { %4262 = vmatpush.bf16.msra.mxu0 %v8256_v53  ;;  %4393 = vmatpush.bf16.msra.mxu3 %v9384_v58 }
0x1ee5   : > { %4236 = vmatpush.bf16.msra.mxu1 %v8008_v46 }
0x1ee8   : > { %4263 = vmatpush.bf16.msra.mxu0 %v8266_v40  ;;  %4394 = vmatpush.bf16.msra.mxu3 %v9393_v0 }
0x1ee9   : > { %4237 = vmatpush.bf16.msra.mxu1 %v8028_v59 }
0x1eec   : > { %4264 = vmatpush.bf16.msra.mxu0 %v8275_v45  ;;  %6355 = vmatmul.msk.bf16.vlgmr.msrb.gmra.mxu1 %vm1197_vm7, %v4179_v32 }
0x1eed   : > { %4238 = vmatpush.bf16.msra.mxu1 %v8041_v16  ;;  %4395 = vmatpush.bf16.msra.mxu3 %v9403_v28 }
0x1ef0   : > { %4265 = vmatpush.bf16.msra.mxu0 %v8285_v49 }
0x1ef1   : > { %4239 = vmatpush.bf16.msra.mxu1 %v8062_v62  ;;  %4396 = vmatpush.bf16.msra.mxu3 %v9411_v19 }
0x1ef4   : > { %4266 = vmatpush.bf16.msra.mxu0 %v8294_v5 }
0x1ef5   : > { %4240 = vmatpush.bf16.msra.mxu1 %v10600_v31  ;;  %4397 = vmatpush.bf16.msra.mxu3 %v9419_v8 }
0x1ef8   : > { %4267 = vmatpush.bf16.msra.mxu0 %v10601_v44 }
0x1ef9   : > { %4241 = vmatpush.bf16.msra.mxu1 %v10602_v42  ;;  %4398 = vmatpush.bf16.msra.mxu3 %v9427_v27 }
0x1efd   : > { %4399 = vmatpush.bf16.msra.mxu3 %v9433_v54 }
0x1f01   : > { %4400 = vmatpush.bf16.msra.mxu3 %v9439_v20 }
0x1f58   : > { %v4063_v14 = vpop.f32.mrf.mxu0 }
0x1f59   : > { %v4076_v43 = vpop.f32.mrf.mxu1 }
0x1f5a   : > { %v4077_v39 = vadd.f32 %v4076_v43, %v4063_v14 }
0x1f60   : > { %v4065_v51 = vpop.f32.mrf.mxu0 }
0x1f61   : > { %v4078_v50 = vpop.f32.mrf.mxu1 }
0x1f65   : > { %v4089_v56 = vpop.f32.mrf.mxu2 }
0x1f66   : > { %v4090_v37 = vadd.f32 %v4089_v56, %v4077_v39  ;;  %v4102_v55 = vpop.f32.mrf.mxu3 }
0x1f68   : > { %v4103_v10 = vadd.f32 %v4102_v55, %v4090_v37 }
0x1f6a   : > { %v4106_v11 = vadd.f32 %v4103_v10, %v9329_v47 }
0x1f6c   : > { %v4107_v7 = vadd.f32 %v4106_v11, %v9445_v2  ;;  %v10605_v2 = vld [vmem:[#allocation29_spill] sm:$0xff] }
0x1f6d   : > { %v4091_v32 = vpop.f32.mrf.mxu2 }
0x1f6e   : > { %v4104_v42 = vpop.f32.mrf.mxu3  ;;  %v4108_v31 = vsel %vm3553_vm8, %v4107_v7, 0.0 }
0x1f6f   : > { %4109 = vadd.xlane.f32.xlu2 %v4108_v31 }
0x1fe2   : > { %v4110_v51 = vpop.xlane.xlu2 %4109 }
0x1fe3   : > { %v4111_v14 = vmul.f32 %v4110_v51, %v7381_v23  ;;  %v9454_v51 = vrot.slane %v9039_v30, 6 }
0x1fe5   : > { %v4112_v43 = vsub.f32 %v4107_v7, %v4111_v14 }
0x1fe7   : > { %v4113_v50 = vmul.f32 %v4112_v43, %v4112_v43 }
0x1fe9   : > { %v4114_v39 = vsel %vm3553_vm8, %v4113_v50, 0.0 }
0x1fea   : > { %4115 = vadd.xlane.f32.xlu0 %v4114_v39  ;;  %v10604_v39 = vld [vmem:[#allocation101_spill] sm:$0xff] }
0x205d   : > { %v4116_v56 = vpop.xlane.xlu0 %4115 }
0x205e   : > { %v4117_v37 = vmul.f32 %v4116_v56, %v7381_v23 }
0x2060   : > { %v4118_v55 = vadd.f32 1e-05, %v4117_v37 }
0x2062   : > { %6788 = vrsqrt.f32 %v4118_v55  ;;  %vm4125_vm1 = vweird.f32 %v4118_v55 }
0x2068   : > { %v6789_v47 = vpop.eup %6788 }
0x2069   : > { %v4120_v10 = vmul.f32 %v6789_v47, %v4118_v55  ;;  %vm4126_vm15 = vweird.f32 %v6789_v47 }
0x206a   : > { %vm4127_vm2 = vmor %vm4125_vm1, %vm4126_vm15 }
0x206b   : > { %v4121_v11 = vmul.f32 %v6789_v47, %v4120_v10 }
0x206d   : > { %v4122_v42 = vmul.f32 0.5, %v4121_v11  ;;  %v10606_v11 = vld [vmem:[#allocation102_spill] sm:$0xff] }
0x206f   : > { %v4123_v32 = vsub.f32 1.5, %v4122_v42 }
0x2071   : > { %v4124_v31 = vmul.f32 %v6789_v47, %v4123_v32 }
0x2073   : > { %v4128_v7 = vsel %vm4127_vm2, %v6789_v47, %v4124_v31 }
0x2074   : > { %v4129_v14 = vmul.f32 %v4128_v7, %v4112_v43 }
0x2076   : > { %v4132_v50 = vmul.f32 %v9454_v51, %v4129_v14 }
0x2078   : > { %v4133_v56 = vadd.f32 %v4132_v50, %v10604_v39 }
0x207a   : > { %v4134_v37 = vpack.c.bf16 %v4133_v56, %v4133_v56 }
0x207c   : > { %4143 = vmatmul.bf16.vlgmr.msrb.gmra.mxu0 %v4134_v37 }
0x207d   : > { %4414 = vmatpush.bf16.xpose.msrb.mxu0 %v10605_v2 }
0x20f9   : > { %v4144_v10 = vpop.f32.mrf.mxu0 }
0x20fa   : > { %v4145_v42 = vadd.f32 %v4144_v10, %v10606_v11  ;;  %v4192_v10 = vpop.f32.mrf.mxu1 }
0x20fc   : > { %v4148_v32 = vsel %vm3553_vm8, %v4145_v42, -inf }
0x20fd   : > { %4149 = vmax.xlane.f32.xlu1 %v4148_v32 }
0x2101   : > { %v4146_v55 = vpop.f32.mrf.mxu0 }
0x2102   : > { %v4194_v11 = vpop.f32.mrf.mxu1 }
0x2170   : > { %v4150_v30 = vpop.xlane.xlu1 %4149 }
0x2171   : > { %vm4151_vm9 = vcmp.eq.f32.partialorder %v4145_v42, %v4150_v30 }
0x2172   : > { %v4152_v47 = vsel %vm4151_vm9, %v8320_v57, 128 }
0x2173   : > { %v4153_v43 = vsel %vm3553_vm8, %v4152_v47, 2147483647  ;;  %v10607_v47 = vld [vmem:[#allocation103_spill] sm:$0xff] }
0x2174   : > { %v4155_v31 = vshra.s32 %v4153_v43, 16  ;;  %v4154_v14 = vand.u32 65535, %v4153_v43  ;;  %v10609_v43 = vmov 1.0|1.0  }
0x2176   : > { %v4157_v7 = vcvt.s32.f32 %v4155_v31  ;;  %v4156_v56 = vcvt.s32.f32 %v4154_v14  ;;  %v3575_v31 = vsel %vm3574_vm5, %v10607_v47, 0 }
0x2178   : > { %4158 = vmin.xlane.f32.xlu2 %v4157_v7 }
0x21eb   : > { %v4159_v50 = vpop.xlane.xlu2 %4158 }
0x21ec   : > { %vm4160_vm4 = vcmp.eq.f32.partialorder %v4157_v7, %v4159_v50  ;;  %v4165_v2 = vcvt.f32.s32 %v4159_v50 }
0x21ed   : > { %v4161_v37 = vsel %vm4160_vm4, %v4156_v56, inf }
0x21ee   : > { %4162 = vmin.xlane.f32.xlu0 %v4161_v37  ;;  %v4166_v42 = vshll.u32 %v4165_v2, 16 }
0x2261   : > { %v4163_v32 = vpop.xlane.xlu0 %4162 }
0x2262   : > { %v4164_v55 = vcvt.f32.s32 %v4163_v32 }
0x2264   : > { %v4167_v30 = vadd.s32 %v4166_v42, %v4164_v55 }
0x2266   : > { %v9466_v39 = vsel %vm4168_vm6, %v4167_v30, %v3575_v31  ;;  %vm4170_vm11 = vcmp.eq.s32.totalorder %v8320_v57, %v4167_v30  ;;  %vm4305_vm6 = vcmp.le.s32.totalorder %v8320_v57, 9 }
0x2267   : > { %10608 = vst [vmem:[#allocation75_spill] sm:$0xff] %v9466_v39  ;;  %vm6356_vm13 = vmpackc.low %vm4170_vm11, %vm4170_vm11  ;;  %v9478_v39 = vld [vmem:[#allocation4] sm:$0xff] }
0x2268   : > { %6357 = vmatmul.msk.bf16.vlgmr.msrb.gmra.mxu2 %vm6356_vm13, %v10609_v43  ;;  %vm4306_vm11 = vmand %vm3768_vm14, %vm4305_vm6 }
0x2269   : > { %vm4307_vm13 = vmor %vm9248_vm0, %vm4306_vm11 }
0x22eb   : > { %v4205_v7 = vpop.f32.mrf.mxu2 }
0x22ec   : > { %v9470_v14 = vadd.f32 %v4205_v7, %v4192_v10 }
0x22ee   : > { %v4209_v50 = vsel %vm3553_vm8, %v9470_v14, 0.0 }
0x22ef   : > { %4210 = vadd.xlane.f32.xlu1 %v4209_v50 }
0x22f3   : > { %v4207_v2 = vpop.f32.mrf.mxu2 }
0x2362   : > { %v4211_v56 = vpop.xlane.xlu1 %4210 }
0x2363   : > { %v4212_v37 = vmul.f32 %v4211_v56, %v7381_v23 }
0x2365   : > { %v4213_v11 = vsub.f32 %v9470_v14, %v4212_v37 }
0x2367   : > { %v4214_v32 = vmul.f32 %v4213_v11, %v4213_v11 }
0x2369   : > { %v4215_v42 = vsel %vm3553_vm8, %v4214_v32, 0.0 }
0x236a   : > { %4216 = vadd.xlane.f32.xlu2 %v4215_v42 }
0x23dd   : > { %v4217_v55 = vpop.xlane.xlu2 %4216 }
0x23de   : > { %v4218_v30 = vmul.f32 %v4217_v55, %v7381_v23 }
0x23e0   : > { %v4219_v47 = vadd.f32 1e-05, %v4218_v30  ;;  %v9500_v30 = vld [vmem:[%s10152_s17 + $0x28] sm:$0xff] }
0x23e1   : > { %10610 = vst [vmem:[#allocation79_spill] sm:$0xff] %v9500_v30 }
0x23e2   : > { %6790 = vrsqrt.f32 %v4219_v47  ;;  %vm4226_vm15 = vweird.f32 %v4219_v47 }
0x23e8   : > { %v6791_v10 = vpop.eup %6790 }
0x23e9   : > { %v4221_v31 = vmul.f32 %v6791_v10, %v4219_v47  ;;  %vm4227_vm12 = vweird.f32 %v6791_v10  ;;  %v9507_v47 = vld [vmem:[%s10152_s17 + $0x20] sm:$0xff] }
0x23ea   : > { %vm4228_vm1 = vmor %vm4226_vm15, %vm4227_vm12  ;;  %10611 = vst [vmem:[#allocation83_spill] sm:$0xff] %v9507_v47 }
0x23eb   : > { %v4222_v7 = vmul.f32 %v6791_v10, %v4221_v31  ;;  %v9514_v31 = vld [vmem:[%s10152_s17 + $0x18] sm:$0xff] }
0x23ec   : > { %10613 = vst [vmem:[#allocation87_spill] sm:$0xff] %v9514_v31 }
0x23ed   : > { %v4223_v43 = vmul.f32 0.5, %v4222_v7  ;;  %v10614_v7 = vld [vmem:[#allocation55_spill] sm:$0xff] }
0x23ef   : > { %v4224_v50 = vsub.f32 1.5, %v4223_v43  ;;  %v9486_v43 = vld [vmem:[%s10152_s17 + $0x38] sm:$0xff] }
0x23f1   : > { %v4225_v2 = vmul.f32 %v6791_v10, %v4224_v50  ;;  %v9521_v50 = vld [vmem:[%s10152_s17 + $0x10] sm:$0xff] }
0x23f2   : > { %10615 = vst [vmem:[#allocation91_spill] sm:$0xff] %v9521_v50 }
0x23f3   : > { %v4229_v56 = vsel %vm4228_vm1, %v6791_v10, %v4225_v2  ;;  %v10612_v10 = vld [vmem:[#allocation51_spill] sm:$0xff] }
0x23f4   : > { %v4230_v37 = vmul.f32 %v4229_v56, %v4213_v11  ;;  %v9493_v11 = vld [vmem:[%s10152_s17 + $0x30] sm:$0xff]  ;;  %v10616_v2 = vld [vmem:[#allocation59_spill] sm:$0xff] }
0x23f5   : > { %v9528_v56 = vld [vmem:[%s10152_s17 + $0x8] sm:$0xff] }
0x23f6   : > { %v4231_v32 = vmul.f32 %v9478_v39, %v4230_v37  ;;  %10617 = vst [vmem:[#allocation66_spill] sm:$0xff] %v9528_v56  ;;  %v10618_v37 = vld [vmem:[#allocation63_spill] sm:$0xff] }
0x23f8   : > { %v4232_v42 = vadd.f32 %v4231_v32, %v9136_v22  ;;  %v9535_v32 = vld [vmem:[%s10152_s17] sm:$0xff] }
0x23f9   : > { %10619 = vst [vmem:[#allocation68_spill] sm:$0xff] %v9535_v32 }
0x23fa   : > { %v4233_v55 = vpack.c.bf16 %v4232_v42, %v4232_v42  ;;  %v10620_v42 = vld [vmem:[#allocation31_spill] sm:$0xff] }
0x23fb   : > { %vm4274_vm2 = vcmp.eq.s32.totalorder %v10620_v42, 9  ;;  %v10622_v42 = vld [vmem:[#allocation24_spill] sm:$0xff] }
0x23fc   : > { %4242 = vmatmul.bf16.vlgmr.msra.gmra.mxu1 %v4233_v55  ;;  %4255 = vmatmul.bf16.vlgmr.msrb.gmra.mxu3 %v4233_v55  ;;  %vm4285_vm9 = vmpackc.low %vm4274_vm2, %vm4274_vm2 }
0x23fd   : > { %4268 = vmatmul.bf16.vlgmr.msra.gmra.mxu0 %v4233_v55  ;;  %4515 = vmatpush.bf16.msrb.mxu3 %v8503_v3  ;;  %v10621_v55 = vmov 0  }
0x23fe   : > { %4450 = vmatpush.bf16.msra.mxu0 %v9486_v43 }
0x2401   : > { %4516 = vmatpush.bf16.msrb.mxu3 %v8545_v1 }
0x2402   : > { %4451 = vmatpush.bf16.msra.mxu0 %v9493_v11 }
0x2405   : > { %4517 = vmatpush.bf16.msrb.mxu3 %v8581_v13 }
0x2406   : > { %4452 = vmatpush.bf16.msra.mxu0 %v9500_v30 }
0x2409   : > { %4518 = vmatpush.bf16.msrb.mxu3 %v8617_v41 }
0x240a   : > { %4453 = vmatpush.bf16.msra.mxu0 %v9507_v47 }
0x240d   : > { %4519 = vmatpush.bf16.msrb.mxu3 %v10612_v10 }
0x240e   : > { %4454 = vmatpush.bf16.msra.mxu0 %v9514_v31 }
0x2411   : > { %4520 = vmatpush.bf16.msrb.mxu3 %v10614_v7 }
0x2412   : > { %4455 = vmatpush.bf16.msra.mxu0 %v9521_v50 }
0x2415   : > { %4521 = vmatpush.bf16.msrb.mxu3 %v10616_v2  ;;  %v4287_v2 = vsel %vm4285_vm9, 65537, %v10621_v55 }
0x2416   : > { %4456 = vmatpush.bf16.msra.mxu0 %v9528_v56  ;;  %v4289_v50 = vunpack.c.l.b16 %v4287_v2 }
0x2418   : > { %v6359_v7 = vunpack.i.l.s16 %v4289_v50  ;;  %v10624_v50 = vld [vmem:[#allocation28_spill] sm:$0xff] }
0x2419   : > { %4522 = vmatpush.bf16.msrb.mxu3 %v10618_v37 }
0x241a   : > { %4457 = vmatpush.bf16.msra.mxu0 %v9535_v32  ;;  %vm4296_vm4 = vcmp.ne.s32.totalorder %v6359_v7, %v9168_v12  ;;  %v10625_v7 = vld [vmem:[#allocation26_spill] sm:$0xff] }
0x241b   : > { %vm4297_vm5 = vmpackc.low %vm4296_vm4, %vm3756_vm10 }
0x2479   : > { %v4243_v31 = vpop.f32.mrf.mxu1 }
0x247a   : > { %v4269_v10 = vpop.f32.mrf.mxu0 }
0x247b   : > { %v4299_v47 = vpack.c.bf16 %v4269_v10, %v4269_v10 }
0x247d   : > { %v4301_v37 = vpack.i.b16 %v4299_v47, %v4299_v47 }
0x247f   : > { %v4303_v56 = vperm.slane %v4301_v37, 0  ;;  %v4256_v41 = vpop.f32.mrf.mxu3  ;;  %v10627_v37 = vld [vmem:[#allocation30_spill] sm:$0xff] }
0x2480   : > { %v4275_v32 = vpack.c.bf16 %v4256_v41, %v4256_v41  ;;  %v4309_v41 = vpack.c.bf16 %v4243_v31, %v4243_v31  ;;  %v10637_v31 = vld [vmem:[#allocation42_spill] sm:$0xff] }
0x2481   : > { %v4245_v30 = vpop.f32.mrf.mxu1  ;;  %v9545_v13 = vsel %vm4297_vm5, %v4303_v56, %v10622_v42  ;;  %v10629_v56 = vld [vmem:[#allocation105_spill] sm:$0xff]  ;;  %v10631_v42 = vld [vmem:[#allocation107_spill] sm:$0xff] }
0x2482   : > { %10623 = vst [vmem:[#allocation72_spill] sm:$0xff] %v9545_v13  ;;  %v4281_v55 = vpack.i.b16 %v4275_v32, %v4275_v32  ;;  %v4271_v2 = vpop.f32.mrf.mxu0  ;;  %4347 = vmatpush.bf16.msrb.mxu1 %v9545_v13  ;;  %v10628_v30 = vld [vmem:[#allocation104_spill] sm:$0xff]  ;;  %v10630_v32 = vld [vmem:[#allocation106_spill] sm:$0xff] }
0x2483   : > { %v10632_v2 = vld [vmem:[#allocation108_spill] sm:$0xff] }
0x2484   : > { %v4283_v10 = vperm.slane %v4281_v55, 0  ;;  %v10633_v55 = vld [vmem:[#allocation109_spill] sm:$0xff] }
0x2486   : > { %4443 = vmatpush.bf16.msra.mxu1 %v10624_v50  ;;  %v9550_v47 = vsel %vm4297_vm5, %v4283_v10, %v10625_v7  ;;  %v10634_v10 = vld [vmem:[#allocation110_spill] sm:$0xff]  ;;  %v10636_v7 = vld [vmem:[#allocation39_spill] sm:$0xff] }
0x2487   : > { %10626 = vst [vmem:[#allocation76_spill] sm:$0xff] %v9550_v47  ;;  %v4258_v12 = vpop.f32.mrf.mxu3  ;;  %4317 = vmatpush.bf16.xpose.msra.mxu2 %v9550_v47 }
0x2488   : > { %v10635_v12 = vld [vmem:[#allocation36_spill] sm:$0xff] }
0x248e   : > { %4318 = vmatmul.bf16.vlgmr.msra.gmra.mxu2 %v4309_v41  ;;  %v10639_v41 = vld [vmem:[#allocation50_spill] sm:$0xff] }
0x248f   : > { %4354 = vmatpush.bf16.msrb.mxu2 %v10627_v37  ;;  %v10638_v37 = vld [vmem:[#allocation46_spill] sm:$0xff] }
0x2493   : > { %4355 = vmatpush.bf16.msrb.mxu2 %v10628_v30  ;;  %v10640_v30 = vld [vmem:[#allocation54_spill] sm:$0xff] }
0x2497   : > { %4356 = vmatpush.bf16.msrb.mxu2 %v10629_v56  ;;  %v10641_v56 = vld [vmem:[#allocation58_spill] sm:$0xff] }
0x249b   : > { %4357 = vmatpush.bf16.msrb.mxu2 %v10630_v32  ;;  %v10642_v32 = vld [vmem:[#allocation62_spill] sm:$0xff] }
0x249f   : > { %4358 = vmatpush.bf16.msrb.mxu2 %v10631_v42 }
0x24a3   : > { %4359 = vmatpush.bf16.msrb.mxu2 %v10632_v2 }
0x24a7   : > { %4360 = vmatpush.bf16.msrb.mxu2 %v10633_v55  ;;  %v10644_v55 = vmov -1e+30  }
0x24ab   : > { %4361 = vmatpush.bf16.msrb.mxu2 %v10634_v10  ;;  %v4308_v10 = vsel %vm4307_vm13, 0.0, %v10644_v55 }
0x24af   : > { %4502 = vmatpush.bf16.msra.mxu2 %v10635_v12 }
0x24b3   : > { %4503 = vmatpush.bf16.msra.mxu2 %v10636_v7 }
0x24b7   : > { %4504 = vmatpush.bf16.msra.mxu2 %v10637_v31 }
0x24bb   : > { %4505 = vmatpush.bf16.msra.mxu2 %v10638_v37 }
0x24bf   : > { %4506 = vmatpush.bf16.msra.mxu2 %v10639_v41 }
0x24c3   : > { %4507 = vmatpush.bf16.msra.mxu2 %v10640_v30 }
0x24c7   : > { %4508 = vmatpush.bf16.msra.mxu2 %v10641_v56 }
0x24cb   : > { %4509 = vmatpush.bf16.msra.mxu2 %v10642_v32 }
0x2511   : > { %v4319_v2 = vpop.f32.mrf.mxu2 }
0x2512   : > { %v4323_v37 = vmul.f32 0.088388346, %v4319_v2  ;;  %v10646_v2 = vld [vmem:[#allocation38_spill] sm:$0xff] }
0x2514   : > { %v4324_v31 = vadd.f32 %v4323_v37, %v4308_v10  ;;  %v10645_v37 = vld [vmem:[#allocation35_spill] sm:$0xff] }
0x2515   : > { %v9607_v10 = vld [vmem:[%s10465_s13 + $0x60] sm:$0xff] }
0x2516   : > { %v4325_v41 = vsel %vm3789_vm3, %v4324_v31, -inf  ;;  %10656 = vst [vmem:[#allocation92_spill] sm:$0xff] %v9607_v10 }
0x2517   : > { %4326 = vmax.xlane.f32.xlu0 %v4325_v41  ;;  %v10647_v41 = vld [vmem:[#allocation41_spill] sm:$0xff] }
0x2519   : > { %v4321_v30 = vpop.f32.mrf.mxu2 }
0x251a   : > { %v10650_v30 = vld [vmem:[#allocation53_spill] sm:$0xff] }
0x258a   : > { %v4327_v56 = vpop.xlane.xlu0 %4326 }
0x258b   : > { %v4328_v7 = vsub.f32 %v4324_v31, %v4327_v56  ;;  %v10648_v31 = vld [vmem:[#allocation45_spill] sm:$0xff] }
0x258d   : > { %v4329_v32 = vmul.f32 1.442695, %v4328_v7  ;;  %v10649_v7 = vld [vmem:[#allocation49_spill] sm:$0xff] }
0x258f   : > { %6792 = vpow2.f32 %v4329_v32  ;;  %v9595_v32 = vld [vmem:[%s10465_s13 + $0x70] sm:$0xff] }
0x2590   : > { %10654 = vst [vmem:[#allocation84_spill] sm:$0xff] %v9595_v32 }
0x2595   : > { %v6793_v12 = vpop.eup %6792 }
0x2596   : > { %v4331_v50 = vsel %vm3789_vm3, %v6793_v12, 0.0 }
0x2597   : > { %4332 = vadd.xlane.f32.xlu1 %v4331_v50  ;;  %v10651_v50 = vld [vmem:[#allocation57_spill] sm:$0xff] }
0x260a   : > { %v4333_v13 = vpop.xlane.xlu1 %4332 }
0x260b   : > { %6794 = vrcp.f32 %v4333_v13  ;;  %v10652_v13 = vld [vmem:[#allocation61_spill] sm:$0xff] }
0x2611   : > { %v6795_v42 = vpop.eup %6794 }
0x2612   : > { %v4335_v47 = vmul.f32 %v6795_v42, %v6793_v12  ;;  %v9601_v42 = vld [vmem:[%s10465_s13 + $0x68] sm:$0xff] }
0x2613   : > { %10655 = vst [vmem:[#allocation88_spill] sm:$0xff] %v9601_v42 }
0x2614   : > { %v4336_v26 = vpack.c.bf16 %v4335_v47, %v4335_v47 }
0x2616   : > { %6360 = vmatmul.msk.bf16.vlgmr.msrb.gmra.mxu1 %vm1197_vm7, %v4336_v26  ;;  %v9589_v26 = vld [vmem:[%s10465_s13 + $0x78] sm:$0xff] }
0x2617   : > { %4489 = vmatpush.bf16.msrb.mxu1 %v10645_v37  ;;  %10653 = vst [vmem:[#allocation80_spill] sm:$0xff] %v9589_v26  ;;  %v10661_v37 = vld [vmem:[#allocation65_spill] sm:$0xff] }
0x261b   : > { %4490 = vmatpush.bf16.msrb.mxu1 %v10646_v2 }
0x261f   : > { %4491 = vmatpush.bf16.msrb.mxu1 %v10647_v41 }
0x2623   : > { %4492 = vmatpush.bf16.msrb.mxu1 %v10648_v31 }
0x2627   : > { %4493 = vmatpush.bf16.msrb.mxu1 %v10649_v7 }
0x262b   : > { %4494 = vmatpush.bf16.msrb.mxu1 %v10650_v30 }
0x262f   : > { %4495 = vmatpush.bf16.msrb.mxu1 %v10651_v50 }
0x2633   : > { %4496 = vmatpush.bf16.msrb.mxu1 %v10652_v13 }
0x2693   : > { %v4349_v12 = vpop.f32.mrf.mxu1 }
0x2694   : > { %v4353_v47 = vpack.c.bf16 %v4349_v12, %v4349_v12  ;;  %v9613_v12 = vld [vmem:[%s10465_s13 + $0x58] sm:$0xff] }
0x2695   : > { %10657 = vst [vmem:[#allocation69_spill] sm:$0xff] %v9613_v12 }
0x2696   : > { %4362 = vmatmul.bf16.vlgmr.msrb.gmra.mxu2 %v4353_v47  ;;  %v9619_v47 = vld [vmem:[%s10465_s13 + $0x50] sm:$0xff] }
0x2697   : > { %4594 = vmatpush.bf16.msrb.mxu2 %v9589_v26  ;;  %10658 = vst [vmem:[#allocation73_spill] sm:$0xff] %v9619_v47 }
0x269b   : > { %v4351_v56 = vpop.f32.mrf.mxu1  ;;  %4595 = vmatpush.bf16.msrb.mxu2 %v9595_v32 }
0x269c   : > { %v9625_v56 = vld [vmem:[%s10465_s13 + $0x48] sm:$0xff] }
0x269d   : > { %10659 = vst [vmem:[#allocation77_spill] sm:$0xff] %v9625_v56 }
0x269f   : > { %4596 = vmatpush.bf16.msrb.mxu2 %v9601_v42 }
0x26a3   : > { %4597 = vmatpush.bf16.msrb.mxu2 %v9607_v10  ;;  %v9631_v10 = vld [vmem:[%s10465_s13 + $0x40] sm:$0xff] }
0x26a4   : > { %10660 = vst [vmem:[#allocation81_spill] sm:$0xff] %v9631_v10 }
0x26a7   : > { %4598 = vmatpush.bf16.msrb.mxu2 %v9613_v12 }
0x26ab   : > { %4599 = vmatpush.bf16.msrb.mxu2 %v9619_v47 }
0x26af   : > { %4600 = vmatpush.bf16.msrb.mxu2 %v9625_v56 }
0x26b3   : > { %4601 = vmatpush.bf16.msrb.mxu2 %v9631_v10 }
0x2719   : > { %v4363_v12 = vpop.f32.mrf.mxu2 }
0x271a   : > { %v9635_v42 = vadd.f32 %v4363_v12, %v9470_v14 }
0x271c   : > { %v4368_v47 = vsel %vm3553_vm8, %v9635_v42, 0.0 }
0x271d   : > { %4369 = vadd.xlane.f32.xlu2 %v4368_v47 }
0x2721   : > { %v4365_v32 = vpop.f32.mrf.mxu2 }
0x2790   : > { %v4370_v26 = vpop.xlane.xlu2 %4369 }
0x2791   : > { %v4371_v13 = vmul.f32 %v4370_v26, %v7381_v23 }
0x2793   : > { %v4372_v56 = vsub.f32 %v9635_v42, %v4371_v13 }
0x2795   : > { %v4373_v50 = vmul.f32 %v4372_v56, %v4372_v56 }
0x2797   : > { %v4374_v30 = vsel %vm3553_vm8, %v4373_v50, 0.0  ;;  %v10662_v50 = vld [vmem:[#allocation67_spill] sm:$0xff] }
0x2798   : > { %4375 = vadd.xlane.f32.xlu0 %v4374_v30 }
0x280b   : > { %v4376_v7 = vpop.xlane.xlu0 %4375 }
0x280c   : > { %v4377_v10 = vmul.f32 %v4376_v7, %v7381_v23  ;;  %v9648_v7 = vld [vmem:[%s10465_s13 + $0xb8] sm:$0xff] }
0x280d   : > { %10663 = vst [vmem:[#allocation85_spill] sm:$0xff] %v9648_v7 }
0x280e   : > { %v4378_v31 = vadd.f32 1e-05, %v4377_v10  ;;  %v9684_v10 = vld [vmem:[%s10465_s13 + $0x88] sm:$0xff] }
0x280f   : > { %10669 = vst [vmem:[#allocation78_spill] sm:$0xff] %v9684_v10 }
0x2810   : > { %6796 = vrsqrt.f32 %v4378_v31  ;;  %vm4385_vm15 = vweird.f32 %v4378_v31 }
0x2816   : > { %v6797_v14 = vpop.eup %6796 }
0x2817   : > { %v4380_v12 = vmul.f32 %v6797_v14, %v4378_v31  ;;  %vm4386_vm12 = vweird.f32 %v6797_v14  ;;  %v9678_v31 = vld [vmem:[%s10465_s13 + $0x90] sm:$0xff] }
0x2818   : > { %vm4387_vm1 = vmor %vm4385_vm15, %vm4386_vm12  ;;  %10668 = vst [vmem:[#allocation74_spill] sm:$0xff] %v9678_v31 }
0x2819   : > { %v4381_v41 = vmul.f32 %v6797_v14, %v4380_v12 }
0x281b   : > { %v4382_v2 = vmul.f32 0.5, %v4381_v41  ;;  %v9672_v41 = vld [vmem:[%s10465_s13 + $0x98] sm:$0xff] }
0x281c   : > { %10667 = vst [vmem:[#allocation70_spill] sm:$0xff] %v9672_v41 }
0x281d   : > { %v4383_v47 = vsub.f32 1.5, %v4382_v2  ;;  %v9654_v2 = vld [vmem:[%s10465_s13 + $0xb0] sm:$0xff] }
0x281e   : > { %10664 = vst [vmem:[#allocation89_spill] sm:$0xff] %v9654_v2 }
0x281f   : > { %v4384_v32 = vmul.f32 %v6797_v14, %v4383_v47  ;;  %v10671_v47 = vld [vmem:[#allocation37_spill] sm:$0xff] }
0x2821   : > { %v4388_v26 = vsel %vm4387_vm1, %v6797_v14, %v4384_v32  ;;  %vm4693_vm1 = vcmp.eq.s32.totalorder %v8320_v57, 2 }
0x2822   : > { %v4389_v13 = vmul.f32 %v4388_v26, %v4372_v56  ;;  %v9690_v56 = vld [vmem:[%s10465_s13 + $0x80] sm:$0xff]  ;;  %v10672_v26 = vld [vmem:[#allocation40_spill] sm:$0xff] }
0x2823   : > { %10670 = vst [vmem:[#allocation82_spill] sm:$0xff] %v9690_v56 }
0x2824   : > { %v4390_v55 = vmul.f32 %v4389_v13, %v10661_v37  ;;  %v10673_v13 = vld [vmem:[#allocation44_spill] sm:$0xff] }
0x2826   : > { %v4391_v30 = vadd.f32 %v4390_v55, %v10662_v50  ;;  %v9660_v55 = vld [vmem:[%s10465_s13 + $0xa8] sm:$0xff] }
0x2827   : > { %10665 = vst [vmem:[#allocation93_spill] sm:$0xff] %v9660_v55 }
0x2828   : > { %v4392_v15 = vpack.c.bf16 %v4391_v30, %v4391_v30  ;;  %v10674_v30 = vld [vmem:[#allocation48_spill] sm:$0xff] }
0x282a   : > { %4401 = vmatmul.bf16.vlgmr.msra.gmra.mxu3 %v4392_v15  ;;  %v9666_v15 = vld [vmem:[%s10465_s13 + $0xa0] sm:$0xff] }
0x282b   : > { %4607 = vmatpush.bf16.msra.mxu3 %v9648_v7  ;;  %10666 = vst [vmem:[#allocation96_spill] sm:$0xff] %v9666_v15 }
0x282f   : > { %4608 = vmatpush.bf16.msra.mxu3 %v9654_v2 }
0x2833   : > { %4609 = vmatpush.bf16.msra.mxu3 %v9660_v55 }
0x2837   : > { %4610 = vmatpush.bf16.msra.mxu3 %v9666_v15  ;;  %v10678_v15 = vld [vmem:[#allocation64_spill] sm:$0xff] }
0x283b   : > { %4611 = vmatpush.bf16.msra.mxu3 %v9672_v41  ;;  %v10677_v41 = vld [vmem:[#allocation60_spill] sm:$0xff] }
0x283f   : > { %4612 = vmatpush.bf16.msra.mxu3 %v9678_v31  ;;  %v10676_v31 = vld [vmem:[#allocation56_spill] sm:$0xff] }
0x2843   : > { %4613 = vmatpush.bf16.msra.mxu3 %v9684_v10  ;;  %v10675_v10 = vld [vmem:[#allocation52_spill] sm:$0xff] }
0x2847   : > { %4614 = vmatpush.bf16.msra.mxu3 %v9690_v56 }
0x28ad   : > { %v4402_v14 = vpop.f32.mrf.mxu3 }
0x28ae   : > { %v4406_v12 = vpack.c.bf16 %v4402_v14, %v4402_v14 }
0x28b0   : > { %4415 = vmatmul.bf16.vlgmr.msrb.gmra.mxu0 %v4406_v12 }
0x28b1   : > { %4528 = vmatpush.bf16.msrb.mxu0 %v10671_v47 }
0x28b5   : > { %v4404_v32 = vpop.f32.mrf.mxu3  ;;  %4529 = vmatpush.bf16.msrb.mxu0 %v10672_v26 }
0x28b9   : > { %4530 = vmatpush.bf16.msrb.mxu0 %v10673_v13 }
0x28bd   : > { %4531 = vmatpush.bf16.msrb.mxu0 %v10674_v30 }
0x28c1   : > { %4532 = vmatpush.bf16.msrb.mxu0 %v10675_v10 }
0x28c5   : > { %4533 = vmatpush.bf16.msrb.mxu0 %v10676_v31 }
0x28c9   : > { %4534 = vmatpush.bf16.msrb.mxu0 %v10677_v41 }
0x28cd   : > { %4535 = vmatpush.bf16.msrb.mxu0 %v10678_v15 }
0x292d   : > { %v4416_v56 = vpop.f32.mrf.mxu0 }
0x292e   : > { %v4420_v14 = vmul.f32 0.088388346, %v4416_v56  ;;  %v9707_v56 = vld [vmem:[%s10465_s13 + $0x38] sm:$0xff] }
0x292f   : > { %10679 = vst [vmem:[#allocation86_spill] sm:$0xff] %v9707_v56 }
0x2930   : > { %v4421_v12 = vsel %vm3789_vm3, %v4420_v14, -inf }
0x2931   : > { %4422 = vmax.xlane.f32.xlu1 %v4421_v12 }
0x2935   : > { %v4418_v32 = vpop.f32.mrf.mxu0 }
0x2936   : > { %v9761_v32 = vld [vmem:[%s10465_s13 + $0xf0] sm:$0xff] }
0x2937   : > { %10688 = vst [vmem:[#allocation103_spill] sm:$0xff] %v9761_v32 }
0x29a4   : > { %v4423_v47 = vpop.xlane.xlu1 %4422 }
0x29a5   : > { %v4424_v26 = vsub.f32 %v4420_v14, %v4423_v47  ;;  %v9743_v47 = vld [vmem:[%s10465_s13 + $0x8] sm:$0xff]  ;;  %v9755_v14 = vld [vmem:[%s10465_s13 + $0xf8] sm:$0xff] }
0x29a6   : > { %10685 = vst [vmem:[#allocation98_spill] sm:$0xff] %v9743_v47 }
0x29a7   : > { %v4425_v55 = vmul.f32 1.442695, %v4424_v26  ;;  %v9749_v26 = vld [vmem:[%s10465_s13] sm:$0xff]  ;;  %10687 = vst [vmem:[#allocation102_spill] sm:$0xff] %v9755_v14 }
0x29a8   : > { %10686 = vst [vmem:[#allocation25_spill] sm:$0xff] %v9749_v26 }
0x29a9   : > { %6798 = vpow2.f32 %v4425_v55  ;;  %v9713_v55 = vld [vmem:[%s10465_s13 + $0x30] sm:$0xff] }
0x29aa   : > { %10680 = vst [vmem:[#allocation90_spill] sm:$0xff] %v9713_v55 }
0x29af   : > { %v6799_v13 = vpop.eup %6798 }
0x29b0   : > { %v4427_v30 = vsel %vm3789_vm3, %v6799_v13, 0.0 }
0x29b1   : > { %4428 = vadd.xlane.f32.xlu2 %v4427_v30 }
0x2a24   : > { %v4429_v10 = vpop.xlane.xlu2 %4428 }
0x2a25   : > { %6800 = vrcp.f32 %v4429_v10  ;;  %v9737_v10 = vld [vmem:[%s10465_s13 + $0x10] sm:$0xff] }
0x2a26   : > { %10684 = vst [vmem:[#allocation21_spill] sm:$0xff] %v9737_v10 }
0x2a2b   : > { %v6801_v31 = vpop.eup %6800 }
0x2a2c   : > { %v4431_v41 = vmul.f32 %v6801_v31, %v6799_v13  ;;  %v9731_v31 = vld [vmem:[%s10465_s13 + $0x18] sm:$0xff] }
0x2a2d   : > { %10683 = vst [vmem:[#allocation20_spill] sm:$0xff] %v9731_v31 }
0x2a2e   : > { %v4432_v2 = vpack.c.bf16 %v4431_v41, %v4431_v41  ;;  %v9719_v41 = vld [vmem:[%s10465_s13 + $0x28] sm:$0xff] }
0x2a2f   : > { %10681 = vst [vmem:[#allocation94_spill] sm:$0xff] %v9719_v41 }
0x2a30   : > { %6361 = vmatmul.msk.bf16.vlgmr.msra.gmra.mxu1 %vm1197_vm7, %v4432_v2  ;;  %v9725_v2 = vld [vmem:[%s10465_s13 + $0x20] sm:$0xff] }
0x2a31   : > { %4581 = vmatpush.bf16.msra.mxu1 %v9707_v56  ;;  %10682 = vst [vmem:[#allocation97_spill] sm:$0xff] %v9725_v2 }
0x2a35   : > { %4582 = vmatpush.bf16.msra.mxu1 %v9713_v55 }
0x2a39   : > { %4583 = vmatpush.bf16.msra.mxu1 %v9719_v41 }
0x2a3d   : > { %4584 = vmatpush.bf16.msra.mxu1 %v9725_v2 }
0x2a41   : > { %4585 = vmatpush.bf16.msra.mxu1 %v9731_v31 }
0x2a45   : > { %4586 = vmatpush.bf16.msra.mxu1 %v9737_v10 }
0x2a49   : > { %4587 = vmatpush.bf16.msra.mxu1 %v9743_v47 }
0x2a4d   : > { %4588 = vmatpush.bf16.msra.mxu1 %v9749_v26 }
0x2aad   : > { %v4445_v13 = vpop.f32.mrf.mxu1 }
0x2aae   : > { %v4449_v30 = vpack.c.bf16 %v4445_v13, %v4445_v13  ;;  %v9767_v13 = vld [vmem:[%s10465_s13 + $0xe8] sm:$0xff] }
0x2aaf   : > { %10689 = vst [vmem:[#allocation24_spill] sm:$0xff] %v9767_v13 }
0x2ab0   : > { %4458 = vmatmul.bf16.vlgmr.msra.gmra.mxu0 %v4449_v30  ;;  %v9773_v30 = vld [vmem:[%s10465_s13 + $0xe0] sm:$0xff] }
0x2ab1   : > { %4620 = vmatpush.bf16.msra.mxu0 %v9755_v14  ;;  %10690 = vst [vmem:[#allocation26_spill] sm:$0xff] %v9773_v30 }
0x2ab5   : > { %v4447_v12 = vpop.f32.mrf.mxu1  ;;  %4621 = vmatpush.bf16.msra.mxu0 %v9761_v32  ;;  %v9785_v32 = vld [vmem:[%s10465_s13 + $0xd0] sm:$0xff] }
0x2ab6   : > { %v9779_v12 = vld [vmem:[%s10465_s13 + $0xd8] sm:$0xff]  ;;  %10692 = vst [vmem:[#allocation104_spill] sm:$0xff] %v9785_v32 }
0x2ab7   : > { %10691 = vst [vmem:[#allocation30_spill] sm:$0xff] %v9779_v12 }
0x2ab9   : > { %4622 = vmatpush.bf16.msra.mxu0 %v9767_v13  ;;  %v9791_v13 = vld [vmem:[%s10465_s13 + $0xc8] sm:$0xff] }
0x2aba   : > { %10693 = vst [vmem:[#allocation105_spill] sm:$0xff] %v9791_v13 }
0x2abd   : > { %4623 = vmatpush.bf16.msra.mxu0 %v9773_v30  ;;  %v9797_v30 = vld [vmem:[%s10465_s13 + $0xc0] sm:$0xff] }
0x2abe   : > { %10694 = vst [vmem:[#allocation106_spill] sm:$0xff] %v9797_v30 }
0x2ac1   : > { %4624 = vmatpush.bf16.msra.mxu0 %v9779_v12 }
0x2ac5   : > { %4625 = vmatpush.bf16.msra.mxu0 %v9785_v32 }
0x2ac9   : > { %4626 = vmatpush.bf16.msra.mxu0 %v9791_v13 }
0x2acd   : > { %4627 = vmatpush.bf16.msra.mxu0 %v9797_v30 }
0x2b2d   : > { %v4459_v12 = vpop.f32.mrf.mxu0 }
0x2b2e   : > { %v9801_v14 = vadd.f32 %v4459_v12, %v9635_v42 }
0x2b30   : > { %v4464_v32 = vsel %vm3553_vm8, %v9801_v14, 0.0 }
0x2b31   : > { %4465 = vadd.xlane.f32.xlu0 %v4464_v32 }
0x2b35   : > { %v4461_v26 = vpop.f32.mrf.mxu0 }
0x2ba4   : > { %v4466_v47 = vpop.xlane.xlu0 %4465 }
0x2ba5   : > { %v4467_v10 = vmul.f32 %v4466_v47, %v7381_v23 }
0x2ba7   : > { %v4468_v13 = vsub.f32 %v9801_v14, %v4467_v10 }
0x2ba9   : > { %v4469_v31 = vmul.f32 %v4468_v13, %v4468_v13 }
0x2bab   : > { %v4470_v2 = vsel %vm3553_vm8, %v4469_v31, 0.0 }
0x2bac   : > { %4471 = vadd.xlane.f32.xlu1 %v4470_v2 }
0x2c1f   : > { %v4472_v41 = vpop.xlane.xlu1 %4471 }
0x2c20   : > { %v4473_v30 = vmul.f32 %v4472_v41, %v7381_v23  ;;  %v9811_v41 = vld [vmem:[#allocation9 + $0x38] sm:$0xff] }
0x2c22   : > { %v4474_v55 = vadd.f32 1e-05, %v4473_v30  ;;  %v6904_v30 = vld [vmem:[%s10159_s24 + $0x28] sm:$0xff] }
0x2c24   : > { %6802 = vrsqrt.f32 %v4474_v55  ;;  %vm4481_vm9 = vweird.f32 %v4474_v55 }
0x2c2a   : > { %v6803_v42 = vpop.eup %6802 }
0x2c2b   : > { %v4476_v12 = vmul.f32 %v6803_v42, %v4474_v55  ;;  %vm4482_vm2 = vweird.f32 %v6803_v42  ;;  %v6902_v55 = vld [vmem:[%s10159_s24 + $0x30] sm:$0xff] }
0x2c2c   : > { %vm4483_vm4 = vmor %vm4481_vm9, %vm4482_vm2 }
0x2c2d   : > { %v4477_v56 = vmul.f32 %v6803_v42, %v4476_v12  ;;  %v6908_v12 = vld [vmem:[%s10159_s24 + $0x18] sm:$0xff] }
0x2c2f   : > { %v4478_v15 = vmul.f32 0.5, %v4477_v56  ;;  %v6900_v56 = vld [vmem:[%s10160_s25] sm:$0xff] }
0x2c31   : > { %v4479_v32 = vsub.f32 1.5, %v4478_v15  ;;  %v6899_v15 = vld [vmem:[%s10159_s24 + $0x38] sm:$0xff] }
0x2c33   : > { %v4480_v26 = vmul.f32 %v6803_v42, %v4479_v32  ;;  %v6910_v32 = vld [vmem:[%s10159_s24 + $0x10] sm:$0xff] }
0x2c35   : > { %v4484_v47 = vsel %vm4483_vm4, %v6803_v42, %v4480_v26  ;;  %v6906_v42 = vld [vmem:[%s10159_s24 + $0x20] sm:$0xff]  ;;  %v6912_v26 = vld [vmem:[%s10159_s24 + $0x8] sm:$0xff] }
0x2c36   : > { %v4485_v10 = vmul.f32 %v4484_v47, %v4468_v13  ;;  %v9828_v13 = vld [vmem:[#allocation9 + $0x28] sm:$0xff]  ;;  %v6914_v47 = vld [vmem:[%s10159_s24] sm:$0xff] }
0x2c37   : > { %10695 = vst [vmem:[#allocation107_spill] sm:$0xff] %v9828_v13 }
0x2c38   : > { %v4486_v7 = vmul.f32 %v4485_v10, %v9338_v24 }
0x2c3a   : > { %v4487_v2 = vadd.f32 %v4486_v7, %v9341_v6  ;;  %v9821_v7 = vld [vmem:[#allocation9 + $0x30] sm:$0xff] }
0x2c3c   : > { %v4488_v31 = vpack.c.bf16 %v4487_v2, %v4487_v2 }
0x2c3e   : > { %4497 = vmatmul.bf16.vlgmr.msrb.gmra.mxu1 %v4488_v31  ;;  %4510 = vmatmul.bf16.vlgmr.msra.gmra.mxu2 %v4488_v31 }
0x2c3f   : > { %4523 = vmatmul.bf16.vlgmr.msrb.gmra.mxu3 %v4488_v31  ;;  %4536 = vmatmul.bf16.vlgmr.msrb.gmra.mxu0 %v4488_v31 }
0x2c40   : > { %4660 = vmatpush.bf16.msrb.mxu1 %v9811_v41  ;;  %4721 = vmatpush.bf16.msrb.mxu3 %v6899_v15 }
0x2c41   : > { %4715 = vmatpush.bf16.msra.mxu2 %v6900_v56  ;;  %4772 = vmatpush.bf16.msrb.mxu0 %v10594_v48  ;;  %v9835_v48 = vld [vmem:[#allocation9 + $0x20] sm:$0xff] }
0x2c42   : > { %10696 = vst [vmem:[#allocation108_spill] sm:$0xff] %v9835_v48 }
0x2c44   : > { %4661 = vmatpush.bf16.msrb.mxu1 %v9821_v7  ;;  %4722 = vmatpush.bf16.msrb.mxu3 %v6902_v55 }
0x2c45   : > { %4773 = vmatpush.bf16.msrb.mxu0 %v10595_v60  ;;  %v9842_v60 = vld [vmem:[#allocation9 + $0x18] sm:$0xff] }
0x2c46   : > { %10697 = vst [vmem:[#allocation109_spill] sm:$0xff] %v9842_v60 }
0x2c48   : > { %4662 = vmatpush.bf16.msrb.mxu1 %v9828_v13  ;;  %4723 = vmatpush.bf16.msrb.mxu3 %v6904_v30 }
0x2c49   : > { %4774 = vmatpush.bf16.msrb.mxu0 %v8019_v52  ;;  %v9849_v52 = vld [vmem:[#allocation9 + $0x10] sm:$0xff] }
0x2c4a   : > { %10698 = vst [vmem:[#allocation110_spill] sm:$0xff] %v9849_v52 }
0x2c4c   : > { %4663 = vmatpush.bf16.msrb.mxu1 %v9835_v48  ;;  %4724 = vmatpush.bf16.msrb.mxu3 %v6906_v42 }
0x2c4d   : > { %4775 = vmatpush.bf16.msrb.mxu0 %v8031_v63  ;;  %v9856_v63 = vld [vmem:[#allocation9 + $0x8] sm:$0xff] }
0x2c4e   : > { %10699 = vst [vmem:[#allocation65_spill] sm:$0xff] %v9856_v63 }
0x2c50   : > { %4664 = vmatpush.bf16.msrb.mxu1 %v9842_v60  ;;  %4725 = vmatpush.bf16.msrb.mxu3 %v6908_v12 }
0x2c51   : > { %4776 = vmatpush.bf16.msrb.mxu0 %v8049_v9  ;;  %v9863_v9 = vld [vmem:[#allocation9] sm:$0xff] }
0x2c52   : > { %10700 = vst [vmem:[#allocation67_spill] sm:$0xff] %v9863_v9 }
0x2c54   : > { %4665 = vmatpush.bf16.msrb.mxu1 %v9849_v52  ;;  %4726 = vmatpush.bf16.msrb.mxu3 %v6910_v32 }
0x2c55   : > { %4777 = vmatpush.bf16.msrb.mxu0 %v8067_v17 }
0x2c58   : > { %4666 = vmatpush.bf16.msrb.mxu1 %v9856_v63  ;;  %4727 = vmatpush.bf16.msrb.mxu3 %v6912_v26 }
0x2c59   : > { %4778 = vmatpush.bf16.msrb.mxu0 %v8088_v25 }
0x2c5c   : > { %4667 = vmatpush.bf16.msrb.mxu1 %v9863_v9  ;;  %4728 = vmatpush.bf16.msrb.mxu3 %v6914_v47 }
0x2c5d   : > { %4779 = vmatpush.bf16.msrb.mxu0 %v8108_v36 }
0x2cbb   : > { %v4498_v17 = vpop.f32.mrf.mxu1 }
0x2cbc   : > { %v4499_v10 = vadd.f32 %v4498_v17, %v8978_v38  ;;  %v4537_v2 = vpop.f32.mrf.mxu0 }
0x2cbd   : > { %v4538_v31 = vadd.f32 %v4537_v2, %v10598_v61 }
0x2cbe   : > { %v4541_v15 = vmul.f32 %v4499_v10, %v4499_v10 }
0x2cbf   : > { %v4544_v56 = vmul.f32 %v4538_v31, %v4538_v31 }
0x2cc0   : > { %v4545_v25 = vmul.f32 %v4541_v15, %v4499_v10 }
0x2cc1   : > { %v4548_v55 = vmul.f32 %v4544_v56, %v4538_v31  ;;  %v4511_v30 = vpop.f32.mrf.mxu2 }
0x2cc2   : > { %v4549_v42 = vmul.f32 0.044715, %v4545_v25  ;;  %v4512_v12 = vadd.f32 %v4511_v30, %v10596_v4  ;;  %v4524_v32 = vpop.f32.mrf.mxu3 }
0x2cc3   : > { %v4552_v26 = vmul.f32 0.044715, %v4548_v55  ;;  %v4525_v47 = vadd.f32 %v4524_v32, %v10597_v34  ;;  %v4500_v9 = vpop.f32.mrf.mxu1 }
0x2cc4   : > { %v4553_v36 = vadd.f32 %v4549_v42, %v4499_v10  ;;  %v4542_v63 = vmul.f32 %v4512_v12, %v4512_v12  ;;  %v4539_v52 = vpop.f32.mrf.mxu0 }
0x2cc5   : > { %v4556_v17 = vadd.f32 %v4552_v26, %v4538_v31  ;;  %v4543_v38 = vmul.f32 %v4525_v47, %v4525_v47 }
0x2cc6   : > { %v4557_v60 = vmul.f32 0.7978846, %v4553_v36  ;;  %v4546_v2 = vmul.f32 %v4542_v63, %v4512_v12 }
0x2cc7   : > { %v4560_v61 = vmul.f32 0.7978846, %v4556_v17  ;;  %v4547_v48 = vmul.f32 %v4543_v38, %v4525_v47 }
0x2cc8   : > { %6804 = vtanh.f32 %v4557_v60  ;;  %v4550_v15 = vmul.f32 0.044715, %v4546_v2 }
0x2cc9   : > { %6806 = vtanh.f32 %v4560_v61  ;;  %v4551_v56 = vmul.f32 0.044715, %v4547_v48  ;;  %v4513_v25 = vpop.f32.mrf.mxu2 }
0x2cca   : > { %v4554_v30 = vadd.f32 %v4550_v15, %v4512_v12  ;;  %v4526_v4 = vpop.f32.mrf.mxu3 }
0x2ccb   : > { %v4555_v55 = vadd.f32 %v4551_v56, %v4525_v47 }
0x2ccc   : > { %v4558_v13 = vmul.f32 0.7978846, %v4554_v30 }
0x2ccd   : > { %v4559_v32 = vmul.f32 0.7978846, %v4555_v55 }
0x2cce   : > { %v6805_v9 = vpop.eup %6804  ;;  %6808 = vtanh.f32 %v4558_v13 }
0x2ccf   : > { %v6807_v42 = vpop.eup %6806  ;;  %v4565_v52 = vadd.f32 1.0, %v6805_v9  ;;  %6810 = vtanh.f32 %v4559_v32 }
0x2cd0   : > { %v4568_v26 = vadd.f32 1.0, %v6807_v42 }
0x2cd1   : > { %v4569_v36 = vmul.f32 0.5, %v4565_v52 }
0x2cd2   : > { %v4572_v63 = vmul.f32 0.5, %v4568_v26 }
0x2cd3   : > { %v4573_v17 = vmul.f32 %v4569_v36, %v4499_v10 }
0x2cd4   : > { %v6809_v38 = vpop.eup %6808  ;;  %v4576_v60 = vmul.f32 %v4572_v63, %v4538_v31  ;;  %v4700_v31 = vstv %s4699_s10  ;;  %s7047_s10 = scalar_lea.hbm %s10161_s26, 2 }
0x2cd5   : > { %v6811_v2 = vpop.eup %6810  ;;  %v4577_v61 = vpack.c.bf16 %v4573_v17, %v4573_v17  ;;  %v4566_v48 = vadd.f32 1.0, %v6809_v38  ;;  %vm4701_vm5 = vcmp.eq.s32.totalorder %v8320_v57, %v4700_v31  ;;  %p7049_p4 = scmp.lt.s32.totalorder %s7047_s10, %s7043_s2 }
0x2cd6   : > { %v4580_v15 = vpack.c.bf16 %v4576_v60, %v4576_v60  ;;  %v4567_v4 = vadd.f32 1.0, %v6811_v2  ;;  %v10704_v2 = vld [vmem:[#allocation101_spill] sm:$0xff] }
0x2cd7   : > { %v4570_v56 = vmul.f32 0.5, %v4566_v48  ;;  %4589 = vmatmul.bf16.vlgmr.msra.gmra.mxu1 %v4577_v61  ;;  %p7050_p7 = por %p7049_p4, %p7048_p3 }
0x2cd8   : > { %v4571_v25 = vmul.f32 0.5, %v4567_v4  ;;  %4628 = vmatmul.bf16.vlgmr.msra.gmra.mxu0 %v4580_v15  ;;  %4785 = vmatpush.bf16.msra.mxu1 %v8238_v29  ;;  %v6363_v29 = vsel %vm4701_vm5, 1.0, %v10599_v18  ;;  %v10705_v15 = vld [vmem:[#allocation29_spill] sm:$0xff] }
0x2cd9   : > { %v4574_v13 = vmul.f32 %v4570_v56, %v4512_v12  ;;  %4918 = vmatpush.bf16.msra.mxu0 %v9384_v58  ;;  %v9914_v56 = vld [vmem:[%s10158_s23] sm:$0x1]  ;;  %p7051_p8 = pnand %p7050_p7, %p7046_p2 }
0x2cda   : > { %v4575_v30 = vmul.f32 %v4571_v25, %v4525_v47 }
0x2cdb   : > { %v4578_v55 = vpack.c.bf16 %v4574_v13, %v4574_v13 }
0x2cdc   : > { %v4579_v10 = vpack.c.bf16 %v4575_v30, %v4575_v30  ;;  %4786 = vmatpush.bf16.msra.mxu1 %v8247_v33 }
0x2cdd   : > { %4602 = vmatmul.bf16.vlgmr.msrb.gmra.mxu2 %v4578_v55  ;;  %4919 = vmatpush.bf16.msra.mxu0 %v9393_v0 }
0x2cde   : > { %4615 = vmatmul.bf16.vlgmr.msra.gmra.mxu3 %v4579_v10  ;;  %4759 = vmatpush.bf16.msrb.mxu2 %v7956_v21  ;;  %v4704_v21 = vpack.c.bf16 %v6363_v29, %v6363_v29 }
0x2ce0   : > { %4787 = vmatpush.bf16.msra.mxu1 %v8256_v53 }
0x2ce1   : > { %4920 = vmatpush.bf16.msra.mxu0 %v9403_v28  ;;  %v10703_v28 = vld [vmem:[#allocation71_spill] sm:$0xff] }
0x2ce2   : > { %4760 = vmatpush.bf16.msrb.mxu2 %v7989_v35  ;;  %v10701_v35 = vld [vmem:[#allocation22_spill] sm:$0xff] }
0x2ce4   : > { %4788 = vmatpush.bf16.msra.mxu1 %v8266_v40 }
0x2ce5   : > { %4921 = vmatpush.bf16.msra.mxu0 %v9411_v19 }
0x2ce6   : > { %4761 = vmatpush.bf16.msrb.mxu2 %v8008_v46  ;;  %v10702_v46 = vld [vmem:[#allocation23_spill] sm:$0xff] }
0x2ce8   : > { %4789 = vmatpush.bf16.msra.mxu1 %v8275_v45 }
0x2ce9   : > { %4922 = vmatpush.bf16.msra.mxu0 %v9419_v8 }
0x2cea   : > { %4762 = vmatpush.bf16.msrb.mxu2 %v8028_v59 }
0x2cec   : > { %4790 = vmatpush.bf16.msra.mxu1 %v8285_v49 }
0x2ced   : > { %6364 = vmatmul.msk.bf16.vlgmr.msra.gmra.mxu2 %vm1197_vm7, %v4704_v21  ;;  %4923 = vmatpush.bf16.msra.mxu0 %v9427_v27 }
0x2cee   : > { %4763 = vmatpush.bf16.msrb.mxu2 %v8041_v16 }
0x2cf0   : > { %4791 = vmatpush.bf16.msra.mxu1 %v8294_v5 }
0x2cf1   : > { %4924 = vmatpush.bf16.msra.mxu0 %v9433_v54 }
0x2cf2   : > { %4764 = vmatpush.bf16.msrb.mxu2 %v8062_v62 }
0x2cf4   : > { %4792 = vmatpush.bf16.msra.mxu1 %v10601_v44 }
0x2cf5   : > { %4925 = vmatpush.bf16.msra.mxu0 %v9439_v20 }
0x2cf6   : > { %4765 = vmatpush.bf16.msrb.mxu2 %v10701_v35 }
0x2cfa   : > { %4766 = vmatpush.bf16.msrb.mxu2 %v10702_v46 }
0x2d54   : > { %v4590_v59 = vpop.f32.mrf.mxu1 }
0x2d55   : > { %v4629_v33 = vpop.f32.mrf.mxu0 }
0x2d5c   : > { %v4592_v53 = vpop.f32.mrf.mxu1 }
0x2d5d   : > { %v4631_v40 = vpop.f32.mrf.mxu0 }
0x2d60   : > { %v4603_v45 = vpop.f32.mrf.mxu2 }
0x2d61   : > { %v4604_v16 = vadd.f32 %v4603_v45, %v4590_v59  ;;  %v4616_v49 = vpop.f32.mrf.mxu3 }
0x2d63   : > { %v4617_v5 = vadd.f32 %v4616_v49, %v4604_v16 }
0x2d65   : > { %v4630_v58 = vadd.f32 %v4629_v33, %v4617_v5 }
0x2d67   : > { %v4633_v18 = vadd.f32 %v4630_v58, %v9801_v14 }
0x2d68   : > { %v4605_v62 = vpop.f32.mrf.mxu2 }
0x2d69   : > { %v4618_v0 = vpop.f32.mrf.mxu3  ;;  %v4634_v19 = vadd.f32 %v4633_v18, %v10703_v28  ;;  %v10706_v18 = vld [vmem:[#allocation75_spill] sm:$0xff] }
0x2d6a   : > { %v10707_v0 = vmov 1.0|1.0  }
0x2d6b   : > { %v4635_v8 = vsel %vm3553_vm8, %v4634_v19, 0.0 }
0x2d6c   : > { %4636 = vadd.xlane.f32.xlu2 %v4635_v8 }
0x2d70   : > { %v4717_v53 = vpop.f32.mrf.mxu2 }
0x2d78   : > { %v4719_v40 = vpop.f32.mrf.mxu2 }
0x2d79   : > { %v10722_v40 = vld [vmem:[#allocation34_spill] sm:$0xff] }
0x2ddf   : > { %v4637_v44 = vpop.xlane.xlu2 %4636 }
0x2de0   : > { %v4638_v27 = vmul.f32 %v4637_v44, %v7381_v23 }
0x2de2   : > { %v4639_v54 = vsub.f32 %v4634_v19, %v4638_v27 }
0x2de4   : > { %v4640_v20 = vmul.f32 %v4639_v54, %v4639_v54 }
0x2de6   : > { %v4641_v12 = vsel %vm3553_vm8, %v4640_v20, 0.0 }
0x2de7   : > { %4642 = vadd.xlane.f32.xlu0 %v4641_v12 }
0x2e5a   : > { %v4643_v47 = vpop.xlane.xlu0 %4642 }
0x2e5b   : > { %v4644_v32 = vmul.f32 %v4643_v47, %v7381_v23 }
0x2e5d   : > { %v4645_v9 = vadd.f32 1e-05, %v4644_v32 }
0x2e5f   : > { %6812 = vrsqrt.f32 %v4645_v9  ;;  %vm4652_vm11 = vweird.f32 %v4645_v9 }
0x2e65   : > { %v6813_v14 = vpop.eup %6812 }
0x2e66   : > { %v4647_v42 = vmul.f32 %v6813_v14, %v4645_v9  ;;  %vm4653_vm6 = vweird.f32 %v6813_v14 }
0x2e67   : > { %vm4654_vm13 = vmor %vm4652_vm11, %vm4653_vm6 }
0x2e68   : > { %v4648_v52 = vmul.f32 %v6813_v14, %v4647_v42 }
0x2e6a   : > { %v4649_v26 = vmul.f32 0.5, %v4648_v52 }
0x2e6c   : > { %v4650_v36 = vsub.f32 1.5, %v4649_v26 }
0x2e6e   : > { %v4651_v63 = vmul.f32 %v6813_v14, %v4650_v36 }
0x2e70   : > { %v4655_v17 = vsel %vm4654_vm13, %v6813_v14, %v4651_v63 }
0x2e71   : > { %v4656_v38 = vmul.f32 %v4655_v17, %v4639_v54 }
0x2e73   : > { %v4657_v60 = vmul.f32 %v4656_v38, %v9454_v51 }
0x2e75   : > { %v4658_v61 = vadd.f32 %v4657_v60, %v10704_v2 }
0x2e77   : > { %v4659_v48 = vpack.c.bf16 %v4658_v61, %v4658_v61 }
0x2e79   : > { %4668 = vmatmul.bf16.vlgmr.msrb.gmra.mxu1 %v4659_v48 }
0x2e7a   : > { %4939 = vmatpush.bf16.xpose.msrb.mxu1 %v10705_v15 }
0x2ef6   : > { %v4669_v4 = vpop.f32.mrf.mxu1 }
0x2ef7   : > { %v4670_v25 = vadd.f32 %v9914_v56, %v4669_v4  ;;  %v10708_v4 = vld [vmem:[#allocation43_spill] sm:$0xff] }
0x2ef9   : > { %v4673_v13 = vsel %vm3553_vm8, %v4670_v25, -inf }
0x2efa   : > { %4674 = vmax.xlane.f32.xlu1 %v4673_v13  ;;  %v10710_v13 = vld [vmem:[#allocation47_spill] sm:$0xff] }
0x2efe   : > { %v4671_v30 = vpop.f32.mrf.mxu1 }
0x2eff   : > { %v10713_v30 = vld [vmem:[#allocation87_spill] sm:$0xff] }
0x2f6d   : > { %v4675_v55 = vpop.xlane.xlu1 %4674 }
0x2f6e   : > { %vm4676_vm12 = vcmp.eq.f32.partialorder %v4670_v25, %v4675_v55  ;;  %v10709_v25 = vld [vmem:[#allocation79_spill] sm:$0xff] }
0x2f6f   : > { %v4677_v10 = vsel %vm4676_vm12, %v8320_v57, 128  ;;  %v10714_v55 = vld [vmem:[#allocation55_spill] sm:$0xff] }
0x2f70   : > { %v4678_v31 = vsel %vm3553_vm8, %v4677_v10, 2147483647  ;;  %v10719_v10 = vld [vmem:[#allocation68_spill] sm:$0xff] }
0x2f71   : > { %v4680_v29 = vshra.s32 %v4678_v31, 16  ;;  %v4679_v35 = vand.u32 65535, %v4678_v31  ;;  %v10720_v31 = vld [vmem:[#allocation31_spill] sm:$0xff] }
0x2f72   : > { %vm4799_vm11 = vcmp.eq.s32.totalorder %v10720_v31, 10 }
0x2f73   : > { %v4682_v21 = vcvt.s32.f32 %v4680_v29  ;;  %v4681_v59 = vcvt.s32.f32 %v4679_v35  ;;  %vm4810_vm13 = vmpackc.low %vm4799_vm11, %vm4799_vm11  ;;  %v10721_v29 = vmov 0  }
0x2f75   : > { %4683 = vmin.xlane.f32.xlu2 %v4682_v21 }
0x2fe8   : > { %v4684_v46 = vpop.xlane.xlu2 %4683 }
0x2fe9   : > { %vm4685_vm15 = vcmp.eq.f32.partialorder %v4682_v21, %v4684_v46  ;;  %v4690_v45 = vcvt.f32.s32 %v4684_v46  ;;  %v4812_v21 = vsel %vm4810_vm13, 65537, %v10721_v29 }
0x2fea   : > { %v4686_v33 = vsel %vm4685_vm15, %v4681_v59, inf  ;;  %v4814_v35 = vunpack.c.l.b16 %v4812_v21 }
0x2feb   : > { %4687 = vmin.xlane.f32.xlu0 %v4686_v33  ;;  %v4691_v49 = vshll.u32 %v4690_v45, 16 }
0x2fec   : > { %v6368_v46 = vunpack.i.l.s16 %v4814_v35 }
0x2fee   : > { %vm4821_vm12 = vcmp.ne.s32.totalorder %v6368_v46, %v10722_v40 }
0x2fef   : > { %vm4822_vm15 = vmpackc.low %vm4821_vm12, %vm3756_vm10  ;;  %vm4830_vm10 = vcmp.le.s32.totalorder %v8320_v57, 10 }
0x305e   : > { %v4688_v16 = vpop.xlane.xlu0 %4687 }
0x305f   : > { %v4689_v5 = vcvt.f32.s32 %v4688_v16 }
0x3061   : > { %v4692_v58 = vadd.s32 %v4691_v49, %v4689_v5  ;;  %v10741_v5 = vld [vmem:[#allocation45_spill] sm:$0xff] }
0x3063   : > { %v9922_v62 = vsel %vm4693_vm1, %v4692_v58, %v10706_v18  ;;  %vm4695_vm2 = vcmp.eq.s32.totalorder %v8320_v57, %v4692_v58  ;;  %vm4831_vm1 = vmand %vm3768_vm14, %vm4830_vm10  ;;  %v10742_v58 = vld [vmem:[#allocation49_spill] sm:$0xff] }
0x3064   : > { %vm6365_vm9 = vmpackc.low %vm4695_vm2, %vm4695_vm2 }
0x3065   : > { %6366 = vmatmul.msk.bf16.vlgmr.msrb.gmra.mxu3 %vm6365_vm9, %v10707_v0  ;;  %vm4832_vm2 = vmor %vm9248_vm0, %vm4831_vm1 }
0x30e8   : > { %v4730_v28 = vpop.f32.mrf.mxu3 }
0x30e9   : > { %v9926_v19 = vadd.f32 %v4730_v28, %v4717_v53 }
0x30eb   : > { %v4734_v8 = vsel %vm3553_vm8, %v9926_v19, 0.0 }
0x30ec   : > { %4735 = vadd.xlane.f32.xlu1 %v4734_v8  ;;  %v10725_v8 = vld [vmem:[#allocation76_spill] sm:$0xff] }
0x30f0   : > { %v4732_v44 = vpop.f32.mrf.mxu3 }
0x315f   : > { %v4736_v27 = vpop.xlane.xlu1 %4735 }
0x3160   : > { %v4737_v54 = vmul.f32 %v4736_v27, %v7381_v23 }
0x3162   : > { %v4738_v20 = vsub.f32 %v9926_v19, %v4737_v54  ;;  %v10726_v54 = vld [vmem:[#allocation72_spill] sm:$0xff] }
0x3164   : > { %v4739_v12 = vmul.f32 %v4738_v20, %v4738_v20 }
0x3166   : > { %v4740_v47 = vsel %vm3553_vm8, %v4739_v12, 0.0 }
0x3167   : > { %4741 = vadd.xlane.f32.xlu2 %v4740_v47  ;;  %v6916_v47 = vld [vmem:[%s10150_s15 + $0x38] sm:$0xff] }
0x31da   : > { %v4742_v32 = vpop.xlane.xlu2 %4741 }
0x31db   : > { %v4743_v9 = vmul.f32 %v4742_v32, %v7381_v23  ;;  %v10727_v32 = vld [vmem:[#allocation28_spill] sm:$0xff] }
0x31dd   : > { %v4744_v14 = vadd.f32 1e-05, %v4743_v9 }
0x31df   : > { %6814 = vrsqrt.f32 %v4744_v14  ;;  %vm4751_vm5 = vweird.f32 %v4744_v14 }
0x31e5   : > { %v6815_v42 = vpop.eup %6814 }
0x31e6   : > { %v4746_v52 = vmul.f32 %v6815_v42, %v4744_v14  ;;  %vm4752_vm4 = vweird.f32 %v6815_v42  ;;  %v6917_v14 = vld [vmem:[%s10150_s15 + $0x30] sm:$0xff] }
0x31e7   : > { %vm4753_vm6 = vmor %vm4751_vm5, %vm4752_vm4 }
0x31e8   : > { %v4747_v26 = vmul.f32 %v6815_v42, %v4746_v52  ;;  %v6918_v52 = vld [vmem:[%s10150_s15 + $0x28] sm:$0xff] }
0x31ea   : > { %v4748_v36 = vmul.f32 0.5, %v4747_v26  ;;  %v6919_v26 = vld [vmem:[%s10150_s15 + $0x20] sm:$0xff] }
0x31ec   : > { %v4749_v63 = vsub.f32 1.5, %v4748_v36  ;;  %v6920_v36 = vld [vmem:[%s10150_s15 + $0x18] sm:$0xff] }
0x31ee   : > { %v4750_v17 = vmul.f32 %v6815_v42, %v4749_v63  ;;  %v6921_v63 = vld [vmem:[%s10150_s15 + $0x10] sm:$0xff] }
0x31f0   : > { %v4754_v38 = vsel %vm4753_vm6, %v6815_v42, %v4750_v17  ;;  %v6922_v17 = vld [vmem:[%s10150_s15 + $0x8] sm:$0xff] }
0x31f1   : > { %v4755_v60 = vmul.f32 %v4754_v38, %v4738_v20  ;;  %v6923_v38 = vld [vmem:[%s10150_s15] sm:$0xff] }
0x31f3   : > { %v4756_v61 = vmul.f32 %v9478_v39, %v4755_v60  ;;  %v10711_v39 = vld [vmem:[#allocation83_spill] sm:$0xff]  ;;  %v10728_v60 = vld [vmem:[#allocation36_spill] sm:$0xff] }
0x31f5   : > { %v4757_v48 = vadd.f32 %v4756_v61, %v9136_v22  ;;  %v10712_v22 = vld [vmem:[#allocation51_spill] sm:$0xff] }
0x31f6   : > { %v10729_v61 = vld [vmem:[#allocation39_spill] sm:$0xff] }
0x31f7   : > { %v4758_v15 = vpack.c.bf16 %v4757_v48, %v4757_v48  ;;  %v10730_v48 = vld [vmem:[#allocation42_spill] sm:$0xff] }
0x31f9   : > { %4767 = vmatmul.bf16.vlgmr.msrb.gmra.mxu2 %v4758_v15  ;;  %4780 = vmatmul.bf16.vlgmr.msrb.gmra.mxu0 %v4758_v15 }
0x31fa   : > { %4793 = vmatmul.bf16.vlgmr.msra.gmra.mxu1 %v4758_v15  ;;  %5040 = vmatpush.bf16.msrb.mxu0 %v8503_v3  ;;  %v10715_v3 = vld [vmem:[#allocation91_spill] sm:$0xff]  ;;  %v10731_v15 = vld [vmem:[#allocation46_spill] sm:$0xff] }
0x31fb   : > { %4975 = vmatpush.bf16.msra.mxu1 %v9486_v43  ;;  %v10716_v43 = vld [vmem:[#allocation59_spill] sm:$0xff] }
0x31fe   : > { %5041 = vmatpush.bf16.msrb.mxu0 %v8545_v1  ;;  %v10717_v1 = vld [vmem:[#allocation66_spill] sm:$0xff] }
0x31ff   : > { %4976 = vmatpush.bf16.msra.mxu1 %v9493_v11  ;;  %v10718_v11 = vld [vmem:[#allocation63_spill] sm:$0xff] }
0x3202   : > { %5042 = vmatpush.bf16.msrb.mxu0 %v10708_v4  ;;  %v10732_v4 = vld [vmem:[#allocation50_spill] sm:$0xff] }
0x3203   : > { %4977 = vmatpush.bf16.msra.mxu1 %v10709_v25  ;;  %v10733_v25 = vld [vmem:[#allocation54_spill] sm:$0xff] }
0x3206   : > { %5043 = vmatpush.bf16.msrb.mxu0 %v10710_v13  ;;  %v10734_v13 = vld [vmem:[#allocation58_spill] sm:$0xff] }
0x3207   : > { %4978 = vmatpush.bf16.msra.mxu1 %v10711_v39  ;;  %v10735_v39 = vld [vmem:[#allocation62_spill] sm:$0xff] }
0x320a   : > { %5044 = vmatpush.bf16.msrb.mxu0 %v10712_v22 }
0x320b   : > { %4979 = vmatpush.bf16.msra.mxu1 %v10713_v30 }
0x320e   : > { %5045 = vmatpush.bf16.msrb.mxu0 %v10714_v55  ;;  %v10737_v55 = vmov -1e+30  }
0x320f   : > { %4980 = vmatpush.bf16.msra.mxu1 %v10715_v3  ;;  %v4833_v3 = vsel %vm4832_vm2, 0.0, %v10737_v55 }
0x3212   : > { %5046 = vmatpush.bf16.msrb.mxu0 %v10716_v43 }
0x3213   : > { %4981 = vmatpush.bf16.msra.mxu1 %v10717_v1 }
0x3216   : > { %5047 = vmatpush.bf16.msrb.mxu0 %v10718_v11 }
0x3217   : > { %4982 = vmatpush.bf16.msra.mxu1 %v10719_v10 }
0x3276   : > { %v4781_v59 = vpop.f32.mrf.mxu0 }
0x3277   : > { %v4800_v33 = vpack.c.bf16 %v4781_v59, %v4781_v59  ;;  %v4794_v53 = vpop.f32.mrf.mxu1 }
0x3278   : > { %v4824_v45 = vpack.c.bf16 %v4794_v53, %v4794_v53 }
0x3279   : > { %v4806_v16 = vpack.i.b16 %v4800_v33, %v4800_v33 }
0x327a   : > { %v4826_v49 = vpack.i.b16 %v4824_v45, %v4824_v45  ;;  %v10738_v45 = vld [vmem:[#allocation35_spill] sm:$0xff] }
0x327b   : > { %v4808_v18 = vperm.slane %v4806_v16, 0  ;;  %v10739_v16 = vld [vmem:[#allocation38_spill] sm:$0xff] }
0x327c   : > { %v4828_v0 = vperm.slane %v4826_v49, 0  ;;  %v4768_v28 = vpop.f32.mrf.mxu2  ;;  %v10740_v49 = vld [vmem:[#allocation41_spill] sm:$0xff] }
0x327d   : > { %v4823_v44 = vsel %vm4822_vm15, %v4808_v18, %v10725_v8  ;;  %v4834_v9 = vpack.c.bf16 %v4768_v28, %v4768_v28  ;;  %v10743_v18 = vld [vmem:[#allocation53_spill] sm:$0xff] }
0x327e   : > { %v4783_v27 = vpop.f32.mrf.mxu0  ;;  %4842 = vmatpush.bf16.xpose.msra.mxu3 %v4823_v44  ;;  %v4829_v20 = vsel %vm4822_vm15, %v4828_v0, %v10726_v54  ;;  %v10744_v0 = vld [vmem:[#allocation57_spill] sm:$0xff] }
0x327f   : > { %v4796_v12 = vpop.f32.mrf.mxu1  ;;  %4872 = vmatpush.bf16.msra.mxu2 %v4829_v20  ;;  %v10745_v28 = vld [vmem:[#allocation61_spill] sm:$0xff]  ;;  %v10746_v27 = vld [vmem:[#allocation80_spill] sm:$0xff] }
0x3280   : > { %v10747_v20 = vld [vmem:[#allocation84_spill] sm:$0xff] }
0x3281   : > { %v10748_v12 = vld [vmem:[#allocation88_spill] sm:$0xff] }
0x3283   : > { %4968 = vmatpush.bf16.msrb.mxu2 %v10727_v32  ;;  %v10750_v32 = vld [vmem:[#allocation69_spill] sm:$0xff] }
0x3284   : > { %v4770_v42 = vpop.f32.mrf.mxu2 }
0x3285   : > { %4843 = vmatmul.bf16.vlgmr.msra.gmra.mxu3 %v4834_v9  ;;  %v10751_v9 = vld [vmem:[#allocation73_spill] sm:$0xff] }
0x3286   : > { %4879 = vmatpush.bf16.msrb.mxu3 %v6916_v47  ;;  %v10749_v47 = vld [vmem:[#allocation92_spill] sm:$0xff]  ;;  %v10753_v42 = vld [vmem:[#allocation81_spill] sm:$0xff] }
0x328a   : > { %4880 = vmatpush.bf16.msrb.mxu3 %v6917_v14  ;;  %v10752_v14 = vld [vmem:[#allocation77_spill] sm:$0xff] }
0x328e   : > { %4881 = vmatpush.bf16.msrb.mxu3 %v6918_v52 }
0x3292   : > { %4882 = vmatpush.bf16.msrb.mxu3 %v6919_v26 }
0x3296   : > { %4883 = vmatpush.bf16.msrb.mxu3 %v6920_v36 }
0x329a   : > { %4884 = vmatpush.bf16.msrb.mxu3 %v6921_v63 }
0x329e   : > { %4885 = vmatpush.bf16.msrb.mxu3 %v6922_v17 }
0x32a2   : > { %4886 = vmatpush.bf16.msrb.mxu3 %v6923_v38 }
0x32a6   : > { %5027 = vmatpush.bf16.msra.mxu3 %v10728_v60 }
0x32aa   : > { %5028 = vmatpush.bf16.msra.mxu3 %v10729_v61 }
0x32ae   : > { %5029 = vmatpush.bf16.msra.mxu3 %v10730_v48 }
0x32b2   : > { %5030 = vmatpush.bf16.msra.mxu3 %v10731_v15 }
0x32b6   : > { %5031 = vmatpush.bf16.msra.mxu3 %v10732_v4 }
0x32ba   : > { %5032 = vmatpush.bf16.msra.mxu3 %v10733_v25 }
0x32be   : > { %5033 = vmatpush.bf16.msra.mxu3 %v10734_v13 }
0x32c2   : > { %5034 = vmatpush.bf16.msra.mxu3 %v10735_v39 }
0x3308   : > { %v4844_v30 = vpop.f32.mrf.mxu3 }
0x3309   : > { %v4848_v43 = vmul.f32 0.088388346, %v4844_v30 }
0x330b   : > { %v4849_v1 = vadd.f32 %v4848_v43, %v4833_v3 }
0x330d   : > { %v4850_v11 = vsel %vm3789_vm3, %v4849_v1, -inf }
0x330e   : > { %4851 = vmax.xlane.f32.xlu0 %v4850_v11 }
0x3310   : > { %v4846_v10 = vpop.f32.mrf.mxu3 }
0x3381   : > { %v4852_v31 = vpop.xlane.xlu0 %4851 }
0x3382   : > { %v4853_v29 = vsub.f32 %v4849_v1, %v4852_v31  ;;  %v10754_v31 = vld [vmem:[#allocation85_spill] sm:$0xff] }
0x3384   : > { %v4854_v21 = vmul.f32 1.442695, %v4853_v29  ;;  %v10755_v29 = vld [vmem:[#allocation89_spill] sm:$0xff] }
0x3386   : > { %6816 = vpow2.f32 %v4854_v21  ;;  %v10756_v21 = vld [vmem:[#allocation93_spill] sm:$0xff] }
0x338c   : > { %v6817_v35 = vpop.eup %6816 }
0x338d   : > { %v4856_v46 = vsel %vm3789_vm3, %v6817_v35, 0.0 }
0x338e   : > { %4857 = vadd.xlane.f32.xlu1 %v4856_v46  ;;  %v10758_v46 = vld [vmem:[#allocation70_spill] sm:$0xff] }
0x3401   : > { %v4858_v59 = vpop.xlane.xlu1 %4857 }
0x3402   : > { %6818 = vrcp.f32 %v4858_v59  ;;  %v10759_v59 = vld [vmem:[#allocation74_spill] sm:$0xff] }
0x3408   : > { %v6819_v33 = vpop.eup %6818 }
0x3409   : > { %v4860_v53 = vmul.f32 %v6819_v33, %v6817_v35  ;;  %v10757_v35 = vld [vmem:[#allocation96_spill] sm:$0xff]  ;;  %v10760_v33 = vld [vmem:[#allocation78_spill] sm:$0xff] }
0x340b   : > { %v4861_v40 = vpack.c.bf16 %v4860_v53, %v4860_v53  ;;  %v10761_v53 = vld [vmem:[#allocation82_spill] sm:$0xff] }
0x340d   : > { %6369 = vmatmul.msk.bf16.vlgmr.msra.gmra.mxu2 %vm1197_vm7, %v4861_v40  ;;  %v10762_v40 = vld [vmem:[#allocation37_spill] sm:$0xff] }
0x340e   : > { %5014 = vmatpush.bf16.msra.mxu2 %v10738_v45 }
0x3412   : > { %5015 = vmatpush.bf16.msra.mxu2 %v10739_v16  ;;  %v10763_v16 = vld [vmem:[#allocation40_spill] sm:$0xff] }
0x3416   : > { %5016 = vmatpush.bf16.msra.mxu2 %v10740_v49  ;;  %v10764_v49 = vld [vmem:[#allocation44_spill] sm:$0xff] }
0x341a   : > { %5017 = vmatpush.bf16.msra.mxu2 %v10741_v5  ;;  %v10765_v5 = vld [vmem:[#allocation48_spill] sm:$0xff] }
0x341e   : > { %5018 = vmatpush.bf16.msra.mxu2 %v10742_v58  ;;  %v10766_v58 = vld [vmem:[#allocation52_spill] sm:$0xff] }
0x3422   : > { %5019 = vmatpush.bf16.msra.mxu2 %v10743_v18  ;;  %v10767_v18 = vld [vmem:[#allocation56_spill] sm:$0xff] }
0x3426   : > { %5020 = vmatpush.bf16.msra.mxu2 %v10744_v0  ;;  %v10768_v0 = vld [vmem:[#allocation60_spill] sm:$0xff] }
0x342a   : > { %5021 = vmatpush.bf16.msra.mxu2 %v10745_v28  ;;  %v10769_v28 = vld [vmem:[#allocation64_spill] sm:$0xff] }
0x3490   : > { %v4874_v8 = vpop.f32.mrf.mxu2 }
0x3491   : > { %v4878_v44 = vpack.c.bf16 %v4874_v8, %v4874_v8 }
0x3493   : > { %4887 = vmatmul.bf16.vlgmr.msrb.gmra.mxu3 %v4878_v44 }
0x3494   : > { %5119 = vmatpush.bf16.msrb.mxu3 %v10746_v27 }
0x3498   : > { %v4876_v54 = vpop.f32.mrf.mxu2  ;;  %5120 = vmatpush.bf16.msrb.mxu3 %v10747_v20 }
0x349c   : > { %5121 = vmatpush.bf16.msrb.mxu3 %v10748_v12 }
0x34a0   : > { %5122 = vmatpush.bf16.msrb.mxu3 %v10749_v47 }
0x34a4   : > { %5123 = vmatpush.bf16.msrb.mxu3 %v10750_v32 }
0x34a8   : > { %5124 = vmatpush.bf16.msrb.mxu3 %v10751_v9 }
0x34ac   : > { %5125 = vmatpush.bf16.msrb.mxu3 %v10752_v14 }
0x34b0   : > { %5126 = vmatpush.bf16.msrb.mxu3 %v10753_v42 }
0x3516   : > { %v4888_v52 = vpop.f32.mrf.mxu3 }
0x3517   : > { %v10019_v26 = vadd.f32 %v4888_v52, %v9926_v19 }
0x3519   : > { %v4893_v36 = vsel %vm3553_vm8, %v10019_v26, 0.0 }
0x351a   : > { %4894 = vadd.xlane.f32.xlu2 %v4893_v36 }
0x351e   : > { %v4890_v63 = vpop.f32.mrf.mxu3 }
0x351f   : > { %v10770_v63 = vld [vmem:[#allocation86_spill] sm:$0xff] }
0x358d   : > { %v4895_v17 = vpop.xlane.xlu2 %4894 }
0x358e   : > { %v4896_v38 = vmul.f32 %v4895_v17, %v7381_v23  ;;  %v10771_v17 = vld [vmem:[#allocation90_spill] sm:$0xff] }
0x3590   : > { %v4897_v60 = vsub.f32 %v10019_v26, %v4896_v38  ;;  %v10772_v38 = vld [vmem:[#allocation94_spill] sm:$0xff] }
0x3592   : > { %v4898_v61 = vmul.f32 %v4897_v60, %v4897_v60 }
0x3594   : > { %v4899_v48 = vsel %vm3553_vm8, %v4898_v61, 0.0  ;;  %v10774_v61 = vld [vmem:[#allocation20_spill] sm:$0xff] }
0x3595   : > { %4900 = vadd.xlane.f32.xlu0 %v4899_v48  ;;  %v10775_v48 = vld [vmem:[#allocation21_spill] sm:$0xff] }
0x3608   : > { %v4901_v15 = vpop.xlane.xlu0 %4900 }
0x3609   : > { %v4902_v4 = vmul.f32 %v4901_v15, %v7381_v23  ;;  %v10776_v15 = vld [vmem:[#allocation98_spill] sm:$0xff] }
0x360b   : > { %v4903_v25 = vadd.f32 1e-05, %v4902_v4  ;;  %v10777_v4 = vld [vmem:[#allocation25_spill] sm:$0xff] }
0x360d   : > { %6820 = vrsqrt.f32 %v4903_v25  ;;  %vm4910_vm0 = vweird.f32 %v4903_v25 }
0x3613   : > { %v6821_v19 = vpop.eup %6820 }
0x3614   : > { %v4905_v13 = vmul.f32 %v6821_v19, %v4903_v25  ;;  %vm4911_vm14 = vweird.f32 %v6821_v19 }
0x3615   : > { %vm4912_vm9 = vmor %vm4910_vm0, %vm4911_vm14 }
0x3616   : > { %v4906_v39 = vmul.f32 %v6821_v19, %v4905_v13  ;;  %v10778_v13 = vld [vmem:[#allocation102_spill] sm:$0xff] }
0x3618   : > { %v4907_v22 = vmul.f32 0.5, %v4906_v39 }
0x361a   : > { %v4908_v30 = vsub.f32 1.5, %v4907_v22  ;;  %v10779_v22 = vld [vmem:[#allocation103_spill] sm:$0xff] }
0x361c   : > { %v4909_v55 = vmul.f32 %v6821_v19, %v4908_v30  ;;  %v10780_v30 = vld [vmem:[#allocation24_spill] sm:$0xff] }
0x361e   : > { %v4913_v3 = vsel %vm4912_vm9, %v6821_v19, %v4909_v55  ;;  %v10781_v55 = vld [vmem:[#allocation26_spill] sm:$0xff] }
0x361f   : > { %v4914_v43 = vmul.f32 %v4913_v3, %v4897_v60  ;;  %v10773_v60 = vld [vmem:[#allocation97_spill] sm:$0xff]  ;;  %v10782_v3 = vld [vmem:[#allocation30_spill] sm:$0xff] }
0x3621   : > { %v4915_v1 = vmul.f32 %v4914_v43, %v10661_v37  ;;  %v10783_v43 = vld [vmem:[#allocation104_spill] sm:$0xff] }
0x3623   : > { %v4916_v11 = vadd.f32 %v4915_v1, %v10662_v50  ;;  %v10784_v1 = vld [vmem:[#allocation105_spill] sm:$0xff] }
0x3625   : > { %v4917_v10 = vpack.c.bf16 %v4916_v11, %v4916_v11  ;;  %v10785_v11 = vld [vmem:[#allocation106_spill] sm:$0xff] }
0x3627   : > { %4926 = vmatmul.bf16.vlgmr.msra.gmra.mxu0 %v4917_v10 }
0x3628   : > { %5132 = vmatpush.bf16.msra.mxu0 %v10754_v31 }
0x362c   : > { %5133 = vmatpush.bf16.msra.mxu0 %v10755_v29 }
0x3630   : > { %5134 = vmatpush.bf16.msra.mxu0 %v10756_v21 }
0x3634   : > { %5135 = vmatpush.bf16.msra.mxu0 %v10757_v35 }
0x3638   : > { %5136 = vmatpush.bf16.msra.mxu0 %v10758_v46 }
0x363c   : > { %5137 = vmatpush.bf16.msra.mxu0 %v10759_v59 }
0x3640   : > { %5138 = vmatpush.bf16.msra.mxu0 %v10760_v33 }
0x3644   : > { %5139 = vmatpush.bf16.msra.mxu0 %v10761_v53 }
0x36a4   : > { %v4927_v37 = vpop.f32.mrf.mxu0 }
0x36a5   : > { %v4931_v50 = vpack.c.bf16 %v4927_v37, %v4927_v37 }
0x36a7   : > { %4940 = vmatmul.bf16.vlgmr.msrb.gmra.mxu1 %v4931_v50 }
0x36a8   : > { %5053 = vmatpush.bf16.msrb.mxu1 %v10762_v40 }
0x36ac   : > { %v4929_v45 = vpop.f32.mrf.mxu0  ;;  %5054 = vmatpush.bf16.msrb.mxu1 %v10763_v16 }
0x36b0   : > { %5055 = vmatpush.bf16.msrb.mxu1 %v10764_v49 }
0x36b4   : > { %5056 = vmatpush.bf16.msrb.mxu1 %v10765_v5 }
0x36b8   : > { %5057 = vmatpush.bf16.msrb.mxu1 %v10766_v58 }
0x36bc   : > { %5058 = vmatpush.bf16.msrb.mxu1 %v10767_v18 }
0x36c0   : > { %5059 = vmatpush.bf16.msrb.mxu1 %v10768_v0 }
0x36c4   : > { %5060 = vmatpush.bf16.msrb.mxu1 %v10769_v28 }
0x3724   : > { %v4941_v8 = vpop.f32.mrf.mxu1 }
0x3725   : > { %v4945_v44 = vmul.f32 0.088388346, %v4941_v8 }
0x3727   : > { %v4946_v27 = vsel %vm3789_vm3, %v4945_v44, -inf }
0x3728   : > { %4947 = vmax.xlane.f32.xlu1 %v4946_v27  ;;  %v10786_v27 = vld [vmem:[#allocation107_spill] sm:$0xff] }
0x372c   : > { %v4943_v54 = vpop.f32.mrf.mxu1 }
0x372d   : > { %v10787_v54 = vld [vmem:[#allocation108_spill] sm:$0xff] }
0x379b   : > { %v4948_v20 = vpop.xlane.xlu1 %4947 }
0x379c   : > { %v4949_v12 = vsub.f32 %v4945_v44, %v4948_v20  ;;  %v10788_v20 = vld [vmem:[#allocation109_spill] sm:$0xff] }
0x379e   : > { %v4950_v47 = vmul.f32 1.442695, %v4949_v12  ;;  %v10789_v12 = vld [vmem:[#allocation110_spill] sm:$0xff] }
0x37a0   : > { %6822 = vpow2.f32 %v4950_v47 }
0x37a6   : > { %v6823_v32 = vpop.eup %6822 }
0x37a7   : > { %v4952_v9 = vsel %vm3789_vm3, %v6823_v32, 0.0 }
0x37a8   : > { %4953 = vadd.xlane.f32.xlu2 %v4952_v9 }
0x381b   : > { %v4954_v14 = vpop.xlane.xlu2 %4953 }
0x381c   : > { %6824 = vrcp.f32 %v4954_v14  ;;  %v10792_v14 = vld [vmem:[#allocation100_spill] sm:$0xff] }
0x3822   : > { %v6825_v42 = vpop.eup %6824 }
0x3823   : > { %v4956_v52 = vmul.f32 %v6825_v42, %v6823_v32 }
0x3825   : > { %v4957_v36 = vpack.c.bf16 %v4956_v52, %v4956_v52 }
0x3827   : > { %6370 = vmatmul.msk.bf16.vlgmr.msrb.gmra.mxu2 %vm1197_vm7, %v4957_v36 }
0x3828   : > { %5106 = vmatpush.bf16.msrb.mxu2 %v10770_v63 }
0x382c   : > { %5107 = vmatpush.bf16.msrb.mxu2 %v10771_v17 }
0x3830   : > { %5108 = vmatpush.bf16.msrb.mxu2 %v10772_v38  ;;  %v10793_v38 = vld [vmem:[#allocation99_spill] sm:$0xff] }
0x3834   : > { %5109 = vmatpush.bf16.msrb.mxu2 %v10773_v60 }
0x3838   : > { %5110 = vmatpush.bf16.msrb.mxu2 %v10774_v61  ;;  %v10794_v61 = vld [vmem:[#allocation95_spill] sm:$0xff] }
0x383c   : > { %5111 = vmatpush.bf16.msrb.mxu2 %v10775_v48 }
0x3840   : > { %5112 = vmatpush.bf16.msrb.mxu2 %v10776_v15 }
0x3844   : > { %5113 = vmatpush.bf16.msrb.mxu2 %v10777_v4 }
0x38aa   : > { %v4970_v25 = vpop.f32.mrf.mxu2 }
0x38ab   : > { %v4974_v19 = vpack.c.bf16 %v4970_v25, %v4970_v25 }
0x38ad   : > { %4983 = vmatmul.bf16.vlgmr.msra.gmra.mxu1 %v4974_v19 }
0x38ae   : > { %5145 = vmatpush.bf16.msra.mxu1 %v10778_v13 }
0x38b2   : > { %v4972_v39 = vpop.f32.mrf.mxu2  ;;  %5146 = vmatpush.bf16.msra.mxu1 %v10779_v22 }
0x38b6   : > { %5147 = vmatpush.bf16.msra.mxu1 %v10780_v30 }
0x38ba   : > { %5148 = vmatpush.bf16.msra.mxu1 %v10781_v55 }
0x38be   : > { %5149 = vmatpush.bf16.msra.mxu1 %v10782_v3 }
0x38c2   : > { %5150 = vmatpush.bf16.msra.mxu1 %v10783_v43 }
0x38c6   : > { %5151 = vmatpush.bf16.msra.mxu1 %v10784_v1 }
0x38ca   : > { %5152 = vmatpush.bf16.msra.mxu1 %v10785_v11 }
0x392a   : > { %v4984_v10 = vpop.f32.mrf.mxu1 }
0x392b   : > { %v10065_v31 = vadd.f32 %v4984_v10, %v10019_v26 }
0x392d   : > { %v4989_v29 = vsel %vm3553_vm8, %v10065_v31, 0.0 }
0x392e   : > { %4990 = vadd.xlane.f32.xlu0 %v4989_v29 }
0x3932   : > { %v4986_v21 = vpop.f32.mrf.mxu1 }
0x39a1   : > { %v4991_v35 = vpop.xlane.xlu0 %4990 }
0x39a2   : > { %v4992_v46 = vmul.f32 %v4991_v35, %v7381_v23 }
0x39a4   : > { %v4993_v59 = vsub.f32 %v10065_v31, %v4992_v46 }
0x39a6   : > { %v4994_v33 = vmul.f32 %v4993_v59, %v4993_v59 }
0x39a8   : > { %v4995_v53 = vsel %vm3553_vm8, %v4994_v33, 0.0 }
0x39a9   : > { %4996 = vadd.xlane.f32.xlu1 %v4995_v53 }
0x3a1c   : > { %v4997_v37 = vpop.xlane.xlu1 %4996 }
0x3a1d   : > { %v4998_v50 = vmul.f32 %v4997_v37, %v7381_v23 }
0x3a1f   : > { %v4999_v40 = vadd.f32 1e-05, %v4998_v50 }
0x3a21   : > { %6826 = vrsqrt.f32 %v4999_v40  ;;  %vm5006_vm3 = vweird.f32 %v4999_v40 }
0x3a27   : > { %v6827_v26 = vpop.eup %6826 }
0x3a28   : > { %v5001_v45 = vmul.f32 %v6827_v26, %v4999_v40  ;;  %vm5007_vm7 = vweird.f32 %v6827_v26 }
0x3a29   : > { %vm5008_vm4 = vmor %vm5006_vm3, %vm5007_vm7 }
0x3a2a   : > { %v5002_v16 = vmul.f32 %v6827_v26, %v5001_v45 }
0x3a2c   : > { %v5003_v49 = vmul.f32 0.5, %v5002_v16 }
0x3a2e   : > { %v5004_v5 = vsub.f32 1.5, %v5003_v49 }
0x3a30   : > { %v5005_v58 = vmul.f32 %v6827_v26, %v5004_v5 }
0x3a32   : > { %v5009_v18 = vsel %vm5008_vm4, %v6827_v26, %v5005_v58 }
0x3a33   : > { %v5010_v0 = vmul.f32 %v5009_v18, %v4993_v59 }
0x3a35   : > { %v5011_v28 = vmul.f32 %v5010_v0, %v9338_v24  ;;  %v10790_v24 = vld [vmem:[#allocation65_spill] sm:$0xff] }
0x3a37   : > { %v5012_v8 = vadd.f32 %v5011_v28, %v9341_v6  ;;  %v10791_v6 = vld [vmem:[#allocation67_spill] sm:$0xff] }
0x3a39   : > { %v5013_v44 = vpack.c.bf16 %v5012_v8, %v5012_v8 }
0x3a3b   : > { %5022 = vmatmul.bf16.vlgmr.msra.gmra.mxu2 %v5013_v44  ;;  %5035 = vmatmul.bf16.vlgmr.msra.gmra.mxu3 %v5013_v44 }
0x3a3c   : > { %5048 = vmatmul.bf16.vlgmr.msrb.gmra.mxu0 %v5013_v44  ;;  %5061 = vmatmul.bf16.vlgmr.msrb.gmra.mxu1 %v5013_v44 }
0x3a3d   : > { %5185 = vmatpush.bf16.msra.mxu2 %v9811_v41 }
0x3a41   : > { %5186 = vmatpush.bf16.msra.mxu2 %v9821_v7 }
0x3a45   : > { %5187 = vmatpush.bf16.msra.mxu2 %v10786_v27 }
0x3a49   : > { %5188 = vmatpush.bf16.msra.mxu2 %v10787_v54 }
0x3a4d   : > { %5189 = vmatpush.bf16.msra.mxu2 %v10788_v20 }
0x3a51   : > { %5190 = vmatpush.bf16.msra.mxu2 %v10789_v12 }
0x3a55   : > { %5191 = vmatpush.bf16.msra.mxu2 %v10790_v24 }
0x3a59   : > { %5192 = vmatpush.bf16.msra.mxu2 %v10791_v6 }
0x3ab9   : > { %v5049_v47 = vpop.f32.mrf.mxu0  ;;  %v5062_v32 = vpop.f32.mrf.mxu1 }
0x3aba   : > { %v5050_v9 = vadd.f32 %v5049_v47, %v10597_v34  ;;  %v5063_v41 = vadd.f32 %v5062_v32, %v10792_v14 }
0x3abc   : > { %v5068_v42 = vmul.f32 %v5050_v9, %v5050_v9  ;;  %v5069_v7 = vmul.f32 %v5063_v41, %v5063_v41 }
0x3abe   : > { %v5072_v52 = vmul.f32 %v5068_v42, %v5050_v9  ;;  %v5073_v36 = vmul.f32 %v5069_v7, %v5063_v41  ;;  %v5023_v63 = vpop.f32.mrf.mxu2  ;;  %v5036_v17 = vpop.f32.mrf.mxu3 }
0x3abf   : > { %v5024_v60 = vadd.f32 %v5023_v63, %v10793_v38  ;;  %v5037_v48 = vadd.f32 %v5036_v17, %v10794_v61  ;;  %v6924_v17 = vld [vmem:[%s10156_s21] sm:$0x1] }
0x3ac0   : > { %v5076_v15 = vmul.f32 0.044715, %v5072_v52  ;;  %v5077_v4 = vmul.f32 0.044715, %v5073_v36 }
0x3ac1   : > { %v5066_v25 = vmul.f32 %v5024_v60, %v5024_v60  ;;  %v5067_v19 = vmul.f32 %v5037_v48, %v5037_v48  ;;  %v5051_v13 = vpop.f32.mrf.mxu0  ;;  %v5064_v39 = vpop.f32.mrf.mxu1 }
0x3ac2   : > { %v5080_v22 = vadd.f32 %v5076_v15, %v5050_v9  ;;  %v5081_v34 = vadd.f32 %v5077_v4, %v5063_v41 }
0x3ac3   : > { %v5070_v30 = vmul.f32 %v5066_v25, %v5024_v60  ;;  %v5071_v55 = vmul.f32 %v5067_v19, %v5037_v48 }
0x3ac4   : > { %v5084_v3 = vmul.f32 0.7978846, %v5080_v22  ;;  %v5085_v43 = vmul.f32 0.7978846, %v5081_v34 }
0x3ac5   : > { %v5074_v1 = vmul.f32 0.044715, %v5070_v30  ;;  %v5075_v11 = vmul.f32 0.044715, %v5071_v55 }
0x3ac6   : > { %6828 = vtanh.f32 %v5084_v3  ;;  %v5025_v10 = vpop.f32.mrf.mxu2  ;;  %v5038_v29 = vpop.f32.mrf.mxu3 }
0x3ac7   : > { %6830 = vtanh.f32 %v5085_v43  ;;  %v5078_v21 = vadd.f32 %v5074_v1, %v5024_v60  ;;  %v5079_v35 = vadd.f32 %v5075_v11, %v5037_v48 }
0x3ac9   : > { %v5082_v46 = vmul.f32 0.7978846, %v5078_v21  ;;  %v5083_v59 = vmul.f32 0.7978846, %v5079_v35 }
0x3acb   : > { %6832 = vtanh.f32 %v5082_v46 }
0x3acc   : > { %v6829_v33 = vpop.eup %6828  ;;  %6834 = vtanh.f32 %v5083_v59 }
0x3acd   : > { %v6831_v53 = vpop.eup %6830  ;;  %v5092_v37 = vadd.f32 1.0, %v6829_v33 }
0x3ace   : > { %v5093_v50 = vadd.f32 1.0, %v6831_v53 }
0x3acf   : > { %v5096_v40 = vmul.f32 0.5, %v5092_v37 }
0x3ad0   : > { %v5097_v26 = vmul.f32 0.5, %v5093_v50 }
0x3ad1   : > { %v6833_v45 = vpop.eup %6832  ;;  %v5100_v16 = vmul.f32 %v5096_v40, %v5050_v9 }
0x3ad2   : > { %v6835_v49 = vpop.eup %6834  ;;  %v5101_v5 = vmul.f32 %v5097_v26, %v5063_v41  ;;  %v5090_v58 = vadd.f32 1.0, %v6833_v45 }
0x3ad3   : > { %v5104_v18 = vpack.c.bf16 %v5100_v16, %v5100_v16  ;;  %v5091_v0 = vadd.f32 1.0, %v6835_v49 }
0x3ad4   : > { %v5105_v28 = vpack.c.bf16 %v5101_v5, %v5101_v5  ;;  %v5094_v8 = vmul.f32 0.5, %v5090_v58 }
0x3ad5   : > { %v5095_v44 = vmul.f32 0.5, %v5091_v0  ;;  %5140 = vmatmul.bf16.vlgmr.msra.gmra.mxu0 %v5104_v18 }
0x3ad6   : > { %v5098_v27 = vmul.f32 %v5094_v8, %v5024_v60  ;;  %5153 = vmatmul.bf16.vlgmr.msra.gmra.mxu1 %v5105_v28 }
0x3ad7   : > { %v5099_v54 = vmul.f32 %v5095_v44, %v5037_v48 }
0x3ad8   : > { %v5102_v20 = vpack.c.bf16 %v5098_v27, %v5098_v27 }
0x3ad9   : > { %v5103_v12 = vpack.c.bf16 %v5099_v54, %v5099_v54 }
0x3ada   : > { %5114 = vmatmul.bf16.vlgmr.msrb.gmra.mxu2 %v5102_v20 }
0x3adb   : > { %5127 = vmatmul.bf16.vlgmr.msrb.gmra.mxu3 %v5103_v12 }
0x3b52   : > { %v5141_v24 = vpop.f32.mrf.mxu0 }
0x3b53   : > { %v5154_v6 = vpop.f32.mrf.mxu1 }
0x3b5a   : > { %v5143_v47 = vpop.f32.mrf.mxu0 }
0x3b5b   : > { %v5156_v32 = vpop.f32.mrf.mxu1 }
0x3b5d   : > { %v5115_v9 = vpop.f32.mrf.mxu2 }
0x3b5e   : > { %v5128_v14 = vpop.f32.mrf.mxu3 }
0x3b5f   : > { %v5129_v41 = vadd.f32 %v5128_v14, %v5115_v9 }
0x3b61   : > { %v5142_v42 = vadd.f32 %v5141_v24, %v5129_v41 }
0x3b63   : > { %v5155_v7 = vadd.f32 %v5154_v6, %v5142_v42 }
0x3b65   : > { %v5117_v52 = vpop.f32.mrf.mxu2  ;;  %v5158_v36 = vadd.f32 %v5155_v7, %v10065_v31 }
0x3b66   : > { %v5130_v63 = vpop.f32.mrf.mxu3 }
0x3b67   : > { %v5159_v38 = vadd.f32 %v6924_v17, %v5158_v36 }
0x3b69   : > { %v5160_v60 = vsel %vm3553_vm8, %v5159_v38, 0.0 }
0x3b6a   : > { %5161 = vadd.xlane.f32.xlu2 %v5160_v60 }
0x3bdd   : > { %v5162_v61 = vpop.xlane.xlu2 %5161 }
0x3bde   : > { %v5163_v48 = vmul.f32 %v5162_v61, %v7381_v23 }
0x3be0   : > { %v5164_v15 = vsub.f32 %v5159_v38, %v5163_v48 }
0x3be2   : > { %v5165_v4 = vmul.f32 %v5164_v15, %v5164_v15 }
0x3be4   : > { %v5166_v25 = vsel %vm3553_vm8, %v5165_v4, 0.0 }
0x3be5   : > { %5167 = vadd.xlane.f32.xlu0 %v5166_v25 }
0x3c58   : > { %v5168_v19 = vpop.xlane.xlu0 %5167 }
0x3c59   : > { %v5169_v31 = vmul.f32 %v5168_v19, %v7381_v23 }
0x3c5b   : > { %v5170_v13 = vadd.f32 1e-05, %v5169_v31 }
0x3c5d   : > { %6836 = vrsqrt.f32 %v5170_v13  ;;  %vm5177_vm6 = vweird.f32 %v5170_v13 }
0x3c63   : > { %v6837_v39 = vpop.eup %6836 }
0x3c64   : > { %v5172_v22 = vmul.f32 %v6837_v39, %v5170_v13  ;;  %vm5178_vm5 = vweird.f32 %v6837_v39 }
0x3c65   : > { %vm5179_vm11 = vmor %vm5177_vm6, %vm5178_vm5 }
0x3c66   : > { %v5173_v34 = vmul.f32 %v6837_v39, %v5172_v22 }
0x3c68   : > { %v5174_v30 = vmul.f32 0.5, %v5173_v34 }
0x3c6a   : > { %v5175_v55 = vsub.f32 1.5, %v5174_v30 }
0x3c6c   : > { %v5176_v3 = vmul.f32 %v6837_v39, %v5175_v55 }
0x3c6e   : > { %v5180_v43 = vsel %vm5179_vm11, %v6837_v39, %v5176_v3 }
0x3c6f   : > { %v5181_v1 = vmul.f32 %v5180_v43, %v5164_v15 }
0x3c71   : > { %v5182_v11 = vmul.f32 %v5181_v1, %v9454_v51 }
0x3c73   : > { %v5183_v10 = vadd.f32 %v5182_v11, %v10704_v2 }
0x3c75   : > { %v5184_v29 = vpack.c.bf16 %v5183_v10, %v5183_v10 }
0x3c77   : > { %5193 = vmatmul.bf16.vlgmr.msra.gmra.mxu2 %v5184_v29 }
0x3cfa   : > { %v5194_v23 = vpop.f32.mrf.mxu2 }
0x3cfb   : > { %v5195_v21 = vadd.f32 %v9914_v56, %v5194_v23 }
0x3cfd   : > { %v5198_v35 = vsel %vm3553_vm8, %v5195_v21, -inf }
0x3cfe   : > { %5199 = vmax.xlane.f32.xlu1 %v5198_v35 }
0x3d02   : > { %v5196_v46 = vpop.f32.mrf.mxu2 }
0x3d71   : > { %v5200_v59 = vpop.xlane.xlu1 %5199 }
0x3d72   : > { %vm5201_vm13 = vcmp.eq.f32.partialorder %v5195_v21, %v5200_v59 }
0x3d73   : > { %v5202_v33 = vsel %vm5201_vm13, %v8320_v57, 128 }
0x3d74   : > { %v5203_v53 = vsel %vm3553_vm8, %v5202_v33, 2147483647  ;;  %vm5218_vm8 = vcmp.eq.s32.totalorder %v8320_v57, 3 }
0x3d75   : > { %v5205_v51 = vshra.s32 %v5203_v53, 16  ;;  %v5204_v2 = vand.u32 65535, %v5203_v53 }
0x3d77   : > { %v5207_v37 = vcvt.s32.f32 %v5205_v51  ;;  %v5206_v40 = vcvt.s32.f32 %v5204_v2 }
0x3d79   : > { %5208 = vmin.xlane.f32.xlu2 %v5207_v37 }
0x3dec   : > { %v5209_v50 = vpop.xlane.xlu2 %5208 }
0x3ded   : > { %vm5210_vm12 = vcmp.eq.f32.partialorder %v5207_v37, %v5209_v50  ;;  %v5215_v26 = vcvt.f32.s32 %v5209_v50 }
0x3dee   : > { %v5211_v56 = vsel %vm5210_vm12, %v5206_v40, inf }
0x3def   : > { %5212 = vmin.xlane.f32.xlu0 %v5211_v56  ;;  %v5216_v16 = vshll.u32 %v5215_v26, 16 }
0x3e62   : > { %v5213_v45 = vpop.xlane.xlu0 %5212 }
0x3e63   : > { %v5214_v49 = vcvt.f32.s32 %v5213_v45 }
0x3e65   : > { %v5217_v5 = vadd.s32 %v5216_v16, %v5214_v49 }
0x3e67   : > { %v5219_v58 = vsel %vm5218_vm8, %v5217_v5, %v9922_v62 }
0x3e68   : > { %5220 = vst [vmem:[%s824_s1] sm:$0x1] %v5219_v58 }
0x3e69   : > { %7054 = shalt.err (!%p7051_p8)
}
0x3e6a   : > { %6635 = dma.vmem_to_hbm [thread:$0]  (%p7289_p5), %s5233_s8, 16, %s5235_s19, %s5222_s9  }
0x3e6b PF: > { %s10795_s28 = sld [smem:[#allocation15_spill]]  ;;  %p6657_p9 = scmp.ge.s32.totalorder %s7099_s0, 2 }
0x3e6d   : > { %p6648_p10 = pnand %p6657_p9, %p7293_p6 }
0x3e6f   : > { %p6649_p11 = pneg %p6648_p10 }
0x3e71   : > { %s5246_s3 = sand.u32 1, %s10795_s28  }
0x3e72   : > { %s5247_s20 = scalar_lea.sflag [#allocation6], %s5246_s3 }
0x3e73   : > { %7082 = dma.done.wait (%p6649_p11), %s5247_s20, 16  }
0x3e74   : > { %7084 = vsyncadd (%p6649_p11), %s5247_s20, 4294967280  ;;  %s10797_s0 = sld [smem:[#allocation17_spill]]  ;;  %s10800_s8 = smov %s7091_s4 }
0x3e75   : > { %s10798_s7 = sld [smem:[#allocation16_spill]] }
0x3e76   : > { %s10799_s29 = sld [smem:[#allocation18_spill]] }
0x3e7a   : > { %p46_p12 = scmp.ge.s32.totalorder %s10797_s0, 4  }
0x3e7b   : > { %s10801_s4 = smov %s10798_s7 }
0x3e7c   :  { %48 = sbr.rel (!%p46_p12) target bundleno = 32 (0x20), region = 171 }
0x3e81   :  { %5252 = vsyncpa [#allocation5], 1 }
0x3e82   :  { %5254 = vsyncpa [#allocation5 + $0x1], 1 }
0x3e83   :  { %5255 = vsyncpa [#allocation8], 1 }
0x3e84   :  { %5256 = vsyncpa [#allocation6], 1 }
0x3e85   :  { %5258 = vsyncpa [#allocation6 + $0x1], 1 }

</bundles_post_ra>
